<compile_context>
chip_gen: v5e
topology: v5e:2x2
jax: 0.10.0
libtpu: 0.0.40
codegen_flags: <defaults>
</compile_context>

<pallas_src>
import functools

import jax
import jax.numpy as jnp
from jax.experimental import pallas as pl
from jax.experimental.pallas import tpu as pltpu


# ----------------------------------------------------------------------------------
# Small helpers
# ----------------------------------------------------------------------------------

def _osz(s, k, st, p):
    return (s + 2 * p - k) // st + 1


def _full_spec(shape):
    r = len(shape)
    return pl.BlockSpec(shape, lambda i, _r=r: (0,) * _r)


def _call(kernel, inputs, out_shapes, scratch_shapes=()):
    in_specs = [_full_spec(x.shape) for x in inputs]
    if isinstance(out_shapes, (list, tuple)):
        out_specs = tuple(_full_spec(s.shape) for s in out_shapes)
    else:
        out_specs = _full_spec(out_shapes.shape)
    return pl.pallas_call(
        kernel,
        out_shape=out_shapes,
        grid=(1,),
        in_specs=in_specs,
        out_specs=out_specs,
        scratch_shapes=list(scratch_shapes),
        compiler_params=pltpu.CompilerParams(dimension_semantics=("arbitrary",)),
    )(*inputs)


# ----------------------------------------------------------------------------------
# In-kernel building blocks (traced inside pallas kernels)
#
# Activation layout inside kernels: 2-D (H, W*N*C) with lane index j*N*C + n*C + c.
# Conv weights are pre-expanded to per-tap block-diagonal matrices of shape
# (KH*KW, Wo*N*Cin, Wo*N*Cout) so each tap is a single lane-dense MXU dot.
# ----------------------------------------------------------------------------------

def _tap_conv(phs, w_ref, K, Ho, Wo, ncin, out_width):
    """Stride-2 KxK conv from 4 even/odd phase refs of the zero-padded input."""
    acc = jnp.zeros((Ho, out_width), jnp.float32)
    for kh in range(K):
        for kw in range(K):
            p = (kh % 2) * 2 + (kw % 2)
            r0 = kh // 2
            c0 = (kw // 2) * ncin
            patch = phs[p][r0:r0 + Ho, c0:c0 + Wo * ncin]
            acc = acc + jnp.dot(patch.astype(jnp.bfloat16), w_ref[kh * K + kw],
                                preferred_element_type=jnp.float32)
    return acc


def _slab_conv(slab_ref, w_ref, Ho, Wo, nc, out_width):
    """3x3 stride-1 pad-1 conv reading a padded VMEM slab (Ho+2, (Wo+2)*nc)."""
    acc = jnp.zeros((Ho, out_width), jnp.float32)
    for kh in range(3):
        for kw in range(3):
            patch = slab_ref[kh:kh + Ho, kw * nc:kw * nc + Wo * nc]
            acc = acc + jnp.dot(patch.astype(jnp.bfloat16), w_ref[kh * 3 + kw],
                                preferred_element_type=jnp.float32)
    return acc


def _fill_slab(slab_ref, val, Wo, nc):
    """Write a (Ho, Wo*nc) value into the interior of a zeroed padded slab."""
    slab_ref[...] = jnp.zeros(slab_ref.shape, slab_ref.dtype)
    slab_ref[1:1 + val.shape[0], nc:nc + Wo * nc] = val


def _block_s1(x, slab_ref, c1w, c1b, c2w, c2b, Ho, Wo, nc):
    """BasicBlock, stride 1, no downsample (BN already folded into weights)."""
    _fill_slab(slab_ref, x, Wo, nc)
    h = _slab_conv(slab_ref, c1w, Ho, Wo, nc, Wo * nc)
    h = jnp.maximum(h + c1b[...], 0.0)
    _fill_slab(slab_ref, h, Wo, nc)
    h = _slab_conv(slab_ref, c2w, Ho, Wo, nc, Wo * nc)
    return jnp.maximum(h + c2b[...] + x, 0.0)


def _block_s2(phs, slab_ref, c1w, c1b, c2w, c2b, dsw, dsb, Ho, Wo, ncin, ncout):
    """BasicBlock, stride 2 with 1x1 downsample; input comes as padded phase slabs."""
    h = _tap_conv(phs, c1w, 3, Ho, Wo, ncin, Wo * ncout)
    h = jnp.maximum(h + c1b[...], 0.0)
    _fill_slab(slab_ref, h, Wo, ncout)
    h = _slab_conv(slab_ref, c2w, Ho, Wo, ncout, Wo * ncout)
    # 1x1 stride-2 downsample: x[:, ::2, ::2, :] == odd/odd phase of the pad-1 input.
    ident = phs[3][0:Ho, 0:Wo * ncin]
    ident = jnp.dot(ident.astype(jnp.bfloat16), dsw[...],
                    preferred_element_type=jnp.float32) + dsb[...]
    return jnp.maximum(h + c2b[...] + ident, 0.0)


def _maxpool_s2(phs, Ho, Wo, nc):
    """3x3 stride-2 pad-1 maxpool (input is post-ReLU, so zero padding is exact)."""
    out = None
    for kh in range(3):
        for kw in range(3):
            p = (kh % 2) * 2 + (kw % 2)
            patch = phs[p][kh // 2:kh // 2 + Ho,
                           (kw // 2) * nc:(kw // 2) * nc + Wo * nc]
            out = patch if out is None else jnp.maximum(out, patch)
    return out


# ----------------------------------------------------------------------------------
# Pallas kernels (5 fused kernels for the whole network)
# ----------------------------------------------------------------------------------

def _stem_kernel(ph0, ph1, ph2, ph3, w_ref, b_ref, out_ref, *, Ho, Wo, ncin):
    phs = (ph0, ph1, ph2, ph3)
    acc = _tap_conv(phs, w_ref, 7, Ho, Wo, ncin, out_ref.shape[1])
    out_ref[...] = jnp.maximum(acc + b_ref[...], 0.0)          # folded BN + ReLU


def _layer1_kernel(ph0, ph1, ph2, ph3,
                   b0c1w, b0c1b, b0c2w, b0c2b,
                   b1c1w, b1c1b, b1c2w, b1c2b,
                   out_ref, slab_ref, *, Ho, Wo, nc):
    phs = (ph0, ph1, ph2, ph3)
    x = _maxpool_s2(phs, Ho, Wo, nc)
    x = _block_s1(x, slab_ref, b0c1w, b0c1b, b0c2w, b0c2b, Ho, Wo, nc)
    x = _block_s1(x, slab_ref, b1c1w, b1c1b, b1c2w, b1c2b, Ho, Wo, nc)
    out_ref[...] = x


def _layer_ds_kernel(ph0, ph1, ph2, ph3,
                     b0c1w, b0c1b, b0c2w, b0c2b, dsw, dsb,
                     b1c1w, b1c1b, b1c2w, b1c2b,
                     out_ref, slab_ref, *, Ho, Wo, ncin, ncout):
    phs = (ph0, ph1, ph2, ph3)
    x = _block_s2(phs, slab_ref, b0c1w, b0c1b, b0c2w, b0c2b, dsw, dsb,
                  Ho, Wo, ncin, ncout)
    x = _block_s1(x, slab_ref, b1c1w, b1c1b, b1c2w, b1c2b, Ho, Wo, ncout)
    out_ref[...] = x


def _layer4_head_kernel(ph0, ph1, ph2, ph3,
                        b0c1w, b0c1b, b0c2w, b0c2b, dsw, dsb,
                        b1c1w, b1c1b, b1c2w, b1c2b,
                        fcw, fcb,
                        fea_ref, logits_ref, slab_ref, *, Ho, Wo, ncin, ncout):
    phs = (ph0, ph1, ph2, ph3)
    x = _block_s2(phs, slab_ref, b0c1w, b0c1b, b0c2w, b0c2b, dsw, dsb,
                  Ho, Wo, ncin, ncout)
    x = _block_s1(x, slab_ref, b1c1w, b1c1b, b1c2w, b1c2b, Ho, Wo, ncout)
    # adaptive avgpool: final spatial here is 1x1 (16x16 input), so mean over rows.
    fea = jnp.mean(x, axis=0, keepdims=True)                   # (1, N*Cout)
    fea_ref[...] = fea
    logits_ref[...] = jnp.dot(fea.astype(jnp.bfloat16), fcw[...],
                              preferred_element_type=jnp.float32) + fcb[...]


# ----------------------------------------------------------------------------------
# Parameter construction: synthetic weights, eval-mode BN folded into conv,
# block-diagonal per-tap expansion for the lane-dense (H, W*N*C) kernel layout.
# ----------------------------------------------------------------------------------

def _conv_w(key, kh, kw, cin, cout):
    fan_in = kh * kw * cin
    return (0.5 * jax.random.normal(key, (kh, kw, cin, cout), jnp.float32)
            / jnp.sqrt(jnp.float32(fan_in)))


def _bn_fold(key, c, eps=1e-5):
    k1, k2, k3, k4 = jax.random.split(key, 4)
    gamma = 1.0 + 0.1 * jax.random.normal(k1, (c,), jnp.float32)
    beta = 0.1 * jax.random.normal(k2, (c,), jnp.float32)
    mean = 0.1 * jax.random.normal(k3, (c,), jnp.float32)
    var = jnp.abs(jax.random.normal(k4, (c,), jnp.float32)) + 0.5
    scale = gamma / jnp.sqrt(var + eps)
    bias = beta - mean * scale
    return scale, bias


def _fold_conv_bn(wkey, bnkey, kh, kw, cin, cout):
    w = _conv_w(wkey, kh, kw, cin, cout)
    s, b = _bn_fold(bnkey, cout)
    return w * s[None, None, None, :], b


def _blockdiag(w, reps):
    """(KH,KW,Cin,Cout) -> (KH*KW, reps*Cin, reps*Cout) bf16 block-diagonal per tap."""
    KH, KW, Cin, Cout = w.shape
    w2 = w.reshape(KH * KW, Cin, Cout)
    eye = jnp.eye(reps, dtype=w.dtype)
    blk = eye[None, :, None, :, None] * w2[:, None, :, None, :]
    return blk.reshape(KH * KW, reps * Cin, reps * Cout).astype(jnp.bfloat16)


def _tile_bias(b, reps):
    return jnp.tile(b, reps)[None, :].astype(jnp.float32)


def make_kernel_params(key, *, batch, img, in_ch=3, base=8, num_classes=10):
    keys = jax.random.split(key, 64)
    ki = iter(range(64))
    nk = lambda: keys[next(ki)]
    N = batch

    s_conv1 = _osz(img, 7, 2, 3)
    s_pool = _osz(s_conv1, 3, 2, 1)
    widths = [base, base * 2, base * 4, base * 8]
    strides = [1, 2, 2, 2]
    spatial, s = [], s_pool
    for st in strides:
        s = _osz(s, 3, st, 1)
        spatial.append(s)

    params = {}
    w1, b1 = _fold_conv_bn(nk(), nk(), 7, 7, in_ch, base)
    params["stem_w"] = _blockdiag(w1, s_conv1 * N)
    params["stem_b"] = _tile_bias(b1, s_conv1 * N)

    cin = base
    for li in range(4):
        cout, st, Wo = widths[li], strides[li], spatial[li]
        reps = Wo * N
        blocks = []
        for bi in range(2):
            bs = st if bi == 0 else 1
            bcin = cin if bi == 0 else cout
            w_c1, b_c1 = _fold_conv_bn(nk(), nk(), 3, 3, bcin, cout)
            w_c2, b_c2 = _fold_conv_bn(nk(), nk(), 3, 3, cout, cout)
            bp = {"c1w": _blockdiag(w_c1, reps), "c1b": _tile_bias(b_c1, reps),
                  "c2w": _blockdiag(w_c2, reps), "c2b": _tile_bias(b_c2, reps)}
            if bi == 0 and (bs != 1 or bcin != cout):
                wd, bd = _fold_conv_bn(nk(), nk(), 1, 1, bcin, cout)
                bp["dsw"] = _blockdiag(wd, reps)[0]
                bp["dsb"] = _tile_bias(bd, reps)
            blocks.append(bp)
        params[f"layer{li + 1}"] = blocks
        cin = cout

    fcw = (0.5 * jax.random.normal(nk(), (widths[-1], num_classes), jnp.float32)
           / jnp.sqrt(jnp.float32(widths[-1])))
    fcb = 0.1 * jax.random.normal(nk(), (num_classes,), jnp.float32)
    params["fc_w"] = _blockdiag(fcw[None, None], N)[0]          # (N*width, N*classes)
    params["fc_b"] = _tile_bias(fcb, N)

    meta = dict(N=N, img=img, base=base, in_ch=in_ch, widths=widths,
                s_conv1=s_conv1, s_pool=s_pool, spatial=spatial,
                num_classes=num_classes)
    return params, meta


# ----------------------------------------------------------------------------------
# Wrapper glue (pure XLA layout plumbing on ~1x-sized activations)
# ----------------------------------------------------------------------------------

def _to_phases(x_nhwc, pad):
    """Zero-pad, split into 4 even/odd phases, flatten to lane-dense (H, W*N*C)."""
    N, H, W, C = x_nhwc.shape
    xp = jnp.pad(x_nhwc, ((0, 0), (pad, pad), (pad, pad), (0, 0)))
    Hp, Wp = H + 2 * pad, W + 2 * pad
    if Hp % 2:
        xp = jnp.pad(xp, ((0, 0), (0, 1), (0, 0), (0, 0)))
        Hp += 1
    if Wp % 2:
        xp = jnp.pad(xp, ((0, 0), (0, 0), (0, 1), (0, 0)))
        Wp += 1
    out = []
    for a in range(2):
        for b in range(2):
            ph = xp[:, a::2, b::2, :]
            ph = jnp.transpose(ph, (1, 2, 0, 3)).reshape(Hp // 2, (Wp // 2) * N * C)
            out.append(ph)
    return out


def _rows_to_nhwc(y, N, Ho, Wo, C):
    return jnp.transpose(y.reshape(Ho, Wo, N, C), (2, 0, 1, 3))


def resnet_with_features(params, meta, x_nchw):
    N, base = meta["N"], meta["base"]
    widths, spatial = meta["widths"], meta["spatial"]
    s_conv1, s_pool = meta["s_conv1"], meta["s_pool"]
    num_classes = meta["num_classes"]

    x = jnp.transpose(x_nchw, (0, 2, 3, 1)).astype(jnp.float32)   # NCHW -> NHWC

    # --- stem: conv1 (7x7 s2 p3) + folded BN + ReLU ---
    phs = _to_phases(x, pad=3)
    stem_out = _call(
        functools.partial(_stem_kernel, Ho=s_conv1, Wo=s_conv1, ncin=N * meta["in_ch"]),
        phs + [params["stem_w"], params["stem_b"]],
        jax.ShapeDtypeStruct((s_conv1, s_conv1 * N * base), jnp.float32),
    )

    # --- layer1: fused maxpool(3x3 s2 p1) + 2 basic blocks ---
    y = _rows_to_nhwc(stem_out, N, s_conv1, s_conv1, base)
    phs = _to_phases(y, pad=1)
    Ho, nc = s_pool, N * base
    bp = params["layer1"]
    cur = _call(
        functools.partial(_layer1_kernel, Ho=Ho, Wo=Ho, nc=nc),
        phs + [bp[0]["c1w"], bp[0]["c1b"], bp[0]["c2w"], bp[0]["c2b"],
               bp[1]["c1w"], bp[1]["c1b"], bp[1]["c2w"], bp[1]["c2b"]],
        jax.ShapeDtypeStruct((Ho, Ho * nc), jnp.float32),
        scratch_shapes=[pltpu.VMEM((Ho + 2, (Ho + 2) * nc), jnp.float32)],
    )
    cur_C, cur_S = base, s_pool

    # --- layers 2 and 3 (stride-2 block with downsample + stride-1 block) ---
    for li in (1, 2):
        cout, So = widths[li], spatial[li]
        y = _rows_to_nhwc(cur, N, cur_S, cur_S, cur_C)
        phs = _to_phases(y, pad=1)
        bp = params[f"layer{li + 1}"]
        ncin, ncout = N * cur_C, N * cout
        cur = _call(
            functools.partial(_layer_ds_kernel, Ho=So, Wo=So, ncin=ncin, ncout=ncout),
            phs + [bp[0]["c1w"], bp[0]["c1b"], bp[0]["c2w"], bp[0]["c2b"],
                   bp[0]["dsw"], bp[0]["dsb"],
                   bp[1]["c1w"], bp[1]["c1b"], bp[1]["c2w"], bp[1]["c2b"]],
            jax.ShapeDtypeStruct((So, So * ncout), jnp.float32),
            scratch_shapes=[pltpu.VMEM((So + 2, (So + 2) * ncout), jnp.float32)],
        )
        cur_C, cur_S = cout, So

    # --- layer4 + avgpool + fc head, fused in one kernel ---
    cout, So = widths[3], spatial[3]
    y = _rows_to_nhwc(cur, N, cur_S, cur_S, cur_C)
    phs = _to_phases(y, pad=1)
    bp = params["layer4"]
    ncin, ncout = N * cur_C, N * cout
    fea2, logits2 = _call(
        functools.partial(_layer4_head_kernel, Ho=So, Wo=So, ncin=ncin, ncout=ncout),
        phs + [bp[0]["c1w"], bp[0]["c1b"], bp[0]["c2w"], bp[0]["c2b"],
               bp[0]["dsw"], bp[0]["dsb"],
               bp[1]["c1w"], bp[1]["c1b"], bp[1]["c2w"], bp[1]["c2b"],
               params["fc_w"], params["fc_b"]],
        (jax.ShapeDtypeStruct((1, So * ncout), jnp.float32),
         jax.ShapeDtypeStruct((1, N * num_classes), jnp.float32)),
        scratch_shapes=[pltpu.VMEM((So + 2, (So + 2) * ncout), jnp.float32)],
    )
    fea = fea2.reshape(N, cout)
    logits = logits2.reshape(N, num_classes)
    return logits, fea


# ----------------------------------------------------------------------------------

if __name__ == "__main__":
    key = jax.random.PRNGKey(0)
    k_params, k_x = jax.random.split(key)

    BATCH, IMG = 2, 16
    params, meta = make_kernel_params(k_params, batch=BATCH, img=IMG,
                                      in_ch=3, base=8, num_classes=10)
    x = jax.random.normal(k_x, (BATCH, 3, IMG, IMG), jnp.float32)   # NCHW like PyTorch

    fwd = jax.jit(lambda p, xx: resnet_with_features(p, meta, xx))
    logits, features = fwd(params, x)
    jax.block_until_ready((logits, features))

    assert logits.shape == (BATCH, 10), logits.shape
    assert features.shape == (BATCH, meta["widths"][-1]), features.shape
    assert bool(jnp.all(jnp.isfinite(logits))) and bool(jnp.all(jnp.isfinite(features)))
    print("KERNEL_OK")
</pallas_src>

<mosaic_0001>
module attributes {stable_mosaic.version = 11 : i64} {
  func.func @_stem_kernel(%arg0: i32, %arg1: memref<11x66xf32, #tpu.memory_space<vmem>>, %arg2: memref<11x66xf32, #tpu.memory_space<vmem>>, %arg3: memref<11x66xf32, #tpu.memory_space<vmem>>, %arg4: memref<11x66xf32, #tpu.memory_space<vmem>>, %arg5: memref<49x48x128xbf16, #tpu.memory_space<vmem>>, %arg6: memref<1x128xf32, #tpu.memory_space<vmem>>, %arg7: memref<8x128xf32, #tpu.memory_space<vmem>>) attributes {dimension_semantics = [#tpu.dimension_semantics<arbitrary>], iteration_bounds = array<i64: 1>, scalar_prefetch = 0 : i64, scratch_operands = 0 : i64, tpu.core_type = #tpu.core_type<tc>, window_params = [{pipeline_mode = #tpu.pipeline_mode<synchronous>, transform_indices = @transform_0, window_bounds = array<i64: 11, 66>}, {pipeline_mode = #tpu.pipeline_mode<synchronous>, transform_indices = @transform_1, window_bounds = array<i64: 11, 66>}, {pipeline_mode = #tpu.pipeline_mode<synchronous>, transform_indices = @transform_2, window_bounds = array<i64: 11, 66>}, {pipeline_mode = #tpu.pipeline_mode<synchronous>, transform_indices = @transform_3, window_bounds = array<i64: 11, 66>}, {pipeline_mode = #tpu.pipeline_mode<synchronous>, transform_indices = @transform_4, window_bounds = array<i64: 49, 48, 128>}, {pipeline_mode = #tpu.pipeline_mode<synchronous>, transform_indices = @transform_5, window_bounds = array<i64: 1, 128>}, {pipeline_mode = #tpu.pipeline_mode<synchronous>, transform_indices = @transform_6, window_bounds = array<i64: 8, 128>}]} {
    %cst = arith.constant 0.000000e+00 : f32
    %0 = vector.broadcast %cst : f32 to vector<8x128xf32>
    %c0 = arith.constant 0 : index
    %c0_0 = arith.constant 0 : index
    %1 = vector.load %arg1[%c0, %c0_0] : memref<11x66xf32, #tpu.memory_space<vmem>>, vector<8x48xf32>
    %2 = arith.truncf %1 : vector<8x48xf32> to vector<8x48xbf16>
    %c0_1 = arith.constant 0 : index
    %c0_2 = arith.constant 0 : index
    %c0_3 = arith.constant 0 : index
    %3 = vector.load %arg5[%c0_1, %c0_2, %c0_3] : memref<49x48x128xbf16, #tpu.memory_space<vmem>>, vector<1x48x128xbf16>
    %4 = vector.shape_cast %3 : vector<1x48x128xbf16> to vector<48x128xbf16>
    %cst_4 = arith.constant dense<0.000000e+00> : vector<8x128xf32>
    %5 = tpu.matmul %2, %4, %cst_4 {dimension_numbers = #tpu.dot_dimension_numbers<[1], [0], [0], [1], [0, 0, 1, 1], [], []>} : vector<8x48xbf16>, vector<48x128xbf16>, vector<8x128xf32> -> vector<8x128xf32>
    %6 = arith.addf %0, %5 : vector<8x128xf32>
    %c0_5 = arith.constant 0 : index
    %c0_6 = arith.constant 0 : index
    %7 = vector.load %arg2[%c0_5, %c0_6] : memref<11x66xf32, #tpu.memory_space<vmem>>, vector<8x48xf32>
    %8 = arith.truncf %7 : vector<8x48xf32> to vector<8x48xbf16>
    %c1 = arith.constant 1 : index
    %c0_7 = arith.constant 0 : index
    %c0_8 = arith.constant 0 : index
    %9 = vector.load %arg5[%c1, %c0_7, %c0_8] : memref<49x48x128xbf16, #tpu.memory_space<vmem>>, vector<1x48x128xbf16>
    %10 = vector.shape_cast %9 : vector<1x48x128xbf16> to vector<48x128xbf16>
    %cst_9 = arith.constant dense<0.000000e+00> : vector<8x128xf32>
    %11 = tpu.matmul %8, %10, %cst_9 {dimension_numbers = #tpu.dot_dimension_numbers<[1], [0], [0], [1], [0, 0, 1, 1], [], []>} : vector<8x48xbf16>, vector<48x128xbf16>, vector<8x128xf32> -> vector<8x128xf32>
    %12 = arith.addf %6, %11 : vector<8x128xf32>
    %c0_10 = arith.constant 0 : index
    %c6 = arith.constant 6 : index
    %13 = vector.load %arg1[%c0_10, %c6] : memref<11x66xf32, #tpu.memory_space<vmem>>, vector<8x48xf32>
    %14 = arith.truncf %13 : vector<8x48xf32> to vector<8x48xbf16>
    %c2 = arith.constant 2 : index
    %c0_11 = arith.constant 0 : index
    %c0_12 = arith.constant 0 : index
    %15 = vector.load %arg5[%c2, %c0_11, %c0_12] : memref<49x48x128xbf16, #tpu.memory_space<vmem>>, vector<1x48x128xbf16>
    %16 = vector.shape_cast %15 : vector<1x48x128xbf16> to vector<48x128xbf16>
    %cst_13 = arith.constant dense<0.000000e+00> : vector<8x128xf32>
    %17 = tpu.matmul %14, %16, %cst_13 {dimension_numbers = #tpu.dot_dimension_numbers<[1], [0], [0], [1], [0, 0, 1, 1], [], []>} : vector<8x48xbf16>, vector<48x128xbf16>, vector<8x128xf32> -> vector<8x128xf32>
    %18 = arith.addf %12, %17 : vector<8x128xf32>
    %c0_14 = arith.constant 0 : index
    %c6_15 = arith.constant 6 : index
    %19 = vector.load %arg2[%c0_14, %c6_15] : memref<11x66xf32, #tpu.memory_space<vmem>>, vector<8x48xf32>
    %20 = arith.truncf %19 : vector<8x48xf32> to vector<8x48xbf16>
    %c3 = arith.constant 3 : index
    %c0_16 = arith.constant 0 : index
    %c0_17 = arith.constant 0 : index
    %21 = vector.load %arg5[%c3, %c0_16, %c0_17] : memref<49x48x128xbf16, #tpu.memory_space<vmem>>, vector<1x48x128xbf16>
    %22 = vector.shape_cast %21 : vector<1x48x128xbf16> to vector<48x128xbf16>
    %cst_18 = arith.constant dense<0.000000e+00> : vector<8x128xf32>
    %23 = tpu.matmul %20, %22, %cst_18 {dimension_numbers = #tpu.dot_dimension_numbers<[1], [0], [0], [1], [0, 0, 1, 1], [], []>} : vector<8x48xbf16>, vector<48x128xbf16>, vector<8x128xf32> -> vector<8x128xf32>
    %24 = arith.addf %18, %23 : vector<8x128xf32>
    %c0_19 = arith.constant 0 : index
    %c12 = arith.constant 12 : index
    %25 = vector.load %arg1[%c0_19, %c12] : memref<11x66xf32, #tpu.memory_space<vmem>>, vector<8x48xf32>
    %26 = arith.truncf %25 : vector<8x48xf32> to vector<8x48xbf16>
    %c4 = arith.constant 4 : index
    %c0_20 = arith.constant 0 : index
    %c0_21 = arith.constant 0 : index
    %27 = vector.load %arg5[%c4, %c0_20, %c0_21] : memref<49x48x128xbf16, #tpu.memory_space<vmem>>, vector<1x48x128xbf16>
    %28 = vector.shape_cast %27 : vector<1x48x128xbf16> to vector<48x128xbf16>
    %cst_22 = arith.constant dense<0.000000e+00> : vector<8x128xf32>
    %29 = tpu.matmul %26, %28, %cst_22 {dimension_numbers = #tpu.dot_dimension_numbers<[1], [0], [0], [1], [0, 0, 1, 1], [], []>} : vector<8x48xbf16>, vector<48x128xbf16>, vector<8x128xf32> -> vector<8x128xf32>
    %30 = arith.addf %24, %29 : vector<8x128xf32>
    %c0_23 = arith.constant 0 : index
    %c12_24 = arith.constant 12 : index
    %31 = vector.load %arg2[%c0_23, %c12_24] : memref<11x66xf32, #tpu.memory_space<vmem>>, vector<8x48xf32>
    %32 = arith.truncf %31 : vector<8x48xf32> to vector<8x48xbf16>
    %c5 = arith.constant 5 : index
    %c0_25 = arith.constant 0 : index
    %c0_26 = arith.constant 0 : index
    %33 = vector.load %arg5[%c5, %c0_25, %c0_26] : memref<49x48x128xbf16, #tpu.memory_space<vmem>>, vector<1x48x128xbf16>
    %34 = vector.shape_cast %33 : vector<1x48x128xbf16> to vector<48x128xbf16>
    %cst_27 = arith.constant dense<0.000000e+00> : vector<8x128xf32>
    %35 = tpu.matmul %32, %34, %cst_27 {dimension_numbers = #tpu.dot_dimension_numbers<[1], [0], [0], [1], [0, 0, 1, 1], [], []>} : vector<8x48xbf16>, vector<48x128xbf16>, vector<8x128xf32> -> vector<8x128xf32>
    %36 = arith.addf %30, %35 : vector<8x128xf32>
    %c0_28 = arith.constant 0 : index
    %c18 = arith.constant 18 : index
    %37 = vector.load %arg1[%c0_28, %c18] : memref<11x66xf32, #tpu.memory_space<vmem>>, vector<8x48xf32>
    %38 = arith.truncf %37 : vector<8x48xf32> to vector<8x48xbf16>
    %c6_29 = arith.constant 6 : index
    %c0_30 = arith.constant 0 : index
    %c0_31 = arith.constant 0 : index
    %39 = vector.load %arg5[%c6_29, %c0_30, %c0_31] : memref<49x48x128xbf16, #tpu.memory_space<vmem>>, vector<1x48x128xbf16>
    %40 = vector.shape_cast %39 : vector<1x48x128xbf16> to vector<48x128xbf16>
    %cst_32 = arith.constant dense<0.000000e+00> : vector<8x128xf32>
    %41 = tpu.matmul %38, %40, %cst_32 {dimension_numbers = #tpu.dot_dimension_numbers<[1], [0], [0], [1], [0, 0, 1, 1], [], []>} : vector<8x48xbf16>, vector<48x128xbf16>, vector<8x128xf32> -> vector<8x128xf32>
    %42 = arith.addf %36, %41 : vector<8x128xf32>
    %c0_33 = arith.constant 0 : index
    %c0_34 = arith.constant 0 : index
    %43 = vector.load %arg3[%c0_33, %c0_34] : memref<11x66xf32, #tpu.memory_space<vmem>>, vector<8x48xf32>
    %44 = arith.truncf %43 : vector<8x48xf32> to vector<8x48xbf16>
    %c7 = arith.constant 7 : index
    %c0_35 = arith.constant 0 : index
    %c0_36 = arith.constant 0 : index
    %45 = vector.load %arg5[%c7, %c0_35, %c0_36] : memref<49x48x128xbf16, #tpu.memory_space<vmem>>, vector<1x48x128xbf16>
    %46 = vector.shape_cast %45 : vector<1x48x128xbf16> to vector<48x128xbf16>
    %cst_37 = arith.constant dense<0.000000e+00> : vector<8x128xf32>
    %47 = tpu.matmul %44, %46, %cst_37 {dimension_numbers = #tpu.dot_dimension_numbers<[1], [0], [0], [1], [0, 0, 1, 1], [], []>} : vector<8x48xbf16>, vector<48x128xbf16>, vector<8x128xf32> -> vector<8x128xf32>
    %48 = arith.addf %42, %47 : vector<8x128xf32>
    %c0_38 = arith.constant 0 : index
    %c0_39 = arith.constant 0 : index
    %49 = vector.load %arg4[%c0_38, %c0_39] : memref<11x66xf32, #tpu.memory_space<vmem>>, vector<8x48xf32>
    %50 = arith.truncf %49 : vector<8x48xf32> to vector<8x48xbf16>
    %c8 = arith.constant 8 : index
    %c0_40 = arith.constant 0 : index
    %c0_41 = arith.constant 0 : index
    %51 = vector.load %arg5[%c8, %c0_40, %c0_41] : memref<49x48x128xbf16, #tpu.memory_space<vmem>>, vector<1x48x128xbf16>
    %52 = vector.shape_cast %51 : vector<1x48x128xbf16> to vector<48x128xbf16>
    %cst_42 = arith.constant dense<0.000000e+00> : vector<8x128xf32>
    %53 = tpu.matmul %50, %52, %cst_42 {dimension_numbers = #tpu.dot_dimension_numbers<[1], [0], [0], [1], [0, 0, 1, 1], [], []>} : vector<8x48xbf16>, vector<48x128xbf16>, vector<8x128xf32> -> vector<8x128xf32>
    %54 = arith.addf %48, %53 : vector<8x128xf32>
    %c0_43 = arith.constant 0 : index
    %c6_44 = arith.constant 6 : index
    %55 = vector.load %arg3[%c0_43, %c6_44] : memref<11x66xf32, #tpu.memory_space<vmem>>, vector<8x48xf32>
    %56 = arith.truncf %55 : vector<8x48xf32> to vector<8x48xbf16>
    %c9 = arith.constant 9 : index
    %c0_45 = arith.constant 0 : index
    %c0_46 = arith.constant 0 : index
    %57 = vector.load %arg5[%c9, %c0_45, %c0_46] : memref<49x48x128xbf16, #tpu.memory_space<vmem>>, vector<1x48x128xbf16>
    %58 = vector.shape_cast %57 : vector<1x48x128xbf16> to vector<48x128xbf16>
    %cst_47 = arith.constant dense<0.000000e+00> : vector<8x128xf32>
    %59 = tpu.matmul %56, %58, %cst_47 {dimension_numbers = #tpu.dot_dimension_numbers<[1], [0], [0], [1], [0, 0, 1, 1], [], []>} : vector<8x48xbf16>, vector<48x128xbf16>, vector<8x128xf32> -> vector<8x128xf32>
    %60 = arith.addf %54, %59 : vector<8x128xf32>
    %c0_48 = arith.constant 0 : index
    %c6_49 = arith.constant 6 : index
    %61 = vector.load %arg4[%c0_48, %c6_49] : memref<11x66xf32, #tpu.memory_space<vmem>>, vector<8x48xf32>
    %62 = arith.truncf %61 : vector<8x48xf32> to vector<8x48xbf16>
    %c10 = arith.constant 10 : index
    %c0_50 = arith.constant 0 : index
    %c0_51 = arith.constant 0 : index
    %63 = vector.load %arg5[%c10, %c0_50, %c0_51] : memref<49x48x128xbf16, #tpu.memory_space<vmem>>, vector<1x48x128xbf16>
    %64 = vector.shape_cast %63 : vector<1x48x128xbf16> to vector<48x128xbf16>
    %cst_52 = arith.constant dense<0.000000e+00> : vector<8x128xf32>
    %65 = tpu.matmul %62, %64, %cst_52 {dimension_numbers = #tpu.dot_dimension_numbers<[1], [0], [0], [1], [0, 0, 1, 1], [], []>} : vector<8x48xbf16>, vector<48x128xbf16>, vector<8x128xf32> -> vector<8x128xf32>
    %66 = arith.addf %60, %65 : vector<8x128xf32>
    %c0_53 = arith.constant 0 : index
    %c12_54 = arith.constant 12 : index
    %67 = vector.load %arg3[%c0_53, %c12_54] : memref<11x66xf32, #tpu.memory_space<vmem>>, vector<8x48xf32>
    %68 = arith.truncf %67 : vector<8x48xf32> to vector<8x48xbf16>
    %c11 = arith.constant 11 : index
    %c0_55 = arith.constant 0 : index
    %c0_56 = arith.constant 0 : index
    %69 = vector.load %arg5[%c11, %c0_55, %c0_56] : memref<49x48x128xbf16, #tpu.memory_space<vmem>>, vector<1x48x128xbf16>
    %70 = vector.shape_cast %69 : vector<1x48x128xbf16> to vector<48x128xbf16>
    %cst_57 = arith.constant dense<0.000000e+00> : vector<8x128xf32>
    %71 = tpu.matmul %68, %70, %cst_57 {dimension_numbers = #tpu.dot_dimension_numbers<[1], [0], [0], [1], [0, 0, 1, 1], [], []>} : vector<8x48xbf16>, vector<48x128xbf16>, vector<8x128xf32> -> vector<8x128xf32>
    %72 = arith.addf %66, %71 : vector<8x128xf32>
    %c0_58 = arith.constant 0 : index
    %c12_59 = arith.constant 12 : index
    %73 = vector.load %arg4[%c0_58, %c12_59] : memref<11x66xf32, #tpu.memory_space<vmem>>, vector<8x48xf32>
    %74 = arith.truncf %73 : vector<8x48xf32> to vector<8x48xbf16>
    %c12_60 = arith.constant 12 : index
    %c0_61 = arith.constant 0 : index
    %c0_62 = arith.constant 0 : index
    %75 = vector.load %arg5[%c12_60, %c0_61, %c0_62] : memref<49x48x128xbf16, #tpu.memory_space<vmem>>, vector<1x48x128xbf16>
    %76 = vector.shape_cast %75 : vector<1x48x128xbf16> to vector<48x128xbf16>
    %cst_63 = arith.constant dense<0.000000e+00> : vector<8x128xf32>
    %77 = tpu.matmul %74, %76, %cst_63 {dimension_numbers = #tpu.dot_dimension_numbers<[1], [0], [0], [1], [0, 0, 1, 1], [], []>} : vector<8x48xbf16>, vector<48x128xbf16>, vector<8x128xf32> -> vector<8x128xf32>
    %78 = arith.addf %72, %77 : vector<8x128xf32>
    %c0_64 = arith.constant 0 : index
    %c18_65 = arith.constant 18 : index
    %79 = vector.load %arg3[%c0_64, %c18_65] : memref<11x66xf32, #tpu.memory_space<vmem>>, vector<8x48xf32>
    %80 = arith.truncf %79 : vector<8x48xf32> to vector<8x48xbf16>
    %c13 = arith.constant 13 : index
    %c0_66 = arith.constant 0 : index
    %c0_67 = arith.constant 0 : index
    %81 = vector.load %arg5[%c13, %c0_66, %c0_67] : memref<49x48x128xbf16, #tpu.memory_space<vmem>>, vector<1x48x128xbf16>
    %82 = vector.shape_cast %81 : vector<1x48x128xbf16> to vector<48x128xbf16>
    %cst_68 = arith.constant dense<0.000000e+00> : vector<8x128xf32>
    %83 = tpu.matmul %80, %82, %cst_68 {dimension_numbers = #tpu.dot_dimension_numbers<[1], [0], [0], [1], [0, 0, 1, 1], [], []>} : vector<8x48xbf16>, vector<48x128xbf16>, vector<8x128xf32> -> vector<8x128xf32>
    %84 = arith.addf %78, %83 : vector<8x128xf32>
    %c1_69 = arith.constant 1 : index
    %c0_70 = arith.constant 0 : index
    %85 = vector.load %arg1[%c1_69, %c0_70] : memref<11x66xf32, #tpu.memory_space<vmem>>, vector<8x48xf32>
    %86 = arith.truncf %85 : vector<8x48xf32> to vector<8x48xbf16>
    %c14 = arith.constant 14 : index
    %c0_71 = arith.constant 0 : index
    %c0_72 = arith.constant 0 : index
    %87 = vector.load %arg5[%c14, %c0_71, %c0_72] : memref<49x48x128xbf16, #tpu.memory_space<vmem>>, vector<1x48x128xbf16>
    %88 = vector.shape_cast %87 : vector<1x48x128xbf16> to vector<48x128xbf16>
    %cst_73 = arith.constant dense<0.000000e+00> : vector<8x128xf32>
    %89 = tpu.matmul %86, %88, %cst_73 {dimension_numbers = #tpu.dot_dimension_numbers<[1], [0], [0], [1], [0, 0, 1, 1], [], []>} : vector<8x48xbf16>, vector<48x128xbf16>, vector<8x128xf32> -> vector<8x128xf32>
    %90 = arith.addf %84, %89 : vector<8x128xf32>
    %c1_74 = arith.constant 1 : index
    %c0_75 = arith.constant 0 : index
    %91 = vector.load %arg2[%c1_74, %c0_75] : memref<11x66xf32, #tpu.memory_space<vmem>>, vector<8x48xf32>
    %92 = arith.truncf %91 : vector<8x48xf32> to vector<8x48xbf16>
    %c15 = arith.constant 15 : index
    %c0_76 = arith.constant 0 : index
    %c0_77 = arith.constant 0 : index
    %93 = vector.load %arg5[%c15, %c0_76, %c0_77] : memref<49x48x128xbf16, #tpu.memory_space<vmem>>, vector<1x48x128xbf16>
    %94 = vector.shape_cast %93 : vector<1x48x128xbf16> to vector<48x128xbf16>
    %cst_78 = arith.constant dense<0.000000e+00> : vector<8x128xf32>
    %95 = tpu.matmul %92, %94, %cst_78 {dimension_numbers = #tpu.dot_dimension_numbers<[1], [0], [0], [1], [0, 0, 1, 1], [], []>} : vector<8x48xbf16>, vector<48x128xbf16>, vector<8x128xf32> -> vector<8x128xf32>
    %96 = arith.addf %90, %95 : vector<8x128xf32>
    %c1_79 = arith.constant 1 : index
    %c6_80 = arith.constant 6 : index
    %97 = vector.load %arg1[%c1_79, %c6_80] : memref<11x66xf32, #tpu.memory_space<vmem>>, vector<8x48xf32>
    %98 = arith.truncf %97 : vector<8x48xf32> to vector<8x48xbf16>
    %c16 = arith.constant 16 : index
    %c0_81 = arith.constant 0 : index
    %c0_82 = arith.constant 0 : index
    %99 = vector.load %arg5[%c16, %c0_81, %c0_82] : memref<49x48x128xbf16, #tpu.memory_space<vmem>>, vector<1x48x128xbf16>
    %100 = vector.shape_cast %99 : vector<1x48x128xbf16> to vector<48x128xbf16>
    %cst_83 = arith.constant dense<0.000000e+00> : vector<8x128xf32>
    %101 = tpu.matmul %98, %100, %cst_83 {dimension_numbers = #tpu.dot_dimension_numbers<[1], [0], [0], [1], [0, 0, 1, 1], [], []>} : vector<8x48xbf16>, vector<48x128xbf16>, vector<8x128xf32> -> vector<8x128xf32>
    %102 = arith.addf %96, %101 : vector<8x128xf32>
    %c1_84 = arith.constant 1 : index
    %c6_85 = arith.constant 6 : index
    %103 = vector.load %arg2[%c1_84, %c6_85] : memref<11x66xf32, #tpu.memory_space<vmem>>, vector<8x48xf32>
    %104 = arith.truncf %103 : vector<8x48xf32> to vector<8x48xbf16>
    %c17 = arith.constant 17 : index
    %c0_86 = arith.constant 0 : index
    %c0_87 = arith.constant 0 : index
    %105 = vector.load %arg5[%c17, %c0_86, %c0_87] : memref<49x48x128xbf16, #tpu.memory_space<vmem>>, vector<1x48x128xbf16>
    %106 = vector.shape_cast %105 : vector<1x48x128xbf16> to vector<48x128xbf16>
    %cst_88 = arith.constant dense<0.000000e+00> : vector<8x128xf32>
    %107 = tpu.matmul %104, %106, %cst_88 {dimension_numbers = #tpu.dot_dimension_numbers<[1], [0], [0], [1], [0, 0, 1, 1], [], []>} : vector<8x48xbf16>, vector<48x128xbf16>, vector<8x128xf32> -> vector<8x128xf32>
    %108 = arith.addf %102, %107 : vector<8x128xf32>
    %c1_89 = arith.constant 1 : index
    %c12_90 = arith.constant 12 : index
    %109 = vector.load %arg1[%c1_89, %c12_90] : memref<11x66xf32, #tpu.memory_space<vmem>>, vector<8x48xf32>
    %110 = arith.truncf %109 : vector<8x48xf32> to vector<8x48xbf16>
    %c18_91 = arith.constant 18 : index
    %c0_92 = arith.constant 0 : index
    %c0_93 = arith.constant 0 : index
    %111 = vector.load %arg5[%c18_91, %c0_92, %c0_93] : memref<49x48x128xbf16, #tpu.memory_space<vmem>>, vector<1x48x128xbf16>
    %112 = vector.shape_cast %111 : vector<1x48x128xbf16> to vector<48x128xbf16>
    %cst_94 = arith.constant dense<0.000000e+00> : vector<8x128xf32>
    %113 = tpu.matmul %110, %112, %cst_94 {dimension_numbers = #tpu.dot_dimension_numbers<[1], [0], [0], [1], [0, 0, 1, 1], [], []>} : vector<8x48xbf16>, vector<48x128xbf16>, vector<8x128xf32> -> vector<8x128xf32>
    %114 = arith.addf %108, %113 : vector<8x128xf32>
    %c1_95 = arith.constant 1 : index
    %c12_96 = arith.constant 12 : index
    %115 = vector.load %arg2[%c1_95, %c12_96] : memref<11x66xf32, #tpu.memory_space<vmem>>, vector<8x48xf32>
    %116 = arith.truncf %115 : vector<8x48xf32> to vector<8x48xbf16>
    %c19 = arith.constant 19 : index
    %c0_97 = arith.constant 0 : index
    %c0_98 = arith.constant 0 : index
    %117 = vector.load %arg5[%c19, %c0_97, %c0_98] : memref<49x48x128xbf16, #tpu.memory_space<vmem>>, vector<1x48x128xbf16>
    %118 = vector.shape_cast %117 : vector<1x48x128xbf16> to vector<48x128xbf16>
    %cst_99 = arith.constant dense<0.000000e+00> : vector<8x128xf32>
    %119 = tpu.matmul %116, %118, %cst_99 {dimension_numbers = #tpu.dot_dimension_numbers<[1], [0], [0], [1], [0, 0, 1, 1], [], []>} : vector<8x48xbf16>, vector<48x128xbf16>, vector<8x128xf32> -> vector<8x128xf32>
    %120 = arith.addf %114, %119 : vector<8x128xf32>
    %c1_100 = arith.constant 1 : index
    %c18_101 = arith.constant 18 : index
    %121 = vector.load %arg1[%c1_100, %c18_101] : memref<11x66xf32, #tpu.memory_space<vmem>>, vector<8x48xf32>
    %122 = arith.truncf %121 : vector<8x48xf32> to vector<8x48xbf16>
    %c20 = arith.constant 20 : index
    %c0_102 = arith.constant 0 : index
    %c0_103 = arith.constant 0 : index
    %123 = vector.load %arg5[%c20, %c0_102, %c0_103] : memref<49x48x128xbf16, #tpu.memory_space<vmem>>, vector<1x48x128xbf16>
    %124 = vector.shape_cast %123 : vector<1x48x128xbf16> to vector<48x128xbf16>
    %cst_104 = arith.constant dense<0.000000e+00> : vector<8x128xf32>
    %125 = tpu.matmul %122, %124, %cst_104 {dimension_numbers = #tpu.dot_dimension_numbers<[1], [0], [0], [1], [0, 0, 1, 1], [], []>} : vector<8x48xbf16>, vector<48x128xbf16>, vector<8x128xf32> -> vector<8x128xf32>
    %126 = arith.addf %120, %125 : vector<8x128xf32>
    %c1_105 = arith.constant 1 : index
    %c0_106 = arith.constant 0 : index
    %127 = vector.load %arg3[%c1_105, %c0_106] : memref<11x66xf32, #tpu.memory_space<vmem>>, vector<8x48xf32>
    %128 = arith.truncf %127 : vector<8x48xf32> to vector<8x48xbf16>
    %c21 = arith.constant 21 : index
    %c0_107 = arith.constant 0 : index
    %c0_108 = arith.constant 0 : index
    %129 = vector.load %arg5[%c21, %c0_107, %c0_108] : memref<49x48x128xbf16, #tpu.memory_space<vmem>>, vector<1x48x128xbf16>
    %130 = vector.shape_cast %129 : vector<1x48x128xbf16> to vector<48x128xbf16>
    %cst_109 = arith.constant dense<0.000000e+00> : vector<8x128xf32>
    %131 = tpu.matmul %128, %130, %cst_109 {dimension_numbers = #tpu.dot_dimension_numbers<[1], [0], [0], [1], [0, 0, 1, 1], [], []>} : vector<8x48xbf16>, vector<48x128xbf16>, vector<8x128xf32> -> vector<8x128xf32>
    %132 = arith.addf %126, %131 : vector<8x128xf32>
    %c1_110 = arith.constant 1 : index
    %c0_111 = arith.constant 0 : index
    %133 = vector.load %arg4[%c1_110, %c0_111] : memref<11x66xf32, #tpu.memory_space<vmem>>, vector<8x48xf32>
    %134 = arith.truncf %133 : vector<8x48xf32> to vector<8x48xbf16>
    %c22 = arith.constant 22 : index
    %c0_112 = arith.constant 0 : index
    %c0_113 = arith.constant 0 : index
    %135 = vector.load %arg5[%c22, %c0_112, %c0_113] : memref<49x48x128xbf16, #tpu.memory_space<vmem>>, vector<1x48x128xbf16>
    %136 = vector.shape_cast %135 : vector<1x48x128xbf16> to vector<48x128xbf16>
    %cst_114 = arith.constant dense<0.000000e+00> : vector<8x128xf32>
    %137 = tpu.matmul %134, %136, %cst_114 {dimension_numbers = #tpu.dot_dimension_numbers<[1], [0], [0], [1], [0, 0, 1, 1], [], []>} : vector<8x48xbf16>, vector<48x128xbf16>, vector<8x128xf32> -> vector<8x128xf32>
    %138 = arith.addf %132, %137 : vector<8x128xf32>
    %c1_115 = arith.constant 1 : index
    %c6_116 = arith.constant 6 : index
    %139 = vector.load %arg3[%c1_115, %c6_116] : memref<11x66xf32, #tpu.memory_space<vmem>>, vector<8x48xf32>
    %140 = arith.truncf %139 : vector<8x48xf32> to vector<8x48xbf16>
    %c23 = arith.constant 23 : index
    %c0_117 = arith.constant 0 : index
    %c0_118 = arith.constant 0 : index
    %141 = vector.load %arg5[%c23, %c0_117, %c0_118] : memref<49x48x128xbf16, #tpu.memory_space<vmem>>, vector<1x48x128xbf16>
    %142 = vector.shape_cast %141 : vector<1x48x128xbf16> to vector<48x128xbf16>
    %cst_119 = arith.constant dense<0.000000e+00> : vector<8x128xf32>
    %143 = tpu.matmul %140, %142, %cst_119 {dimension_numbers = #tpu.dot_dimension_numbers<[1], [0], [0], [1], [0, 0, 1, 1], [], []>} : vector<8x48xbf16>, vector<48x128xbf16>, vector<8x128xf32> -> vector<8x128xf32>
    %144 = arith.addf %138, %143 : vector<8x128xf32>
    %c1_120 = arith.constant 1 : index
    %c6_121 = arith.constant 6 : index
    %145 = vector.load %arg4[%c1_120, %c6_121] : memref<11x66xf32, #tpu.memory_space<vmem>>, vector<8x48xf32>
    %146 = arith.truncf %145 : vector<8x48xf32> to vector<8x48xbf16>
    %c24 = arith.constant 24 : index
    %c0_122 = arith.constant 0 : index
    %c0_123 = arith.constant 0 : index
    %147 = vector.load %arg5[%c24, %c0_122, %c0_123] : memref<49x48x128xbf16, #tpu.memory_space<vmem>>, vector<1x48x128xbf16>
    %148 = vector.shape_cast %147 : vector<1x48x128xbf16> to vector<48x128xbf16>
    %cst_124 = arith.constant dense<0.000000e+00> : vector<8x128xf32>
    %149 = tpu.matmul %146, %148, %cst_124 {dimension_numbers = #tpu.dot_dimension_numbers<[1], [0], [0], [1], [0, 0, 1, 1], [], []>} : vector<8x48xbf16>, vector<48x128xbf16>, vector<8x128xf32> -> vector<8x128xf32>
    %150 = arith.addf %144, %149 : vector<8x128xf32>
    %c1_125 = arith.constant 1 : index
    %c12_126 = arith.constant 12 : index
    %151 = vector.load %arg3[%c1_125, %c12_126] : memref<11x66xf32, #tpu.memory_space<vmem>>, vector<8x48xf32>
    %152 = arith.truncf %151 : vector<8x48xf32> to vector<8x48xbf16>
    %c25 = arith.constant 25 : index
    %c0_127 = arith.constant 0 : index
    %c0_128 = arith.constant 0 : index
    %153 = vector.load %arg5[%c25, %c0_127, %c0_128] : memref<49x48x128xbf16, #tpu.memory_space<vmem>>, vector<1x48x128xbf16>
    %154 = vector.shape_cast %153 : vector<1x48x128xbf16> to vector<48x128xbf16>
    %cst_129 = arith.constant dense<0.000000e+00> : vector<8x128xf32>
    %155 = tpu.matmul %152, %154, %cst_129 {dimension_numbers = #tpu.dot_dimension_numbers<[1], [0], [0], [1], [0, 0, 1, 1], [], []>} : vector<8x48xbf16>, vector<48x128xbf16>, vector<8x128xf32> -> vector<8x128xf32>
    %156 = arith.addf %150, %155 : vector<8x128xf32>
    %c1_130 = arith.constant 1 : index
    %c12_131 = arith.constant 12 : index
    %157 = vector.load %arg4[%c1_130, %c12_131] : memref<11x66xf32, #tpu.memory_space<vmem>>, vector<8x48xf32>
    %158 = arith.truncf %157 : vector<8x48xf32> to vector<8x48xbf16>
    %c26 = arith.constant 26 : index
    %c0_132 = arith.constant 0 : index
    %c0_133 = arith.constant 0 : index
    %159 = vector.load %arg5[%c26, %c0_132, %c0_133] : memref<49x48x128xbf16, #tpu.memory_space<vmem>>, vector<1x48x128xbf16>
    %160 = vector.shape_cast %159 : vector<1x48x128xbf16> to vector<48x128xbf16>
    %cst_134 = arith.constant dense<0.000000e+00> : vector<8x128xf32>
    %161 = tpu.matmul %158, %160, %cst_134 {dimension_numbers = #tpu.dot_dimension_numbers<[1], [0], [0], [1], [0, 0, 1, 1], [], []>} : vector<8x48xbf16>, vector<48x128xbf16>, vector<8x128xf32> -> vector<8x128xf32>
    %162 = arith.addf %156, %161 : vector<8x128xf32>
    %c1_135 = arith.constant 1 : index
    %c18_136 = arith.constant 18 : index
    %163 = vector.load %arg3[%c1_135, %c18_136] : memref<11x66xf32, #tpu.memory_space<vmem>>, vector<8x48xf32>
    %164 = arith.truncf %163 : vector<8x48xf32> to vector<8x48xbf16>
    %c27 = arith.constant 27 : index
    %c0_137 = arith.constant 0 : index
    %c0_138 = arith.constant 0 : index
    %165 = vector.load %arg5[%c27, %c0_137, %c0_138] : memref<49x48x128xbf16, #tpu.memory_space<vmem>>, vector<1x48x128xbf16>
    %166 = vector.shape_cast %165 : vector<1x48x128xbf16> to vector<48x128xbf16>
    %cst_139 = arith.constant dense<0.000000e+00> : vector<8x128xf32>
    %167 = tpu.matmul %164, %166, %cst_139 {dimension_numbers = #tpu.dot_dimension_numbers<[1], [0], [0], [1], [0, 0, 1, 1], [], []>} : vector<8x48xbf16>, vector<48x128xbf16>, vector<8x128xf32> -> vector<8x128xf32>
    %168 = arith.addf %162, %167 : vector<8x128xf32>
    %c2_140 = arith.constant 2 : index
    %c0_141 = arith.constant 0 : index
    %169 = vector.load %arg1[%c2_140, %c0_141] : memref<11x66xf32, #tpu.memory_space<vmem>>, vector<8x48xf32>
    %170 = arith.truncf %169 : vector<8x48xf32> to vector<8x48xbf16>
    %c28 = arith.constant 28 : index
    %c0_142 = arith.constant 0 : index
    %c0_143 = arith.constant 0 : index
    %171 = vector.load %arg5[%c28, %c0_142, %c0_143] : memref<49x48x128xbf16, #tpu.memory_space<vmem>>, vector<1x48x128xbf16>
    %172 = vector.shape_cast %171 : vector<1x48x128xbf16> to vector<48x128xbf16>
    %cst_144 = arith.constant dense<0.000000e+00> : vector<8x128xf32>
    %173 = tpu.matmul %170, %172, %cst_144 {dimension_numbers = #tpu.dot_dimension_numbers<[1], [0], [0], [1], [0, 0, 1, 1], [], []>} : vector<8x48xbf16>, vector<48x128xbf16>, vector<8x128xf32> -> vector<8x128xf32>
    %174 = arith.addf %168, %173 : vector<8x128xf32>
    %c2_145 = arith.constant 2 : index
    %c0_146 = arith.constant 0 : index
    %175 = vector.load %arg2[%c2_145, %c0_146] : memref<11x66xf32, #tpu.memory_space<vmem>>, vector<8x48xf32>
    %176 = arith.truncf %175 : vector<8x48xf32> to vector<8x48xbf16>
    %c29 = arith.constant 29 : index
    %c0_147 = arith.constant 0 : index
    %c0_148 = arith.constant 0 : index
    %177 = vector.load %arg5[%c29, %c0_147, %c0_148] : memref<49x48x128xbf16, #tpu.memory_space<vmem>>, vector<1x48x128xbf16>
    %178 = vector.shape_cast %177 : vector<1x48x128xbf16> to vector<48x128xbf16>
    %cst_149 = arith.constant dense<0.000000e+00> : vector<8x128xf32>
    %179 = tpu.matmul %176, %178, %cst_149 {dimension_numbers = #tpu.dot_dimension_numbers<[1], [0], [0], [1], [0, 0, 1, 1], [], []>} : vector<8x48xbf16>, vector<48x128xbf16>, vector<8x128xf32> -> vector<8x128xf32>
    %180 = arith.addf %174, %179 : vector<8x128xf32>
    %c2_150 = arith.constant 2 : index
    %c6_151 = arith.constant 6 : index
    %181 = vector.load %arg1[%c2_150, %c6_151] : memref<11x66xf32, #tpu.memory_space<vmem>>, vector<8x48xf32>
    %182 = arith.truncf %181 : vector<8x48xf32> to vector<8x48xbf16>
    %c30 = arith.constant 30 : index
    %c0_152 = arith.constant 0 : index
    %c0_153 = arith.constant 0 : index
    %183 = vector.load %arg5[%c30, %c0_152, %c0_153] : memref<49x48x128xbf16, #tpu.memory_space<vmem>>, vector<1x48x128xbf16>
    %184 = vector.shape_cast %183 : vector<1x48x128xbf16> to vector<48x128xbf16>
    %cst_154 = arith.constant dense<0.000000e+00> : vector<8x128xf32>
    %185 = tpu.matmul %182, %184, %cst_154 {dimension_numbers = #tpu.dot_dimension_numbers<[1], [0], [0], [1], [0, 0, 1, 1], [], []>} : vector<8x48xbf16>, vector<48x128xbf16>, vector<8x128xf32> -> vector<8x128xf32>
    %186 = arith.addf %180, %185 : vector<8x128xf32>
    %c2_155 = arith.constant 2 : index
    %c6_156 = arith.constant 6 : index
    %187 = vector.load %arg2[%c2_155, %c6_156] : memref<11x66xf32, #tpu.memory_space<vmem>>, vector<8x48xf32>
    %188 = arith.truncf %187 : vector<8x48xf32> to vector<8x48xbf16>
    %c31 = arith.constant 31 : index
    %c0_157 = arith.constant 0 : index
    %c0_158 = arith.constant 0 : index
    %189 = vector.load %arg5[%c31, %c0_157, %c0_158] : memref<49x48x128xbf16, #tpu.memory_space<vmem>>, vector<1x48x128xbf16>
    %190 = vector.shape_cast %189 : vector<1x48x128xbf16> to vector<48x128xbf16>
    %cst_159 = arith.constant dense<0.000000e+00> : vector<8x128xf32>
    %191 = tpu.matmul %188, %190, %cst_159 {dimension_numbers = #tpu.dot_dimension_numbers<[1], [0], [0], [1], [0, 0, 1, 1], [], []>} : vector<8x48xbf16>, vector<48x128xbf16>, vector<8x128xf32> -> vector<8x128xf32>
    %192 = arith.addf %186, %191 : vector<8x128xf32>
    %c2_160 = arith.constant 2 : index
    %c12_161 = arith.constant 12 : index
    %193 = vector.load %arg1[%c2_160, %c12_161] : memref<11x66xf32, #tpu.memory_space<vmem>>, vector<8x48xf32>
    %194 = arith.truncf %193 : vector<8x48xf32> to vector<8x48xbf16>
    %c32 = arith.constant 32 : index
    %c0_162 = arith.constant 0 : index
    %c0_163 = arith.constant 0 : index
    %195 = vector.load %arg5[%c32, %c0_162, %c0_163] : memref<49x48x128xbf16, #tpu.memory_space<vmem>>, vector<1x48x128xbf16>
    %196 = vector.shape_cast %195 : vector<1x48x128xbf16> to vector<48x128xbf16>
    %cst_164 = arith.constant dense<0.000000e+00> : vector<8x128xf32>
    %197 = tpu.matmul %194, %196, %cst_164 {dimension_numbers = #tpu.dot_dimension_numbers<[1], [0], [0], [1], [0, 0, 1, 1], [], []>} : vector<8x48xbf16>, vector<48x128xbf16>, vector<8x128xf32> -> vector<8x128xf32>
    %198 = arith.addf %192, %197 : vector<8x128xf32>
    %c2_165 = arith.constant 2 : index
    %c12_166 = arith.constant 12 : index
    %199 = vector.load %arg2[%c2_165, %c12_166] : memref<11x66xf32, #tpu.memory_space<vmem>>, vector<8x48xf32>
    %200 = arith.truncf %199 : vector<8x48xf32> to vector<8x48xbf16>
    %c33 = arith.constant 33 : index
    %c0_167 = arith.constant 0 : index
    %c0_168 = arith.constant 0 : index
    %201 = vector.load %arg5[%c33, %c0_167, %c0_168] : memref<49x48x128xbf16, #tpu.memory_space<vmem>>, vector<1x48x128xbf16>
    %202 = vector.shape_cast %201 : vector<1x48x128xbf16> to vector<48x128xbf16>
    %cst_169 = arith.constant dense<0.000000e+00> : vector<8x128xf32>
    %203 = tpu.matmul %200, %202, %cst_169 {dimension_numbers = #tpu.dot_dimension_numbers<[1], [0], [0], [1], [0, 0, 1, 1], [], []>} : vector<8x48xbf16>, vector<48x128xbf16>, vector<8x128xf32> -> vector<8x128xf32>
    %204 = arith.addf %198, %203 : vector<8x128xf32>
    %c2_170 = arith.constant 2 : index
    %c18_171 = arith.constant 18 : index
    %205 = vector.load %arg1[%c2_170, %c18_171] : memref<11x66xf32, #tpu.memory_space<vmem>>, vector<8x48xf32>
    %206 = arith.truncf %205 : vector<8x48xf32> to vector<8x48xbf16>
    %c34 = arith.constant 34 : index
    %c0_172 = arith.constant 0 : index
    %c0_173 = arith.constant 0 : index
    %207 = vector.load %arg5[%c34, %c0_172, %c0_173] : memref<49x48x128xbf16, #tpu.memory_space<vmem>>, vector<1x48x128xbf16>
    %208 = vector.shape_cast %207 : vector<1x48x128xbf16> to vector<48x128xbf16>
    %cst_174 = arith.constant dense<0.000000e+00> : vector<8x128xf32>
    %209 = tpu.matmul %206, %208, %cst_174 {dimension_numbers = #tpu.dot_dimension_numbers<[1], [0], [0], [1], [0, 0, 1, 1], [], []>} : vector<8x48xbf16>, vector<48x128xbf16>, vector<8x128xf32> -> vector<8x128xf32>
    %210 = arith.addf %204, %209 : vector<8x128xf32>
    %c2_175 = arith.constant 2 : index
    %c0_176 = arith.constant 0 : index
    %211 = vector.load %arg3[%c2_175, %c0_176] : memref<11x66xf32, #tpu.memory_space<vmem>>, vector<8x48xf32>
    %212 = arith.truncf %211 : vector<8x48xf32> to vector<8x48xbf16>
    %c35 = arith.constant 35 : index
    %c0_177 = arith.constant 0 : index
    %c0_178 = arith.constant 0 : index
    %213 = vector.load %arg5[%c35, %c0_177, %c0_178] : memref<49x48x128xbf16, #tpu.memory_space<vmem>>, vector<1x48x128xbf16>
    %214 = vector.shape_cast %213 : vector<1x48x128xbf16> to vector<48x128xbf16>
    %cst_179 = arith.constant dense<0.000000e+00> : vector<8x128xf32>
    %215 = tpu.matmul %212, %214, %cst_179 {dimension_numbers = #tpu.dot_dimension_numbers<[1], [0], [0], [1], [0, 0, 1, 1], [], []>} : vector<8x48xbf16>, vector<48x128xbf16>, vector<8x128xf32> -> vector<8x128xf32>
    %216 = arith.addf %210, %215 : vector<8x128xf32>
    %c2_180 = arith.constant 2 : index
    %c0_181 = arith.constant 0 : index
    %217 = vector.load %arg4[%c2_180, %c0_181] : memref<11x66xf32, #tpu.memory_space<vmem>>, vector<8x48xf32>
    %218 = arith.truncf %217 : vector<8x48xf32> to vector<8x48xbf16>
    %c36 = arith.constant 36 : index
    %c0_182 = arith.constant 0 : index
    %c0_183 = arith.constant 0 : index
    %219 = vector.load %arg5[%c36, %c0_182, %c0_183] : memref<49x48x128xbf16, #tpu.memory_space<vmem>>, vector<1x48x128xbf16>
    %220 = vector.shape_cast %219 : vector<1x48x128xbf16> to vector<48x128xbf16>
    %cst_184 = arith.constant dense<0.000000e+00> : vector<8x128xf32>
    %221 = tpu.matmul %218, %220, %cst_184 {dimension_numbers = #tpu.dot_dimension_numbers<[1], [0], [0], [1], [0, 0, 1, 1], [], []>} : vector<8x48xbf16>, vector<48x128xbf16>, vector<8x128xf32> -> vector<8x128xf32>
    %222 = arith.addf %216, %221 : vector<8x128xf32>
    %c2_185 = arith.constant 2 : index
    %c6_186 = arith.constant 6 : index
    %223 = vector.load %arg3[%c2_185, %c6_186] : memref<11x66xf32, #tpu.memory_space<vmem>>, vector<8x48xf32>
    %224 = arith.truncf %223 : vector<8x48xf32> to vector<8x48xbf16>
    %c37 = arith.constant 37 : index
    %c0_187 = arith.constant 0 : index
    %c0_188 = arith.constant 0 : index
    %225 = vector.load %arg5[%c37, %c0_187, %c0_188] : memref<49x48x128xbf16, #tpu.memory_space<vmem>>, vector<1x48x128xbf16>
    %226 = vector.shape_cast %225 : vector<1x48x128xbf16> to vector<48x128xbf16>
    %cst_189 = arith.constant dense<0.000000e+00> : vector<8x128xf32>
    %227 = tpu.matmul %224, %226, %cst_189 {dimension_numbers = #tpu.dot_dimension_numbers<[1], [0], [0], [1], [0, 0, 1, 1], [], []>} : vector<8x48xbf16>, vector<48x128xbf16>, vector<8x128xf32> -> vector<8x128xf32>
    %228 = arith.addf %222, %227 : vector<8x128xf32>
    %c2_190 = arith.constant 2 : index
    %c6_191 = arith.constant 6 : index
    %229 = vector.load %arg4[%c2_190, %c6_191] : memref<11x66xf32, #tpu.memory_space<vmem>>, vector<8x48xf32>
    %230 = arith.truncf %229 : vector<8x48xf32> to vector<8x48xbf16>
    %c38 = arith.constant 38 : index
    %c0_192 = arith.constant 0 : index
    %c0_193 = arith.constant 0 : index
    %231 = vector.load %arg5[%c38, %c0_192, %c0_193] : memref<49x48x128xbf16, #tpu.memory_space<vmem>>, vector<1x48x128xbf16>
    %232 = vector.shape_cast %231 : vector<1x48x128xbf16> to vector<48x128xbf16>
    %cst_194 = arith.constant dense<0.000000e+00> : vector<8x128xf32>
    %233 = tpu.matmul %230, %232, %cst_194 {dimension_numbers = #tpu.dot_dimension_numbers<[1], [0], [0], [1], [0, 0, 1, 1], [], []>} : vector<8x48xbf16>, vector<48x128xbf16>, vector<8x128xf32> -> vector<8x128xf32>
    %234 = arith.addf %228, %233 : vector<8x128xf32>
    %c2_195 = arith.constant 2 : index
    %c12_196 = arith.constant 12 : index
    %235 = vector.load %arg3[%c2_195, %c12_196] : memref<11x66xf32, #tpu.memory_space<vmem>>, vector<8x48xf32>
    %236 = arith.truncf %235 : vector<8x48xf32> to vector<8x48xbf16>
    %c39 = arith.constant 39 : index
    %c0_197 = arith.constant 0 : index
    %c0_198 = arith.constant 0 : index
    %237 = vector.load %arg5[%c39, %c0_197, %c0_198] : memref<49x48x128xbf16, #tpu.memory_space<vmem>>, vector<1x48x128xbf16>
    %238 = vector.shape_cast %237 : vector<1x48x128xbf16> to vector<48x128xbf16>
    %cst_199 = arith.constant dense<0.000000e+00> : vector<8x128xf32>
    %239 = tpu.matmul %236, %238, %cst_199 {dimension_numbers = #tpu.dot_dimension_numbers<[1], [0], [0], [1], [0, 0, 1, 1], [], []>} : vector<8x48xbf16>, vector<48x128xbf16>, vector<8x128xf32> -> vector<8x128xf32>
    %240 = arith.addf %234, %239 : vector<8x128xf32>
    %c2_200 = arith.constant 2 : index
    %c12_201 = arith.constant 12 : index
    %241 = vector.load %arg4[%c2_200, %c12_201] : memref<11x66xf32, #tpu.memory_space<vmem>>, vector<8x48xf32>
    %242 = arith.truncf %241 : vector<8x48xf32> to vector<8x48xbf16>
    %c40 = arith.constant 40 : index
    %c0_202 = arith.constant 0 : index
    %c0_203 = arith.constant 0 : index
    %243 = vector.load %arg5[%c40, %c0_202, %c0_203] : memref<49x48x128xbf16, #tpu.memory_space<vmem>>, vector<1x48x128xbf16>
    %244 = vector.shape_cast %243 : vector<1x48x128xbf16> to vector<48x128xbf16>
    %cst_204 = arith.constant dense<0.000000e+00> : vector<8x128xf32>
    %245 = tpu.matmul %242, %244, %cst_204 {dimension_numbers = #tpu.dot_dimension_numbers<[1], [0], [0], [1], [0, 0, 1, 1], [], []>} : vector<8x48xbf16>, vector<48x128xbf16>, vector<8x128xf32> -> vector<8x128xf32>
    %246 = arith.addf %240, %245 : vector<8x128xf32>
    %c2_205 = arith.constant 2 : index
    %c18_206 = arith.constant 18 : index
    %247 = vector.load %arg3[%c2_205, %c18_206] : memref<11x66xf32, #tpu.memory_space<vmem>>, vector<8x48xf32>
    %248 = arith.truncf %247 : vector<8x48xf32> to vector<8x48xbf16>
    %c41 = arith.constant 41 : index
    %c0_207 = arith.constant 0 : index
    %c0_208 = arith.constant 0 : index
    %249 = vector.load %arg5[%c41, %c0_207, %c0_208] : memref<49x48x128xbf16, #tpu.memory_space<vmem>>, vector<1x48x128xbf16>
    %250 = vector.shape_cast %249 : vector<1x48x128xbf16> to vector<48x128xbf16>
    %cst_209 = arith.constant dense<0.000000e+00> : vector<8x128xf32>
    %251 = tpu.matmul %248, %250, %cst_209 {dimension_numbers = #tpu.dot_dimension_numbers<[1], [0], [0], [1], [0, 0, 1, 1], [], []>} : vector<8x48xbf16>, vector<48x128xbf16>, vector<8x128xf32> -> vector<8x128xf32>
    %252 = arith.addf %246, %251 : vector<8x128xf32>
    %c3_210 = arith.constant 3 : index
    %c0_211 = arith.constant 0 : index
    %253 = vector.load %arg1[%c3_210, %c0_211] : memref<11x66xf32, #tpu.memory_space<vmem>>, vector<8x48xf32>
    %254 = arith.truncf %253 : vector<8x48xf32> to vector<8x48xbf16>
    %c42 = arith.constant 42 : index
    %c0_212 = arith.constant 0 : index
    %c0_213 = arith.constant 0 : index
    %255 = vector.load %arg5[%c42, %c0_212, %c0_213] : memref<49x48x128xbf16, #tpu.memory_space<vmem>>, vector<1x48x128xbf16>
    %256 = vector.shape_cast %255 : vector<1x48x128xbf16> to vector<48x128xbf16>
    %cst_214 = arith.constant dense<0.000000e+00> : vector<8x128xf32>
    %257 = tpu.matmul %254, %256, %cst_214 {dimension_numbers = #tpu.dot_dimension_numbers<[1], [0], [0], [1], [0, 0, 1, 1], [], []>} : vector<8x48xbf16>, vector<48x128xbf16>, vector<8x128xf32> -> vector<8x128xf32>
    %258 = arith.addf %252, %257 : vector<8x128xf32>
    %c3_215 = arith.constant 3 : index
    %c0_216 = arith.constant 0 : index
    %259 = vector.load %arg2[%c3_215, %c0_216] : memref<11x66xf32, #tpu.memory_space<vmem>>, vector<8x48xf32>
    %260 = arith.truncf %259 : vector<8x48xf32> to vector<8x48xbf16>
    %c43 = arith.constant 43 : index
    %c0_217 = arith.constant 0 : index
    %c0_218 = arith.constant 0 : index
    %261 = vector.load %arg5[%c43, %c0_217, %c0_218] : memref<49x48x128xbf16, #tpu.memory_space<vmem>>, vector<1x48x128xbf16>
    %262 = vector.shape_cast %261 : vector<1x48x128xbf16> to vector<48x128xbf16>
    %cst_219 = arith.constant dense<0.000000e+00> : vector<8x128xf32>
    %263 = tpu.matmul %260, %262, %cst_219 {dimension_numbers = #tpu.dot_dimension_numbers<[1], [0], [0], [1], [0, 0, 1, 1], [], []>} : vector<8x48xbf16>, vector<48x128xbf16>, vector<8x128xf32> -> vector<8x128xf32>
    %264 = arith.addf %258, %263 : vector<8x128xf32>
    %c3_220 = arith.constant 3 : index
    %c6_221 = arith.constant 6 : index
    %265 = vector.load %arg1[%c3_220, %c6_221] : memref<11x66xf32, #tpu.memory_space<vmem>>, vector<8x48xf32>
    %266 = arith.truncf %265 : vector<8x48xf32> to vector<8x48xbf16>
    %c44 = arith.constant 44 : index
    %c0_222 = arith.constant 0 : index
    %c0_223 = arith.constant 0 : index
    %267 = vector.load %arg5[%c44, %c0_222, %c0_223] : memref<49x48x128xbf16, #tpu.memory_space<vmem>>, vector<1x48x128xbf16>
    %268 = vector.shape_cast %267 : vector<1x48x128xbf16> to vector<48x128xbf16>
    %cst_224 = arith.constant dense<0.000000e+00> : vector<8x128xf32>
    %269 = tpu.matmul %266, %268, %cst_224 {dimension_numbers = #tpu.dot_dimension_numbers<[1], [0], [0], [1], [0, 0, 1, 1], [], []>} : vector<8x48xbf16>, vector<48x128xbf16>, vector<8x128xf32> -> vector<8x128xf32>
    %270 = arith.addf %264, %269 : vector<8x128xf32>
    %c3_225 = arith.constant 3 : index
    %c6_226 = arith.constant 6 : index
    %271 = vector.load %arg2[%c3_225, %c6_226] : memref<11x66xf32, #tpu.memory_space<vmem>>, vector<8x48xf32>
    %272 = arith.truncf %271 : vector<8x48xf32> to vector<8x48xbf16>
    %c45 = arith.constant 45 : index
    %c0_227 = arith.constant 0 : index
    %c0_228 = arith.constant 0 : index
    %273 = vector.load %arg5[%c45, %c0_227, %c0_228] : memref<49x48x128xbf16, #tpu.memory_space<vmem>>, vector<1x48x128xbf16>
    %274 = vector.shape_cast %273 : vector<1x48x128xbf16> to vector<48x128xbf16>
    %cst_229 = arith.constant dense<0.000000e+00> : vector<8x128xf32>
    %275 = tpu.matmul %272, %274, %cst_229 {dimension_numbers = #tpu.dot_dimension_numbers<[1], [0], [0], [1], [0, 0, 1, 1], [], []>} : vector<8x48xbf16>, vector<48x128xbf16>, vector<8x128xf32> -> vector<8x128xf32>
    %276 = arith.addf %270, %275 : vector<8x128xf32>
    %c3_230 = arith.constant 3 : index
    %c12_231 = arith.constant 12 : index
    %277 = vector.load %arg1[%c3_230, %c12_231] : memref<11x66xf32, #tpu.memory_space<vmem>>, vector<8x48xf32>
    %278 = arith.truncf %277 : vector<8x48xf32> to vector<8x48xbf16>
    %c46 = arith.constant 46 : index
    %c0_232 = arith.constant 0 : index
    %c0_233 = arith.constant 0 : index
    %279 = vector.load %arg5[%c46, %c0_232, %c0_233] : memref<49x48x128xbf16, #tpu.memory_space<vmem>>, vector<1x48x128xbf16>
    %280 = vector.shape_cast %279 : vector<1x48x128xbf16> to vector<48x128xbf16>
    %cst_234 = arith.constant dense<0.000000e+00> : vector<8x128xf32>
    %281 = tpu.matmul %278, %280, %cst_234 {dimension_numbers = #tpu.dot_dimension_numbers<[1], [0], [0], [1], [0, 0, 1, 1], [], []>} : vector<8x48xbf16>, vector<48x128xbf16>, vector<8x128xf32> -> vector<8x128xf32>
    %282 = arith.addf %276, %281 : vector<8x128xf32>
    %c3_235 = arith.constant 3 : index
    %c12_236 = arith.constant 12 : index
    %283 = vector.load %arg2[%c3_235, %c12_236] : memref<11x66xf32, #tpu.memory_space<vmem>>, vector<8x48xf32>
    %284 = arith.truncf %283 : vector<8x48xf32> to vector<8x48xbf16>
    %c47 = arith.constant 47 : index
    %c0_237 = arith.constant 0 : index
    %c0_238 = arith.constant 0 : index
    %285 = vector.load %arg5[%c47, %c0_237, %c0_238] : memref<49x48x128xbf16, #tpu.memory_space<vmem>>, vector<1x48x128xbf16>
    %286 = vector.shape_cast %285 : vector<1x48x128xbf16> to vector<48x128xbf16>
    %cst_239 = arith.constant dense<0.000000e+00> : vector<8x128xf32>
    %287 = tpu.matmul %284, %286, %cst_239 {dimension_numbers = #tpu.dot_dimension_numbers<[1], [0], [0], [1], [0, 0, 1, 1], [], []>} : vector<8x48xbf16>, vector<48x128xbf16>, vector<8x128xf32> -> vector<8x128xf32>
    %288 = arith.addf %282, %287 : vector<8x128xf32>
    %c3_240 = arith.constant 3 : index
    %c18_241 = arith.constant 18 : index
    %289 = vector.load %arg1[%c3_240, %c18_241] : memref<11x66xf32, #tpu.memory_space<vmem>>, vector<8x48xf32>
    %290 = arith.truncf %289 : vector<8x48xf32> to vector<8x48xbf16>
    %c48 = arith.constant 48 : index
    %c0_242 = arith.constant 0 : index
    %c0_243 = arith.constant 0 : index
    %291 = vector.load %arg5[%c48, %c0_242, %c0_243] : memref<49x48x128xbf16, #tpu.memory_space<vmem>>, vector<1x48x128xbf16>
    %292 = vector.shape_cast %291 : vector<1x48x128xbf16> to vector<48x128xbf16>
    %cst_244 = arith.constant dense<0.000000e+00> : vector<8x128xf32>
    %293 = tpu.matmul %290, %292, %cst_244 {dimension_numbers = #tpu.dot_dimension_numbers<[1], [0], [0], [1], [0, 0, 1, 1], [], []>} : vector<8x48xbf16>, vector<48x128xbf16>, vector<8x128xf32> -> vector<8x128xf32>
    %294 = arith.addf %288, %293 : vector<8x128xf32>
    %c0_245 = arith.constant 0 : index
    %c0_246 = arith.constant 0 : index
    %295 = vector.load %arg6[%c0_245, %c0_246] : memref<1x128xf32, #tpu.memory_space<vmem>>, vector<1x128xf32>
    %296 = vector.broadcast %295 : vector<1x128xf32> to vector<8x128xf32>
    %297 = arith.addf %294, %296 : vector<8x128xf32>
    %cst_247 = arith.constant 0.000000e+00 : f32
    %298 = vector.broadcast %cst_247 : f32 to vector<8x128xf32>
    %299 = arith.maximumf %297, %298 : vector<8x128xf32>
    %c0_248 = arith.constant 0 : index
    %c0_249 = arith.constant 0 : index
    %300 = vector.load %arg7[%c0_248, %c0_249] : memref<8x128xf32, #tpu.memory_space<vmem>>, vector<8x128xf32>
    tpu.vector_store %arg7[%c0_248, %c0_249], %299 {strides = array<i32>} : memref<8x128xf32, #tpu.memory_space<vmem>>, vector<8x128xf32>,
    return
  }
  func.func @transform_0(%arg0: i32) -> (i32, i32) {
    %c0_i32 = arith.constant 0 : i32
    %c0_i32_0 = arith.constant 0 : i32
    %c0_i32_1 = arith.constant 0 : i32
    return %c0_i32, %c0_i32_0 : i32, i32
  }
  func.func @transform_1(%arg0: i32) -> (i32, i32) {
    %c0_i32 = arith.constant 0 : i32
    %c0_i32_0 = arith.constant 0 : i32
    %c0_i32_1 = arith.constant 0 : i32
    return %c0_i32, %c0_i32_0 : i32, i32
  }
  func.func @transform_2(%arg0: i32) -> (i32, i32) {
    %c0_i32 = arith.constant 0 : i32
    %c0_i32_0 = arith.constant 0 : i32
    %c0_i32_1 = arith.constant 0 : i32
    return %c0_i32, %c0_i32_0 : i32, i32
  }
  func.func @transform_3(%arg0: i32) -> (i32, i32) {
    %c0_i32 = arith.constant 0 : i32
    %c0_i32_0 = arith.constant 0 : i32
    %c0_i32_1 = arith.constant 0 : i32
    return %c0_i32, %c0_i32_0 : i32, i32
  }
  func.func @transform_4(%arg0: i32) -> (i32, i32, i32) {
    %c0_i32 = arith.constant 0 : i32
    %c0_i32_0 = arith.constant 0 : i32
    %c0_i32_1 = arith.constant 0 : i32
    %c0_i32_2 = arith.constant 0 : i32
    return %c0_i32, %c0_i32_0, %c0_i32_1 : i32, i32, i32
  }
  func.func @transform_5(%arg0: i32) -> (i32, i32) {
    %c0_i32 = arith.constant 0 : i32
    %c0_i32_0 = arith.constant 0 : i32
    %c0_i32_1 = arith.constant 0 : i32
    return %c0_i32, %c0_i32_0 : i32, i32
  }
  func.func @transform_6(%arg0: i32) -> (i32, i32) {
    %c0_i32 = arith.constant 0 : i32
    %c0_i32_0 = arith.constant 0 : i32
    %c0_i32_1 = arith.constant 0 : i32
    return %c0_i32, %c0_i32_0 : i32, i32
  }
}

module attributes {stable_mosaic.version = 11 : i64} {
  func.func @_layer1_kernel(%arg0: i32, %arg1: memref<5x80xf32, #tpu.memory_space<vmem>>, %arg2: memref<5x80xf32, #tpu.memory_space<vmem>>, %arg3: memref<5x80xf32, #tpu.memory_space<vmem>>, %arg4: memref<5x80xf32, #tpu.memory_space<vmem>>, %arg5: memref<9x64x64xbf16, #tpu.memory_space<vmem>>, %arg6: memref<1x64xf32, #tpu.memory_space<vmem>>, %arg7: memref<9x64x64xbf16, #tpu.memory_space<vmem>>, %arg8: memref<1x64xf32, #tpu.memory_space<vmem>>, %arg9: memref<9x64x64xbf16, #tpu.memory_space<vmem>>, %arg10: memref<1x64xf32, #tpu.memory_space<vmem>>, %arg11: memref<9x64x64xbf16, #tpu.memory_space<vmem>>, %arg12: memref<1x64xf32, #tpu.memory_space<vmem>>, %arg13: memref<4x64xf32, #tpu.memory_space<vmem>>, %arg14: memref<6x96xf32, #tpu.memory_space<vmem>>) attributes {dimension_semantics = [#tpu.dimension_semantics<arbitrary>], iteration_bounds = array<i64: 1>, scalar_prefetch = 0 : i64, scratch_operands = 1 : i64, tpu.core_type = #tpu.core_type<tc>, window_params = [{pipeline_mode = #tpu.pipeline_mode<synchronous>, transform_indices = @transform_0, window_bounds = array<i64: 5, 80>}, {pipeline_mode = #tpu.pipeline_mode<synchronous>, transform_indices = @transform_1, window_bounds = array<i64: 5, 80>}, {pipeline_mode = #tpu.pipeline_mode<synchronous>, transform_indices = @transform_2, window_bounds = array<i64: 5, 80>}, {pipeline_mode = #tpu.pipeline_mode<synchronous>, transform_indices = @transform_3, window_bounds = array<i64: 5, 80>}, {pipeline_mode = #tpu.pipeline_mode<synchronous>, transform_indices = @transform_4, window_bounds = array<i64: 9, 64, 64>}, {pipeline_mode = #tpu.pipeline_mode<synchronous>, transform_indices = @transform_5, window_bounds = array<i64: 1, 64>}, {pipeline_mode = #tpu.pipeline_mode<synchronous>, transform_indices = @transform_6, window_bounds = array<i64: 9, 64, 64>}, {pipeline_mode = #tpu.pipeline_mode<synchronous>, transform_indices = @transform_7, window_bounds = array<i64: 1, 64>}, {pipeline_mode = #tpu.pipeline_mode<synchronous>, transform_indices = @transform_8, window_bounds = array<i64: 9, 64, 64>}, {pipeline_mode = #tpu.pipeline_mode<synchronous>, transform_indices = @transform_9, window_bounds = array<i64: 1, 64>}, {pipeline_mode = #tpu.pipeline_mode<synchronous>, transform_indices = @transform_10, window_bounds = array<i64: 9, 64, 64>}, {pipeline_mode = #tpu.pipeline_mode<synchronous>, transform_indices = @transform_11, window_bounds = array<i64: 1, 64>}, {pipeline_mode = #tpu.pipeline_mode<synchronous>, transform_indices = @transform_12, window_bounds = array<i64: 4, 64>}]} {
    %c0 = arith.constant 0 : index
    %c0_0 = arith.constant 0 : index
    %0 = vector.load %arg1[%c0, %c0_0] : memref<5x80xf32, #tpu.memory_space<vmem>>, vector<4x64xf32>
    %c0_1 = arith.constant 0 : index
    %c0_2 = arith.constant 0 : index
    %1 = vector.load %arg2[%c0_1, %c0_2] : memref<5x80xf32, #tpu.memory_space<vmem>>, vector<4x64xf32>
    %2 = arith.maximumf %0, %1 : vector<4x64xf32>
    %c0_3 = arith.constant 0 : index
    %c16 = arith.constant 16 : index
    %3 = vector.load %arg1[%c0_3, %c16] : memref<5x80xf32, #tpu.memory_space<vmem>>, vector<4x64xf32>
    %4 = arith.maximumf %2, %3 : vector<4x64xf32>
    %c0_4 = arith.constant 0 : index
    %c0_5 = arith.constant 0 : index
    %5 = vector.load %arg3[%c0_4, %c0_5] : memref<5x80xf32, #tpu.memory_space<vmem>>, vector<4x64xf32>
    %6 = arith.maximumf %4, %5 : vector<4x64xf32>
    %c0_6 = arith.constant 0 : index
    %c0_7 = arith.constant 0 : index
    %7 = vector.load %arg4[%c0_6, %c0_7] : memref<5x80xf32, #tpu.memory_space<vmem>>, vector<4x64xf32>
    %8 = arith.maximumf %6, %7 : vector<4x64xf32>
    %c0_8 = arith.constant 0 : index
    %c16_9 = arith.constant 16 : index
    %9 = vector.load %arg3[%c0_8, %c16_9] : memref<5x80xf32, #tpu.memory_space<vmem>>, vector<4x64xf32>
    %10 = arith.maximumf %8, %9 : vector<4x64xf32>
    %c1 = arith.constant 1 : index
    %c0_10 = arith.constant 0 : index
    %11 = vector.load %arg1[%c1, %c0_10] : memref<5x80xf32, #tpu.memory_space<vmem>>, vector<4x64xf32>
    %12 = arith.maximumf %10, %11 : vector<4x64xf32>
    %c1_11 = arith.constant 1 : index
    %c0_12 = arith.constant 0 : index
    %13 = vector.load %arg2[%c1_11, %c0_12] : memref<5x80xf32, #tpu.memory_space<vmem>>, vector<4x64xf32>
    %14 = arith.maximumf %12, %13 : vector<4x64xf32>
    %c1_13 = arith.constant 1 : index
    %c16_14 = arith.constant 16 : index
    %15 = vector.load %arg1[%c1_13, %c16_14] : memref<5x80xf32, #tpu.memory_space<vmem>>, vector<4x64xf32>
    %16 = arith.maximumf %14, %15 : vector<4x64xf32>
    %cst = arith.constant 0.000000e+00 : f32
    %17 = vector.broadcast %cst : f32 to vector<6x96xf32>
    %c0_15 = arith.constant 0 : index
    %c0_16 = arith.constant 0 : index
    %18 = vector.load %arg14[%c0_15, %c0_16] : memref<6x96xf32, #tpu.memory_space<vmem>>, vector<6x96xf32>
    tpu.vector_store %arg14[%c0_15, %c0_16], %17 {strides = array<i32>} : memref<6x96xf32, #tpu.memory_space<vmem>>, vector<6x96xf32>,
    %c1_17 = arith.constant 1 : index
    %c16_18 = arith.constant 16 : index
    %19 = vector.load %arg14[%c1_17, %c16_18] : memref<6x96xf32, #tpu.memory_space<vmem>>, vector<4x64xf32>
    tpu.vector_store %arg14[%c1_17, %c16_18], %16 {strides = array<i32>} : memref<6x96xf32, #tpu.memory_space<vmem>>, vector<4x64xf32>,
    %cst_19 = arith.constant 0.000000e+00 : f32
    %20 = vector.broadcast %cst_19 : f32 to vector<4x64xf32>
    %c0_20 = arith.constant 0 : index
    %c0_21 = arith.constant 0 : index
    %21 = vector.load %arg14[%c0_20, %c0_21] : memref<6x96xf32, #tpu.memory_space<vmem>>, vector<4x64xf32>
    %22 = arith.truncf %21 : vector<4x64xf32> to vector<4x64xbf16>
    %c0_22 = arith.constant 0 : index
    %c0_23 = arith.constant 0 : index
    %c0_24 = arith.constant 0 : index
    %23 = vector.load %arg5[%c0_22, %c0_23, %c0_24] : memref<9x64x64xbf16, #tpu.memory_space<vmem>>, vector<1x64x64xbf16>
    %24 = vector.shape_cast %23 : vector<1x64x64xbf16> to vector<64x64xbf16>
    %cst_25 = arith.constant dense<0.000000e+00> : vector<4x64xf32>
    %25 = tpu.matmul %22, %24, %cst_25 {dimension_numbers = #tpu.dot_dimension_numbers<[1], [0], [0], [1], [0, 0, 1, 1], [], []>} : vector<4x64xbf16>, vector<64x64xbf16>, vector<4x64xf32> -> vector<4x64xf32>
    %26 = arith.addf %20, %25 : vector<4x64xf32>
    %c0_26 = arith.constant 0 : index
    %c16_27 = arith.constant 16 : index
    %27 = vector.load %arg14[%c0_26, %c16_27] : memref<6x96xf32, #tpu.memory_space<vmem>>, vector<4x64xf32>
    %28 = arith.truncf %27 : vector<4x64xf32> to vector<4x64xbf16>
    %c1_28 = arith.constant 1 : index
    %c0_29 = arith.constant 0 : index
    %c0_30 = arith.constant 0 : index
    %29 = vector.load %arg5[%c1_28, %c0_29, %c0_30] : memref<9x64x64xbf16, #tpu.memory_space<vmem>>, vector<1x64x64xbf16>
    %30 = vector.shape_cast %29 : vector<1x64x64xbf16> to vector<64x64xbf16>
    %cst_31 = arith.constant dense<0.000000e+00> : vector<4x64xf32>
    %31 = tpu.matmul %28, %30, %cst_31 {dimension_numbers = #tpu.dot_dimension_numbers<[1], [0], [0], [1], [0, 0, 1, 1], [], []>} : vector<4x64xbf16>, vector<64x64xbf16>, vector<4x64xf32> -> vector<4x64xf32>
    %32 = arith.addf %26, %31 : vector<4x64xf32>
    %c0_32 = arith.constant 0 : index
    %c32 = arith.constant 32 : index
    %33 = vector.load %arg14[%c0_32, %c32] : memref<6x96xf32, #tpu.memory_space<vmem>>, vector<4x64xf32>
    %34 = arith.truncf %33 : vector<4x64xf32> to vector<4x64xbf16>
    %c2 = arith.constant 2 : index
    %c0_33 = arith.constant 0 : index
    %c0_34 = arith.constant 0 : index
    %35 = vector.load %arg5[%c2, %c0_33, %c0_34] : memref<9x64x64xbf16, #tpu.memory_space<vmem>>, vector<1x64x64xbf16>
    %36 = vector.shape_cast %35 : vector<1x64x64xbf16> to vector<64x64xbf16>
    %cst_35 = arith.constant dense<0.000000e+00> : vector<4x64xf32>
    %37 = tpu.matmul %34, %36, %cst_35 {dimension_numbers = #tpu.dot_dimension_numbers<[1], [0], [0], [1], [0, 0, 1, 1], [], []>} : vector<4x64xbf16>, vector<64x64xbf16>, vector<4x64xf32> -> vector<4x64xf32>
    %38 = arith.addf %32, %37 : vector<4x64xf32>
    %c1_36 = arith.constant 1 : index
    %c0_37 = arith.constant 0 : index
    %39 = vector.load %arg14[%c1_36, %c0_37] : memref<6x96xf32, #tpu.memory_space<vmem>>, vector<4x64xf32>
    %40 = arith.truncf %39 : vector<4x64xf32> to vector<4x64xbf16>
    %c3 = arith.constant 3 : index
    %c0_38 = arith.constant 0 : index
    %c0_39 = arith.constant 0 : index
    %41 = vector.load %arg5[%c3, %c0_38, %c0_39] : memref<9x64x64xbf16, #tpu.memory_space<vmem>>, vector<1x64x64xbf16>
    %42 = vector.shape_cast %41 : vector<1x64x64xbf16> to vector<64x64xbf16>
    %cst_40 = arith.constant dense<0.000000e+00> : vector<4x64xf32>
    %43 = tpu.matmul %40, %42, %cst_40 {dimension_numbers = #tpu.dot_dimension_numbers<[1], [0], [0], [1], [0, 0, 1, 1], [], []>} : vector<4x64xbf16>, vector<64x64xbf16>, vector<4x64xf32> -> vector<4x64xf32>
    %44 = arith.addf %38, %43 : vector<4x64xf32>
    %c1_41 = arith.constant 1 : index
    %c16_42 = arith.constant 16 : index
    %45 = vector.load %arg14[%c1_41, %c16_42] : memref<6x96xf32, #tpu.memory_space<vmem>>, vector<4x64xf32>
    %46 = arith.truncf %45 : vector<4x64xf32> to vector<4x64xbf16>
    %c4 = arith.constant 4 : index
    %c0_43 = arith.constant 0 : index
    %c0_44 = arith.constant 0 : index
    %47 = vector.load %arg5[%c4, %c0_43, %c0_44] : memref<9x64x64xbf16, #tpu.memory_space<vmem>>, vector<1x64x64xbf16>
    %48 = vector.shape_cast %47 : vector<1x64x64xbf16> to vector<64x64xbf16>
    %cst_45 = arith.constant dense<0.000000e+00> : vector<4x64xf32>
    %49 = tpu.matmul %46, %48, %cst_45 {dimension_numbers = #tpu.dot_dimension_numbers<[1], [0], [0], [1], [0, 0, 1, 1], [], []>} : vector<4x64xbf16>, vector<64x64xbf16>, vector<4x64xf32> -> vector<4x64xf32>
    %50 = arith.addf %44, %49 : vector<4x64xf32>
    %c1_46 = arith.constant 1 : index
    %c32_47 = arith.constant 32 : index
    %51 = vector.load %arg14[%c1_46, %c32_47] : memref<6x96xf32, #tpu.memory_space<vmem>>, vector<4x64xf32>
    %52 = arith.truncf %51 : vector<4x64xf32> to vector<4x64xbf16>
    %c5 = arith.constant 5 : index
    %c0_48 = arith.constant 0 : index
    %c0_49 = arith.constant 0 : index
    %53 = vector.load %arg5[%c5, %c0_48, %c0_49] : memref<9x64x64xbf16, #tpu.memory_space<vmem>>, vector<1x64x64xbf16>
    %54 = vector.shape_cast %53 : vector<1x64x64xbf16> to vector<64x64xbf16>
    %cst_50 = arith.constant dense<0.000000e+00> : vector<4x64xf32>
    %55 = tpu.matmul %52, %54, %cst_50 {dimension_numbers = #tpu.dot_dimension_numbers<[1], [0], [0], [1], [0, 0, 1, 1], [], []>} : vector<4x64xbf16>, vector<64x64xbf16>, vector<4x64xf32> -> vector<4x64xf32>
    %56 = arith.addf %50, %55 : vector<4x64xf32>
    %c2_51 = arith.constant 2 : index
    %c0_52 = arith.constant 0 : index
    %57 = vector.load %arg14[%c2_51, %c0_52] : memref<6x96xf32, #tpu.memory_space<vmem>>, vector<4x64xf32>
    %58 = arith.truncf %57 : vector<4x64xf32> to vector<4x64xbf16>
    %c6 = arith.constant 6 : index
    %c0_53 = arith.constant 0 : index
    %c0_54 = arith.constant 0 : index
    %59 = vector.load %arg5[%c6, %c0_53, %c0_54] : memref<9x64x64xbf16, #tpu.memory_space<vmem>>, vector<1x64x64xbf16>
    %60 = vector.shape_cast %59 : vector<1x64x64xbf16> to vector<64x64xbf16>
    %cst_55 = arith.constant dense<0.000000e+00> : vector<4x64xf32>
    %61 = tpu.matmul %58, %60, %cst_55 {dimension_numbers = #tpu.dot_dimension_numbers<[1], [0], [0], [1], [0, 0, 1, 1], [], []>} : vector<4x64xbf16>, vector<64x64xbf16>, vector<4x64xf32> -> vector<4x64xf32>
    %62 = arith.addf %56, %61 : vector<4x64xf32>
    %c2_56 = arith.constant 2 : index
    %c16_57 = arith.constant 16 : index
    %63 = vector.load %arg14[%c2_56, %c16_57] : memref<6x96xf32, #tpu.memory_space<vmem>>, vector<4x64xf32>
    %64 = arith.truncf %63 : vector<4x64xf32> to vector<4x64xbf16>
    %c7 = arith.constant 7 : index
    %c0_58 = arith.constant 0 : index
    %c0_59 = arith.constant 0 : index
    %65 = vector.load %arg5[%c7, %c0_58, %c0_59] : memref<9x64x64xbf16, #tpu.memory_space<vmem>>, vector<1x64x64xbf16>
    %66 = vector.shape_cast %65 : vector<1x64x64xbf16> to vector<64x64xbf16>
    %cst_60 = arith.constant dense<0.000000e+00> : vector<4x64xf32>
    %67 = tpu.matmul %64, %66, %cst_60 {dimension_numbers = #tpu.dot_dimension_numbers<[1], [0], [0], [1], [0, 0, 1, 1], [], []>} : vector<4x64xbf16>, vector<64x64xbf16>, vector<4x64xf32> -> vector<4x64xf32>
    %68 = arith.addf %62, %67 : vector<4x64xf32>
    %c2_61 = arith.constant 2 : index
    %c32_62 = arith.constant 32 : index
    %69 = vector.load %arg14[%c2_61, %c32_62] : memref<6x96xf32, #tpu.memory_space<vmem>>, vector<4x64xf32>
    %70 = arith.truncf %69 : vector<4x64xf32> to vector<4x64xbf16>
    %c8 = arith.constant 8 : index
    %c0_63 = arith.constant 0 : index
    %c0_64 = arith.constant 0 : index
    %71 = vector.load %arg5[%c8, %c0_63, %c0_64] : memref<9x64x64xbf16, #tpu.memory_space<vmem>>, vector<1x64x64xbf16>
    %72 = vector.shape_cast %71 : vector<1x64x64xbf16> to vector<64x64xbf16>
    %cst_65 = arith.constant dense<0.000000e+00> : vector<4x64xf32>
    %73 = tpu.matmul %70, %72, %cst_65 {dimension_numbers = #tpu.dot_dimension_numbers<[1], [0], [0], [1], [0, 0, 1, 1], [], []>} : vector<4x64xbf16>, vector<64x64xbf16>, vector<4x64xf32> -> vector<4x64xf32>
    %74 = arith.addf %68, %73 : vector<4x64xf32>
    %c0_66 = arith.constant 0 : index
    %c0_67 = arith.constant 0 : index
    %75 = vector.load %arg6[%c0_66, %c0_67] : memref<1x64xf32, #tpu.memory_space<vmem>>, vector<1x64xf32>
    %76 = vector.broadcast %75 : vector<1x64xf32> to vector<4x64xf32>
    %77 = arith.addf %74, %76 : vector<4x64xf32>
    %cst_68 = arith.constant 0.000000e+00 : f32
    %78 = vector.broadcast %cst_68 : f32 to vector<4x64xf32>
    %79 = arith.maximumf %77, %78 : vector<4x64xf32>
    %cst_69 = arith.constant 0.000000e+00 : f32
    %80 = vector.broadcast %cst_69 : f32 to vector<6x96xf32>
    %c0_70 = arith.constant 0 : index
    %c0_71 = arith.constant 0 : index
    %81 = vector.load %arg14[%c0_70, %c0_71] : memref<6x96xf32, #tpu.memory_space<vmem>>, vector<6x96xf32>
    tpu.vector_store %arg14[%c0_70, %c0_71], %80 {strides = array<i32>} : memref<6x96xf32, #tpu.memory_space<vmem>>, vector<6x96xf32>,
    %c1_72 = arith.constant 1 : index
    %c16_73 = arith.constant 16 : index
    %82 = vector.load %arg14[%c1_72, %c16_73] : memref<6x96xf32, #tpu.memory_space<vmem>>, vector<4x64xf32>
    tpu.vector_store %arg14[%c1_72, %c16_73], %79 {strides = array<i32>} : memref<6x96xf32, #tpu.memory_space<vmem>>, vector<4x64xf32>,
    %cst_74 = arith.constant 0.000000e+00 : f32
    %83 = vector.broadcast %cst_74 : f32 to vector<4x64xf32>
    %c0_75 = arith.constant 0 : index
    %c0_76 = arith.constant 0 : index
    %84 = vector.load %arg14[%c0_75, %c0_76] : memref<6x96xf32, #tpu.memory_space<vmem>>, vector<4x64xf32>
    %85 = arith.truncf %84 : vector<4x64xf32> to vector<4x64xbf16>
    %c0_77 = arith.constant 0 : index
    %c0_78 = arith.constant 0 : index
    %c0_79 = arith.constant 0 : index
    %86 = vector.load %arg7[%c0_77, %c0_78, %c0_79] : memref<9x64x64xbf16, #tpu.memory_space<vmem>>, vector<1x64x64xbf16>
    %87 = vector.shape_cast %86 : vector<1x64x64xbf16> to vector<64x64xbf16>
    %cst_80 = arith.constant dense<0.000000e+00> : vector<4x64xf32>
    %88 = tpu.matmul %85, %87, %cst_80 {dimension_numbers = #tpu.dot_dimension_numbers<[1], [0], [0], [1], [0, 0, 1, 1], [], []>} : vector<4x64xbf16>, vector<64x64xbf16>, vector<4x64xf32> -> vector<4x64xf32>
    %89 = arith.addf %83, %88 : vector<4x64xf32>
    %c0_81 = arith.constant 0 : index
    %c16_82 = arith.constant 16 : index
    %90 = vector.load %arg14[%c0_81, %c16_82] : memref<6x96xf32, #tpu.memory_space<vmem>>, vector<4x64xf32>
    %91 = arith.truncf %90 : vector<4x64xf32> to vector<4x64xbf16>
    %c1_83 = arith.constant 1 : index
    %c0_84 = arith.constant 0 : index
    %c0_85 = arith.constant 0 : index
    %92 = vector.load %arg7[%c1_83, %c0_84, %c0_85] : memref<9x64x64xbf16, #tpu.memory_space<vmem>>, vector<1x64x64xbf16>
    %93 = vector.shape_cast %92 : vector<1x64x64xbf16> to vector<64x64xbf16>
    %cst_86 = arith.constant dense<0.000000e+00> : vector<4x64xf32>
    %94 = tpu.matmul %91, %93, %cst_86 {dimension_numbers = #tpu.dot_dimension_numbers<[1], [0], [0], [1], [0, 0, 1, 1], [], []>} : vector<4x64xbf16>, vector<64x64xbf16>, vector<4x64xf32> -> vector<4x64xf32>
    %95 = arith.addf %89, %94 : vector<4x64xf32>
    %c0_87 = arith.constant 0 : index
    %c32_88 = arith.constant 32 : index
    %96 = vector.load %arg14[%c0_87, %c32_88] : memref<6x96xf32, #tpu.memory_space<vmem>>, vector<4x64xf32>
    %97 = arith.truncf %96 : vector<4x64xf32> to vector<4x64xbf16>
    %c2_89 = arith.constant 2 : index
    %c0_90 = arith.constant 0 : index
    %c0_91 = arith.constant 0 : index
    %98 = vector.load %arg7[%c2_89, %c0_90, %c0_91] : memref<9x64x64xbf16, #tpu.memory_space<vmem>>, vector<1x64x64xbf16>
    %99 = vector.shape_cast %98 : vector<1x64x64xbf16> to vector<64x64xbf16>
    %cst_92 = arith.constant dense<0.000000e+00> : vector<4x64xf32>
    %100 = tpu.matmul %97, %99, %cst_92 {dimension_numbers = #tpu.dot_dimension_numbers<[1], [0], [0], [1], [0, 0, 1, 1], [], []>} : vector<4x64xbf16>, vector<64x64xbf16>, vector<4x64xf32> -> vector<4x64xf32>
    %101 = arith.addf %95, %100 : vector<4x64xf32>
    %c1_93 = arith.constant 1 : index
    %c0_94 = arith.constant 0 : index
    %102 = vector.load %arg14[%c1_93, %c0_94] : memref<6x96xf32, #tpu.memory_space<vmem>>, vector<4x64xf32>
    %103 = arith.truncf %102 : vector<4x64xf32> to vector<4x64xbf16>
    %c3_95 = arith.constant 3 : index
    %c0_96 = arith.constant 0 : index
    %c0_97 = arith.constant 0 : index
    %104 = vector.load %arg7[%c3_95, %c0_96, %c0_97] : memref<9x64x64xbf16, #tpu.memory_space<vmem>>, vector<1x64x64xbf16>
    %105 = vector.shape_cast %104 : vector<1x64x64xbf16> to vector<64x64xbf16>
    %cst_98 = arith.constant dense<0.000000e+00> : vector<4x64xf32>
    %106 = tpu.matmul %103, %105, %cst_98 {dimension_numbers = #tpu.dot_dimension_numbers<[1], [0], [0], [1], [0, 0, 1, 1], [], []>} : vector<4x64xbf16>, vector<64x64xbf16>, vector<4x64xf32> -> vector<4x64xf32>
    %107 = arith.addf %101, %106 : vector<4x64xf32>
    %c1_99 = arith.constant 1 : index
    %c16_100 = arith.constant 16 : index
    %108 = vector.load %arg14[%c1_99, %c16_100] : memref<6x96xf32, #tpu.memory_space<vmem>>, vector<4x64xf32>
    %109 = arith.truncf %108 : vector<4x64xf32> to vector<4x64xbf16>
    %c4_101 = arith.constant 4 : index
    %c0_102 = arith.constant 0 : index
    %c0_103 = arith.constant 0 : index
    %110 = vector.load %arg7[%c4_101, %c0_102, %c0_103] : memref<9x64x64xbf16, #tpu.memory_space<vmem>>, vector<1x64x64xbf16>
    %111 = vector.shape_cast %110 : vector<1x64x64xbf16> to vector<64x64xbf16>
    %cst_104 = arith.constant dense<0.000000e+00> : vector<4x64xf32>
    %112 = tpu.matmul %109, %111, %cst_104 {dimension_numbers = #tpu.dot_dimension_numbers<[1], [0], [0], [1], [0, 0, 1, 1], [], []>} : vector<4x64xbf16>, vector<64x64xbf16>, vector<4x64xf32> -> vector<4x64xf32>
    %113 = arith.addf %107, %112 : vector<4x64xf32>
    %c1_105 = arith.constant 1 : index
    %c32_106 = arith.constant 32 : index
    %114 = vector.load %arg14[%c1_105, %c32_106] : memref<6x96xf32, #tpu.memory_space<vmem>>, vector<4x64xf32>
    %115 = arith.truncf %114 : vector<4x64xf32> to vector<4x64xbf16>
    %c5_107 = arith.constant 5 : index
    %c0_108 = arith.constant 0 : index
    %c0_109 = arith.constant 0 : index
    %116 = vector.load %arg7[%c5_107, %c0_108, %c0_109] : memref<9x64x64xbf16, #tpu.memory_space<vmem>>, vector<1x64x64xbf16>
    %117 = vector.shape_cast %116 : vector<1x64x64xbf16> to vector<64x64xbf16>
    %cst_110 = arith.constant dense<0.000000e+00> : vector<4x64xf32>
    %118 = tpu.matmul %115, %117, %cst_110 {dimension_numbers = #tpu.dot_dimension_numbers<[1], [0], [0], [1], [0, 0, 1, 1], [], []>} : vector<4x64xbf16>, vector<64x64xbf16>, vector<4x64xf32> -> vector<4x64xf32>
    %119 = arith.addf %113, %118 : vector<4x64xf32>
    %c2_111 = arith.constant 2 : index
    %c0_112 = arith.constant 0 : index
    %120 = vector.load %arg14[%c2_111, %c0_112] : memref<6x96xf32, #tpu.memory_space<vmem>>, vector<4x64xf32>
    %121 = arith.truncf %120 : vector<4x64xf32> to vector<4x64xbf16>
    %c6_113 = arith.constant 6 : index
    %c0_114 = arith.constant 0 : index
    %c0_115 = arith.constant 0 : index
    %122 = vector.load %arg7[%c6_113, %c0_114, %c0_115] : memref<9x64x64xbf16, #tpu.memory_space<vmem>>, vector<1x64x64xbf16>
    %123 = vector.shape_cast %122 : vector<1x64x64xbf16> to vector<64x64xbf16>
    %cst_116 = arith.constant dense<0.000000e+00> : vector<4x64xf32>
    %124 = tpu.matmul %121, %123, %cst_116 {dimension_numbers = #tpu.dot_dimension_numbers<[1], [0], [0], [1], [0, 0, 1, 1], [], []>} : vector<4x64xbf16>, vector<64x64xbf16>, vector<4x64xf32> -> vector<4x64xf32>
    %125 = arith.addf %119, %124 : vector<4x64xf32>
    %c2_117 = arith.constant 2 : index
    %c16_118 = arith.constant 16 : index
    %126 = vector.load %arg14[%c2_117, %c16_118] : memref<6x96xf32, #tpu.memory_space<vmem>>, vector<4x64xf32>
    %127 = arith.truncf %126 : vector<4x64xf32> to vector<4x64xbf16>
    %c7_119 = arith.constant 7 : index
    %c0_120 = arith.constant 0 : index
    %c0_121 = arith.constant 0 : index
    %128 = vector.load %arg7[%c7_119, %c0_120, %c0_121] : memref<9x64x64xbf16, #tpu.memory_space<vmem>>, vector<1x64x64xbf16>
    %129 = vector.shape_cast %128 : vector<1x64x64xbf16> to vector<64x64xbf16>
    %cst_122 = arith.constant dense<0.000000e+00> : vector<4x64xf32>
    %130 = tpu.matmul %127, %129, %cst_122 {dimension_numbers = #tpu.dot_dimension_numbers<[1], [0], [0], [1], [0, 0, 1, 1], [], []>} : vector<4x64xbf16>, vector<64x64xbf16>, vector<4x64xf32> -> vector<4x64xf32>
    %131 = arith.addf %125, %130 : vector<4x64xf32>
    %c2_123 = arith.constant 2 : index
    %c32_124 = arith.constant 32 : index
    %132 = vector.load %arg14[%c2_123, %c32_124] : memref<6x96xf32, #tpu.memory_space<vmem>>, vector<4x64xf32>
    %133 = arith.truncf %132 : vector<4x64xf32> to vector<4x64xbf16>
    %c8_125 = arith.constant 8 : index
    %c0_126 = arith.constant 0 : index
    %c0_127 = arith.constant 0 : index
    %134 = vector.load %arg7[%c8_125, %c0_126, %c0_127] : memref<9x64x64xbf16, #tpu.memory_space<vmem>>, vector<1x64x64xbf16>
    %135 = vector.shape_cast %134 : vector<1x64x64xbf16> to vector<64x64xbf16>
    %cst_128 = arith.constant dense<0.000000e+00> : vector<4x64xf32>
    %136 = tpu.matmul %133, %135, %cst_128 {dimension_numbers = #tpu.dot_dimension_numbers<[1], [0], [0], [1], [0, 0, 1, 1], [], []>} : vector<4x64xbf16>, vector<64x64xbf16>, vector<4x64xf32> -> vector<4x64xf32>
    %137 = arith.addf %131, %136 : vector<4x64xf32>
    %c0_129 = arith.constant 0 : index
    %c0_130 = arith.constant 0 : index
    %138 = vector.load %arg8[%c0_129, %c0_130] : memref<1x64xf32, #tpu.memory_space<vmem>>, vector<1x64xf32>
    %139 = vector.broadcast %138 : vector<1x64xf32> to vector<4x64xf32>
    %140 = arith.addf %137, %139 : vector<4x64xf32>
    %141 = arith.addf %140, %16 : vector<4x64xf32>
    %cst_131 = arith.constant 0.000000e+00 : f32
    %142 = vector.broadcast %cst_131 : f32 to vector<4x64xf32>
    %143 = arith.maximumf %141, %142 : vector<4x64xf32>
    %cst_132 = arith.constant 0.000000e+00 : f32
    %144 = vector.broadcast %cst_132 : f32 to vector<6x96xf32>
    %c0_133 = arith.constant 0 : index
    %c0_134 = arith.constant 0 : index
    %145 = vector.load %arg14[%c0_133, %c0_134] : memref<6x96xf32, #tpu.memory_space<vmem>>, vector<6x96xf32>
    tpu.vector_store %arg14[%c0_133, %c0_134], %144 {strides = array<i32>} : memref<6x96xf32, #tpu.memory_space<vmem>>, vector<6x96xf32>,
    %c1_135 = arith.constant 1 : index
    %c16_136 = arith.constant 16 : index
    %146 = vector.load %arg14[%c1_135, %c16_136] : memref<6x96xf32, #tpu.memory_space<vmem>>, vector<4x64xf32>
    tpu.vector_store %arg14[%c1_135, %c16_136], %143 {strides = array<i32>} : memref<6x96xf32, #tpu.memory_space<vmem>>, vector<4x64xf32>,
    %cst_137 = arith.constant 0.000000e+00 : f32
    %147 = vector.broadcast %cst_137 : f32 to vector<4x64xf32>
    %c0_138 = arith.constant 0 : index
    %c0_139 = arith.constant 0 : index
    %148 = vector.load %arg14[%c0_138, %c0_139] : memref<6x96xf32, #tpu.memory_space<vmem>>, vector<4x64xf32>
    %149 = arith.truncf %148 : vector<4x64xf32> to vector<4x64xbf16>
    %c0_140 = arith.constant 0 : index
    %c0_141 = arith.constant 0 : index
    %c0_142 = arith.constant 0 : index
    %150 = vector.load %arg9[%c0_140, %c0_141, %c0_142] : memref<9x64x64xbf16, #tpu.memory_space<vmem>>, vector<1x64x64xbf16>
    %151 = vector.shape_cast %150 : vector<1x64x64xbf16> to vector<64x64xbf16>
    %cst_143 = arith.constant dense<0.000000e+00> : vector<4x64xf32>
    %152 = tpu.matmul %149, %151, %cst_143 {dimension_numbers = #tpu.dot_dimension_numbers<[1], [0], [0], [1], [0, 0, 1, 1], [], []>} : vector<4x64xbf16>, vector<64x64xbf16>, vector<4x64xf32> -> vector<4x64xf32>
    %153 = arith.addf %147, %152 : vector<4x64xf32>
    %c0_144 = arith.constant 0 : index
    %c16_145 = arith.constant 16 : index
    %154 = vector.load %arg14[%c0_144, %c16_145] : memref<6x96xf32, #tpu.memory_space<vmem>>, vector<4x64xf32>
    %155 = arith.truncf %154 : vector<4x64xf32> to vector<4x64xbf16>
    %c1_146 = arith.constant 1 : index
    %c0_147 = arith.constant 0 : index
    %c0_148 = arith.constant 0 : index
    %156 = vector.load %arg9[%c1_146, %c0_147, %c0_148] : memref<9x64x64xbf16, #tpu.memory_space<vmem>>, vector<1x64x64xbf16>
    %157 = vector.shape_cast %156 : vector<1x64x64xbf16> to vector<64x64xbf16>
    %cst_149 = arith.constant dense<0.000000e+00> : vector<4x64xf32>
    %158 = tpu.matmul %155, %157, %cst_149 {dimension_numbers = #tpu.dot_dimension_numbers<[1], [0], [0], [1], [0, 0, 1, 1], [], []>} : vector<4x64xbf16>, vector<64x64xbf16>, vector<4x64xf32> -> vector<4x64xf32>
    %159 = arith.addf %153, %158 : vector<4x64xf32>
    %c0_150 = arith.constant 0 : index
    %c32_151 = arith.constant 32 : index
    %160 = vector.load %arg14[%c0_150, %c32_151] : memref<6x96xf32, #tpu.memory_space<vmem>>, vector<4x64xf32>
    %161 = arith.truncf %160 : vector<4x64xf32> to vector<4x64xbf16>
    %c2_152 = arith.constant 2 : index
    %c0_153 = arith.constant 0 : index
    %c0_154 = arith.constant 0 : index
    %162 = vector.load %arg9[%c2_152, %c0_153, %c0_154] : memref<9x64x64xbf16, #tpu.memory_space<vmem>>, vector<1x64x64xbf16>
    %163 = vector.shape_cast %162 : vector<1x64x64xbf16> to vector<64x64xbf16>
    %cst_155 = arith.constant dense<0.000000e+00> : vector<4x64xf32>
    %164 = tpu.matmul %161, %163, %cst_155 {dimension_numbers = #tpu.dot_dimension_numbers<[1], [0], [0], [1], [0, 0, 1, 1], [], []>} : vector<4x64xbf16>, vector<64x64xbf16>, vector<4x64xf32> -> vector<4x64xf32>
    %165 = arith.addf %159, %164 : vector<4x64xf32>
    %c1_156 = arith.constant 1 : index
    %c0_157 = arith.constant 0 : index
    %166 = vector.load %arg14[%c1_156, %c0_157] : memref<6x96xf32, #tpu.memory_space<vmem>>, vector<4x64xf32>
    %167 = arith.truncf %166 : vector<4x64xf32> to vector<4x64xbf16>
    %c3_158 = arith.constant 3 : index
    %c0_159 = arith.constant 0 : index
    %c0_160 = arith.constant 0 : index
    %168 = vector.load %arg9[%c3_158, %c0_159, %c0_160] : memref<9x64x64xbf16, #tpu.memory_space<vmem>>, vector<1x64x64xbf16>
    %169 = vector.shape_cast %168 : vector<1x64x64xbf16> to vector<64x64xbf16>
    %cst_161 = arith.constant dense<0.000000e+00> : vector<4x64xf32>
    %170 = tpu.matmul %167, %169, %cst_161 {dimension_numbers = #tpu.dot_dimension_numbers<[1], [0], [0], [1], [0, 0, 1, 1], [], []>} : vector<4x64xbf16>, vector<64x64xbf16>, vector<4x64xf32> -> vector<4x64xf32>
    %171 = arith.addf %165, %170 : vector<4x64xf32>
    %c1_162 = arith.constant 1 : index
    %c16_163 = arith.constant 16 : index
    %172 = vector.load %arg14[%c1_162, %c16_163] : memref<6x96xf32, #tpu.memory_space<vmem>>, vector<4x64xf32>
    %173 = arith.truncf %172 : vector<4x64xf32> to vector<4x64xbf16>
    %c4_164 = arith.constant 4 : index
    %c0_165 = arith.constant 0 : index
    %c0_166 = arith.constant 0 : index
    %174 = vector.load %arg9[%c4_164, %c0_165, %c0_166] : memref<9x64x64xbf16, #tpu.memory_space<vmem>>, vector<1x64x64xbf16>
    %175 = vector.shape_cast %174 : vector<1x64x64xbf16> to vector<64x64xbf16>
    %cst_167 = arith.constant dense<0.000000e+00> : vector<4x64xf32>
    %176 = tpu.matmul %173, %175, %cst_167 {dimension_numbers = #tpu.dot_dimension_numbers<[1], [0], [0], [1], [0, 0, 1, 1], [], []>} : vector<4x64xbf16>, vector<64x64xbf16>, vector<4x64xf32> -> vector<4x64xf32>
    %177 = arith.addf %171, %176 : vector<4x64xf32>
    %c1_168 = arith.constant 1 : index
    %c32_169 = arith.constant 32 : index
    %178 = vector.load %arg14[%c1_168, %c32_169] : memref<6x96xf32, #tpu.memory_space<vmem>>, vector<4x64xf32>
    %179 = arith.truncf %178 : vector<4x64xf32> to vector<4x64xbf16>
    %c5_170 = arith.constant 5 : index
    %c0_171 = arith.constant 0 : index
    %c0_172 = arith.constant 0 : index
    %180 = vector.load %arg9[%c5_170, %c0_171, %c0_172] : memref<9x64x64xbf16, #tpu.memory_space<vmem>>, vector<1x64x64xbf16>
    %181 = vector.shape_cast %180 : vector<1x64x64xbf16> to vector<64x64xbf16>
    %cst_173 = arith.constant dense<0.000000e+00> : vector<4x64xf32>
    %182 = tpu.matmul %179, %181, %cst_173 {dimension_numbers = #tpu.dot_dimension_numbers<[1], [0], [0], [1], [0, 0, 1, 1], [], []>} : vector<4x64xbf16>, vector<64x64xbf16>, vector<4x64xf32> -> vector<4x64xf32>
    %183 = arith.addf %177, %182 : vector<4x64xf32>
    %c2_174 = arith.constant 2 : index
    %c0_175 = arith.constant 0 : index
    %184 = vector.load %arg14[%c2_174, %c0_175] : memref<6x96xf32, #tpu.memory_space<vmem>>, vector<4x64xf32>
    %185 = arith.truncf %184 : vector<4x64xf32> to vector<4x64xbf16>
    %c6_176 = arith.constant 6 : index
    %c0_177 = arith.constant 0 : index
    %c0_178 = arith.constant 0 : index
    %186 = vector.load %arg9[%c6_176, %c0_177, %c0_178] : memref<9x64x64xbf16, #tpu.memory_space<vmem>>, vector<1x64x64xbf16>
    %187 = vector.shape_cast %186 : vector<1x64x64xbf16> to vector<64x64xbf16>
    %cst_179 = arith.constant dense<0.000000e+00> : vector<4x64xf32>
    %188 = tpu.matmul %185, %187, %cst_179 {dimension_numbers = #tpu.dot_dimension_numbers<[1], [0], [0], [1], [0, 0, 1, 1], [], []>} : vector<4x64xbf16>, vector<64x64xbf16>, vector<4x64xf32> -> vector<4x64xf32>
    %189 = arith.addf %183, %188 : vector<4x64xf32>
    %c2_180 = arith.constant 2 : index
    %c16_181 = arith.constant 16 : index
    %190 = vector.load %arg14[%c2_180, %c16_181] : memref<6x96xf32, #tpu.memory_space<vmem>>, vector<4x64xf32>
    %191 = arith.truncf %190 : vector<4x64xf32> to vector<4x64xbf16>
    %c7_182 = arith.constant 7 : index
    %c0_183 = arith.constant 0 : index
    %c0_184 = arith.constant 0 : index
    %192 = vector.load %arg9[%c7_182, %c0_183, %c0_184] : memref<9x64x64xbf16, #tpu.memory_space<vmem>>, vector<1x64x64xbf16>
    %193 = vector.shape_cast %192 : vector<1x64x64xbf16> to vector<64x64xbf16>
    %cst_185 = arith.constant dense<0.000000e+00> : vector<4x64xf32>
    %194 = tpu.matmul %191, %193, %cst_185 {dimension_numbers = #tpu.dot_dimension_numbers<[1], [0], [0], [1], [0, 0, 1, 1], [], []>} : vector<4x64xbf16>, vector<64x64xbf16>, vector<4x64xf32> -> vector<4x64xf32>
    %195 = arith.addf %189, %194 : vector<4x64xf32>
    %c2_186 = arith.constant 2 : index
    %c32_187 = arith.constant 32 : index
    %196 = vector.load %arg14[%c2_186, %c32_187] : memref<6x96xf32, #tpu.memory_space<vmem>>, vector<4x64xf32>
    %197 = arith.truncf %196 : vector<4x64xf32> to vector<4x64xbf16>
    %c8_188 = arith.constant 8 : index
    %c0_189 = arith.constant 0 : index
    %c0_190 = arith.constant 0 : index
    %198 = vector.load %arg9[%c8_188, %c0_189, %c0_190] : memref<9x64x64xbf16, #tpu.memory_space<vmem>>, vector<1x64x64xbf16>
    %199 = vector.shape_cast %198 : vector<1x64x64xbf16> to vector<64x64xbf16>
    %cst_191 = arith.constant dense<0.000000e+00> : vector<4x64xf32>
    %200 = tpu.matmul %197, %199, %cst_191 {dimension_numbers = #tpu.dot_dimension_numbers<[1], [0], [0], [1], [0, 0, 1, 1], [], []>} : vector<4x64xbf16>, vector<64x64xbf16>, vector<4x64xf32> -> vector<4x64xf32>
    %201 = arith.addf %195, %200 : vector<4x64xf32>
    %c0_192 = arith.constant 0 : index
    %c0_193 = arith.constant 0 : index
    %202 = vector.load %arg10[%c0_192, %c0_193] : memref<1x64xf32, #tpu.memory_space<vmem>>, vector<1x64xf32>
    %203 = vector.broadcast %202 : vector<1x64xf32> to vector<4x64xf32>
    %204 = arith.addf %201, %203 : vector<4x64xf32>
    %cst_194 = arith.constant 0.000000e+00 : f32
    %205 = vector.broadcast %cst_194 : f32 to vector<4x64xf32>
    %206 = arith.maximumf %204, %205 : vector<4x64xf32>
    %cst_195 = arith.constant 0.000000e+00 : f32
    %207 = vector.broadcast %cst_195 : f32 to vector<6x96xf32>
    %c0_196 = arith.constant 0 : index
    %c0_197 = arith.constant 0 : index
    %208 = vector.load %arg14[%c0_196, %c0_197] : memref<6x96xf32, #tpu.memory_space<vmem>>, vector<6x96xf32>
    tpu.vector_store %arg14[%c0_196, %c0_197], %207 {strides = array<i32>} : memref<6x96xf32, #tpu.memory_space<vmem>>, vector<6x96xf32>,
    %c1_198 = arith.constant 1 : index
    %c16_199 = arith.constant 16 : index
    %209 = vector.load %arg14[%c1_198, %c16_199] : memref<6x96xf32, #tpu.memory_space<vmem>>, vector<4x64xf32>
    tpu.vector_store %arg14[%c1_198, %c16_199], %206 {strides = array<i32>} : memref<6x96xf32, #tpu.memory_space<vmem>>, vector<4x64xf32>,
    %cst_200 = arith.constant 0.000000e+00 : f32
    %210 = vector.broadcast %cst_200 : f32 to vector<4x64xf32>
    %c0_201 = arith.constant 0 : index
    %c0_202 = arith.constant 0 : index
    %211 = vector.load %arg14[%c0_201, %c0_202] : memref<6x96xf32, #tpu.memory_space<vmem>>, vector<4x64xf32>
    %212 = arith.truncf %211 : vector<4x64xf32> to vector<4x64xbf16>
    %c0_203 = arith.constant 0 : index
    %c0_204 = arith.constant 0 : index
    %c0_205 = arith.constant 0 : index
    %213 = vector.load %arg11[%c0_203, %c0_204, %c0_205] : memref<9x64x64xbf16, #tpu.memory_space<vmem>>, vector<1x64x64xbf16>
    %214 = vector.shape_cast %213 : vector<1x64x64xbf16> to vector<64x64xbf16>
    %cst_206 = arith.constant dense<0.000000e+00> : vector<4x64xf32>
    %215 = tpu.matmul %212, %214, %cst_206 {dimension_numbers = #tpu.dot_dimension_numbers<[1], [0], [0], [1], [0, 0, 1, 1], [], []>} : vector<4x64xbf16>, vector<64x64xbf16>, vector<4x64xf32> -> vector<4x64xf32>
    %216 = arith.addf %210, %215 : vector<4x64xf32>
    %c0_207 = arith.constant 0 : index
    %c16_208 = arith.constant 16 : index
    %217 = vector.load %arg14[%c0_207, %c16_208] : memref<6x96xf32, #tpu.memory_space<vmem>>, vector<4x64xf32>
    %218 = arith.truncf %217 : vector<4x64xf32> to vector<4x64xbf16>
    %c1_209 = arith.constant 1 : index
    %c0_210 = arith.constant 0 : index
    %c0_211 = arith.constant 0 : index
    %219 = vector.load %arg11[%c1_209, %c0_210, %c0_211] : memref<9x64x64xbf16, #tpu.memory_space<vmem>>, vector<1x64x64xbf16>
    %220 = vector.shape_cast %219 : vector<1x64x64xbf16> to vector<64x64xbf16>
    %cst_212 = arith.constant dense<0.000000e+00> : vector<4x64xf32>
    %221 = tpu.matmul %218, %220, %cst_212 {dimension_numbers = #tpu.dot_dimension_numbers<[1], [0], [0], [1], [0, 0, 1, 1], [], []>} : vector<4x64xbf16>, vector<64x64xbf16>, vector<4x64xf32> -> vector<4x64xf32>
    %222 = arith.addf %216, %221 : vector<4x64xf32>
    %c0_213 = arith.constant 0 : index
    %c32_214 = arith.constant 32 : index
    %223 = vector.load %arg14[%c0_213, %c32_214] : memref<6x96xf32, #tpu.memory_space<vmem>>, vector<4x64xf32>
    %224 = arith.truncf %223 : vector<4x64xf32> to vector<4x64xbf16>
    %c2_215 = arith.constant 2 : index
    %c0_216 = arith.constant 0 : index
    %c0_217 = arith.constant 0 : index
    %225 = vector.load %arg11[%c2_215, %c0_216, %c0_217] : memref<9x64x64xbf16, #tpu.memory_space<vmem>>, vector<1x64x64xbf16>
    %226 = vector.shape_cast %225 : vector<1x64x64xbf16> to vector<64x64xbf16>
    %cst_218 = arith.constant dense<0.000000e+00> : vector<4x64xf32>
    %227 = tpu.matmul %224, %226, %cst_218 {dimension_numbers = #tpu.dot_dimension_numbers<[1], [0], [0], [1], [0, 0, 1, 1], [], []>} : vector<4x64xbf16>, vector<64x64xbf16>, vector<4x64xf32> -> vector<4x64xf32>
    %228 = arith.addf %222, %227 : vector<4x64xf32>
    %c1_219 = arith.constant 1 : index
    %c0_220 = arith.constant 0 : index
    %229 = vector.load %arg14[%c1_219, %c0_220] : memref<6x96xf32, #tpu.memory_space<vmem>>, vector<4x64xf32>
    %230 = arith.truncf %229 : vector<4x64xf32> to vector<4x64xbf16>
    %c3_221 = arith.constant 3 : index
    %c0_222 = arith.constant 0 : index
    %c0_223 = arith.constant 0 : index
    %231 = vector.load %arg11[%c3_221, %c0_222, %c0_223] : memref<9x64x64xbf16, #tpu.memory_space<vmem>>, vector<1x64x64xbf16>
    %232 = vector.shape_cast %231 : vector<1x64x64xbf16> to vector<64x64xbf16>
    %cst_224 = arith.constant dense<0.000000e+00> : vector<4x64xf32>
    %233 = tpu.matmul %230, %232, %cst_224 {dimension_numbers = #tpu.dot_dimension_numbers<[1], [0], [0], [1], [0, 0, 1, 1], [], []>} : vector<4x64xbf16>, vector<64x64xbf16>, vector<4x64xf32> -> vector<4x64xf32>
    %234 = arith.addf %228, %233 : vector<4x64xf32>
    %c1_225 = arith.constant 1 : index
    %c16_226 = arith.constant 16 : index
    %235 = vector.load %arg14[%c1_225, %c16_226] : memref<6x96xf32, #tpu.memory_space<vmem>>, vector<4x64xf32>
    %236 = arith.truncf %235 : vector<4x64xf32> to vector<4x64xbf16>
    %c4_227 = arith.constant 4 : index
    %c0_228 = arith.constant 0 : index
    %c0_229 = arith.constant 0 : index
    %237 = vector.load %arg11[%c4_227, %c0_228, %c0_229] : memref<9x64x64xbf16, #tpu.memory_space<vmem>>, vector<1x64x64xbf16>
    %238 = vector.shape_cast %237 : vector<1x64x64xbf16> to vector<64x64xbf16>
    %cst_230 = arith.constant dense<0.000000e+00> : vector<4x64xf32>
    %239 = tpu.matmul %236, %238, %cst_230 {dimension_numbers = #tpu.dot_dimension_numbers<[1], [0], [0], [1], [0, 0, 1, 1], [], []>} : vector<4x64xbf16>, vector<64x64xbf16>, vector<4x64xf32> -> vector<4x64xf32>
    %240 = arith.addf %234, %239 : vector<4x64xf32>
    %c1_231 = arith.constant 1 : index
    %c32_232 = arith.constant 32 : index
    %241 = vector.load %arg14[%c1_231, %c32_232] : memref<6x96xf32, #tpu.memory_space<vmem>>, vector<4x64xf32>
    %242 = arith.truncf %241 : vector<4x64xf32> to vector<4x64xbf16>
    %c5_233 = arith.constant 5 : index
    %c0_234 = arith.constant 0 : index
    %c0_235 = arith.constant 0 : index
    %243 = vector.load %arg11[%c5_233, %c0_234, %c0_235] : memref<9x64x64xbf16, #tpu.memory_space<vmem>>, vector<1x64x64xbf16>
    %244 = vector.shape_cast %243 : vector<1x64x64xbf16> to vector<64x64xbf16>
    %cst_236 = arith.constant dense<0.000000e+00> : vector<4x64xf32>
    %245 = tpu.matmul %242, %244, %cst_236 {dimension_numbers = #tpu.dot_dimension_numbers<[1], [0], [0], [1], [0, 0, 1, 1], [], []>} : vector<4x64xbf16>, vector<64x64xbf16>, vector<4x64xf32> -> vector<4x64xf32>
    %246 = arith.addf %240, %245 : vector<4x64xf32>
    %c2_237 = arith.constant 2 : index
    %c0_238 = arith.constant 0 : index
    %247 = vector.load %arg14[%c2_237, %c0_238] : memref<6x96xf32, #tpu.memory_space<vmem>>, vector<4x64xf32>
    %248 = arith.truncf %247 : vector<4x64xf32> to vector<4x64xbf16>
    %c6_239 = arith.constant 6 : index
    %c0_240 = arith.constant 0 : index
    %c0_241 = arith.constant 0 : index
    %249 = vector.load %arg11[%c6_239, %c0_240, %c0_241] : memref<9x64x64xbf16, #tpu.memory_space<vmem>>, vector<1x64x64xbf16>
    %250 = vector.shape_cast %249 : vector<1x64x64xbf16> to vector<64x64xbf16>
    %cst_242 = arith.constant dense<0.000000e+00> : vector<4x64xf32>
    %251 = tpu.matmul %248, %250, %cst_242 {dimension_numbers = #tpu.dot_dimension_numbers<[1], [0], [0], [1], [0, 0, 1, 1], [], []>} : vector<4x64xbf16>, vector<64x64xbf16>, vector<4x64xf32> -> vector<4x64xf32>
    %252 = arith.addf %246, %251 : vector<4x64xf32>
    %c2_243 = arith.constant 2 : index
    %c16_244 = arith.constant 16 : index
    %253 = vector.load %arg14[%c2_243, %c16_244] : memref<6x96xf32, #tpu.memory_space<vmem>>, vector<4x64xf32>
    %254 = arith.truncf %253 : vector<4x64xf32> to vector<4x64xbf16>
    %c7_245 = arith.constant 7 : index
    %c0_246 = arith.constant 0 : index
    %c0_247 = arith.constant 0 : index
    %255 = vector.load %arg11[%c7_245, %c0_246, %c0_247] : memref<9x64x64xbf16, #tpu.memory_space<vmem>>, vector<1x64x64xbf16>
    %256 = vector.shape_cast %255 : vector<1x64x64xbf16> to vector<64x64xbf16>
    %cst_248 = arith.constant dense<0.000000e+00> : vector<4x64xf32>
    %257 = tpu.matmul %254, %256, %cst_248 {dimension_numbers = #tpu.dot_dimension_numbers<[1], [0], [0], [1], [0, 0, 1, 1], [], []>} : vector<4x64xbf16>, vector<64x64xbf16>, vector<4x64xf32> -> vector<4x64xf32>
    %258 = arith.addf %252, %257 : vector<4x64xf32>
    %c2_249 = arith.constant 2 : index
    %c32_250 = arith.constant 32 : index
    %259 = vector.load %arg14[%c2_249, %c32_250] : memref<6x96xf32, #tpu.memory_space<vmem>>, vector<4x64xf32>
    %260 = arith.truncf %259 : vector<4x64xf32> to vector<4x64xbf16>
    %c8_251 = arith.constant 8 : index
    %c0_252 = arith.constant 0 : index
    %c0_253 = arith.constant 0 : index
    %261 = vector.load %arg11[%c8_251, %c0_252, %c0_253] : memref<9x64x64xbf16, #tpu.memory_space<vmem>>, vector<1x64x64xbf16>
    %262 = vector.shape_cast %261 : vector<1x64x64xbf16> to vector<64x64xbf16>
    %cst_254 = arith.constant dense<0.000000e+00> : vector<4x64xf32>
    %263 = tpu.matmul %260, %262, %cst_254 {dimension_numbers = #tpu.dot_dimension_numbers<[1], [0], [0], [1], [0, 0, 1, 1], [], []>} : vector<4x64xbf16>, vector<64x64xbf16>, vector<4x64xf32> -> vector<4x64xf32>
    %264 = arith.addf %258, %263 : vector<4x64xf32>
    %c0_255 = arith.constant 0 : index
    %c0_256 = arith.constant 0 : index
    %265 = vector.load %arg12[%c0_255, %c0_256] : memref<1x64xf32, #tpu.memory_space<vmem>>, vector<1x64xf32>
    %266 = vector.broadcast %265 : vector<1x64xf32> to vector<4x64xf32>
    %267 = arith.addf %264, %266 : vector<4x64xf32>
    %268 = arith.addf %267, %143 : vector<4x64xf32>
    %cst_257 = arith.constant 0.000000e+00 : f32
    %269 = vector.broadcast %cst_257 : f32 to vector<4x64xf32>
    %270 = arith.maximumf %268, %269 : vector<4x64xf32>
    %c0_258 = arith.constant 0 : index
    %c0_259 = arith.constant 0 : index
    %271 = vector.load %arg13[%c0_258, %c0_259] : memref<4x64xf32, #tpu.memory_space<vmem>>, vector<4x64xf32>
    tpu.vector_store %arg13[%c0_258, %c0_259], %270 {strides = array<i32>} : memref<4x64xf32, #tpu.memory_space<vmem>>, vector<4x64xf32>,
    return
  }
  func.func @transform_0(%arg0: i32) -> (i32, i32) {
    %c0_i32 = arith.constant 0 : i32
    %c0_i32_0 = arith.constant 0 : i32
    %c0_i32_1 = arith.constant 0 : i32
    return %c0_i32, %c0_i32_0 : i32, i32
  }
  func.func @transform_1(%arg0: i32) -> (i32, i32) {
    %c0_i32 = arith.constant 0 : i32
    %c0_i32_0 = arith.constant 0 : i32
    %c0_i32_1 = arith.constant 0 : i32
    return %c0_i32, %c0_i32_0 : i32, i32
  }
  func.func @transform_2(%arg0: i32) -> (i32, i32) {
    %c0_i32 = arith.constant 0 : i32
    %c0_i32_0 = arith.constant 0 : i32
    %c0_i32_1 = arith.constant 0 : i32
    return %c0_i32, %c0_i32_0 : i32, i32
  }
  func.func @transform_3(%arg0: i32) -> (i32, i32) {
    %c0_i32 = arith.constant 0 : i32
    %c0_i32_0 = arith.constant 0 : i32
    %c0_i32_1 = arith.constant 0 : i32
    return %c0_i32, %c0_i32_0 : i32, i32
  }
  func.func @transform_4(%arg0: i32) -> (i32, i32, i32) {
    %c0_i32 = arith.constant 0 : i32
    %c0_i32_0 = arith.constant 0 : i32
    %c0_i32_1 = arith.constant 0 : i32
    %c0_i32_2 = arith.constant 0 : i32
    return %c0_i32, %c0_i32_0, %c0_i32_1 : i32, i32, i32
  }
  func.func @transform_5(%arg0: i32) -> (i32, i32) {
    %c0_i32 = arith.constant 0 : i32
    %c0_i32_0 = arith.constant 0 : i32
    %c0_i32_1 = arith.constant 0 : i32
    return %c0_i32, %c0_i32_0 : i32, i32
  }
  func.func @transform_6(%arg0: i32) -> (i32, i32, i32) {
    %c0_i32 = arith.constant 0 : i32
    %c0_i32_0 = arith.constant 0 : i32
    %c0_i32_1 = arith.constant 0 : i32
    %c0_i32_2 = arith.constant 0 : i32
    return %c0_i32, %c0_i32_0, %c0_i32_1 : i32, i32, i32
  }
  func.func @transform_7(%arg0: i32) -> (i32, i32) {
    %c0_i32 = arith.constant 0 : i32
    %c0_i32_0 = arith.constant 0 : i32
    %c0_i32_1 = arith.constant 0 : i32
    return %c0_i32, %c0_i32_0 : i32, i32
  }
  func.func @transform_8(%arg0: i32) -> (i32, i32, i32) {
    %c0_i32 = arith.constant 0 : i32
    %c0_i32_0 = arith.constant 0 : i32
    %c0_i32_1 = arith.constant 0 : i32
    %c0_i32_2 = arith.constant 0 : i32
    return %c0_i32, %c0_i32_0, %c0_i32_1 : i32, i32, i32
  }
  func.func @transform_9(%arg0: i32) -> (i32, i32) {
    %c0_i32 = arith.constant 0 : i32
    %c0_i32_0 = arith.constant 0 : i32
    %c0_i32_1 = arith.constant 0 : i32
    return %c0_i32, %c0_i32_0 : i32, i32
  }
  func.func @transform_10(%arg0: i32) -> (i32, i32, i32) {
    %c0_i32 = arith.constant 0 : i32
    %c0_i32_0 = arith.constant 0 : i32
    %c0_i32_1 = arith.constant 0 : i32
    %c0_i32_2 = arith.constant 0 : i32
    return %c0_i32, %c0_i32_0, %c0_i32_1 : i32, i32, i32
  }
  func.func @transform_11(%arg0: i32) -> (i32, i32) {
    %c0_i32 = arith.constant 0 : i32
    %c0_i32_0 = arith.constant 0 : i32
    %c0_i32_1 = arith.constant 0 : i32
    return %c0_i32, %c0_i32_0 : i32, i32
  }
  func.func @transform_12(%arg0: i32) -> (i32, i32) {
    %c0_i32 = arith.constant 0 : i32
    %c0_i32_0 = arith.constant 0 : i32
    %c0_i32_1 = arith.constant 0 : i32
    return %c0_i32, %c0_i32_0 : i32, i32
  }
}

module attributes {stable_mosaic.version = 11 : i64} {
  func.func @_layer_ds_kernel(%arg0: i32, %arg1: memref<3x48xf32, #tpu.memory_space<vmem>>, %arg2: memref<3x48xf32, #tpu.memory_space<vmem>>, %arg3: memref<3x48xf32, #tpu.memory_space<vmem>>, %arg4: memref<3x48xf32, #tpu.memory_space<vmem>>, %arg5: memref<9x32x64xbf16, #tpu.memory_space<vmem>>, %arg6: memref<1x64xf32, #tpu.memory_space<vmem>>, %arg7: memref<9x64x64xbf16, #tpu.memory_space<vmem>>, %arg8: memref<1x64xf32, #tpu.memory_space<vmem>>, %arg9: memref<32x64xbf16, #tpu.memory_space<vmem>>, %arg10: memref<1x64xf32, #tpu.memory_space<vmem>>, %arg11: memref<9x64x64xbf16, #tpu.memory_space<vmem>>, %arg12: memref<1x64xf32, #tpu.memory_space<vmem>>, %arg13: memref<9x64x64xbf16, #tpu.memory_space<vmem>>, %arg14: memref<1x64xf32, #tpu.memory_space<vmem>>, %arg15: memref<2x64xf32, #tpu.memory_space<vmem>>, %arg16: memref<4x128xf32, #tpu.memory_space<vmem>>) attributes {dimension_semantics = [#tpu.dimension_semantics<arbitrary>], iteration_bounds = array<i64: 1>, scalar_prefetch = 0 : i64, scratch_operands = 1 : i64, tpu.core_type = #tpu.core_type<tc>, window_params = [{pipeline_mode = #tpu.pipeline_mode<synchronous>, transform_indices = @transform_0, window_bounds = array<i64: 3, 48>}, {pipeline_mode = #tpu.pipeline_mode<synchronous>, transform_indices = @transform_1, window_bounds = array<i64: 3, 48>}, {pipeline_mode = #tpu.pipeline_mode<synchronous>, transform_indices = @transform_2, window_bounds = array<i64: 3, 48>}, {pipeline_mode = #tpu.pipeline_mode<synchronous>, transform_indices = @transform_3, window_bounds = array<i64: 3, 48>}, {pipeline_mode = #tpu.pipeline_mode<synchronous>, transform_indices = @transform_4, window_bounds = array<i64: 9, 32, 64>}, {pipeline_mode = #tpu.pipeline_mode<synchronous>, transform_indices = @transform_5, window_bounds = array<i64: 1, 64>}, {pipeline_mode = #tpu.pipeline_mode<synchronous>, transform_indices = @transform_6, window_bounds = array<i64: 9, 64, 64>}, {pipeline_mode = #tpu.pipeline_mode<synchronous>, transform_indices = @transform_7, window_bounds = array<i64: 1, 64>}, {pipeline_mode = #tpu.pipeline_mode<synchronous>, transform_indices = @transform_8, window_bounds = array<i64: 32, 64>}, {pipeline_mode = #tpu.pipeline_mode<synchronous>, transform_indices = @transform_9, window_bounds = array<i64: 1, 64>}, {pipeline_mode = #tpu.pipeline_mode<synchronous>, transform_indices = @transform_10, window_bounds = array<i64: 9, 64, 64>}, {pipeline_mode = #tpu.pipeline_mode<synchronous>, transform_indices = @transform_11, window_bounds = array<i64: 1, 64>}, {pipeline_mode = #tpu.pipeline_mode<synchronous>, transform_indices = @transform_12, window_bounds = array<i64: 9, 64, 64>}, {pipeline_mode = #tpu.pipeline_mode<synchronous>, transform_indices = @transform_13, window_bounds = array<i64: 1, 64>}, {pipeline_mode = #tpu.pipeline_mode<synchronous>, transform_indices = @transform_14, window_bounds = array<i64: 2, 64>}]} {
    %cst = arith.constant 0.000000e+00 : f32
    %0 = vector.broadcast %cst : f32 to vector<2x64xf32>
    %c0 = arith.constant 0 : index
    %c0_0 = arith.constant 0 : index
    %1 = vector.load %arg1[%c0, %c0_0] : memref<3x48xf32, #tpu.memory_space<vmem>>, vector<2x32xf32>
    %2 = arith.truncf %1 : vector<2x32xf32> to vector<2x32xbf16>
    %c0_1 = arith.constant 0 : index
    %c0_2 = arith.constant 0 : index
    %c0_3 = arith.constant 0 : index
    %3 = vector.load %arg5[%c0_1, %c0_2, %c0_3] : memref<9x32x64xbf16, #tpu.memory_space<vmem>>, vector<1x32x64xbf16>
    %4 = vector.shape_cast %3 : vector<1x32x64xbf16> to vector<32x64xbf16>
    %cst_4 = arith.constant dense<0.000000e+00> : vector<2x64xf32>
    %5 = tpu.matmul %2, %4, %cst_4 {dimension_numbers = #tpu.dot_dimension_numbers<[1], [0], [0], [1], [0, 0, 1, 1], [], []>} : vector<2x32xbf16>, vector<32x64xbf16>, vector<2x64xf32> -> vector<2x64xf32>
    %6 = arith.addf %0, %5 : vector<2x64xf32>
    %c0_5 = arith.constant 0 : index
    %c0_6 = arith.constant 0 : index
    %7 = vector.load %arg2[%c0_5, %c0_6] : memref<3x48xf32, #tpu.memory_space<vmem>>, vector<2x32xf32>
    %8 = arith.truncf %7 : vector<2x32xf32> to vector<2x32xbf16>
    %c1 = arith.constant 1 : index
    %c0_7 = arith.constant 0 : index
    %c0_8 = arith.constant 0 : index
    %9 = vector.load %arg5[%c1, %c0_7, %c0_8] : memref<9x32x64xbf16, #tpu.memory_space<vmem>>, vector<1x32x64xbf16>
    %10 = vector.shape_cast %9 : vector<1x32x64xbf16> to vector<32x64xbf16>
    %cst_9 = arith.constant dense<0.000000e+00> : vector<2x64xf32>
    %11 = tpu.matmul %8, %10, %cst_9 {dimension_numbers = #tpu.dot_dimension_numbers<[1], [0], [0], [1], [0, 0, 1, 1], [], []>} : vector<2x32xbf16>, vector<32x64xbf16>, vector<2x64xf32> -> vector<2x64xf32>
    %12 = arith.addf %6, %11 : vector<2x64xf32>
    %c0_10 = arith.constant 0 : index
    %c16 = arith.constant 16 : index
    %13 = vector.load %arg1[%c0_10, %c16] : memref<3x48xf32, #tpu.memory_space<vmem>>, vector<2x32xf32>
    %14 = arith.truncf %13 : vector<2x32xf32> to vector<2x32xbf16>
    %c2 = arith.constant 2 : index
    %c0_11 = arith.constant 0 : index
    %c0_12 = arith.constant 0 : index
    %15 = vector.load %arg5[%c2, %c0_11, %c0_12] : memref<9x32x64xbf16, #tpu.memory_space<vmem>>, vector<1x32x64xbf16>
    %16 = vector.shape_cast %15 : vector<1x32x64xbf16> to vector<32x64xbf16>
    %cst_13 = arith.constant dense<0.000000e+00> : vector<2x64xf32>
    %17 = tpu.matmul %14, %16, %cst_13 {dimension_numbers = #tpu.dot_dimension_numbers<[1], [0], [0], [1], [0, 0, 1, 1], [], []>} : vector<2x32xbf16>, vector<32x64xbf16>, vector<2x64xf32> -> vector<2x64xf32>
    %18 = arith.addf %12, %17 : vector<2x64xf32>
    %c0_14 = arith.constant 0 : index
    %c0_15 = arith.constant 0 : index
    %19 = vector.load %arg3[%c0_14, %c0_15] : memref<3x48xf32, #tpu.memory_space<vmem>>, vector<2x32xf32>
    %20 = arith.truncf %19 : vector<2x32xf32> to vector<2x32xbf16>
    %c3 = arith.constant 3 : index
    %c0_16 = arith.constant 0 : index
    %c0_17 = arith.constant 0 : index
    %21 = vector.load %arg5[%c3, %c0_16, %c0_17] : memref<9x32x64xbf16, #tpu.memory_space<vmem>>, vector<1x32x64xbf16>
    %22 = vector.shape_cast %21 : vector<1x32x64xbf16> to vector<32x64xbf16>
    %cst_18 = arith.constant dense<0.000000e+00> : vector<2x64xf32>
    %23 = tpu.matmul %20, %22, %cst_18 {dimension_numbers = #tpu.dot_dimension_numbers<[1], [0], [0], [1], [0, 0, 1, 1], [], []>} : vector<2x32xbf16>, vector<32x64xbf16>, vector<2x64xf32> -> vector<2x64xf32>
    %24 = arith.addf %18, %23 : vector<2x64xf32>
    %c0_19 = arith.constant 0 : index
    %c0_20 = arith.constant 0 : index
    %25 = vector.load %arg4[%c0_19, %c0_20] : memref<3x48xf32, #tpu.memory_space<vmem>>, vector<2x32xf32>
    %26 = arith.truncf %25 : vector<2x32xf32> to vector<2x32xbf16>
    %c4 = arith.constant 4 : index
    %c0_21 = arith.constant 0 : index
    %c0_22 = arith.constant 0 : index
    %27 = vector.load %arg5[%c4, %c0_21, %c0_22] : memref<9x32x64xbf16, #tpu.memory_space<vmem>>, vector<1x32x64xbf16>
    %28 = vector.shape_cast %27 : vector<1x32x64xbf16> to vector<32x64xbf16>
    %cst_23 = arith.constant dense<0.000000e+00> : vector<2x64xf32>
    %29 = tpu.matmul %26, %28, %cst_23 {dimension_numbers = #tpu.dot_dimension_numbers<[1], [0], [0], [1], [0, 0, 1, 1], [], []>} : vector<2x32xbf16>, vector<32x64xbf16>, vector<2x64xf32> -> vector<2x64xf32>
    %30 = arith.addf %24, %29 : vector<2x64xf32>
    %c0_24 = arith.constant 0 : index
    %c16_25 = arith.constant 16 : index
    %31 = vector.load %arg3[%c0_24, %c16_25] : memref<3x48xf32, #tpu.memory_space<vmem>>, vector<2x32xf32>
    %32 = arith.truncf %31 : vector<2x32xf32> to vector<2x32xbf16>
    %c5 = arith.constant 5 : index
    %c0_26 = arith.constant 0 : index
    %c0_27 = arith.constant 0 : index
    %33 = vector.load %arg5[%c5, %c0_26, %c0_27] : memref<9x32x64xbf16, #tpu.memory_space<vmem>>, vector<1x32x64xbf16>
    %34 = vector.shape_cast %33 : vector<1x32x64xbf16> to vector<32x64xbf16>
    %cst_28 = arith.constant dense<0.000000e+00> : vector<2x64xf32>
    %35 = tpu.matmul %32, %34, %cst_28 {dimension_numbers = #tpu.dot_dimension_numbers<[1], [0], [0], [1], [0, 0, 1, 1], [], []>} : vector<2x32xbf16>, vector<32x64xbf16>, vector<2x64xf32> -> vector<2x64xf32>
    %36 = arith.addf %30, %35 : vector<2x64xf32>
    %c1_29 = arith.constant 1 : index
    %c0_30 = arith.constant 0 : index
    %37 = vector.load %arg1[%c1_29, %c0_30] : memref<3x48xf32, #tpu.memory_space<vmem>>, vector<2x32xf32>
    %38 = arith.truncf %37 : vector<2x32xf32> to vector<2x32xbf16>
    %c6 = arith.constant 6 : index
    %c0_31 = arith.constant 0 : index
    %c0_32 = arith.constant 0 : index
    %39 = vector.load %arg5[%c6, %c0_31, %c0_32] : memref<9x32x64xbf16, #tpu.memory_space<vmem>>, vector<1x32x64xbf16>
    %40 = vector.shape_cast %39 : vector<1x32x64xbf16> to vector<32x64xbf16>
    %cst_33 = arith.constant dense<0.000000e+00> : vector<2x64xf32>
    %41 = tpu.matmul %38, %40, %cst_33 {dimension_numbers = #tpu.dot_dimension_numbers<[1], [0], [0], [1], [0, 0, 1, 1], [], []>} : vector<2x32xbf16>, vector<32x64xbf16>, vector<2x64xf32> -> vector<2x64xf32>
    %42 = arith.addf %36, %41 : vector<2x64xf32>
    %c1_34 = arith.constant 1 : index
    %c0_35 = arith.constant 0 : index
    %43 = vector.load %arg2[%c1_34, %c0_35] : memref<3x48xf32, #tpu.memory_space<vmem>>, vector<2x32xf32>
    %44 = arith.truncf %43 : vector<2x32xf32> to vector<2x32xbf16>
    %c7 = arith.constant 7 : index
    %c0_36 = arith.constant 0 : index
    %c0_37 = arith.constant 0 : index
    %45 = vector.load %arg5[%c7, %c0_36, %c0_37] : memref<9x32x64xbf16, #tpu.memory_space<vmem>>, vector<1x32x64xbf16>
    %46 = vector.shape_cast %45 : vector<1x32x64xbf16> to vector<32x64xbf16>
    %cst_38 = arith.constant dense<0.000000e+00> : vector<2x64xf32>
    %47 = tpu.matmul %44, %46, %cst_38 {dimension_numbers = #tpu.dot_dimension_numbers<[1], [0], [0], [1], [0, 0, 1, 1], [], []>} : vector<2x32xbf16>, vector<32x64xbf16>, vector<2x64xf32> -> vector<2x64xf32>
    %48 = arith.addf %42, %47 : vector<2x64xf32>
    %c1_39 = arith.constant 1 : index
    %c16_40 = arith.constant 16 : index
    %49 = vector.load %arg1[%c1_39, %c16_40] : memref<3x48xf32, #tpu.memory_space<vmem>>, vector<2x32xf32>
    %50 = arith.truncf %49 : vector<2x32xf32> to vector<2x32xbf16>
    %c8 = arith.constant 8 : index
    %c0_41 = arith.constant 0 : index
    %c0_42 = arith.constant 0 : index
    %51 = vector.load %arg5[%c8, %c0_41, %c0_42] : memref<9x32x64xbf16, #tpu.memory_space<vmem>>, vector<1x32x64xbf16>
    %52 = vector.shape_cast %51 : vector<1x32x64xbf16> to vector<32x64xbf16>
    %cst_43 = arith.constant dense<0.000000e+00> : vector<2x64xf32>
    %53 = tpu.matmul %50, %52, %cst_43 {dimension_numbers = #tpu.dot_dimension_numbers<[1], [0], [0], [1], [0, 0, 1, 1], [], []>} : vector<2x32xbf16>, vector<32x64xbf16>, vector<2x64xf32> -> vector<2x64xf32>
    %54 = arith.addf %48, %53 : vector<2x64xf32>
    %c0_44 = arith.constant 0 : index
    %c0_45 = arith.constant 0 : index
    %55 = vector.load %arg6[%c0_44, %c0_45] : memref<1x64xf32, #tpu.memory_space<vmem>>, vector<1x64xf32>
    %56 = vector.broadcast %55 : vector<1x64xf32> to vector<2x64xf32>
    %57 = arith.addf %54, %56 : vector<2x64xf32>
    %cst_46 = arith.constant 0.000000e+00 : f32
    %58 = vector.broadcast %cst_46 : f32 to vector<2x64xf32>
    %59 = arith.maximumf %57, %58 : vector<2x64xf32>
    %cst_47 = arith.constant 0.000000e+00 : f32
    %60 = vector.broadcast %cst_47 : f32 to vector<4x128xf32>
    %c0_48 = arith.constant 0 : index
    %c0_49 = arith.constant 0 : index
    %61 = vector.load %arg16[%c0_48, %c0_49] : memref<4x128xf32, #tpu.memory_space<vmem>>, vector<4x128xf32>
    tpu.vector_store %arg16[%c0_48, %c0_49], %60 {strides = array<i32>} : memref<4x128xf32, #tpu.memory_space<vmem>>, vector<4x128xf32>,
    %c1_50 = arith.constant 1 : index
    %c32 = arith.constant 32 : index
    %62 = vector.load %arg16[%c1_50, %c32] : memref<4x128xf32, #tpu.memory_space<vmem>>, vector<2x64xf32>
    tpu.vector_store %arg16[%c1_50, %c32], %59 {strides = array<i32>} : memref<4x128xf32, #tpu.memory_space<vmem>>, vector<2x64xf32>,
    %cst_51 = arith.constant 0.000000e+00 : f32
    %63 = vector.broadcast %cst_51 : f32 to vector<2x64xf32>
    %c0_52 = arith.constant 0 : index
    %c0_53 = arith.constant 0 : index
    %64 = vector.load %arg16[%c0_52, %c0_53] : memref<4x128xf32, #tpu.memory_space<vmem>>, vector<2x64xf32>
    %65 = arith.truncf %64 : vector<2x64xf32> to vector<2x64xbf16>
    %c0_54 = arith.constant 0 : index
    %c0_55 = arith.constant 0 : index
    %c0_56 = arith.constant 0 : index
    %66 = vector.load %arg7[%c0_54, %c0_55, %c0_56] : memref<9x64x64xbf16, #tpu.memory_space<vmem>>, vector<1x64x64xbf16>
    %67 = vector.shape_cast %66 : vector<1x64x64xbf16> to vector<64x64xbf16>
    %cst_57 = arith.constant dense<0.000000e+00> : vector<2x64xf32>
    %68 = tpu.matmul %65, %67, %cst_57 {dimension_numbers = #tpu.dot_dimension_numbers<[1], [0], [0], [1], [0, 0, 1, 1], [], []>} : vector<2x64xbf16>, vector<64x64xbf16>, vector<2x64xf32> -> vector<2x64xf32>
    %69 = arith.addf %63, %68 : vector<2x64xf32>
    %c0_58 = arith.constant 0 : index
    %c32_59 = arith.constant 32 : index
    %70 = vector.load %arg16[%c0_58, %c32_59] : memref<4x128xf32, #tpu.memory_space<vmem>>, vector<2x64xf32>
    %71 = arith.truncf %70 : vector<2x64xf32> to vector<2x64xbf16>
    %c1_60 = arith.constant 1 : index
    %c0_61 = arith.constant 0 : index
    %c0_62 = arith.constant 0 : index
    %72 = vector.load %arg7[%c1_60, %c0_61, %c0_62] : memref<9x64x64xbf16, #tpu.memory_space<vmem>>, vector<1x64x64xbf16>
    %73 = vector.shape_cast %72 : vector<1x64x64xbf16> to vector<64x64xbf16>
    %cst_63 = arith.constant dense<0.000000e+00> : vector<2x64xf32>
    %74 = tpu.matmul %71, %73, %cst_63 {dimension_numbers = #tpu.dot_dimension_numbers<[1], [0], [0], [1], [0, 0, 1, 1], [], []>} : vector<2x64xbf16>, vector<64x64xbf16>, vector<2x64xf32> -> vector<2x64xf32>
    %75 = arith.addf %69, %74 : vector<2x64xf32>
    %c0_64 = arith.constant 0 : index
    %c64 = arith.constant 64 : index
    %76 = vector.load %arg16[%c0_64, %c64] : memref<4x128xf32, #tpu.memory_space<vmem>>, vector<2x64xf32>
    %77 = arith.truncf %76 : vector<2x64xf32> to vector<2x64xbf16>
    %c2_65 = arith.constant 2 : index
    %c0_66 = arith.constant 0 : index
    %c0_67 = arith.constant 0 : index
    %78 = vector.load %arg7[%c2_65, %c0_66, %c0_67] : memref<9x64x64xbf16, #tpu.memory_space<vmem>>, vector<1x64x64xbf16>
    %79 = vector.shape_cast %78 : vector<1x64x64xbf16> to vector<64x64xbf16>
    %cst_68 = arith.constant dense<0.000000e+00> : vector<2x64xf32>
    %80 = tpu.matmul %77, %79, %cst_68 {dimension_numbers = #tpu.dot_dimension_numbers<[1], [0], [0], [1], [0, 0, 1, 1], [], []>} : vector<2x64xbf16>, vector<64x64xbf16>, vector<2x64xf32> -> vector<2x64xf32>
    %81 = arith.addf %75, %80 : vector<2x64xf32>
    %c1_69 = arith.constant 1 : index
    %c0_70 = arith.constant 0 : index
    %82 = vector.load %arg16[%c1_69, %c0_70] : memref<4x128xf32, #tpu.memory_space<vmem>>, vector<2x64xf32>
    %83 = arith.truncf %82 : vector<2x64xf32> to vector<2x64xbf16>
    %c3_71 = arith.constant 3 : index
    %c0_72 = arith.constant 0 : index
    %c0_73 = arith.constant 0 : index
    %84 = vector.load %arg7[%c3_71, %c0_72, %c0_73] : memref<9x64x64xbf16, #tpu.memory_space<vmem>>, vector<1x64x64xbf16>
    %85 = vector.shape_cast %84 : vector<1x64x64xbf16> to vector<64x64xbf16>
    %cst_74 = arith.constant dense<0.000000e+00> : vector<2x64xf32>
    %86 = tpu.matmul %83, %85, %cst_74 {dimension_numbers = #tpu.dot_dimension_numbers<[1], [0], [0], [1], [0, 0, 1, 1], [], []>} : vector<2x64xbf16>, vector<64x64xbf16>, vector<2x64xf32> -> vector<2x64xf32>
    %87 = arith.addf %81, %86 : vector<2x64xf32>
    %c1_75 = arith.constant 1 : index
    %c32_76 = arith.constant 32 : index
    %88 = vector.load %arg16[%c1_75, %c32_76] : memref<4x128xf32, #tpu.memory_space<vmem>>, vector<2x64xf32>
    %89 = arith.truncf %88 : vector<2x64xf32> to vector<2x64xbf16>
    %c4_77 = arith.constant 4 : index
    %c0_78 = arith.constant 0 : index
    %c0_79 = arith.constant 0 : index
    %90 = vector.load %arg7[%c4_77, %c0_78, %c0_79] : memref<9x64x64xbf16, #tpu.memory_space<vmem>>, vector<1x64x64xbf16>
    %91 = vector.shape_cast %90 : vector<1x64x64xbf16> to vector<64x64xbf16>
    %cst_80 = arith.constant dense<0.000000e+00> : vector<2x64xf32>
    %92 = tpu.matmul %89, %91, %cst_80 {dimension_numbers = #tpu.dot_dimension_numbers<[1], [0], [0], [1], [0, 0, 1, 1], [], []>} : vector<2x64xbf16>, vector<64x64xbf16>, vector<2x64xf32> -> vector<2x64xf32>
    %93 = arith.addf %87, %92 : vector<2x64xf32>
    %c1_81 = arith.constant 1 : index
    %c64_82 = arith.constant 64 : index
    %94 = vector.load %arg16[%c1_81, %c64_82] : memref<4x128xf32, #tpu.memory_space<vmem>>, vector<2x64xf32>
    %95 = arith.truncf %94 : vector<2x64xf32> to vector<2x64xbf16>
    %c5_83 = arith.constant 5 : index
    %c0_84 = arith.constant 0 : index
    %c0_85 = arith.constant 0 : index
    %96 = vector.load %arg7[%c5_83, %c0_84, %c0_85] : memref<9x64x64xbf16, #tpu.memory_space<vmem>>, vector<1x64x64xbf16>
    %97 = vector.shape_cast %96 : vector<1x64x64xbf16> to vector<64x64xbf16>
    %cst_86 = arith.constant dense<0.000000e+00> : vector<2x64xf32>
    %98 = tpu.matmul %95, %97, %cst_86 {dimension_numbers = #tpu.dot_dimension_numbers<[1], [0], [0], [1], [0, 0, 1, 1], [], []>} : vector<2x64xbf16>, vector<64x64xbf16>, vector<2x64xf32> -> vector<2x64xf32>
    %99 = arith.addf %93, %98 : vector<2x64xf32>
    %c2_87 = arith.constant 2 : index
    %c0_88 = arith.constant 0 : index
    %100 = vector.load %arg16[%c2_87, %c0_88] : memref<4x128xf32, #tpu.memory_space<vmem>>, vector<2x64xf32>
    %101 = arith.truncf %100 : vector<2x64xf32> to vector<2x64xbf16>
    %c6_89 = arith.constant 6 : index
    %c0_90 = arith.constant 0 : index
    %c0_91 = arith.constant 0 : index
    %102 = vector.load %arg7[%c6_89, %c0_90, %c0_91] : memref<9x64x64xbf16, #tpu.memory_space<vmem>>, vector<1x64x64xbf16>
    %103 = vector.shape_cast %102 : vector<1x64x64xbf16> to vector<64x64xbf16>
    %cst_92 = arith.constant dense<0.000000e+00> : vector<2x64xf32>
    %104 = tpu.matmul %101, %103, %cst_92 {dimension_numbers = #tpu.dot_dimension_numbers<[1], [0], [0], [1], [0, 0, 1, 1], [], []>} : vector<2x64xbf16>, vector<64x64xbf16>, vector<2x64xf32> -> vector<2x64xf32>
    %105 = arith.addf %99, %104 : vector<2x64xf32>
    %c2_93 = arith.constant 2 : index
    %c32_94 = arith.constant 32 : index
    %106 = vector.load %arg16[%c2_93, %c32_94] : memref<4x128xf32, #tpu.memory_space<vmem>>, vector<2x64xf32>
    %107 = arith.truncf %106 : vector<2x64xf32> to vector<2x64xbf16>
    %c7_95 = arith.constant 7 : index
    %c0_96 = arith.constant 0 : index
    %c0_97 = arith.constant 0 : index
    %108 = vector.load %arg7[%c7_95, %c0_96, %c0_97] : memref<9x64x64xbf16, #tpu.memory_space<vmem>>, vector<1x64x64xbf16>
    %109 = vector.shape_cast %108 : vector<1x64x64xbf16> to vector<64x64xbf16>
    %cst_98 = arith.constant dense<0.000000e+00> : vector<2x64xf32>
    %110 = tpu.matmul %107, %109, %cst_98 {dimension_numbers = #tpu.dot_dimension_numbers<[1], [0], [0], [1], [0, 0, 1, 1], [], []>} : vector<2x64xbf16>, vector<64x64xbf16>, vector<2x64xf32> -> vector<2x64xf32>
    %111 = arith.addf %105, %110 : vector<2x64xf32>
    %c2_99 = arith.constant 2 : index
    %c64_100 = arith.constant 64 : index
    %112 = vector.load %arg16[%c2_99, %c64_100] : memref<4x128xf32, #tpu.memory_space<vmem>>, vector<2x64xf32>
    %113 = arith.truncf %112 : vector<2x64xf32> to vector<2x64xbf16>
    %c8_101 = arith.constant 8 : index
    %c0_102 = arith.constant 0 : index
    %c0_103 = arith.constant 0 : index
    %114 = vector.load %arg7[%c8_101, %c0_102, %c0_103] : memref<9x64x64xbf16, #tpu.memory_space<vmem>>, vector<1x64x64xbf16>
    %115 = vector.shape_cast %114 : vector<1x64x64xbf16> to vector<64x64xbf16>
    %cst_104 = arith.constant dense<0.000000e+00> : vector<2x64xf32>
    %116 = tpu.matmul %113, %115, %cst_104 {dimension_numbers = #tpu.dot_dimension_numbers<[1], [0], [0], [1], [0, 0, 1, 1], [], []>} : vector<2x64xbf16>, vector<64x64xbf16>, vector<2x64xf32> -> vector<2x64xf32>
    %117 = arith.addf %111, %116 : vector<2x64xf32>
    %c0_105 = arith.constant 0 : index
    %c0_106 = arith.constant 0 : index
    %118 = vector.load %arg4[%c0_105, %c0_106] : memref<3x48xf32, #tpu.memory_space<vmem>>, vector<2x32xf32>
    %119 = arith.truncf %118 : vector<2x32xf32> to vector<2x32xbf16>
    %c0_107 = arith.constant 0 : index
    %c0_108 = arith.constant 0 : index
    %120 = vector.load %arg9[%c0_107, %c0_108] : memref<32x64xbf16, #tpu.memory_space<vmem>>, vector<32x64xbf16>
    %cst_109 = arith.constant dense<0.000000e+00> : vector<2x64xf32>
    %121 = tpu.matmul %119, %120, %cst_109 {dimension_numbers = #tpu.dot_dimension_numbers<[1], [0], [0], [1], [0, 0, 1, 1], [], []>} : vector<2x32xbf16>, vector<32x64xbf16>, vector<2x64xf32> -> vector<2x64xf32>
    %c0_110 = arith.constant 0 : index
    %c0_111 = arith.constant 0 : index
    %122 = vector.load %arg10[%c0_110, %c0_111] : memref<1x64xf32, #tpu.memory_space<vmem>>, vector<1x64xf32>
    %123 = vector.broadcast %122 : vector<1x64xf32> to vector<2x64xf32>
    %124 = arith.addf %121, %123 : vector<2x64xf32>
    %c0_112 = arith.constant 0 : index
    %c0_113 = arith.constant 0 : index
    %125 = vector.load %arg8[%c0_112, %c0_113] : memref<1x64xf32, #tpu.memory_space<vmem>>, vector<1x64xf32>
    %126 = vector.broadcast %125 : vector<1x64xf32> to vector<2x64xf32>
    %127 = arith.addf %117, %126 : vector<2x64xf32>
    %128 = arith.addf %127, %124 : vector<2x64xf32>
    %cst_114 = arith.constant 0.000000e+00 : f32
    %129 = vector.broadcast %cst_114 : f32 to vector<2x64xf32>
    %130 = arith.maximumf %128, %129 : vector<2x64xf32>
    %cst_115 = arith.constant 0.000000e+00 : f32
    %131 = vector.broadcast %cst_115 : f32 to vector<4x128xf32>
    %c0_116 = arith.constant 0 : index
    %c0_117 = arith.constant 0 : index
    %132 = vector.load %arg16[%c0_116, %c0_117] : memref<4x128xf32, #tpu.memory_space<vmem>>, vector<4x128xf32>
    tpu.vector_store %arg16[%c0_116, %c0_117], %131 {strides = array<i32>} : memref<4x128xf32, #tpu.memory_space<vmem>>, vector<4x128xf32>,
    %c1_118 = arith.constant 1 : index
    %c32_119 = arith.constant 32 : index
    %133 = vector.load %arg16[%c1_118, %c32_119] : memref<4x128xf32, #tpu.memory_space<vmem>>, vector<2x64xf32>
    tpu.vector_store %arg16[%c1_118, %c32_119], %130 {strides = array<i32>} : memref<4x128xf32, #tpu.memory_space<vmem>>, vector<2x64xf32>,
    %cst_120 = arith.constant 0.000000e+00 : f32
    %134 = vector.broadcast %cst_120 : f32 to vector<2x64xf32>
    %c0_121 = arith.constant 0 : index
    %c0_122 = arith.constant 0 : index
    %135 = vector.load %arg16[%c0_121, %c0_122] : memref<4x128xf32, #tpu.memory_space<vmem>>, vector<2x64xf32>
    %136 = arith.truncf %135 : vector<2x64xf32> to vector<2x64xbf16>
    %c0_123 = arith.constant 0 : index
    %c0_124 = arith.constant 0 : index
    %c0_125 = arith.constant 0 : index
    %137 = vector.load %arg11[%c0_123, %c0_124, %c0_125] : memref<9x64x64xbf16, #tpu.memory_space<vmem>>, vector<1x64x64xbf16>
    %138 = vector.shape_cast %137 : vector<1x64x64xbf16> to vector<64x64xbf16>
    %cst_126 = arith.constant dense<0.000000e+00> : vector<2x64xf32>
    %139 = tpu.matmul %136, %138, %cst_126 {dimension_numbers = #tpu.dot_dimension_numbers<[1], [0], [0], [1], [0, 0, 1, 1], [], []>} : vector<2x64xbf16>, vector<64x64xbf16>, vector<2x64xf32> -> vector<2x64xf32>
    %140 = arith.addf %134, %139 : vector<2x64xf32>
    %c0_127 = arith.constant 0 : index
    %c32_128 = arith.constant 32 : index
    %141 = vector.load %arg16[%c0_127, %c32_128] : memref<4x128xf32, #tpu.memory_space<vmem>>, vector<2x64xf32>
    %142 = arith.truncf %141 : vector<2x64xf32> to vector<2x64xbf16>
    %c1_129 = arith.constant 1 : index
    %c0_130 = arith.constant 0 : index
    %c0_131 = arith.constant 0 : index
    %143 = vector.load %arg11[%c1_129, %c0_130, %c0_131] : memref<9x64x64xbf16, #tpu.memory_space<vmem>>, vector<1x64x64xbf16>
    %144 = vector.shape_cast %143 : vector<1x64x64xbf16> to vector<64x64xbf16>
    %cst_132 = arith.constant dense<0.000000e+00> : vector<2x64xf32>
    %145 = tpu.matmul %142, %144, %cst_132 {dimension_numbers = #tpu.dot_dimension_numbers<[1], [0], [0], [1], [0, 0, 1, 1], [], []>} : vector<2x64xbf16>, vector<64x64xbf16>, vector<2x64xf32> -> vector<2x64xf32>
    %146 = arith.addf %140, %145 : vector<2x64xf32>
    %c0_133 = arith.constant 0 : index
    %c64_134 = arith.constant 64 : index
    %147 = vector.load %arg16[%c0_133, %c64_134] : memref<4x128xf32, #tpu.memory_space<vmem>>, vector<2x64xf32>
    %148 = arith.truncf %147 : vector<2x64xf32> to vector<2x64xbf16>
    %c2_135 = arith.constant 2 : index
    %c0_136 = arith.constant 0 : index
    %c0_137 = arith.constant 0 : index
    %149 = vector.load %arg11[%c2_135, %c0_136, %c0_137] : memref<9x64x64xbf16, #tpu.memory_space<vmem>>, vector<1x64x64xbf16>
    %150 = vector.shape_cast %149 : vector<1x64x64xbf16> to vector<64x64xbf16>
    %cst_138 = arith.constant dense<0.000000e+00> : vector<2x64xf32>
    %151 = tpu.matmul %148, %150, %cst_138 {dimension_numbers = #tpu.dot_dimension_numbers<[1], [0], [0], [1], [0, 0, 1, 1], [], []>} : vector<2x64xbf16>, vector<64x64xbf16>, vector<2x64xf32> -> vector<2x64xf32>
    %152 = arith.addf %146, %151 : vector<2x64xf32>
    %c1_139 = arith.constant 1 : index
    %c0_140 = arith.constant 0 : index
    %153 = vector.load %arg16[%c1_139, %c0_140] : memref<4x128xf32, #tpu.memory_space<vmem>>, vector<2x64xf32>
    %154 = arith.truncf %153 : vector<2x64xf32> to vector<2x64xbf16>
    %c3_141 = arith.constant 3 : index
    %c0_142 = arith.constant 0 : index
    %c0_143 = arith.constant 0 : index
    %155 = vector.load %arg11[%c3_141, %c0_142, %c0_143] : memref<9x64x64xbf16, #tpu.memory_space<vmem>>, vector<1x64x64xbf16>
    %156 = vector.shape_cast %155 : vector<1x64x64xbf16> to vector<64x64xbf16>
    %cst_144 = arith.constant dense<0.000000e+00> : vector<2x64xf32>
    %157 = tpu.matmul %154, %156, %cst_144 {dimension_numbers = #tpu.dot_dimension_numbers<[1], [0], [0], [1], [0, 0, 1, 1], [], []>} : vector<2x64xbf16>, vector<64x64xbf16>, vector<2x64xf32> -> vector<2x64xf32>
    %158 = arith.addf %152, %157 : vector<2x64xf32>
    %c1_145 = arith.constant 1 : index
    %c32_146 = arith.constant 32 : index
    %159 = vector.load %arg16[%c1_145, %c32_146] : memref<4x128xf32, #tpu.memory_space<vmem>>, vector<2x64xf32>
    %160 = arith.truncf %159 : vector<2x64xf32> to vector<2x64xbf16>
    %c4_147 = arith.constant 4 : index
    %c0_148 = arith.constant 0 : index
    %c0_149 = arith.constant 0 : index
    %161 = vector.load %arg11[%c4_147, %c0_148, %c0_149] : memref<9x64x64xbf16, #tpu.memory_space<vmem>>, vector<1x64x64xbf16>
    %162 = vector.shape_cast %161 : vector<1x64x64xbf16> to vector<64x64xbf16>
    %cst_150 = arith.constant dense<0.000000e+00> : vector<2x64xf32>
    %163 = tpu.matmul %160, %162, %cst_150 {dimension_numbers = #tpu.dot_dimension_numbers<[1], [0], [0], [1], [0, 0, 1, 1], [], []>} : vector<2x64xbf16>, vector<64x64xbf16>, vector<2x64xf32> -> vector<2x64xf32>
    %164 = arith.addf %158, %163 : vector<2x64xf32>
    %c1_151 = arith.constant 1 : index
    %c64_152 = arith.constant 64 : index
    %165 = vector.load %arg16[%c1_151, %c64_152] : memref<4x128xf32, #tpu.memory_space<vmem>>, vector<2x64xf32>
    %166 = arith.truncf %165 : vector<2x64xf32> to vector<2x64xbf16>
    %c5_153 = arith.constant 5 : index
    %c0_154 = arith.constant 0 : index
    %c0_155 = arith.constant 0 : index
    %167 = vector.load %arg11[%c5_153, %c0_154, %c0_155] : memref<9x64x64xbf16, #tpu.memory_space<vmem>>, vector<1x64x64xbf16>
    %168 = vector.shape_cast %167 : vector<1x64x64xbf16> to vector<64x64xbf16>
    %cst_156 = arith.constant dense<0.000000e+00> : vector<2x64xf32>
    %169 = tpu.matmul %166, %168, %cst_156 {dimension_numbers = #tpu.dot_dimension_numbers<[1], [0], [0], [1], [0, 0, 1, 1], [], []>} : vector<2x64xbf16>, vector<64x64xbf16>, vector<2x64xf32> -> vector<2x64xf32>
    %170 = arith.addf %164, %169 : vector<2x64xf32>
    %c2_157 = arith.constant 2 : index
    %c0_158 = arith.constant 0 : index
    %171 = vector.load %arg16[%c2_157, %c0_158] : memref<4x128xf32, #tpu.memory_space<vmem>>, vector<2x64xf32>
    %172 = arith.truncf %171 : vector<2x64xf32> to vector<2x64xbf16>
    %c6_159 = arith.constant 6 : index
    %c0_160 = arith.constant 0 : index
    %c0_161 = arith.constant 0 : index
    %173 = vector.load %arg11[%c6_159, %c0_160, %c0_161] : memref<9x64x64xbf16, #tpu.memory_space<vmem>>, vector<1x64x64xbf16>
    %174 = vector.shape_cast %173 : vector<1x64x64xbf16> to vector<64x64xbf16>
    %cst_162 = arith.constant dense<0.000000e+00> : vector<2x64xf32>
    %175 = tpu.matmul %172, %174, %cst_162 {dimension_numbers = #tpu.dot_dimension_numbers<[1], [0], [0], [1], [0, 0, 1, 1], [], []>} : vector<2x64xbf16>, vector<64x64xbf16>, vector<2x64xf32> -> vector<2x64xf32>
    %176 = arith.addf %170, %175 : vector<2x64xf32>
    %c2_163 = arith.constant 2 : index
    %c32_164 = arith.constant 32 : index
    %177 = vector.load %arg16[%c2_163, %c32_164] : memref<4x128xf32, #tpu.memory_space<vmem>>, vector<2x64xf32>
    %178 = arith.truncf %177 : vector<2x64xf32> to vector<2x64xbf16>
    %c7_165 = arith.constant 7 : index
    %c0_166 = arith.constant 0 : index
    %c0_167 = arith.constant 0 : index
    %179 = vector.load %arg11[%c7_165, %c0_166, %c0_167] : memref<9x64x64xbf16, #tpu.memory_space<vmem>>, vector<1x64x64xbf16>
    %180 = vector.shape_cast %179 : vector<1x64x64xbf16> to vector<64x64xbf16>
    %cst_168 = arith.constant dense<0.000000e+00> : vector<2x64xf32>
    %181 = tpu.matmul %178, %180, %cst_168 {dimension_numbers = #tpu.dot_dimension_numbers<[1], [0], [0], [1], [0, 0, 1, 1], [], []>} : vector<2x64xbf16>, vector<64x64xbf16>, vector<2x64xf32> -> vector<2x64xf32>
    %182 = arith.addf %176, %181 : vector<2x64xf32>
    %c2_169 = arith.constant 2 : index
    %c64_170 = arith.constant 64 : index
    %183 = vector.load %arg16[%c2_169, %c64_170] : memref<4x128xf32, #tpu.memory_space<vmem>>, vector<2x64xf32>
    %184 = arith.truncf %183 : vector<2x64xf32> to vector<2x64xbf16>
    %c8_171 = arith.constant 8 : index
    %c0_172 = arith.constant 0 : index
    %c0_173 = arith.constant 0 : index
    %185 = vector.load %arg11[%c8_171, %c0_172, %c0_173] : memref<9x64x64xbf16, #tpu.memory_space<vmem>>, vector<1x64x64xbf16>
    %186 = vector.shape_cast %185 : vector<1x64x64xbf16> to vector<64x64xbf16>
    %cst_174 = arith.constant dense<0.000000e+00> : vector<2x64xf32>
    %187 = tpu.matmul %184, %186, %cst_174 {dimension_numbers = #tpu.dot_dimension_numbers<[1], [0], [0], [1], [0, 0, 1, 1], [], []>} : vector<2x64xbf16>, vector<64x64xbf16>, vector<2x64xf32> -> vector<2x64xf32>
    %188 = arith.addf %182, %187 : vector<2x64xf32>
    %c0_175 = arith.constant 0 : index
    %c0_176 = arith.constant 0 : index
    %189 = vector.load %arg12[%c0_175, %c0_176] : memref<1x64xf32, #tpu.memory_space<vmem>>, vector<1x64xf32>
    %190 = vector.broadcast %189 : vector<1x64xf32> to vector<2x64xf32>
    %191 = arith.addf %188, %190 : vector<2x64xf32>
    %cst_177 = arith.constant 0.000000e+00 : f32
    %192 = vector.broadcast %cst_177 : f32 to vector<2x64xf32>
    %193 = arith.maximumf %191, %192 : vector<2x64xf32>
    %cst_178 = arith.constant 0.000000e+00 : f32
    %194 = vector.broadcast %cst_178 : f32 to vector<4x128xf32>
    %c0_179 = arith.constant 0 : index
    %c0_180 = arith.constant 0 : index
    %195 = vector.load %arg16[%c0_179, %c0_180] : memref<4x128xf32, #tpu.memory_space<vmem>>, vector<4x128xf32>
    tpu.vector_store %arg16[%c0_179, %c0_180], %194 {strides = array<i32>} : memref<4x128xf32, #tpu.memory_space<vmem>>, vector<4x128xf32>,
    %c1_181 = arith.constant 1 : index
    %c32_182 = arith.constant 32 : index
    %196 = vector.load %arg16[%c1_181, %c32_182] : memref<4x128xf32, #tpu.memory_space<vmem>>, vector<2x64xf32>
    tpu.vector_store %arg16[%c1_181, %c32_182], %193 {strides = array<i32>} : memref<4x128xf32, #tpu.memory_space<vmem>>, vector<2x64xf32>,
    %cst_183 = arith.constant 0.000000e+00 : f32
    %197 = vector.broadcast %cst_183 : f32 to vector<2x64xf32>
    %c0_184 = arith.constant 0 : index
    %c0_185 = arith.constant 0 : index
    %198 = vector.load %arg16[%c0_184, %c0_185] : memref<4x128xf32, #tpu.memory_space<vmem>>, vector<2x64xf32>
    %199 = arith.truncf %198 : vector<2x64xf32> to vector<2x64xbf16>
    %c0_186 = arith.constant 0 : index
    %c0_187 = arith.constant 0 : index
    %c0_188 = arith.constant 0 : index
    %200 = vector.load %arg13[%c0_186, %c0_187, %c0_188] : memref<9x64x64xbf16, #tpu.memory_space<vmem>>, vector<1x64x64xbf16>
    %201 = vector.shape_cast %200 : vector<1x64x64xbf16> to vector<64x64xbf16>
    %cst_189 = arith.constant dense<0.000000e+00> : vector<2x64xf32>
    %202 = tpu.matmul %199, %201, %cst_189 {dimension_numbers = #tpu.dot_dimension_numbers<[1], [0], [0], [1], [0, 0, 1, 1], [], []>} : vector<2x64xbf16>, vector<64x64xbf16>, vector<2x64xf32> -> vector<2x64xf32>
    %203 = arith.addf %197, %202 : vector<2x64xf32>
    %c0_190 = arith.constant 0 : index
    %c32_191 = arith.constant 32 : index
    %204 = vector.load %arg16[%c0_190, %c32_191] : memref<4x128xf32, #tpu.memory_space<vmem>>, vector<2x64xf32>
    %205 = arith.truncf %204 : vector<2x64xf32> to vector<2x64xbf16>
    %c1_192 = arith.constant 1 : index
    %c0_193 = arith.constant 0 : index
    %c0_194 = arith.constant 0 : index
    %206 = vector.load %arg13[%c1_192, %c0_193, %c0_194] : memref<9x64x64xbf16, #tpu.memory_space<vmem>>, vector<1x64x64xbf16>
    %207 = vector.shape_cast %206 : vector<1x64x64xbf16> to vector<64x64xbf16>
    %cst_195 = arith.constant dense<0.000000e+00> : vector<2x64xf32>
    %208 = tpu.matmul %205, %207, %cst_195 {dimension_numbers = #tpu.dot_dimension_numbers<[1], [0], [0], [1], [0, 0, 1, 1], [], []>} : vector<2x64xbf16>, vector<64x64xbf16>, vector<2x64xf32> -> vector<2x64xf32>
    %209 = arith.addf %203, %208 : vector<2x64xf32>
    %c0_196 = arith.constant 0 : index
    %c64_197 = arith.constant 64 : index
    %210 = vector.load %arg16[%c0_196, %c64_197] : memref<4x128xf32, #tpu.memory_space<vmem>>, vector<2x64xf32>
    %211 = arith.truncf %210 : vector<2x64xf32> to vector<2x64xbf16>
    %c2_198 = arith.constant 2 : index
    %c0_199 = arith.constant 0 : index
    %c0_200 = arith.constant 0 : index
    %212 = vector.load %arg13[%c2_198, %c0_199, %c0_200] : memref<9x64x64xbf16, #tpu.memory_space<vmem>>, vector<1x64x64xbf16>
    %213 = vector.shape_cast %212 : vector<1x64x64xbf16> to vector<64x64xbf16>
    %cst_201 = arith.constant dense<0.000000e+00> : vector<2x64xf32>
    %214 = tpu.matmul %211, %213, %cst_201 {dimension_numbers = #tpu.dot_dimension_numbers<[1], [0], [0], [1], [0, 0, 1, 1], [], []>} : vector<2x64xbf16>, vector<64x64xbf16>, vector<2x64xf32> -> vector<2x64xf32>
    %215 = arith.addf %209, %214 : vector<2x64xf32>
    %c1_202 = arith.constant 1 : index
    %c0_203 = arith.constant 0 : index
    %216 = vector.load %arg16[%c1_202, %c0_203] : memref<4x128xf32, #tpu.memory_space<vmem>>, vector<2x64xf32>
    %217 = arith.truncf %216 : vector<2x64xf32> to vector<2x64xbf16>
    %c3_204 = arith.constant 3 : index
    %c0_205 = arith.constant 0 : index
    %c0_206 = arith.constant 0 : index
    %218 = vector.load %arg13[%c3_204, %c0_205, %c0_206] : memref<9x64x64xbf16, #tpu.memory_space<vmem>>, vector<1x64x64xbf16>
    %219 = vector.shape_cast %218 : vector<1x64x64xbf16> to vector<64x64xbf16>
    %cst_207 = arith.constant dense<0.000000e+00> : vector<2x64xf32>
    %220 = tpu.matmul %217, %219, %cst_207 {dimension_numbers = #tpu.dot_dimension_numbers<[1], [0], [0], [1], [0, 0, 1, 1], [], []>} : vector<2x64xbf16>, vector<64x64xbf16>, vector<2x64xf32> -> vector<2x64xf32>
    %221 = arith.addf %215, %220 : vector<2x64xf32>
    %c1_208 = arith.constant 1 : index
    %c32_209 = arith.constant 32 : index
    %222 = vector.load %arg16[%c1_208, %c32_209] : memref<4x128xf32, #tpu.memory_space<vmem>>, vector<2x64xf32>
    %223 = arith.truncf %222 : vector<2x64xf32> to vector<2x64xbf16>
    %c4_210 = arith.constant 4 : index
    %c0_211 = arith.constant 0 : index
    %c0_212 = arith.constant 0 : index
    %224 = vector.load %arg13[%c4_210, %c0_211, %c0_212] : memref<9x64x64xbf16, #tpu.memory_space<vmem>>, vector<1x64x64xbf16>
    %225 = vector.shape_cast %224 : vector<1x64x64xbf16> to vector<64x64xbf16>
    %cst_213 = arith.constant dense<0.000000e+00> : vector<2x64xf32>
    %226 = tpu.matmul %223, %225, %cst_213 {dimension_numbers = #tpu.dot_dimension_numbers<[1], [0], [0], [1], [0, 0, 1, 1], [], []>} : vector<2x64xbf16>, vector<64x64xbf16>, vector<2x64xf32> -> vector<2x64xf32>
    %227 = arith.addf %221, %226 : vector<2x64xf32>
    %c1_214 = arith.constant 1 : index
    %c64_215 = arith.constant 64 : index
    %228 = vector.load %arg16[%c1_214, %c64_215] : memref<4x128xf32, #tpu.memory_space<vmem>>, vector<2x64xf32>
    %229 = arith.truncf %228 : vector<2x64xf32> to vector<2x64xbf16>
    %c5_216 = arith.constant 5 : index
    %c0_217 = arith.constant 0 : index
    %c0_218 = arith.constant 0 : index
    %230 = vector.load %arg13[%c5_216, %c0_217, %c0_218] : memref<9x64x64xbf16, #tpu.memory_space<vmem>>, vector<1x64x64xbf16>
    %231 = vector.shape_cast %230 : vector<1x64x64xbf16> to vector<64x64xbf16>
    %cst_219 = arith.constant dense<0.000000e+00> : vector<2x64xf32>
    %232 = tpu.matmul %229, %231, %cst_219 {dimension_numbers = #tpu.dot_dimension_numbers<[1], [0], [0], [1], [0, 0, 1, 1], [], []>} : vector<2x64xbf16>, vector<64x64xbf16>, vector<2x64xf32> -> vector<2x64xf32>
    %233 = arith.addf %227, %232 : vector<2x64xf32>
    %c2_220 = arith.constant 2 : index
    %c0_221 = arith.constant 0 : index
    %234 = vector.load %arg16[%c2_220, %c0_221] : memref<4x128xf32, #tpu.memory_space<vmem>>, vector<2x64xf32>
    %235 = arith.truncf %234 : vector<2x64xf32> to vector<2x64xbf16>
    %c6_222 = arith.constant 6 : index
    %c0_223 = arith.constant 0 : index
    %c0_224 = arith.constant 0 : index
    %236 = vector.load %arg13[%c6_222, %c0_223, %c0_224] : memref<9x64x64xbf16, #tpu.memory_space<vmem>>, vector<1x64x64xbf16>
    %237 = vector.shape_cast %236 : vector<1x64x64xbf16> to vector<64x64xbf16>
    %cst_225 = arith.constant dense<0.000000e+00> : vector<2x64xf32>
    %238 = tpu.matmul %235, %237, %cst_225 {dimension_numbers = #tpu.dot_dimension_numbers<[1], [0], [0], [1], [0, 0, 1, 1], [], []>} : vector<2x64xbf16>, vector<64x64xbf16>, vector<2x64xf32> -> vector<2x64xf32>
    %239 = arith.addf %233, %238 : vector<2x64xf32>
    %c2_226 = arith.constant 2 : index
    %c32_227 = arith.constant 32 : index
    %240 = vector.load %arg16[%c2_226, %c32_227] : memref<4x128xf32, #tpu.memory_space<vmem>>, vector<2x64xf32>
    %241 = arith.truncf %240 : vector<2x64xf32> to vector<2x64xbf16>
    %c7_228 = arith.constant 7 : index
    %c0_229 = arith.constant 0 : index
    %c0_230 = arith.constant 0 : index
    %242 = vector.load %arg13[%c7_228, %c0_229, %c0_230] : memref<9x64x64xbf16, #tpu.memory_space<vmem>>, vector<1x64x64xbf16>
    %243 = vector.shape_cast %242 : vector<1x64x64xbf16> to vector<64x64xbf16>
    %cst_231 = arith.constant dense<0.000000e+00> : vector<2x64xf32>
    %244 = tpu.matmul %241, %243, %cst_231 {dimension_numbers = #tpu.dot_dimension_numbers<[1], [0], [0], [1], [0, 0, 1, 1], [], []>} : vector<2x64xbf16>, vector<64x64xbf16>, vector<2x64xf32> -> vector<2x64xf32>
    %245 = arith.addf %239, %244 : vector<2x64xf32>
    %c2_232 = arith.constant 2 : index
    %c64_233 = arith.constant 64 : index
    %246 = vector.load %arg16[%c2_232, %c64_233] : memref<4x128xf32, #tpu.memory_space<vmem>>, vector<2x64xf32>
    %247 = arith.truncf %246 : vector<2x64xf32> to vector<2x64xbf16>
    %c8_234 = arith.constant 8 : index
    %c0_235 = arith.constant 0 : index
    %c0_236 = arith.constant 0 : index
    %248 = vector.load %arg13[%c8_234, %c0_235, %c0_236] : memref<9x64x64xbf16, #tpu.memory_space<vmem>>, vector<1x64x64xbf16>
    %249 = vector.shape_cast %248 : vector<1x64x64xbf16> to vector<64x64xbf16>
    %cst_237 = arith.constant dense<0.000000e+00> : vector<2x64xf32>
    %250 = tpu.matmul %247, %249, %cst_237 {dimension_numbers = #tpu.dot_dimension_numbers<[1], [0], [0], [1], [0, 0, 1, 1], [], []>} : vector<2x64xbf16>, vector<64x64xbf16>, vector<2x64xf32> -> vector<2x64xf32>
    %251 = arith.addf %245, %250 : vector<2x64xf32>
    %c0_238 = arith.constant 0 : index
    %c0_239 = arith.constant 0 : index
    %252 = vector.load %arg14[%c0_238, %c0_239] : memref<1x64xf32, #tpu.memory_space<vmem>>, vector<1x64xf32>
    %253 = vector.broadcast %252 : vector<1x64xf32> to vector<2x64xf32>
    %254 = arith.addf %251, %253 : vector<2x64xf32>
    %255 = arith.addf %254, %130 : vector<2x64xf32>
    %cst_240 = arith.constant 0.000000e+00 : f32
    %256 = vector.broadcast %cst_240 : f32 to vector<2x64xf32>
    %257 = arith.maximumf %255, %256 : vector<2x64xf32>
    %c0_241 = arith.constant 0 : index
    %c0_242 = arith.constant 0 : index
    %258 = vector.load %arg15[%c0_241, %c0_242] : memref<2x64xf32, #tpu.memory_space<vmem>>, vector<2x64xf32>
    tpu.vector_store %arg15[%c0_241, %c0_242], %257 {strides = array<i32>} : memref<2x64xf32, #tpu.memory_space<vmem>>, vector<2x64xf32>,
    return
  }
  func.func @transform_0(%arg0: i32) -> (i32, i32) {
    %c0_i32 = arith.constant 0 : i32
    %c0_i32_0 = arith.constant 0 : i32
    %c0_i32_1 = arith.constant 0 : i32
    return %c0_i32, %c0_i32_0 : i32, i32
  }
  func.func @transform_1(%arg0: i32) -> (i32, i32) {
    %c0_i32 = arith.constant 0 : i32
    %c0_i32_0 = arith.constant 0 : i32
    %c0_i32_1 = arith.constant 0 : i32
    return %c0_i32, %c0_i32_0 : i32, i32
  }
  func.func @transform_2(%arg0: i32) -> (i32, i32) {
    %c0_i32 = arith.constant 0 : i32
    %c0_i32_0 = arith.constant 0 : i32
    %c0_i32_1 = arith.constant 0 : i32
    return %c0_i32, %c0_i32_0 : i32, i32
  }
  func.func @transform_3(%arg0: i32) -> (i32, i32) {
    %c0_i32 = arith.constant 0 : i32
    %c0_i32_0 = arith.constant 0 : i32
    %c0_i32_1 = arith.constant 0 : i32
    return %c0_i32, %c0_i32_0 : i32, i32
  }
  func.func @transform_4(%arg0: i32) -> (i32, i32, i32) {
    %c0_i32 = arith.constant 0 : i32
    %c0_i32_0 = arith.constant 0 : i32
    %c0_i32_1 = arith.constant 0 : i32
    %c0_i32_2 = arith.constant 0 : i32
    return %c0_i32, %c0_i32_0, %c0_i32_1 : i32, i32, i32
  }
  func.func @transform_5(%arg0: i32) -> (i32, i32) {
    %c0_i32 = arith.constant 0 : i32
    %c0_i32_0 = arith.constant 0 : i32
    %c0_i32_1 = arith.constant 0 : i32
    return %c0_i32, %c0_i32_0 : i32, i32
  }
  func.func @transform_6(%arg0: i32) -> (i32, i32, i32) {
    %c0_i32 = arith.constant 0 : i32
    %c0_i32_0 = arith.constant 0 : i32
    %c0_i32_1 = arith.constant 0 : i32
    %c0_i32_2 = arith.constant 0 : i32
    return %c0_i32, %c0_i32_0, %c0_i32_1 : i32, i32, i32
  }
  func.func @transform_7(%arg0: i32) -> (i32, i32) {
    %c0_i32 = arith.constant 0 : i32
    %c0_i32_0 = arith.constant 0 : i32
    %c0_i32_1 = arith.constant 0 : i32
    return %c0_i32, %c0_i32_0 : i32, i32
  }
  func.func @transform_8(%arg0: i32) -> (i32, i32) {
    %c0_i32 = arith.constant 0 : i32
    %c0_i32_0 = arith.constant 0 : i32
    %c0_i32_1 = arith.constant 0 : i32
    return %c0_i32, %c0_i32_0 : i32, i32
  }
  func.func @transform_9(%arg0: i32) -> (i32, i32) {
    %c0_i32 = arith.constant 0 : i32
    %c0_i32_0 = arith.constant 0 : i32
    %c0_i32_1 = arith.constant 0 : i32
    return %c0_i32, %c0_i32_0 : i32, i32
  }
  func.func @transform_10(%arg0: i32) -> (i32, i32, i32) {
    %c0_i32 = arith.constant 0 : i32
    %c0_i32_0 = arith.constant 0 : i32
    %c0_i32_1 = arith.constant 0 : i32
    %c0_i32_2 = arith.constant 0 : i32
    return %c0_i32, %c0_i32_0, %c0_i32_1 : i32, i32, i32
  }
  func.func @transform_11(%arg0: i32) -> (i32, i32) {
    %c0_i32 = arith.constant 0 : i32
    %c0_i32_0 = arith.constant 0 : i32
    %c0_i32_1 = arith.constant 0 : i32
    return %c0_i32, %c0_i32_0 : i32, i32
  }
  func.func @transform_12(%arg0: i32) -> (i32, i32, i32) {
    %c0_i32 = arith.constant 0 : i32
    %c0_i32_0 = arith.constant 0 : i32
    %c0_i32_1 = arith.constant 0 : i32
    %c0_i32_2 = arith.constant 0 : i32
    return %c0_i32, %c0_i32_0, %c0_i32_1 : i32, i32, i32
  }
  func.func @transform_13(%arg0: i32) -> (i32, i32) {
    %c0_i32 = arith.constant 0 : i32
    %c0_i32_0 = arith.constant 0 : i32
    %c0_i32_1 = arith.constant 0 : i32
    return %c0_i32, %c0_i32_0 : i32, i32
  }
  func.func @transform_14(%arg0: i32) -> (i32, i32) {
    %c0_i32 = arith.constant 0 : i32
    %c0_i32_0 = arith.constant 0 : i32
    %c0_i32_1 = arith.constant 0 : i32
    return %c0_i32, %c0_i32_0 : i32, i32
  }
}

module attributes {stable_mosaic.version = 11 : i64} {
  func.func @_layer_ds_kernel(%arg0: i32, %arg1: memref<2x64xf32, #tpu.memory_space<vmem>>, %arg2: memref<2x64xf32, #tpu.memory_space<vmem>>, %arg3: memref<2x64xf32, #tpu.memory_space<vmem>>, %arg4: memref<2x64xf32, #tpu.memory_space<vmem>>, %arg5: memref<9x32x64xbf16, #tpu.memory_space<vmem>>, %arg6: memref<1x64xf32, #tpu.memory_space<vmem>>, %arg7: memref<9x64x64xbf16, #tpu.memory_space<vmem>>, %arg8: memref<1x64xf32, #tpu.memory_space<vmem>>, %arg9: memref<32x64xbf16, #tpu.memory_space<vmem>>, %arg10: memref<1x64xf32, #tpu.memory_space<vmem>>, %arg11: memref<9x64x64xbf16, #tpu.memory_space<vmem>>, %arg12: memref<1x64xf32, #tpu.memory_space<vmem>>, %arg13: memref<9x64x64xbf16, #tpu.memory_space<vmem>>, %arg14: memref<1x64xf32, #tpu.memory_space<vmem>>, %arg15: memref<1x64xf32, #tpu.memory_space<vmem>>, %arg16: memref<3x192xf32, #tpu.memory_space<vmem>>) attributes {dimension_semantics = [#tpu.dimension_semantics<arbitrary>], iteration_bounds = array<i64: 1>, scalar_prefetch = 0 : i64, scratch_operands = 1 : i64, tpu.core_type = #tpu.core_type<tc>, window_params = [{pipeline_mode = #tpu.pipeline_mode<synchronous>, transform_indices = @transform_0, window_bounds = array<i64: 2, 64>}, {pipeline_mode = #tpu.pipeline_mode<synchronous>, transform_indices = @transform_1, window_bounds = array<i64: 2, 64>}, {pipeline_mode = #tpu.pipeline_mode<synchronous>, transform_indices = @transform_2, window_bounds = array<i64: 2, 64>}, {pipeline_mode = #tpu.pipeline_mode<synchronous>, transform_indices = @transform_3, window_bounds = array<i64: 2, 64>}, {pipeline_mode = #tpu.pipeline_mode<synchronous>, transform_indices = @transform_4, window_bounds = array<i64: 9, 32, 64>}, {pipeline_mode = #tpu.pipeline_mode<synchronous>, transform_indices = @transform_5, window_bounds = array<i64: 1, 64>}, {pipeline_mode = #tpu.pipeline_mode<synchronous>, transform_indices = @transform_6, window_bounds = array<i64: 9, 64, 64>}, {pipeline_mode = #tpu.pipeline_mode<synchronous>, transform_indices = @transform_7, window_bounds = array<i64: 1, 64>}, {pipeline_mode = #tpu.pipeline_mode<synchronous>, transform_indices = @transform_8, window_bounds = array<i64: 32, 64>}, {pipeline_mode = #tpu.pipeline_mode<synchronous>, transform_indices = @transform_9, window_bounds = array<i64: 1, 64>}, {pipeline_mode = #tpu.pipeline_mode<synchronous>, transform_indices = @transform_10, window_bounds = array<i64: 9, 64, 64>}, {pipeline_mode = #tpu.pipeline_mode<synchronous>, transform_indices = @transform_11, window_bounds = array<i64: 1, 64>}, {pipeline_mode = #tpu.pipeline_mode<synchronous>, transform_indices = @transform_12, window_bounds = array<i64: 9, 64, 64>}, {pipeline_mode = #tpu.pipeline_mode<synchronous>, transform_indices = @transform_13, window_bounds = array<i64: 1, 64>}, {pipeline_mode = #tpu.pipeline_mode<synchronous>, transform_indices = @transform_14, window_bounds = array<i64: 1, 64>}]} {
    %cst = arith.constant 0.000000e+00 : f32
    %0 = vector.broadcast %cst : f32 to vector<1x64xf32>
    %c0 = arith.constant 0 : index
    %c0_0 = arith.constant 0 : index
    %1 = vector.load %arg1[%c0, %c0_0] : memref<2x64xf32, #tpu.memory_space<vmem>>, vector<1x32xf32>
    %2 = arith.truncf %1 : vector<1x32xf32> to vector<1x32xbf16>
    %c0_1 = arith.constant 0 : index
    %c0_2 = arith.constant 0 : index
    %c0_3 = arith.constant 0 : index
    %3 = vector.load %arg5[%c0_1, %c0_2, %c0_3] : memref<9x32x64xbf16, #tpu.memory_space<vmem>>, vector<1x32x64xbf16>
    %4 = vector.shape_cast %3 : vector<1x32x64xbf16> to vector<32x64xbf16>
    %cst_4 = arith.constant dense<0.000000e+00> : vector<1x64xf32>
    %5 = tpu.matmul %2, %4, %cst_4 {dimension_numbers = #tpu.dot_dimension_numbers<[1], [0], [0], [1], [0, 0, 1, 1], [], []>} : vector<1x32xbf16>, vector<32x64xbf16>, vector<1x64xf32> -> vector<1x64xf32>
    %6 = arith.addf %0, %5 : vector<1x64xf32>
    %c0_5 = arith.constant 0 : index
    %c0_6 = arith.constant 0 : index
    %7 = vector.load %arg2[%c0_5, %c0_6] : memref<2x64xf32, #tpu.memory_space<vmem>>, vector<1x32xf32>
    %8 = arith.truncf %7 : vector<1x32xf32> to vector<1x32xbf16>
    %c1 = arith.constant 1 : index
    %c0_7 = arith.constant 0 : index
    %c0_8 = arith.constant 0 : index
    %9 = vector.load %arg5[%c1, %c0_7, %c0_8] : memref<9x32x64xbf16, #tpu.memory_space<vmem>>, vector<1x32x64xbf16>
    %10 = vector.shape_cast %9 : vector<1x32x64xbf16> to vector<32x64xbf16>
    %cst_9 = arith.constant dense<0.000000e+00> : vector<1x64xf32>
    %11 = tpu.matmul %8, %10, %cst_9 {dimension_numbers = #tpu.dot_dimension_numbers<[1], [0], [0], [1], [0, 0, 1, 1], [], []>} : vector<1x32xbf16>, vector<32x64xbf16>, vector<1x64xf32> -> vector<1x64xf32>
    %12 = arith.addf %6, %11 : vector<1x64xf32>
    %c0_10 = arith.constant 0 : index
    %c32 = arith.constant 32 : index
    %13 = vector.load %arg1[%c0_10, %c32] : memref<2x64xf32, #tpu.memory_space<vmem>>, vector<1x32xf32>
    %14 = arith.truncf %13 : vector<1x32xf32> to vector<1x32xbf16>
    %c2 = arith.constant 2 : index
    %c0_11 = arith.constant 0 : index
    %c0_12 = arith.constant 0 : index
    %15 = vector.load %arg5[%c2, %c0_11, %c0_12] : memref<9x32x64xbf16, #tpu.memory_space<vmem>>, vector<1x32x64xbf16>
    %16 = vector.shape_cast %15 : vector<1x32x64xbf16> to vector<32x64xbf16>
    %cst_13 = arith.constant dense<0.000000e+00> : vector<1x64xf32>
    %17 = tpu.matmul %14, %16, %cst_13 {dimension_numbers = #tpu.dot_dimension_numbers<[1], [0], [0], [1], [0, 0, 1, 1], [], []>} : vector<1x32xbf16>, vector<32x64xbf16>, vector<1x64xf32> -> vector<1x64xf32>
    %18 = arith.addf %12, %17 : vector<1x64xf32>
    %c0_14 = arith.constant 0 : index
    %c0_15 = arith.constant 0 : index
    %19 = vector.load %arg3[%c0_14, %c0_15] : memref<2x64xf32, #tpu.memory_space<vmem>>, vector<1x32xf32>
    %20 = arith.truncf %19 : vector<1x32xf32> to vector<1x32xbf16>
    %c3 = arith.constant 3 : index
    %c0_16 = arith.constant 0 : index
    %c0_17 = arith.constant 0 : index
    %21 = vector.load %arg5[%c3, %c0_16, %c0_17] : memref<9x32x64xbf16, #tpu.memory_space<vmem>>, vector<1x32x64xbf16>
    %22 = vector.shape_cast %21 : vector<1x32x64xbf16> to vector<32x64xbf16>
    %cst_18 = arith.constant dense<0.000000e+00> : vector<1x64xf32>
    %23 = tpu.matmul %20, %22, %cst_18 {dimension_numbers = #tpu.dot_dimension_numbers<[1], [0], [0], [1], [0, 0, 1, 1], [], []>} : vector<1x32xbf16>, vector<32x64xbf16>, vector<1x64xf32> -> vector<1x64xf32>
    %24 = arith.addf %18, %23 : vector<1x64xf32>
    %c0_19 = arith.constant 0 : index
    %c0_20 = arith.constant 0 : index
    %25 = vector.load %arg4[%c0_19, %c0_20] : memref<2x64xf32, #tpu.memory_space<vmem>>, vector<1x32xf32>
    %26 = arith.truncf %25 : vector<1x32xf32> to vector<1x32xbf16>
    %c4 = arith.constant 4 : index
    %c0_21 = arith.constant 0 : index
    %c0_22 = arith.constant 0 : index
    %27 = vector.load %arg5[%c4, %c0_21, %c0_22] : memref<9x32x64xbf16, #tpu.memory_space<vmem>>, vector<1x32x64xbf16>
    %28 = vector.shape_cast %27 : vector<1x32x64xbf16> to vector<32x64xbf16>
    %cst_23 = arith.constant dense<0.000000e+00> : vector<1x64xf32>
    %29 = tpu.matmul %26, %28, %cst_23 {dimension_numbers = #tpu.dot_dimension_numbers<[1], [0], [0], [1], [0, 0, 1, 1], [], []>} : vector<1x32xbf16>, vector<32x64xbf16>, vector<1x64xf32> -> vector<1x64xf32>
    %30 = arith.addf %24, %29 : vector<1x64xf32>
    %c0_24 = arith.constant 0 : index
    %c32_25 = arith.constant 32 : index
    %31 = vector.load %arg3[%c0_24, %c32_25] : memref<2x64xf32, #tpu.memory_space<vmem>>, vector<1x32xf32>
    %32 = arith.truncf %31 : vector<1x32xf32> to vector<1x32xbf16>
    %c5 = arith.constant 5 : index
    %c0_26 = arith.constant 0 : index
    %c0_27 = arith.constant 0 : index
    %33 = vector.load %arg5[%c5, %c0_26, %c0_27] : memref<9x32x64xbf16, #tpu.memory_space<vmem>>, vector<1x32x64xbf16>
    %34 = vector.shape_cast %33 : vector<1x32x64xbf16> to vector<32x64xbf16>
    %cst_28 = arith.constant dense<0.000000e+00> : vector<1x64xf32>
    %35 = tpu.matmul %32, %34, %cst_28 {dimension_numbers = #tpu.dot_dimension_numbers<[1], [0], [0], [1], [0, 0, 1, 1], [], []>} : vector<1x32xbf16>, vector<32x64xbf16>, vector<1x64xf32> -> vector<1x64xf32>
    %36 = arith.addf %30, %35 : vector<1x64xf32>
    %c1_29 = arith.constant 1 : index
    %c0_30 = arith.constant 0 : index
    %37 = vector.load %arg1[%c1_29, %c0_30] : memref<2x64xf32, #tpu.memory_space<vmem>>, vector<1x32xf32>
    %38 = arith.truncf %37 : vector<1x32xf32> to vector<1x32xbf16>
    %c6 = arith.constant 6 : index
    %c0_31 = arith.constant 0 : index
    %c0_32 = arith.constant 0 : index
    %39 = vector.load %arg5[%c6, %c0_31, %c0_32] : memref<9x32x64xbf16, #tpu.memory_space<vmem>>, vector<1x32x64xbf16>
    %40 = vector.shape_cast %39 : vector<1x32x64xbf16> to vector<32x64xbf16>
    %cst_33 = arith.constant dense<0.000000e+00> : vector<1x64xf32>
    %41 = tpu.matmul %38, %40, %cst_33 {dimension_numbers = #tpu.dot_dimension_numbers<[1], [0], [0], [1], [0, 0, 1, 1], [], []>} : vector<1x32xbf16>, vector<32x64xbf16>, vector<1x64xf32> -> vector<1x64xf32>
    %42 = arith.addf %36, %41 : vector<1x64xf32>
    %c1_34 = arith.constant 1 : index
    %c0_35 = arith.constant 0 : index
    %43 = vector.load %arg2[%c1_34, %c0_35] : memref<2x64xf32, #tpu.memory_space<vmem>>, vector<1x32xf32>
    %44 = arith.truncf %43 : vector<1x32xf32> to vector<1x32xbf16>
    %c7 = arith.constant 7 : index
    %c0_36 = arith.constant 0 : index
    %c0_37 = arith.constant 0 : index
    %45 = vector.load %arg5[%c7, %c0_36, %c0_37] : memref<9x32x64xbf16, #tpu.memory_space<vmem>>, vector<1x32x64xbf16>
    %46 = vector.shape_cast %45 : vector<1x32x64xbf16> to vector<32x64xbf16>
    %cst_38 = arith.constant dense<0.000000e+00> : vector<1x64xf32>
    %47 = tpu.matmul %44, %46, %cst_38 {dimension_numbers = #tpu.dot_dimension_numbers<[1], [0], [0], [1], [0, 0, 1, 1], [], []>} : vector<1x32xbf16>, vector<32x64xbf16>, vector<1x64xf32> -> vector<1x64xf32>
    %48 = arith.addf %42, %47 : vector<1x64xf32>
    %c1_39 = arith.constant 1 : index
    %c32_40 = arith.constant 32 : index
    %49 = vector.load %arg1[%c1_39, %c32_40] : memref<2x64xf32, #tpu.memory_space<vmem>>, vector<1x32xf32>
    %50 = arith.truncf %49 : vector<1x32xf32> to vector<1x32xbf16>
    %c8 = arith.constant 8 : index
    %c0_41 = arith.constant 0 : index
    %c0_42 = arith.constant 0 : index
    %51 = vector.load %arg5[%c8, %c0_41, %c0_42] : memref<9x32x64xbf16, #tpu.memory_space<vmem>>, vector<1x32x64xbf16>
    %52 = vector.shape_cast %51 : vector<1x32x64xbf16> to vector<32x64xbf16>
    %cst_43 = arith.constant dense<0.000000e+00> : vector<1x64xf32>
    %53 = tpu.matmul %50, %52, %cst_43 {dimension_numbers = #tpu.dot_dimension_numbers<[1], [0], [0], [1], [0, 0, 1, 1], [], []>} : vector<1x32xbf16>, vector<32x64xbf16>, vector<1x64xf32> -> vector<1x64xf32>
    %54 = arith.addf %48, %53 : vector<1x64xf32>
    %c0_44 = arith.constant 0 : index
    %c0_45 = arith.constant 0 : index
    %55 = vector.load %arg6[%c0_44, %c0_45] : memref<1x64xf32, #tpu.memory_space<vmem>>, vector<1x64xf32>
    %56 = arith.addf %54, %55 : vector<1x64xf32>
    %cst_46 = arith.constant 0.000000e+00 : f32
    %57 = vector.broadcast %cst_46 : f32 to vector<1x64xf32>
    %58 = arith.maximumf %56, %57 : vector<1x64xf32>
    %cst_47 = arith.constant 0.000000e+00 : f32
    %59 = vector.broadcast %cst_47 : f32 to vector<3x192xf32>
    %c0_48 = arith.constant 0 : index
    %c0_49 = arith.constant 0 : index
    %60 = vector.load %arg16[%c0_48, %c0_49] : memref<3x192xf32, #tpu.memory_space<vmem>>, vector<3x192xf32>
    tpu.vector_store %arg16[%c0_48, %c0_49], %59 {strides = array<i32>} : memref<3x192xf32, #tpu.memory_space<vmem>>, vector<3x192xf32>,
    %c1_50 = arith.constant 1 : index
    %c64 = arith.constant 64 : index
    %61 = vector.load %arg16[%c1_50, %c64] : memref<3x192xf32, #tpu.memory_space<vmem>>, vector<1x64xf32>
    tpu.vector_store %arg16[%c1_50, %c64], %58 {strides = array<i32>} : memref<3x192xf32, #tpu.memory_space<vmem>>, vector<1x64xf32>,
    %cst_51 = arith.constant 0.000000e+00 : f32
    %62 = vector.broadcast %cst_51 : f32 to vector<1x64xf32>
    %c0_52 = arith.constant 0 : index
    %c0_53 = arith.constant 0 : index
    %63 = vector.load %arg16[%c0_52, %c0_53] : memref<3x192xf32, #tpu.memory_space<vmem>>, vector<1x64xf32>
    %64 = arith.truncf %63 : vector<1x64xf32> to vector<1x64xbf16>
    %c0_54 = arith.constant 0 : index
    %c0_55 = arith.constant 0 : index
    %c0_56 = arith.constant 0 : index
    %65 = vector.load %arg7[%c0_54, %c0_55, %c0_56] : memref<9x64x64xbf16, #tpu.memory_space<vmem>>, vector<1x64x64xbf16>
    %66 = vector.shape_cast %65 : vector<1x64x64xbf16> to vector<64x64xbf16>
    %cst_57 = arith.constant dense<0.000000e+00> : vector<1x64xf32>
    %67 = tpu.matmul %64, %66, %cst_57 {dimension_numbers = #tpu.dot_dimension_numbers<[1], [0], [0], [1], [0, 0, 1, 1], [], []>} : vector<1x64xbf16>, vector<64x64xbf16>, vector<1x64xf32> -> vector<1x64xf32>
    %68 = arith.addf %62, %67 : vector<1x64xf32>
    %c0_58 = arith.constant 0 : index
    %c64_59 = arith.constant 64 : index
    %69 = vector.load %arg16[%c0_58, %c64_59] : memref<3x192xf32, #tpu.memory_space<vmem>>, vector<1x64xf32>
    %70 = arith.truncf %69 : vector<1x64xf32> to vector<1x64xbf16>
    %c1_60 = arith.constant 1 : index
    %c0_61 = arith.constant 0 : index
    %c0_62 = arith.constant 0 : index
    %71 = vector.load %arg7[%c1_60, %c0_61, %c0_62] : memref<9x64x64xbf16, #tpu.memory_space<vmem>>, vector<1x64x64xbf16>
    %72 = vector.shape_cast %71 : vector<1x64x64xbf16> to vector<64x64xbf16>
    %cst_63 = arith.constant dense<0.000000e+00> : vector<1x64xf32>
    %73 = tpu.matmul %70, %72, %cst_63 {dimension_numbers = #tpu.dot_dimension_numbers<[1], [0], [0], [1], [0, 0, 1, 1], [], []>} : vector<1x64xbf16>, vector<64x64xbf16>, vector<1x64xf32> -> vector<1x64xf32>
    %74 = arith.addf %68, %73 : vector<1x64xf32>
    %c0_64 = arith.constant 0 : index
    %c128 = arith.constant 128 : index
    %75 = vector.load %arg16[%c0_64, %c128] : memref<3x192xf32, #tpu.memory_space<vmem>>, vector<1x64xf32>
    %76 = arith.truncf %75 : vector<1x64xf32> to vector<1x64xbf16>
    %c2_65 = arith.constant 2 : index
    %c0_66 = arith.constant 0 : index
    %c0_67 = arith.constant 0 : index
    %77 = vector.load %arg7[%c2_65, %c0_66, %c0_67] : memref<9x64x64xbf16, #tpu.memory_space<vmem>>, vector<1x64x64xbf16>
    %78 = vector.shape_cast %77 : vector<1x64x64xbf16> to vector<64x64xbf16>
    %cst_68 = arith.constant dense<0.000000e+00> : vector<1x64xf32>
    %79 = tpu.matmul %76, %78, %cst_68 {dimension_numbers = #tpu.dot_dimension_numbers<[1], [0], [0], [1], [0, 0, 1, 1], [], []>} : vector<1x64xbf16>, vector<64x64xbf16>, vector<1x64xf32> -> vector<1x64xf32>
    %80 = arith.addf %74, %79 : vector<1x64xf32>
    %c1_69 = arith.constant 1 : index
    %c0_70 = arith.constant 0 : index
    %81 = vector.load %arg16[%c1_69, %c0_70] : memref<3x192xf32, #tpu.memory_space<vmem>>, vector<1x64xf32>
    %82 = arith.truncf %81 : vector<1x64xf32> to vector<1x64xbf16>
    %c3_71 = arith.constant 3 : index
    %c0_72 = arith.constant 0 : index
    %c0_73 = arith.constant 0 : index
    %83 = vector.load %arg7[%c3_71, %c0_72, %c0_73] : memref<9x64x64xbf16, #tpu.memory_space<vmem>>, vector<1x64x64xbf16>
    %84 = vector.shape_cast %83 : vector<1x64x64xbf16> to vector<64x64xbf16>
    %cst_74 = arith.constant dense<0.000000e+00> : vector<1x64xf32>
    %85 = tpu.matmul %82, %84, %cst_74 {dimension_numbers = #tpu.dot_dimension_numbers<[1], [0], [0], [1], [0, 0, 1, 1], [], []>} : vector<1x64xbf16>, vector<64x64xbf16>, vector<1x64xf32> -> vector<1x64xf32>
    %86 = arith.addf %80, %85 : vector<1x64xf32>
    %c1_75 = arith.constant 1 : index
    %c64_76 = arith.constant 64 : index
    %87 = vector.load %arg16[%c1_75, %c64_76] : memref<3x192xf32, #tpu.memory_space<vmem>>, vector<1x64xf32>
    %88 = arith.truncf %87 : vector<1x64xf32> to vector<1x64xbf16>
    %c4_77 = arith.constant 4 : index
    %c0_78 = arith.constant 0 : index
    %c0_79 = arith.constant 0 : index
    %89 = vector.load %arg7[%c4_77, %c0_78, %c0_79] : memref<9x64x64xbf16, #tpu.memory_space<vmem>>, vector<1x64x64xbf16>
    %90 = vector.shape_cast %89 : vector<1x64x64xbf16> to vector<64x64xbf16>
    %cst_80 = arith.constant dense<0.000000e+00> : vector<1x64xf32>
    %91 = tpu.matmul %88, %90, %cst_80 {dimension_numbers = #tpu.dot_dimension_numbers<[1], [0], [0], [1], [0, 0, 1, 1], [], []>} : vector<1x64xbf16>, vector<64x64xbf16>, vector<1x64xf32> -> vector<1x64xf32>
    %92 = arith.addf %86, %91 : vector<1x64xf32>
    %c1_81 = arith.constant 1 : index
    %c128_82 = arith.constant 128 : index
    %93 = vector.load %arg16[%c1_81, %c128_82] : memref<3x192xf32, #tpu.memory_space<vmem>>, vector<1x64xf32>
    %94 = arith.truncf %93 : vector<1x64xf32> to vector<1x64xbf16>
    %c5_83 = arith.constant 5 : index
    %c0_84 = arith.constant 0 : index
    %c0_85 = arith.constant 0 : index
    %95 = vector.load %arg7[%c5_83, %c0_84, %c0_85] : memref<9x64x64xbf16, #tpu.memory_space<vmem>>, vector<1x64x64xbf16>
    %96 = vector.shape_cast %95 : vector<1x64x64xbf16> to vector<64x64xbf16>
    %cst_86 = arith.constant dense<0.000000e+00> : vector<1x64xf32>
    %97 = tpu.matmul %94, %96, %cst_86 {dimension_numbers = #tpu.dot_dimension_numbers<[1], [0], [0], [1], [0, 0, 1, 1], [], []>} : vector<1x64xbf16>, vector<64x64xbf16>, vector<1x64xf32> -> vector<1x64xf32>
    %98 = arith.addf %92, %97 : vector<1x64xf32>
    %c2_87 = arith.constant 2 : index
    %c0_88 = arith.constant 0 : index
    %99 = vector.load %arg16[%c2_87, %c0_88] : memref<3x192xf32, #tpu.memory_space<vmem>>, vector<1x64xf32>
    %100 = arith.truncf %99 : vector<1x64xf32> to vector<1x64xbf16>
    %c6_89 = arith.constant 6 : index
    %c0_90 = arith.constant 0 : index
    %c0_91 = arith.constant 0 : index
    %101 = vector.load %arg7[%c6_89, %c0_90, %c0_91] : memref<9x64x64xbf16, #tpu.memory_space<vmem>>, vector<1x64x64xbf16>
    %102 = vector.shape_cast %101 : vector<1x64x64xbf16> to vector<64x64xbf16>
    %cst_92 = arith.constant dense<0.000000e+00> : vector<1x64xf32>
    %103 = tpu.matmul %100, %102, %cst_92 {dimension_numbers = #tpu.dot_dimension_numbers<[1], [0], [0], [1], [0, 0, 1, 1], [], []>} : vector<1x64xbf16>, vector<64x64xbf16>, vector<1x64xf32> -> vector<1x64xf32>
    %104 = arith.addf %98, %103 : vector<1x64xf32>
    %c2_93 = arith.constant 2 : index
    %c64_94 = arith.constant 64 : index
    %105 = vector.load %arg16[%c2_93, %c64_94] : memref<3x192xf32, #tpu.memory_space<vmem>>, vector<1x64xf32>
    %106 = arith.truncf %105 : vector<1x64xf32> to vector<1x64xbf16>
    %c7_95 = arith.constant 7 : index
    %c0_96 = arith.constant 0 : index
    %c0_97 = arith.constant 0 : index
    %107 = vector.load %arg7[%c7_95, %c0_96, %c0_97] : memref<9x64x64xbf16, #tpu.memory_space<vmem>>, vector<1x64x64xbf16>
    %108 = vector.shape_cast %107 : vector<1x64x64xbf16> to vector<64x64xbf16>
    %cst_98 = arith.constant dense<0.000000e+00> : vector<1x64xf32>
    %109 = tpu.matmul %106, %108, %cst_98 {dimension_numbers = #tpu.dot_dimension_numbers<[1], [0], [0], [1], [0, 0, 1, 1], [], []>} : vector<1x64xbf16>, vector<64x64xbf16>, vector<1x64xf32> -> vector<1x64xf32>
    %110 = arith.addf %104, %109 : vector<1x64xf32>
    %c2_99 = arith.constant 2 : index
    %c128_100 = arith.constant 128 : index
    %111 = vector.load %arg16[%c2_99, %c128_100] : memref<3x192xf32, #tpu.memory_space<vmem>>, vector<1x64xf32>
    %112 = arith.truncf %111 : vector<1x64xf32> to vector<1x64xbf16>
    %c8_101 = arith.constant 8 : index
    %c0_102 = arith.constant 0 : index
    %c0_103 = arith.constant 0 : index
    %113 = vector.load %arg7[%c8_101, %c0_102, %c0_103] : memref<9x64x64xbf16, #tpu.memory_space<vmem>>, vector<1x64x64xbf16>
    %114 = vector.shape_cast %113 : vector<1x64x64xbf16> to vector<64x64xbf16>
    %cst_104 = arith.constant dense<0.000000e+00> : vector<1x64xf32>
    %115 = tpu.matmul %112, %114, %cst_104 {dimension_numbers = #tpu.dot_dimension_numbers<[1], [0], [0], [1], [0, 0, 1, 1], [], []>} : vector<1x64xbf16>, vector<64x64xbf16>, vector<1x64xf32> -> vector<1x64xf32>
    %116 = arith.addf %110, %115 : vector<1x64xf32>
    %c0_105 = arith.constant 0 : index
    %c0_106 = arith.constant 0 : index
    %117 = vector.load %arg4[%c0_105, %c0_106] : memref<2x64xf32, #tpu.memory_space<vmem>>, vector<1x32xf32>
    %118 = arith.truncf %117 : vector<1x32xf32> to vector<1x32xbf16>
    %c0_107 = arith.constant 0 : index
    %c0_108 = arith.constant 0 : index
    %119 = vector.load %arg9[%c0_107, %c0_108] : memref<32x64xbf16, #tpu.memory_space<vmem>>, vector<32x64xbf16>
    %cst_109 = arith.constant dense<0.000000e+00> : vector<1x64xf32>
    %120 = tpu.matmul %118, %119, %cst_109 {dimension_numbers = #tpu.dot_dimension_numbers<[1], [0], [0], [1], [0, 0, 1, 1], [], []>} : vector<1x32xbf16>, vector<32x64xbf16>, vector<1x64xf32> -> vector<1x64xf32>
    %c0_110 = arith.constant 0 : index
    %c0_111 = arith.constant 0 : index
    %121 = vector.load %arg10[%c0_110, %c0_111] : memref<1x64xf32, #tpu.memory_space<vmem>>, vector<1x64xf32>
    %122 = arith.addf %120, %121 : vector<1x64xf32>
    %c0_112 = arith.constant 0 : index
    %c0_113 = arith.constant 0 : index
    %123 = vector.load %arg8[%c0_112, %c0_113] : memref<1x64xf32, #tpu.memory_space<vmem>>, vector<1x64xf32>
    %124 = arith.addf %116, %123 : vector<1x64xf32>
    %125 = arith.addf %124, %122 : vector<1x64xf32>
    %cst_114 = arith.constant 0.000000e+00 : f32
    %126 = vector.broadcast %cst_114 : f32 to vector<1x64xf32>
    %127 = arith.maximumf %125, %126 : vector<1x64xf32>
    %cst_115 = arith.constant 0.000000e+00 : f32
    %128 = vector.broadcast %cst_115 : f32 to vector<3x192xf32>
    %c0_116 = arith.constant 0 : index
    %c0_117 = arith.constant 0 : index
    %129 = vector.load %arg16[%c0_116, %c0_117] : memref<3x192xf32, #tpu.memory_space<vmem>>, vector<3x192xf32>
    tpu.vector_store %arg16[%c0_116, %c0_117], %128 {strides = array<i32>} : memref<3x192xf32, #tpu.memory_space<vmem>>, vector<3x192xf32>,
    %c1_118 = arith.constant 1 : index
    %c64_119 = arith.constant 64 : index
    %130 = vector.load %arg16[%c1_118, %c64_119] : memref<3x192xf32, #tpu.memory_space<vmem>>, vector<1x64xf32>
    tpu.vector_store %arg16[%c1_118, %c64_119], %127 {strides = array<i32>} : memref<3x192xf32, #tpu.memory_space<vmem>>, vector<1x64xf32>,
    %cst_120 = arith.constant 0.000000e+00 : f32
    %131 = vector.broadcast %cst_120 : f32 to vector<1x64xf32>
    %c0_121 = arith.constant 0 : index
    %c0_122 = arith.constant 0 : index
    %132 = vector.load %arg16[%c0_121, %c0_122] : memref<3x192xf32, #tpu.memory_space<vmem>>, vector<1x64xf32>
    %133 = arith.truncf %132 : vector<1x64xf32> to vector<1x64xbf16>
    %c0_123 = arith.constant 0 : index
    %c0_124 = arith.constant 0 : index
    %c0_125 = arith.constant 0 : index
    %134 = vector.load %arg11[%c0_123, %c0_124, %c0_125] : memref<9x64x64xbf16, #tpu.memory_space<vmem>>, vector<1x64x64xbf16>
    %135 = vector.shape_cast %134 : vector<1x64x64xbf16> to vector<64x64xbf16>
    %cst_126 = arith.constant dense<0.000000e+00> : vector<1x64xf32>
    %136 = tpu.matmul %133, %135, %cst_126 {dimension_numbers = #tpu.dot_dimension_numbers<[1], [0], [0], [1], [0, 0, 1, 1], [], []>} : vector<1x64xbf16>, vector<64x64xbf16>, vector<1x64xf32> -> vector<1x64xf32>
    %137 = arith.addf %131, %136 : vector<1x64xf32>
    %c0_127 = arith.constant 0 : index
    %c64_128 = arith.constant 64 : index
    %138 = vector.load %arg16[%c0_127, %c64_128] : memref<3x192xf32, #tpu.memory_space<vmem>>, vector<1x64xf32>
    %139 = arith.truncf %138 : vector<1x64xf32> to vector<1x64xbf16>
    %c1_129 = arith.constant 1 : index
    %c0_130 = arith.constant 0 : index
    %c0_131 = arith.constant 0 : index
    %140 = vector.load %arg11[%c1_129, %c0_130, %c0_131] : memref<9x64x64xbf16, #tpu.memory_space<vmem>>, vector<1x64x64xbf16>
    %141 = vector.shape_cast %140 : vector<1x64x64xbf16> to vector<64x64xbf16>
    %cst_132 = arith.constant dense<0.000000e+00> : vector<1x64xf32>
    %142 = tpu.matmul %139, %141, %cst_132 {dimension_numbers = #tpu.dot_dimension_numbers<[1], [0], [0], [1], [0, 0, 1, 1], [], []>} : vector<1x64xbf16>, vector<64x64xbf16>, vector<1x64xf32> -> vector<1x64xf32>
    %143 = arith.addf %137, %142 : vector<1x64xf32>
    %c0_133 = arith.constant 0 : index
    %c128_134 = arith.constant 128 : index
    %144 = vector.load %arg16[%c0_133, %c128_134] : memref<3x192xf32, #tpu.memory_space<vmem>>, vector<1x64xf32>
    %145 = arith.truncf %144 : vector<1x64xf32> to vector<1x64xbf16>
    %c2_135 = arith.constant 2 : index
    %c0_136 = arith.constant 0 : index
    %c0_137 = arith.constant 0 : index
    %146 = vector.load %arg11[%c2_135, %c0_136, %c0_137] : memref<9x64x64xbf16, #tpu.memory_space<vmem>>, vector<1x64x64xbf16>
    %147 = vector.shape_cast %146 : vector<1x64x64xbf16> to vector<64x64xbf16>
    %cst_138 = arith.constant dense<0.000000e+00> : vector<1x64xf32>
    %148 = tpu.matmul %145, %147, %cst_138 {dimension_numbers = #tpu.dot_dimension_numbers<[1], [0], [0], [1], [0, 0, 1, 1], [], []>} : vector<1x64xbf16>, vector<64x64xbf16>, vector<1x64xf32> -> vector<1x64xf32>
    %149 = arith.addf %143, %148 : vector<1x64xf32>
    %c1_139 = arith.constant 1 : index
    %c0_140 = arith.constant 0 : index
    %150 = vector.load %arg16[%c1_139, %c0_140] : memref<3x192xf32, #tpu.memory_space<vmem>>, vector<1x64xf32>
    %151 = arith.truncf %150 : vector<1x64xf32> to vector<1x64xbf16>
    %c3_141 = arith.constant 3 : index
    %c0_142 = arith.constant 0 : index
    %c0_143 = arith.constant 0 : index
    %152 = vector.load %arg11[%c3_141, %c0_142, %c0_143] : memref<9x64x64xbf16, #tpu.memory_space<vmem>>, vector<1x64x64xbf16>
    %153 = vector.shape_cast %152 : vector<1x64x64xbf16> to vector<64x64xbf16>
    %cst_144 = arith.constant dense<0.000000e+00> : vector<1x64xf32>
    %154 = tpu.matmul %151, %153, %cst_144 {dimension_numbers = #tpu.dot_dimension_numbers<[1], [0], [0], [1], [0, 0, 1, 1], [], []>} : vector<1x64xbf16>, vector<64x64xbf16>, vector<1x64xf32> -> vector<1x64xf32>
    %155 = arith.addf %149, %154 : vector<1x64xf32>
    %c1_145 = arith.constant 1 : index
    %c64_146 = arith.constant 64 : index
    %156 = vector.load %arg16[%c1_145, %c64_146] : memref<3x192xf32, #tpu.memory_space<vmem>>, vector<1x64xf32>
    %157 = arith.truncf %156 : vector<1x64xf32> to vector<1x64xbf16>
    %c4_147 = arith.constant 4 : index
    %c0_148 = arith.constant 0 : index
    %c0_149 = arith.constant 0 : index
    %158 = vector.load %arg11[%c4_147, %c0_148, %c0_149] : memref<9x64x64xbf16, #tpu.memory_space<vmem>>, vector<1x64x64xbf16>
    %159 = vector.shape_cast %158 : vector<1x64x64xbf16> to vector<64x64xbf16>
    %cst_150 = arith.constant dense<0.000000e+00> : vector<1x64xf32>
    %160 = tpu.matmul %157, %159, %cst_150 {dimension_numbers = #tpu.dot_dimension_numbers<[1], [0], [0], [1], [0, 0, 1, 1], [], []>} : vector<1x64xbf16>, vector<64x64xbf16>, vector<1x64xf32> -> vector<1x64xf32>
    %161 = arith.addf %155, %160 : vector<1x64xf32>
    %c1_151 = arith.constant 1 : index
    %c128_152 = arith.constant 128 : index
    %162 = vector.load %arg16[%c1_151, %c128_152] : memref<3x192xf32, #tpu.memory_space<vmem>>, vector<1x64xf32>
    %163 = arith.truncf %162 : vector<1x64xf32> to vector<1x64xbf16>
    %c5_153 = arith.constant 5 : index
    %c0_154 = arith.constant 0 : index
    %c0_155 = arith.constant 0 : index
    %164 = vector.load %arg11[%c5_153, %c0_154, %c0_155] : memref<9x64x64xbf16, #tpu.memory_space<vmem>>, vector<1x64x64xbf16>
    %165 = vector.shape_cast %164 : vector<1x64x64xbf16> to vector<64x64xbf16>
    %cst_156 = arith.constant dense<0.000000e+00> : vector<1x64xf32>
    %166 = tpu.matmul %163, %165, %cst_156 {dimension_numbers = #tpu.dot_dimension_numbers<[1], [0], [0], [1], [0, 0, 1, 1], [], []>} : vector<1x64xbf16>, vector<64x64xbf16>, vector<1x64xf32> -> vector<1x64xf32>
    %167 = arith.addf %161, %166 : vector<1x64xf32>
    %c2_157 = arith.constant 2 : index
    %c0_158 = arith.constant 0 : index
    %168 = vector.load %arg16[%c2_157, %c0_158] : memref<3x192xf32, #tpu.memory_space<vmem>>, vector<1x64xf32>
    %169 = arith.truncf %168 : vector<1x64xf32> to vector<1x64xbf16>
    %c6_159 = arith.constant 6 : index
    %c0_160 = arith.constant 0 : index
    %c0_161 = arith.constant 0 : index
    %170 = vector.load %arg11[%c6_159, %c0_160, %c0_161] : memref<9x64x64xbf16, #tpu.memory_space<vmem>>, vector<1x64x64xbf16>
    %171 = vector.shape_cast %170 : vector<1x64x64xbf16> to vector<64x64xbf16>
    %cst_162 = arith.constant dense<0.000000e+00> : vector<1x64xf32>
    %172 = tpu.matmul %169, %171, %cst_162 {dimension_numbers = #tpu.dot_dimension_numbers<[1], [0], [0], [1], [0, 0, 1, 1], [], []>} : vector<1x64xbf16>, vector<64x64xbf16>, vector<1x64xf32> -> vector<1x64xf32>
    %173 = arith.addf %167, %172 : vector<1x64xf32>
    %c2_163 = arith.constant 2 : index
    %c64_164 = arith.constant 64 : index
    %174 = vector.load %arg16[%c2_163, %c64_164] : memref<3x192xf32, #tpu.memory_space<vmem>>, vector<1x64xf32>
    %175 = arith.truncf %174 : vector<1x64xf32> to vector<1x64xbf16>
    %c7_165 = arith.constant 7 : index
    %c0_166 = arith.constant 0 : index
    %c0_167 = arith.constant 0 : index
    %176 = vector.load %arg11[%c7_165, %c0_166, %c0_167] : memref<9x64x64xbf16, #tpu.memory_space<vmem>>, vector<1x64x64xbf16>
    %177 = vector.shape_cast %176 : vector<1x64x64xbf16> to vector<64x64xbf16>
    %cst_168 = arith.constant dense<0.000000e+00> : vector<1x64xf32>
    %178 = tpu.matmul %175, %177, %cst_168 {dimension_numbers = #tpu.dot_dimension_numbers<[1], [0], [0], [1], [0, 0, 1, 1], [], []>} : vector<1x64xbf16>, vector<64x64xbf16>, vector<1x64xf32> -> vector<1x64xf32>
    %179 = arith.addf %173, %178 : vector<1x64xf32>
    %c2_169 = arith.constant 2 : index
    %c128_170 = arith.constant 128 : index
    %180 = vector.load %arg16[%c2_169, %c128_170] : memref<3x192xf32, #tpu.memory_space<vmem>>, vector<1x64xf32>
    %181 = arith.truncf %180 : vector<1x64xf32> to vector<1x64xbf16>
    %c8_171 = arith.constant 8 : index
    %c0_172 = arith.constant 0 : index
    %c0_173 = arith.constant 0 : index
    %182 = vector.load %arg11[%c8_171, %c0_172, %c0_173] : memref<9x64x64xbf16, #tpu.memory_space<vmem>>, vector<1x64x64xbf16>
    %183 = vector.shape_cast %182 : vector<1x64x64xbf16> to vector<64x64xbf16>
    %cst_174 = arith.constant dense<0.000000e+00> : vector<1x64xf32>
    %184 = tpu.matmul %181, %183, %cst_174 {dimension_numbers = #tpu.dot_dimension_numbers<[1], [0], [0], [1], [0, 0, 1, 1], [], []>} : vector<1x64xbf16>, vector<64x64xbf16>, vector<1x64xf32> -> vector<1x64xf32>
    %185 = arith.addf %179, %184 : vector<1x64xf32>
    %c0_175 = arith.constant 0 : index
    %c0_176 = arith.constant 0 : index
    %186 = vector.load %arg12[%c0_175, %c0_176] : memref<1x64xf32, #tpu.memory_space<vmem>>, vector<1x64xf32>
    %187 = arith.addf %185, %186 : vector<1x64xf32>
    %cst_177 = arith.constant 0.000000e+00 : f32
    %188 = vector.broadcast %cst_177 : f32 to vector<1x64xf32>
    %189 = arith.maximumf %187, %188 : vector<1x64xf32>
    %cst_178 = arith.constant 0.000000e+00 : f32
    %190 = vector.broadcast %cst_178 : f32 to vector<3x192xf32>
    %c0_179 = arith.constant 0 : index
    %c0_180 = arith.constant 0 : index
    %191 = vector.load %arg16[%c0_179, %c0_180] : memref<3x192xf32, #tpu.memory_space<vmem>>, vector<3x192xf32>
    tpu.vector_store %arg16[%c0_179, %c0_180], %190 {strides = array<i32>} : memref<3x192xf32, #tpu.memory_space<vmem>>, vector<3x192xf32>,
    %c1_181 = arith.constant 1 : index
    %c64_182 = arith.constant 64 : index
    %192 = vector.load %arg16[%c1_181, %c64_182] : memref<3x192xf32, #tpu.memory_space<vmem>>, vector<1x64xf32>
    tpu.vector_store %arg16[%c1_181, %c64_182], %189 {strides = array<i32>} : memref<3x192xf32, #tpu.memory_space<vmem>>, vector<1x64xf32>,
    %cst_183 = arith.constant 0.000000e+00 : f32
    %193 = vector.broadcast %cst_183 : f32 to vector<1x64xf32>
    %c0_184 = arith.constant 0 : index
    %c0_185 = arith.constant 0 : index
    %194 = vector.load %arg16[%c0_184, %c0_185] : memref<3x192xf32, #tpu.memory_space<vmem>>, vector<1x64xf32>
    %195 = arith.truncf %194 : vector<1x64xf32> to vector<1x64xbf16>
    %c0_186 = arith.constant 0 : index
    %c0_187 = arith.constant 0 : index
    %c0_188 = arith.constant 0 : index
    %196 = vector.load %arg13[%c0_186, %c0_187, %c0_188] : memref<9x64x64xbf16, #tpu.memory_space<vmem>>, vector<1x64x64xbf16>
    %197 = vector.shape_cast %196 : vector<1x64x64xbf16> to vector<64x64xbf16>
    %cst_189 = arith.constant dense<0.000000e+00> : vector<1x64xf32>
    %198 = tpu.matmul %195, %197, %cst_189 {dimension_numbers = #tpu.dot_dimension_numbers<[1], [0], [0], [1], [0, 0, 1, 1], [], []>} : vector<1x64xbf16>, vector<64x64xbf16>, vector<1x64xf32> -> vector<1x64xf32>
    %199 = arith.addf %193, %198 : vector<1x64xf32>
    %c0_190 = arith.constant 0 : index
    %c64_191 = arith.constant 64 : index
    %200 = vector.load %arg16[%c0_190, %c64_191] : memref<3x192xf32, #tpu.memory_space<vmem>>, vector<1x64xf32>
    %201 = arith.truncf %200 : vector<1x64xf32> to vector<1x64xbf16>
    %c1_192 = arith.constant 1 : index
    %c0_193 = arith.constant 0 : index
    %c0_194 = arith.constant 0 : index
    %202 = vector.load %arg13[%c1_192, %c0_193, %c0_194] : memref<9x64x64xbf16, #tpu.memory_space<vmem>>, vector<1x64x64xbf16>
    %203 = vector.shape_cast %202 : vector<1x64x64xbf16> to vector<64x64xbf16>
    %cst_195 = arith.constant dense<0.000000e+00> : vector<1x64xf32>
    %204 = tpu.matmul %201, %203, %cst_195 {dimension_numbers = #tpu.dot_dimension_numbers<[1], [0], [0], [1], [0, 0, 1, 1], [], []>} : vector<1x64xbf16>, vector<64x64xbf16>, vector<1x64xf32> -> vector<1x64xf32>
    %205 = arith.addf %199, %204 : vector<1x64xf32>
    %c0_196 = arith.constant 0 : index
    %c128_197 = arith.constant 128 : index
    %206 = vector.load %arg16[%c0_196, %c128_197] : memref<3x192xf32, #tpu.memory_space<vmem>>, vector<1x64xf32>
    %207 = arith.truncf %206 : vector<1x64xf32> to vector<1x64xbf16>
    %c2_198 = arith.constant 2 : index
    %c0_199 = arith.constant 0 : index
    %c0_200 = arith.constant 0 : index
    %208 = vector.load %arg13[%c2_198, %c0_199, %c0_200] : memref<9x64x64xbf16, #tpu.memory_space<vmem>>, vector<1x64x64xbf16>
    %209 = vector.shape_cast %208 : vector<1x64x64xbf16> to vector<64x64xbf16>
    %cst_201 = arith.constant dense<0.000000e+00> : vector<1x64xf32>
    %210 = tpu.matmul %207, %209, %cst_201 {dimension_numbers = #tpu.dot_dimension_numbers<[1], [0], [0], [1], [0, 0, 1, 1], [], []>} : vector<1x64xbf16>, vector<64x64xbf16>, vector<1x64xf32> -> vector<1x64xf32>
    %211 = arith.addf %205, %210 : vector<1x64xf32>
    %c1_202 = arith.constant 1 : index
    %c0_203 = arith.constant 0 : index
    %212 = vector.load %arg16[%c1_202, %c0_203] : memref<3x192xf32, #tpu.memory_space<vmem>>, vector<1x64xf32>
    %213 = arith.truncf %212 : vector<1x64xf32> to vector<1x64xbf16>
    %c3_204 = arith.constant 3 : index
    %c0_205 = arith.constant 0 : index
    %c0_206 = arith.constant 0 : index
    %214 = vector.load %arg13[%c3_204, %c0_205, %c0_206] : memref<9x64x64xbf16, #tpu.memory_space<vmem>>, vector<1x64x64xbf16>
    %215 = vector.shape_cast %214 : vector<1x64x64xbf16> to vector<64x64xbf16>
    %cst_207 = arith.constant dense<0.000000e+00> : vector<1x64xf32>
    %216 = tpu.matmul %213, %215, %cst_207 {dimension_numbers = #tpu.dot_dimension_numbers<[1], [0], [0], [1], [0, 0, 1, 1], [], []>} : vector<1x64xbf16>, vector<64x64xbf16>, vector<1x64xf32> -> vector<1x64xf32>
    %217 = arith.addf %211, %216 : vector<1x64xf32>
    %c1_208 = arith.constant 1 : index
    %c64_209 = arith.constant 64 : index
    %218 = vector.load %arg16[%c1_208, %c64_209] : memref<3x192xf32, #tpu.memory_space<vmem>>, vector<1x64xf32>
    %219 = arith.truncf %218 : vector<1x64xf32> to vector<1x64xbf16>
    %c4_210 = arith.constant 4 : index
    %c0_211 = arith.constant 0 : index
    %c0_212 = arith.constant 0 : index
    %220 = vector.load %arg13[%c4_210, %c0_211, %c0_212] : memref<9x64x64xbf16, #tpu.memory_space<vmem>>, vector<1x64x64xbf16>
    %221 = vector.shape_cast %220 : vector<1x64x64xbf16> to vector<64x64xbf16>
    %cst_213 = arith.constant dense<0.000000e+00> : vector<1x64xf32>
    %222 = tpu.matmul %219, %221, %cst_213 {dimension_numbers = #tpu.dot_dimension_numbers<[1], [0], [0], [1], [0, 0, 1, 1], [], []>} : vector<1x64xbf16>, vector<64x64xbf16>, vector<1x64xf32> -> vector<1x64xf32>
    %223 = arith.addf %217, %222 : vector<1x64xf32>
    %c1_214 = arith.constant 1 : index
    %c128_215 = arith.constant 128 : index
    %224 = vector.load %arg16[%c1_214, %c128_215] : memref<3x192xf32, #tpu.memory_space<vmem>>, vector<1x64xf32>
    %225 = arith.truncf %224 : vector<1x64xf32> to vector<1x64xbf16>
    %c5_216 = arith.constant 5 : index
    %c0_217 = arith.constant 0 : index
    %c0_218 = arith.constant 0 : index
    %226 = vector.load %arg13[%c5_216, %c0_217, %c0_218] : memref<9x64x64xbf16, #tpu.memory_space<vmem>>, vector<1x64x64xbf16>
    %227 = vector.shape_cast %226 : vector<1x64x64xbf16> to vector<64x64xbf16>
    %cst_219 = arith.constant dense<0.000000e+00> : vector<1x64xf32>
    %228 = tpu.matmul %225, %227, %cst_219 {dimension_numbers = #tpu.dot_dimension_numbers<[1], [0], [0], [1], [0, 0, 1, 1], [], []>} : vector<1x64xbf16>, vector<64x64xbf16>, vector<1x64xf32> -> vector<1x64xf32>
    %229 = arith.addf %223, %228 : vector<1x64xf32>
    %c2_220 = arith.constant 2 : index
    %c0_221 = arith.constant 0 : index
    %230 = vector.load %arg16[%c2_220, %c0_221] : memref<3x192xf32, #tpu.memory_space<vmem>>, vector<1x64xf32>
    %231 = arith.truncf %230 : vector<1x64xf32> to vector<1x64xbf16>
    %c6_222 = arith.constant 6 : index
    %c0_223 = arith.constant 0 : index
    %c0_224 = arith.constant 0 : index
    %232 = vector.load %arg13[%c6_222, %c0_223, %c0_224] : memref<9x64x64xbf16, #tpu.memory_space<vmem>>, vector<1x64x64xbf16>
    %233 = vector.shape_cast %232 : vector<1x64x64xbf16> to vector<64x64xbf16>
    %cst_225 = arith.constant dense<0.000000e+00> : vector<1x64xf32>
    %234 = tpu.matmul %231, %233, %cst_225 {dimension_numbers = #tpu.dot_dimension_numbers<[1], [0], [0], [1], [0, 0, 1, 1], [], []>} : vector<1x64xbf16>, vector<64x64xbf16>, vector<1x64xf32> -> vector<1x64xf32>
    %235 = arith.addf %229, %234 : vector<1x64xf32>
    %c2_226 = arith.constant 2 : index
    %c64_227 = arith.constant 64 : index
    %236 = vector.load %arg16[%c2_226, %c64_227] : memref<3x192xf32, #tpu.memory_space<vmem>>, vector<1x64xf32>
    %237 = arith.truncf %236 : vector<1x64xf32> to vector<1x64xbf16>
    %c7_228 = arith.constant 7 : index
    %c0_229 = arith.constant 0 : index
    %c0_230 = arith.constant 0 : index
    %238 = vector.load %arg13[%c7_228, %c0_229, %c0_230] : memref<9x64x64xbf16, #tpu.memory_space<vmem>>, vector<1x64x64xbf16>
    %239 = vector.shape_cast %238 : vector<1x64x64xbf16> to vector<64x64xbf16>
    %cst_231 = arith.constant dense<0.000000e+00> : vector<1x64xf32>
    %240 = tpu.matmul %237, %239, %cst_231 {dimension_numbers = #tpu.dot_dimension_numbers<[1], [0], [0], [1], [0, 0, 1, 1], [], []>} : vector<1x64xbf16>, vector<64x64xbf16>, vector<1x64xf32> -> vector<1x64xf32>
    %241 = arith.addf %235, %240 : vector<1x64xf32>
    %c2_232 = arith.constant 2 : index
    %c128_233 = arith.constant 128 : index
    %242 = vector.load %arg16[%c2_232, %c128_233] : memref<3x192xf32, #tpu.memory_space<vmem>>, vector<1x64xf32>
    %243 = arith.truncf %242 : vector<1x64xf32> to vector<1x64xbf16>
    %c8_234 = arith.constant 8 : index
    %c0_235 = arith.constant 0 : index
    %c0_236 = arith.constant 0 : index
    %244 = vector.load %arg13[%c8_234, %c0_235, %c0_236] : memref<9x64x64xbf16, #tpu.memory_space<vmem>>, vector<1x64x64xbf16>
    %245 = vector.shape_cast %244 : vector<1x64x64xbf16> to vector<64x64xbf16>
    %cst_237 = arith.constant dense<0.000000e+00> : vector<1x64xf32>
    %246 = tpu.matmul %243, %245, %cst_237 {dimension_numbers = #tpu.dot_dimension_numbers<[1], [0], [0], [1], [0, 0, 1, 1], [], []>} : vector<1x64xbf16>, vector<64x64xbf16>, vector<1x64xf32> -> vector<1x64xf32>
    %247 = arith.addf %241, %246 : vector<1x64xf32>
    %c0_238 = arith.constant 0 : index
    %c0_239 = arith.constant 0 : index
    %248 = vector.load %arg14[%c0_238, %c0_239] : memref<1x64xf32, #tpu.memory_space<vmem>>, vector<1x64xf32>
    %249 = arith.addf %247, %248 : vector<1x64xf32>
    %250 = arith.addf %249, %127 : vector<1x64xf32>
    %cst_240 = arith.constant 0.000000e+00 : f32
    %251 = vector.broadcast %cst_240 : f32 to vector<1x64xf32>
    %252 = arith.maximumf %250, %251 : vector<1x64xf32>
    %c0_241 = arith.constant 0 : index
    %c0_242 = arith.constant 0 : index
    %253 = vector.load %arg15[%c0_241, %c0_242] : memref<1x64xf32, #tpu.memory_space<vmem>>, vector<1x64xf32>
    tpu.vector_store %arg15[%c0_241, %c0_242], %252 {strides = array<i32>} : memref<1x64xf32, #tpu.memory_space<vmem>>, vector<1x64xf32>,
    return
  }
  func.func @transform_0(%arg0: i32) -> (i32, i32) {
    %c0_i32 = arith.constant 0 : i32
    %c0_i32_0 = arith.constant 0 : i32
    %c0_i32_1 = arith.constant 0 : i32
    return %c0_i32, %c0_i32_0 : i32, i32
  }
  func.func @transform_1(%arg0: i32) -> (i32, i32) {
    %c0_i32 = arith.constant 0 : i32
    %c0_i32_0 = arith.constant 0 : i32
    %c0_i32_1 = arith.constant 0 : i32
    return %c0_i32, %c0_i32_0 : i32, i32
  }
  func.func @transform_2(%arg0: i32) -> (i32, i32) {
    %c0_i32 = arith.constant 0 : i32
    %c0_i32_0 = arith.constant 0 : i32
    %c0_i32_1 = arith.constant 0 : i32
    return %c0_i32, %c0_i32_0 : i32, i32
  }
  func.func @transform_3(%arg0: i32) -> (i32, i32) {
    %c0_i32 = arith.constant 0 : i32
    %c0_i32_0 = arith.constant 0 : i32
    %c0_i32_1 = arith.constant 0 : i32
    return %c0_i32, %c0_i32_0 : i32, i32
  }
  func.func @transform_4(%arg0: i32) -> (i32, i32, i32) {
    %c0_i32 = arith.constant 0 : i32
    %c0_i32_0 = arith.constant 0 : i32
    %c0_i32_1 = arith.constant 0 : i32
    %c0_i32_2 = arith.constant 0 : i32
    return %c0_i32, %c0_i32_0, %c0_i32_1 : i32, i32, i32
  }
  func.func @transform_5(%arg0: i32) -> (i32, i32) {
    %c0_i32 = arith.constant 0 : i32
    %c0_i32_0 = arith.constant 0 : i32
    %c0_i32_1 = arith.constant 0 : i32
    return %c0_i32, %c0_i32_0 : i32, i32
  }
  func.func @transform_6(%arg0: i32) -> (i32, i32, i32) {
    %c0_i32 = arith.constant 0 : i32
    %c0_i32_0 = arith.constant 0 : i32
    %c0_i32_1 = arith.constant 0 : i32
    %c0_i32_2 = arith.constant 0 : i32
    return %c0_i32, %c0_i32_0, %c0_i32_1 : i32, i32, i32
  }
  func.func @transform_7(%arg0: i32) -> (i32, i32) {
    %c0_i32 = arith.constant 0 : i32
    %c0_i32_0 = arith.constant 0 : i32
    %c0_i32_1 = arith.constant 0 : i32
    return %c0_i32, %c0_i32_0 : i32, i32
  }
  func.func @transform_8(%arg0: i32) -> (i32, i32) {
    %c0_i32 = arith.constant 0 : i32
    %c0_i32_0 = arith.constant 0 : i32
    %c0_i32_1 = arith.constant 0 : i32
    return %c0_i32, %c0_i32_0 : i32, i32
  }
  func.func @transform_9(%arg0: i32) -> (i32, i32) {
    %c0_i32 = arith.constant 0 : i32
    %c0_i32_0 = arith.constant 0 : i32
    %c0_i32_1 = arith.constant 0 : i32
    return %c0_i32, %c0_i32_0 : i32, i32
  }
  func.func @transform_10(%arg0: i32) -> (i32, i32, i32) {
    %c0_i32 = arith.constant 0 : i32
    %c0_i32_0 = arith.constant 0 : i32
    %c0_i32_1 = arith.constant 0 : i32
    %c0_i32_2 = arith.constant 0 : i32
    return %c0_i32, %c0_i32_0, %c0_i32_1 : i32, i32, i32
  }
  func.func @transform_11(%arg0: i32) -> (i32, i32) {
    %c0_i32 = arith.constant 0 : i32
    %c0_i32_0 = arith.constant 0 : i32
    %c0_i32_1 = arith.constant 0 : i32
    return %c0_i32, %c0_i32_0 : i32, i32
  }
  func.func @transform_12(%arg0: i32) -> (i32, i32, i32) {
    %c0_i32 = arith.constant 0 : i32
    %c0_i32_0 = arith.constant 0 : i32
    %c0_i32_1 = arith.constant 0 : i32
    %c0_i32_2 = arith.constant 0 : i32
    return %c0_i32, %c0_i32_0, %c0_i32_1 : i32, i32, i32
  }
  func.func @transform_13(%arg0: i32) -> (i32, i32) {
    %c0_i32 = arith.constant 0 : i32
    %c0_i32_0 = arith.constant 0 : i32
    %c0_i32_1 = arith.constant 0 : i32
    return %c0_i32, %c0_i32_0 : i32, i32
  }
  func.func @transform_14(%arg0: i32) -> (i32, i32) {
    %c0_i32 = arith.constant 0 : i32
    %c0_i32_0 = arith.constant 0 : i32
    %c0_i32_1 = arith.constant 0 : i32
    return %c0_i32, %c0_i32_0 : i32, i32
  }
}

module attributes {stable_mosaic.version = 11 : i64} {
  func.func @_layer4_head_kernel(%arg0: i32, %arg1: memref<2x128xf32, #tpu.memory_space<vmem>>, %arg2: memref<2x128xf32, #tpu.memory_space<vmem>>, %arg3: memref<2x128xf32, #tpu.memory_space<vmem>>, %arg4: memref<2x128xf32, #tpu.memory_space<vmem>>, %arg5: memref<9x64x128xbf16, #tpu.memory_space<vmem>>, %arg6: memref<1x128xf32, #tpu.memory_space<vmem>>, %arg7: memref<9x128x128xbf16, #tpu.memory_space<vmem>>, %arg8: memref<1x128xf32, #tpu.memory_space<vmem>>, %arg9: memref<64x128xbf16, #tpu.memory_space<vmem>>, %arg10: memref<1x128xf32, #tpu.memory_space<vmem>>, %arg11: memref<9x128x128xbf16, #tpu.memory_space<vmem>>, %arg12: memref<1x128xf32, #tpu.memory_space<vmem>>, %arg13: memref<9x128x128xbf16, #tpu.memory_space<vmem>>, %arg14: memref<1x128xf32, #tpu.memory_space<vmem>>, %arg15: memref<128x20xbf16, #tpu.memory_space<vmem>>, %arg16: memref<1x20xf32, #tpu.memory_space<vmem>>, %arg17: memref<1x128xf32, #tpu.memory_space<vmem>>, %arg18: memref<1x20xf32, #tpu.memory_space<vmem>>, %arg19: memref<3x384xf32, #tpu.memory_space<vmem>>) attributes {dimension_semantics = [#tpu.dimension_semantics<arbitrary>], iteration_bounds = array<i64: 1>, scalar_prefetch = 0 : i64, scratch_operands = 1 : i64, tpu.core_type = #tpu.core_type<tc>, window_params = [{pipeline_mode = #tpu.pipeline_mode<synchronous>, transform_indices = @transform_0, window_bounds = array<i64: 2, 128>}, {pipeline_mode = #tpu.pipeline_mode<synchronous>, transform_indices = @transform_1, window_bounds = array<i64: 2, 128>}, {pipeline_mode = #tpu.pipeline_mode<synchronous>, transform_indices = @transform_2, window_bounds = array<i64: 2, 128>}, {pipeline_mode = #tpu.pipeline_mode<synchronous>, transform_indices = @transform_3, window_bounds = array<i64: 2, 128>}, {pipeline_mode = #tpu.pipeline_mode<synchronous>, transform_indices = @transform_4, window_bounds = array<i64: 9, 64, 128>}, {pipeline_mode = #tpu.pipeline_mode<synchronous>, transform_indices = @transform_5, window_bounds = array<i64: 1, 128>}, {pipeline_mode = #tpu.pipeline_mode<synchronous>, transform_indices = @transform_6, window_bounds = array<i64: 9, 128, 128>}, {pipeline_mode = #tpu.pipeline_mode<synchronous>, transform_indices = @transform_7, window_bounds = array<i64: 1, 128>}, {pipeline_mode = #tpu.pipeline_mode<synchronous>, transform_indices = @transform_8, window_bounds = array<i64: 64, 128>}, {pipeline_mode = #tpu.pipeline_mode<synchronous>, transform_indices = @transform_9, window_bounds = array<i64: 1, 128>}, {pipeline_mode = #tpu.pipeline_mode<synchronous>, transform_indices = @transform_10, window_bounds = array<i64: 9, 128, 128>}, {pipeline_mode = #tpu.pipeline_mode<synchronous>, transform_indices = @transform_11, window_bounds = array<i64: 1, 128>}, {pipeline_mode = #tpu.pipeline_mode<synchronous>, transform_indices = @transform_12, window_bounds = array<i64: 9, 128, 128>}, {pipeline_mode = #tpu.pipeline_mode<synchronous>, transform_indices = @transform_13, window_bounds = array<i64: 1, 128>}, {pipeline_mode = #tpu.pipeline_mode<synchronous>, transform_indices = @transform_14, window_bounds = array<i64: 128, 20>}, {pipeline_mode = #tpu.pipeline_mode<synchronous>, transform_indices = @transform_15, window_bounds = array<i64: 1, 20>}, {pipeline_mode = #tpu.pipeline_mode<synchronous>, transform_indices = @transform_16, window_bounds = array<i64: 1, 128>}, {pipeline_mode = #tpu.pipeline_mode<synchronous>, transform_indices = @transform_17, window_bounds = array<i64: 1, 20>}]} {
    %cst = arith.constant 0.000000e+00 : f32
    %0 = vector.broadcast %cst : f32 to vector<1x128xf32>
    %c0 = arith.constant 0 : index
    %c0_0 = arith.constant 0 : index
    %1 = vector.load %arg1[%c0, %c0_0] : memref<2x128xf32, #tpu.memory_space<vmem>>, vector<1x64xf32>
    %2 = arith.truncf %1 : vector<1x64xf32> to vector<1x64xbf16>
    %c0_1 = arith.constant 0 : index
    %c0_2 = arith.constant 0 : index
    %c0_3 = arith.constant 0 : index
    %3 = vector.load %arg5[%c0_1, %c0_2, %c0_3] : memref<9x64x128xbf16, #tpu.memory_space<vmem>>, vector<1x64x128xbf16>
    %4 = vector.shape_cast %3 : vector<1x64x128xbf16> to vector<64x128xbf16>
    %cst_4 = arith.constant dense<0.000000e+00> : vector<1x128xf32>
    %5 = tpu.matmul %2, %4, %cst_4 {dimension_numbers = #tpu.dot_dimension_numbers<[1], [0], [0], [1], [0, 0, 1, 1], [], []>} : vector<1x64xbf16>, vector<64x128xbf16>, vector<1x128xf32> -> vector<1x128xf32>
    %6 = arith.addf %0, %5 : vector<1x128xf32>
    %c0_5 = arith.constant 0 : index
    %c0_6 = arith.constant 0 : index
    %7 = vector.load %arg2[%c0_5, %c0_6] : memref<2x128xf32, #tpu.memory_space<vmem>>, vector<1x64xf32>
    %8 = arith.truncf %7 : vector<1x64xf32> to vector<1x64xbf16>
    %c1 = arith.constant 1 : index
    %c0_7 = arith.constant 0 : index
    %c0_8 = arith.constant 0 : index
    %9 = vector.load %arg5[%c1, %c0_7, %c0_8] : memref<9x64x128xbf16, #tpu.memory_space<vmem>>, vector<1x64x128xbf16>
    %10 = vector.shape_cast %9 : vector<1x64x128xbf16> to vector<64x128xbf16>
    %cst_9 = arith.constant dense<0.000000e+00> : vector<1x128xf32>
    %11 = tpu.matmul %8, %10, %cst_9 {dimension_numbers = #tpu.dot_dimension_numbers<[1], [0], [0], [1], [0, 0, 1, 1], [], []>} : vector<1x64xbf16>, vector<64x128xbf16>, vector<1x128xf32> -> vector<1x128xf32>
    %12 = arith.addf %6, %11 : vector<1x128xf32>
    %c0_10 = arith.constant 0 : index
    %c64 = arith.constant 64 : index
    %13 = vector.load %arg1[%c0_10, %c64] : memref<2x128xf32, #tpu.memory_space<vmem>>, vector<1x64xf32>
    %14 = arith.truncf %13 : vector<1x64xf32> to vector<1x64xbf16>
    %c2 = arith.constant 2 : index
    %c0_11 = arith.constant 0 : index
    %c0_12 = arith.constant 0 : index
    %15 = vector.load %arg5[%c2, %c0_11, %c0_12] : memref<9x64x128xbf16, #tpu.memory_space<vmem>>, vector<1x64x128xbf16>
    %16 = vector.shape_cast %15 : vector<1x64x128xbf16> to vector<64x128xbf16>
    %cst_13 = arith.constant dense<0.000000e+00> : vector<1x128xf32>
    %17 = tpu.matmul %14, %16, %cst_13 {dimension_numbers = #tpu.dot_dimension_numbers<[1], [0], [0], [1], [0, 0, 1, 1], [], []>} : vector<1x64xbf16>, vector<64x128xbf16>, vector<1x128xf32> -> vector<1x128xf32>
    %18 = arith.addf %12, %17 : vector<1x128xf32>
    %c0_14 = arith.constant 0 : index
    %c0_15 = arith.constant 0 : index
    %19 = vector.load %arg3[%c0_14, %c0_15] : memref<2x128xf32, #tpu.memory_space<vmem>>, vector<1x64xf32>
    %20 = arith.truncf %19 : vector<1x64xf32> to vector<1x64xbf16>
    %c3 = arith.constant 3 : index
    %c0_16 = arith.constant 0 : index
    %c0_17 = arith.constant 0 : index
    %21 = vector.load %arg5[%c3, %c0_16, %c0_17] : memref<9x64x128xbf16, #tpu.memory_space<vmem>>, vector<1x64x128xbf16>
    %22 = vector.shape_cast %21 : vector<1x64x128xbf16> to vector<64x128xbf16>
    %cst_18 = arith.constant dense<0.000000e+00> : vector<1x128xf32>
    %23 = tpu.matmul %20, %22, %cst_18 {dimension_numbers = #tpu.dot_dimension_numbers<[1], [0], [0], [1], [0, 0, 1, 1], [], []>} : vector<1x64xbf16>, vector<64x128xbf16>, vector<1x128xf32> -> vector<1x128xf32>
    %24 = arith.addf %18, %23 : vector<1x128xf32>
    %c0_19 = arith.constant 0 : index
    %c0_20 = arith.constant 0 : index
    %25 = vector.load %arg4[%c0_19, %c0_20] : memref<2x128xf32, #tpu.memory_space<vmem>>, vector<1x64xf32>
    %26 = arith.truncf %25 : vector<1x64xf32> to vector<1x64xbf16>
    %c4 = arith.constant 4 : index
    %c0_21 = arith.constant 0 : index
    %c0_22 = arith.constant 0 : index
    %27 = vector.load %arg5[%c4, %c0_21, %c0_22] : memref<9x64x128xbf16, #tpu.memory_space<vmem>>, vector<1x64x128xbf16>
    %28 = vector.shape_cast %27 : vector<1x64x128xbf16> to vector<64x128xbf16>
    %cst_23 = arith.constant dense<0.000000e+00> : vector<1x128xf32>
    %29 = tpu.matmul %26, %28, %cst_23 {dimension_numbers = #tpu.dot_dimension_numbers<[1], [0], [0], [1], [0, 0, 1, 1], [], []>} : vector<1x64xbf16>, vector<64x128xbf16>, vector<1x128xf32> -> vector<1x128xf32>
    %30 = arith.addf %24, %29 : vector<1x128xf32>
    %c0_24 = arith.constant 0 : index
    %c64_25 = arith.constant 64 : index
    %31 = vector.load %arg3[%c0_24, %c64_25] : memref<2x128xf32, #tpu.memory_space<vmem>>, vector<1x64xf32>
    %32 = arith.truncf %31 : vector<1x64xf32> to vector<1x64xbf16>
    %c5 = arith.constant 5 : index
    %c0_26 = arith.constant 0 : index
    %c0_27 = arith.constant 0 : index
    %33 = vector.load %arg5[%c5, %c0_26, %c0_27] : memref<9x64x128xbf16, #tpu.memory_space<vmem>>, vector<1x64x128xbf16>
    %34 = vector.shape_cast %33 : vector<1x64x128xbf16> to vector<64x128xbf16>
    %cst_28 = arith.constant dense<0.000000e+00> : vector<1x128xf32>
    %35 = tpu.matmul %32, %34, %cst_28 {dimension_numbers = #tpu.dot_dimension_numbers<[1], [0], [0], [1], [0, 0, 1, 1], [], []>} : vector<1x64xbf16>, vector<64x128xbf16>, vector<1x128xf32> -> vector<1x128xf32>
    %36 = arith.addf %30, %35 : vector<1x128xf32>
    %c1_29 = arith.constant 1 : index
    %c0_30 = arith.constant 0 : index
    %37 = vector.load %arg1[%c1_29, %c0_30] : memref<2x128xf32, #tpu.memory_space<vmem>>, vector<1x64xf32>
    %38 = arith.truncf %37 : vector<1x64xf32> to vector<1x64xbf16>
    %c6 = arith.constant 6 : index
    %c0_31 = arith.constant 0 : index
    %c0_32 = arith.constant 0 : index
    %39 = vector.load %arg5[%c6, %c0_31, %c0_32] : memref<9x64x128xbf16, #tpu.memory_space<vmem>>, vector<1x64x128xbf16>
    %40 = vector.shape_cast %39 : vector<1x64x128xbf16> to vector<64x128xbf16>
    %cst_33 = arith.constant dense<0.000000e+00> : vector<1x128xf32>
    %41 = tpu.matmul %38, %40, %cst_33 {dimension_numbers = #tpu.dot_dimension_numbers<[1], [0], [0], [1], [0, 0, 1, 1], [], []>} : vector<1x64xbf16>, vector<64x128xbf16>, vector<1x128xf32> -> vector<1x128xf32>
    %42 = arith.addf %36, %41 : vector<1x128xf32>
    %c1_34 = arith.constant 1 : index
    %c0_35 = arith.constant 0 : index
    %43 = vector.load %arg2[%c1_34, %c0_35] : memref<2x128xf32, #tpu.memory_space<vmem>>, vector<1x64xf32>
    %44 = arith.truncf %43 : vector<1x64xf32> to vector<1x64xbf16>
    %c7 = arith.constant 7 : index
    %c0_36 = arith.constant 0 : index
    %c0_37 = arith.constant 0 : index
    %45 = vector.load %arg5[%c7, %c0_36, %c0_37] : memref<9x64x128xbf16, #tpu.memory_space<vmem>>, vector<1x64x128xbf16>
    %46 = vector.shape_cast %45 : vector<1x64x128xbf16> to vector<64x128xbf16>
    %cst_38 = arith.constant dense<0.000000e+00> : vector<1x128xf32>
    %47 = tpu.matmul %44, %46, %cst_38 {dimension_numbers = #tpu.dot_dimension_numbers<[1], [0], [0], [1], [0, 0, 1, 1], [], []>} : vector<1x64xbf16>, vector<64x128xbf16>, vector<1x128xf32> -> vector<1x128xf32>
    %48 = arith.addf %42, %47 : vector<1x128xf32>
    %c1_39 = arith.constant 1 : index
    %c64_40 = arith.constant 64 : index
    %49 = vector.load %arg1[%c1_39, %c64_40] : memref<2x128xf32, #tpu.memory_space<vmem>>, vector<1x64xf32>
    %50 = arith.truncf %49 : vector<1x64xf32> to vector<1x64xbf16>
    %c8 = arith.constant 8 : index
    %c0_41 = arith.constant 0 : index
    %c0_42 = arith.constant 0 : index
    %51 = vector.load %arg5[%c8, %c0_41, %c0_42] : memref<9x64x128xbf16, #tpu.memory_space<vmem>>, vector<1x64x128xbf16>
    %52 = vector.shape_cast %51 : vector<1x64x128xbf16> to vector<64x128xbf16>
    %cst_43 = arith.constant dense<0.000000e+00> : vector<1x128xf32>
    %53 = tpu.matmul %50, %52, %cst_43 {dimension_numbers = #tpu.dot_dimension_numbers<[1], [0], [0], [1], [0, 0, 1, 1], [], []>} : vector<1x64xbf16>, vector<64x128xbf16>, vector<1x128xf32> -> vector<1x128xf32>
    %54 = arith.addf %48, %53 : vector<1x128xf32>
    %c0_44 = arith.constant 0 : index
    %c0_45 = arith.constant 0 : index
    %55 = vector.load %arg6[%c0_44, %c0_45] : memref<1x128xf32, #tpu.memory_space<vmem>>, vector<1x128xf32>
    %56 = arith.addf %54, %55 : vector<1x128xf32>
    %cst_46 = arith.constant 0.000000e+00 : f32
    %57 = vector.broadcast %cst_46 : f32 to vector<1x128xf32>
    %58 = arith.maximumf %56, %57 : vector<1x128xf32>
    %cst_47 = arith.constant 0.000000e+00 : f32
    %59 = vector.broadcast %cst_47 : f32 to vector<3x384xf32>
    %c0_48 = arith.constant 0 : index
    %c0_49 = arith.constant 0 : index
    %60 = vector.load %arg19[%c0_48, %c0_49] : memref<3x384xf32, #tpu.memory_space<vmem>>, vector<3x384xf32>
    tpu.vector_store %arg19[%c0_48, %c0_49], %59 {strides = array<i32>} : memref<3x384xf32, #tpu.memory_space<vmem>>, vector<3x384xf32>,
    %c1_50 = arith.constant 1 : index
    %c128 = arith.constant 128 : index
    %61 = vector.load %arg19[%c1_50, %c128] : memref<3x384xf32, #tpu.memory_space<vmem>>, vector<1x128xf32>
    tpu.vector_store %arg19[%c1_50, %c128], %58 {strides = array<i32>} : memref<3x384xf32, #tpu.memory_space<vmem>>, vector<1x128xf32>,
    %cst_51 = arith.constant 0.000000e+00 : f32
    %62 = vector.broadcast %cst_51 : f32 to vector<1x128xf32>
    %c0_52 = arith.constant 0 : index
    %c0_53 = arith.constant 0 : index
    %63 = vector.load %arg19[%c0_52, %c0_53] : memref<3x384xf32, #tpu.memory_space<vmem>>, vector<1x128xf32>
    %64 = arith.truncf %63 : vector<1x128xf32> to vector<1x128xbf16>
    %c0_54 = arith.constant 0 : index
    %c0_55 = arith.constant 0 : index
    %c0_56 = arith.constant 0 : index
    %65 = vector.load %arg7[%c0_54, %c0_55, %c0_56] : memref<9x128x128xbf16, #tpu.memory_space<vmem>>, vector<1x128x128xbf16>
    %66 = vector.shape_cast %65 : vector<1x128x128xbf16> to vector<128x128xbf16>
    %cst_57 = arith.constant dense<0.000000e+00> : vector<1x128xf32>
    %67 = tpu.matmul %64, %66, %cst_57 {dimension_numbers = #tpu.dot_dimension_numbers<[1], [0], [0], [1], [0, 0, 1, 1], [], []>} : vector<1x128xbf16>, vector<128x128xbf16>, vector<1x128xf32> -> vector<1x128xf32>
    %68 = arith.addf %62, %67 : vector<1x128xf32>
    %c0_58 = arith.constant 0 : index
    %c128_59 = arith.constant 128 : index
    %69 = vector.load %arg19[%c0_58, %c128_59] : memref<3x384xf32, #tpu.memory_space<vmem>>, vector<1x128xf32>
    %70 = arith.truncf %69 : vector<1x128xf32> to vector<1x128xbf16>
    %c1_60 = arith.constant 1 : index
    %c0_61 = arith.constant 0 : index
    %c0_62 = arith.constant 0 : index
    %71 = vector.load %arg7[%c1_60, %c0_61, %c0_62] : memref<9x128x128xbf16, #tpu.memory_space<vmem>>, vector<1x128x128xbf16>
    %72 = vector.shape_cast %71 : vector<1x128x128xbf16> to vector<128x128xbf16>
    %cst_63 = arith.constant dense<0.000000e+00> : vector<1x128xf32>
    %73 = tpu.matmul %70, %72, %cst_63 {dimension_numbers = #tpu.dot_dimension_numbers<[1], [0], [0], [1], [0, 0, 1, 1], [], []>} : vector<1x128xbf16>, vector<128x128xbf16>, vector<1x128xf32> -> vector<1x128xf32>
    %74 = arith.addf %68, %73 : vector<1x128xf32>
    %c0_64 = arith.constant 0 : index
    %c256 = arith.constant 256 : index
    %75 = vector.load %arg19[%c0_64, %c256] : memref<3x384xf32, #tpu.memory_space<vmem>>, vector<1x128xf32>
    %76 = arith.truncf %75 : vector<1x128xf32> to vector<1x128xbf16>
    %c2_65 = arith.constant 2 : index
    %c0_66 = arith.constant 0 : index
    %c0_67 = arith.constant 0 : index
    %77 = vector.load %arg7[%c2_65, %c0_66, %c0_67] : memref<9x128x128xbf16, #tpu.memory_space<vmem>>, vector<1x128x128xbf16>
    %78 = vector.shape_cast %77 : vector<1x128x128xbf16> to vector<128x128xbf16>
    %cst_68 = arith.constant dense<0.000000e+00> : vector<1x128xf32>
    %79 = tpu.matmul %76, %78, %cst_68 {dimension_numbers = #tpu.dot_dimension_numbers<[1], [0], [0], [1], [0, 0, 1, 1], [], []>} : vector<1x128xbf16>, vector<128x128xbf16>, vector<1x128xf32> -> vector<1x128xf32>
    %80 = arith.addf %74, %79 : vector<1x128xf32>
    %c1_69 = arith.constant 1 : index
    %c0_70 = arith.constant 0 : index
    %81 = vector.load %arg19[%c1_69, %c0_70] : memref<3x384xf32, #tpu.memory_space<vmem>>, vector<1x128xf32>
    %82 = arith.truncf %81 : vector<1x128xf32> to vector<1x128xbf16>
    %c3_71 = arith.constant 3 : index
    %c0_72 = arith.constant 0 : index
    %c0_73 = arith.constant 0 : index
    %83 = vector.load %arg7[%c3_71, %c0_72, %c0_73] : memref<9x128x128xbf16, #tpu.memory_space<vmem>>, vector<1x128x128xbf16>
    %84 = vector.shape_cast %83 : vector<1x128x128xbf16> to vector<128x128xbf16>
    %cst_74 = arith.constant dense<0.000000e+00> : vector<1x128xf32>
    %85 = tpu.matmul %82, %84, %cst_74 {dimension_numbers = #tpu.dot_dimension_numbers<[1], [0], [0], [1], [0, 0, 1, 1], [], []>} : vector<1x128xbf16>, vector<128x128xbf16>, vector<1x128xf32> -> vector<1x128xf32>
    %86 = arith.addf %80, %85 : vector<1x128xf32>
    %c1_75 = arith.constant 1 : index
    %c128_76 = arith.constant 128 : index
    %87 = vector.load %arg19[%c1_75, %c128_76] : memref<3x384xf32, #tpu.memory_space<vmem>>, vector<1x128xf32>
    %88 = arith.truncf %87 : vector<1x128xf32> to vector<1x128xbf16>
    %c4_77 = arith.constant 4 : index
    %c0_78 = arith.constant 0 : index
    %c0_79 = arith.constant 0 : index
    %89 = vector.load %arg7[%c4_77, %c0_78, %c0_79] : memref<9x128x128xbf16, #tpu.memory_space<vmem>>, vector<1x128x128xbf16>
    %90 = vector.shape_cast %89 : vector<1x128x128xbf16> to vector<128x128xbf16>
    %cst_80 = arith.constant dense<0.000000e+00> : vector<1x128xf32>
    %91 = tpu.matmul %88, %90, %cst_80 {dimension_numbers = #tpu.dot_dimension_numbers<[1], [0], [0], [1], [0, 0, 1, 1], [], []>} : vector<1x128xbf16>, vector<128x128xbf16>, vector<1x128xf32> -> vector<1x128xf32>
    %92 = arith.addf %86, %91 : vector<1x128xf32>
    %c1_81 = arith.constant 1 : index
    %c256_82 = arith.constant 256 : index
    %93 = vector.load %arg19[%c1_81, %c256_82] : memref<3x384xf32, #tpu.memory_space<vmem>>, vector<1x128xf32>
    %94 = arith.truncf %93 : vector<1x128xf32> to vector<1x128xbf16>
    %c5_83 = arith.constant 5 : index
    %c0_84 = arith.constant 0 : index
    %c0_85 = arith.constant 0 : index
    %95 = vector.load %arg7[%c5_83, %c0_84, %c0_85] : memref<9x128x128xbf16, #tpu.memory_space<vmem>>, vector<1x128x128xbf16>
    %96 = vector.shape_cast %95 : vector<1x128x128xbf16> to vector<128x128xbf16>
    %cst_86 = arith.constant dense<0.000000e+00> : vector<1x128xf32>
    %97 = tpu.matmul %94, %96, %cst_86 {dimension_numbers = #tpu.dot_dimension_numbers<[1], [0], [0], [1], [0, 0, 1, 1], [], []>} : vector<1x128xbf16>, vector<128x128xbf16>, vector<1x128xf32> -> vector<1x128xf32>
    %98 = arith.addf %92, %97 : vector<1x128xf32>
    %c2_87 = arith.constant 2 : index
    %c0_88 = arith.constant 0 : index
    %99 = vector.load %arg19[%c2_87, %c0_88] : memref<3x384xf32, #tpu.memory_space<vmem>>, vector<1x128xf32>
    %100 = arith.truncf %99 : vector<1x128xf32> to vector<1x128xbf16>
    %c6_89 = arith.constant 6 : index
    %c0_90 = arith.constant 0 : index
    %c0_91 = arith.constant 0 : index
    %101 = vector.load %arg7[%c6_89, %c0_90, %c0_91] : memref<9x128x128xbf16, #tpu.memory_space<vmem>>, vector<1x128x128xbf16>
    %102 = vector.shape_cast %101 : vector<1x128x128xbf16> to vector<128x128xbf16>
    %cst_92 = arith.constant dense<0.000000e+00> : vector<1x128xf32>
    %103 = tpu.matmul %100, %102, %cst_92 {dimension_numbers = #tpu.dot_dimension_numbers<[1], [0], [0], [1], [0, 0, 1, 1], [], []>} : vector<1x128xbf16>, vector<128x128xbf16>, vector<1x128xf32> -> vector<1x128xf32>
    %104 = arith.addf %98, %103 : vector<1x128xf32>
    %c2_93 = arith.constant 2 : index
    %c128_94 = arith.constant 128 : index
    %105 = vector.load %arg19[%c2_93, %c128_94] : memref<3x384xf32, #tpu.memory_space<vmem>>, vector<1x128xf32>
    %106 = arith.truncf %105 : vector<1x128xf32> to vector<1x128xbf16>
    %c7_95 = arith.constant 7 : index
    %c0_96 = arith.constant 0 : index
    %c0_97 = arith.constant 0 : index
    %107 = vector.load %arg7[%c7_95, %c0_96, %c0_97] : memref<9x128x128xbf16, #tpu.memory_space<vmem>>, vector<1x128x128xbf16>
    %108 = vector.shape_cast %107 : vector<1x128x128xbf16> to vector<128x128xbf16>
    %cst_98 = arith.constant dense<0.000000e+00> : vector<1x128xf32>
    %109 = tpu.matmul %106, %108, %cst_98 {dimension_numbers = #tpu.dot_dimension_numbers<[1], [0], [0], [1], [0, 0, 1, 1], [], []>} : vector<1x128xbf16>, vector<128x128xbf16>, vector<1x128xf32> -> vector<1x128xf32>
    %110 = arith.addf %104, %109 : vector<1x128xf32>
    %c2_99 = arith.constant 2 : index
    %c256_100 = arith.constant 256 : index
    %111 = vector.load %arg19[%c2_99, %c256_100] : memref<3x384xf32, #tpu.memory_space<vmem>>, vector<1x128xf32>
    %112 = arith.truncf %111 : vector<1x128xf32> to vector<1x128xbf16>
    %c8_101 = arith.constant 8 : index
    %c0_102 = arith.constant 0 : index
    %c0_103 = arith.constant 0 : index
    %113 = vector.load %arg7[%c8_101, %c0_102, %c0_103] : memref<9x128x128xbf16, #tpu.memory_space<vmem>>, vector<1x128x128xbf16>
    %114 = vector.shape_cast %113 : vector<1x128x128xbf16> to vector<128x128xbf16>
    %cst_104 = arith.constant dense<0.000000e+00> : vector<1x128xf32>
    %115 = tpu.matmul %112, %114, %cst_104 {dimension_numbers = #tpu.dot_dimension_numbers<[1], [0], [0], [1], [0, 0, 1, 1], [], []>} : vector<1x128xbf16>, vector<128x128xbf16>, vector<1x128xf32> -> vector<1x128xf32>
    %116 = arith.addf %110, %115 : vector<1x128xf32>
    %c0_105 = arith.constant 0 : index
    %c0_106 = arith.constant 0 : index
    %117 = vector.load %arg4[%c0_105, %c0_106] : memref<2x128xf32, #tpu.memory_space<vmem>>, vector<1x64xf32>
    %118 = arith.truncf %117 : vector<1x64xf32> to vector<1x64xbf16>
    %c0_107 = arith.constant 0 : index
    %c0_108 = arith.constant 0 : index
    %119 = vector.load %arg9[%c0_107, %c0_108] : memref<64x128xbf16, #tpu.memory_space<vmem>>, vector<64x128xbf16>
    %cst_109 = arith.constant dense<0.000000e+00> : vector<1x128xf32>
    %120 = tpu.matmul %118, %119, %cst_109 {dimension_numbers = #tpu.dot_dimension_numbers<[1], [0], [0], [1], [0, 0, 1, 1], [], []>} : vector<1x64xbf16>, vector<64x128xbf16>, vector<1x128xf32> -> vector<1x128xf32>
    %c0_110 = arith.constant 0 : index
    %c0_111 = arith.constant 0 : index
    %121 = vector.load %arg10[%c0_110, %c0_111] : memref<1x128xf32, #tpu.memory_space<vmem>>, vector<1x128xf32>
    %122 = arith.addf %120, %121 : vector<1x128xf32>
    %c0_112 = arith.constant 0 : index
    %c0_113 = arith.constant 0 : index
    %123 = vector.load %arg8[%c0_112, %c0_113] : memref<1x128xf32, #tpu.memory_space<vmem>>, vector<1x128xf32>
    %124 = arith.addf %116, %123 : vector<1x128xf32>
    %125 = arith.addf %124, %122 : vector<1x128xf32>
    %cst_114 = arith.constant 0.000000e+00 : f32
    %126 = vector.broadcast %cst_114 : f32 to vector<1x128xf32>
    %127 = arith.maximumf %125, %126 : vector<1x128xf32>
    %cst_115 = arith.constant 0.000000e+00 : f32
    %128 = vector.broadcast %cst_115 : f32 to vector<3x384xf32>
    %c0_116 = arith.constant 0 : index
    %c0_117 = arith.constant 0 : index
    %129 = vector.load %arg19[%c0_116, %c0_117] : memref<3x384xf32, #tpu.memory_space<vmem>>, vector<3x384xf32>
    tpu.vector_store %arg19[%c0_116, %c0_117], %128 {strides = array<i32>} : memref<3x384xf32, #tpu.memory_space<vmem>>, vector<3x384xf32>,
    %c1_118 = arith.constant 1 : index
    %c128_119 = arith.constant 128 : index
    %130 = vector.load %arg19[%c1_118, %c128_119] : memref<3x384xf32, #tpu.memory_space<vmem>>, vector<1x128xf32>
    tpu.vector_store %arg19[%c1_118, %c128_119], %127 {strides = array<i32>} : memref<3x384xf32, #tpu.memory_space<vmem>>, vector<1x128xf32>,
    %cst_120 = arith.constant 0.000000e+00 : f32
    %131 = vector.broadcast %cst_120 : f32 to vector<1x128xf32>
    %c0_121 = arith.constant 0 : index
    %c0_122 = arith.constant 0 : index
    %132 = vector.load %arg19[%c0_121, %c0_122] : memref<3x384xf32, #tpu.memory_space<vmem>>, vector<1x128xf32>
    %133 = arith.truncf %132 : vector<1x128xf32> to vector<1x128xbf16>
    %c0_123 = arith.constant 0 : index
    %c0_124 = arith.constant 0 : index
    %c0_125 = arith.constant 0 : index
    %134 = vector.load %arg11[%c0_123, %c0_124, %c0_125] : memref<9x128x128xbf16, #tpu.memory_space<vmem>>, vector<1x128x128xbf16>
    %135 = vector.shape_cast %134 : vector<1x128x128xbf16> to vector<128x128xbf16>
    %cst_126 = arith.constant dense<0.000000e+00> : vector<1x128xf32>
    %136 = tpu.matmul %133, %135, %cst_126 {dimension_numbers = #tpu.dot_dimension_numbers<[1], [0], [0], [1], [0, 0, 1, 1], [], []>} : vector<1x128xbf16>, vector<128x128xbf16>, vector<1x128xf32> -> vector<1x128xf32>
    %137 = arith.addf %131, %136 : vector<1x128xf32>
    %c0_127 = arith.constant 0 : index
    %c128_128 = arith.constant 128 : index
    %138 = vector.load %arg19[%c0_127, %c128_128] : memref<3x384xf32, #tpu.memory_space<vmem>>, vector<1x128xf32>
    %139 = arith.truncf %138 : vector<1x128xf32> to vector<1x128xbf16>
    %c1_129 = arith.constant 1 : index
    %c0_130 = arith.constant 0 : index
    %c0_131 = arith.constant 0 : index
    %140 = vector.load %arg11[%c1_129, %c0_130, %c0_131] : memref<9x128x128xbf16, #tpu.memory_space<vmem>>, vector<1x128x128xbf16>
    %141 = vector.shape_cast %140 : vector<1x128x128xbf16> to vector<128x128xbf16>
    %cst_132 = arith.constant dense<0.000000e+00> : vector<1x128xf32>
    %142 = tpu.matmul %139, %141, %cst_132 {dimension_numbers = #tpu.dot_dimension_numbers<[1], [0], [0], [1], [0, 0, 1, 1], [], []>} : vector<1x128xbf16>, vector<128x128xbf16>, vector<1x128xf32> -> vector<1x128xf32>
    %143 = arith.addf %137, %142 : vector<1x128xf32>
    %c0_133 = arith.constant 0 : index
    %c256_134 = arith.constant 256 : index
    %144 = vector.load %arg19[%c0_133, %c256_134] : memref<3x384xf32, #tpu.memory_space<vmem>>, vector<1x128xf32>
    %145 = arith.truncf %144 : vector<1x128xf32> to vector<1x128xbf16>
    %c2_135 = arith.constant 2 : index
    %c0_136 = arith.constant 0 : index
    %c0_137 = arith.constant 0 : index
    %146 = vector.load %arg11[%c2_135, %c0_136, %c0_137] : memref<9x128x128xbf16, #tpu.memory_space<vmem>>, vector<1x128x128xbf16>
    %147 = vector.shape_cast %146 : vector<1x128x128xbf16> to vector<128x128xbf16>
    %cst_138 = arith.constant dense<0.000000e+00> : vector<1x128xf32>
    %148 = tpu.matmul %145, %147, %cst_138 {dimension_numbers = #tpu.dot_dimension_numbers<[1], [0], [0], [1], [0, 0, 1, 1], [], []>} : vector<1x128xbf16>, vector<128x128xbf16>, vector<1x128xf32> -> vector<1x128xf32>
    %149 = arith.addf %143, %148 : vector<1x128xf32>
    %c1_139 = arith.constant 1 : index
    %c0_140 = arith.constant 0 : index
    %150 = vector.load %arg19[%c1_139, %c0_140] : memref<3x384xf32, #tpu.memory_space<vmem>>, vector<1x128xf32>
    %151 = arith.truncf %150 : vector<1x128xf32> to vector<1x128xbf16>
    %c3_141 = arith.constant 3 : index
    %c0_142 = arith.constant 0 : index
    %c0_143 = arith.constant 0 : index
    %152 = vector.load %arg11[%c3_141, %c0_142, %c0_143] : memref<9x128x128xbf16, #tpu.memory_space<vmem>>, vector<1x128x128xbf16>
    %153 = vector.shape_cast %152 : vector<1x128x128xbf16> to vector<128x128xbf16>
    %cst_144 = arith.constant dense<0.000000e+00> : vector<1x128xf32>
    %154 = tpu.matmul %151, %153, %cst_144 {dimension_numbers = #tpu.dot_dimension_numbers<[1], [0], [0], [1], [0, 0, 1, 1], [], []>} : vector<1x128xbf16>, vector<128x128xbf16>, vector<1x128xf32> -> vector<1x128xf32>
    %155 = arith.addf %149, %154 : vector<1x128xf32>
    %c1_145 = arith.constant 1 : index
    %c128_146 = arith.constant 128 : index
    %156 = vector.load %arg19[%c1_145, %c128_146] : memref<3x384xf32, #tpu.memory_space<vmem>>, vector<1x128xf32>
    %157 = arith.truncf %156 : vector<1x128xf32> to vector<1x128xbf16>
    %c4_147 = arith.constant 4 : index
    %c0_148 = arith.constant 0 : index
    %c0_149 = arith.constant 0 : index
    %158 = vector.load %arg11[%c4_147, %c0_148, %c0_149] : memref<9x128x128xbf16, #tpu.memory_space<vmem>>, vector<1x128x128xbf16>
    %159 = vector.shape_cast %158 : vector<1x128x128xbf16> to vector<128x128xbf16>
    %cst_150 = arith.constant dense<0.000000e+00> : vector<1x128xf32>
    %160 = tpu.matmul %157, %159, %cst_150 {dimension_numbers = #tpu.dot_dimension_numbers<[1], [0], [0], [1], [0, 0, 1, 1], [], []>} : vector<1x128xbf16>, vector<128x128xbf16>, vector<1x128xf32> -> vector<1x128xf32>
    %161 = arith.addf %155, %160 : vector<1x128xf32>
    %c1_151 = arith.constant 1 : index
    %c256_152 = arith.constant 256 : index
    %162 = vector.load %arg19[%c1_151, %c256_152] : memref<3x384xf32, #tpu.memory_space<vmem>>, vector<1x128xf32>
    %163 = arith.truncf %162 : vector<1x128xf32> to vector<1x128xbf16>
    %c5_153 = arith.constant 5 : index
    %c0_154 = arith.constant 0 : index
    %c0_155 = arith.constant 0 : index
    %164 = vector.load %arg11[%c5_153, %c0_154, %c0_155] : memref<9x128x128xbf16, #tpu.memory_space<vmem>>, vector<1x128x128xbf16>
    %165 = vector.shape_cast %164 : vector<1x128x128xbf16> to vector<128x128xbf16>
    %cst_156 = arith.constant dense<0.000000e+00> : vector<1x128xf32>
    %166 = tpu.matmul %163, %165, %cst_156 {dimension_numbers = #tpu.dot_dimension_numbers<[1], [0], [0], [1], [0, 0, 1, 1], [], []>} : vector<1x128xbf16>, vector<128x128xbf16>, vector<1x128xf32> -> vector<1x128xf32>
    %167 = arith.addf %161, %166 : vector<1x128xf32>
    %c2_157 = arith.constant 2 : index
    %c0_158 = arith.constant 0 : index
    %168 = vector.load %arg19[%c2_157, %c0_158] : memref<3x384xf32, #tpu.memory_space<vmem>>, vector<1x128xf32>
    %169 = arith.truncf %168 : vector<1x128xf32> to vector<1x128xbf16>
    %c6_159 = arith.constant 6 : index
    %c0_160 = arith.constant 0 : index
    %c0_161 = arith.constant 0 : index
    %170 = vector.load %arg11[%c6_159, %c0_160, %c0_161] : memref<9x128x128xbf16, #tpu.memory_space<vmem>>, vector<1x128x128xbf16>
    %171 = vector.shape_cast %170 : vector<1x128x128xbf16> to vector<128x128xbf16>
    %cst_162 = arith.constant dense<0.000000e+00> : vector<1x128xf32>
    %172 = tpu.matmul %169, %171, %cst_162 {dimension_numbers = #tpu.dot_dimension_numbers<[1], [0], [0], [1], [0, 0, 1, 1], [], []>} : vector<1x128xbf16>, vector<128x128xbf16>, vector<1x128xf32> -> vector<1x128xf32>
    %173 = arith.addf %167, %172 : vector<1x128xf32>
    %c2_163 = arith.constant 2 : index
    %c128_164 = arith.constant 128 : index
    %174 = vector.load %arg19[%c2_163, %c128_164] : memref<3x384xf32, #tpu.memory_space<vmem>>, vector<1x128xf32>
    %175 = arith.truncf %174 : vector<1x128xf32> to vector<1x128xbf16>
    %c7_165 = arith.constant 7 : index
    %c0_166 = arith.constant 0 : index
    %c0_167 = arith.constant 0 : index
    %176 = vector.load %arg11[%c7_165, %c0_166, %c0_167] : memref<9x128x128xbf16, #tpu.memory_space<vmem>>, vector<1x128x128xbf16>
    %177 = vector.shape_cast %176 : vector<1x128x128xbf16> to vector<128x128xbf16>
    %cst_168 = arith.constant dense<0.000000e+00> : vector<1x128xf32>
    %178 = tpu.matmul %175, %177, %cst_168 {dimension_numbers = #tpu.dot_dimension_numbers<[1], [0], [0], [1], [0, 0, 1, 1], [], []>} : vector<1x128xbf16>, vector<128x128xbf16>, vector<1x128xf32> -> vector<1x128xf32>
    %179 = arith.addf %173, %178 : vector<1x128xf32>
    %c2_169 = arith.constant 2 : index
    %c256_170 = arith.constant 256 : index
    %180 = vector.load %arg19[%c2_169, %c256_170] : memref<3x384xf32, #tpu.memory_space<vmem>>, vector<1x128xf32>
    %181 = arith.truncf %180 : vector<1x128xf32> to vector<1x128xbf16>
    %c8_171 = arith.constant 8 : index
    %c0_172 = arith.constant 0 : index
    %c0_173 = arith.constant 0 : index
    %182 = vector.load %arg11[%c8_171, %c0_172, %c0_173] : memref<9x128x128xbf16, #tpu.memory_space<vmem>>, vector<1x128x128xbf16>
    %183 = vector.shape_cast %182 : vector<1x128x128xbf16> to vector<128x128xbf16>
    %cst_174 = arith.constant dense<0.000000e+00> : vector<1x128xf32>
    %184 = tpu.matmul %181, %183, %cst_174 {dimension_numbers = #tpu.dot_dimension_numbers<[1], [0], [0], [1], [0, 0, 1, 1], [], []>} : vector<1x128xbf16>, vector<128x128xbf16>, vector<1x128xf32> -> vector<1x128xf32>
    %185 = arith.addf %179, %184 : vector<1x128xf32>
    %c0_175 = arith.constant 0 : index
    %c0_176 = arith.constant 0 : index
    %186 = vector.load %arg12[%c0_175, %c0_176] : memref<1x128xf32, #tpu.memory_space<vmem>>, vector<1x128xf32>
    %187 = arith.addf %185, %186 : vector<1x128xf32>
    %cst_177 = arith.constant 0.000000e+00 : f32
    %188 = vector.broadcast %cst_177 : f32 to vector<1x128xf32>
    %189 = arith.maximumf %187, %188 : vector<1x128xf32>
    %cst_178 = arith.constant 0.000000e+00 : f32
    %190 = vector.broadcast %cst_178 : f32 to vector<3x384xf32>
    %c0_179 = arith.constant 0 : index
    %c0_180 = arith.constant 0 : index
    %191 = vector.load %arg19[%c0_179, %c0_180] : memref<3x384xf32, #tpu.memory_space<vmem>>, vector<3x384xf32>
    tpu.vector_store %arg19[%c0_179, %c0_180], %190 {strides = array<i32>} : memref<3x384xf32, #tpu.memory_space<vmem>>, vector<3x384xf32>,
    %c1_181 = arith.constant 1 : index
    %c128_182 = arith.constant 128 : index
    %192 = vector.load %arg19[%c1_181, %c128_182] : memref<3x384xf32, #tpu.memory_space<vmem>>, vector<1x128xf32>
    tpu.vector_store %arg19[%c1_181, %c128_182], %189 {strides = array<i32>} : memref<3x384xf32, #tpu.memory_space<vmem>>, vector<1x128xf32>,
    %cst_183 = arith.constant 0.000000e+00 : f32
    %193 = vector.broadcast %cst_183 : f32 to vector<1x128xf32>
    %c0_184 = arith.constant 0 : index
    %c0_185 = arith.constant 0 : index
    %194 = vector.load %arg19[%c0_184, %c0_185] : memref<3x384xf32, #tpu.memory_space<vmem>>, vector<1x128xf32>
    %195 = arith.truncf %194 : vector<1x128xf32> to vector<1x128xbf16>
    %c0_186 = arith.constant 0 : index
    %c0_187 = arith.constant 0 : index
    %c0_188 = arith.constant 0 : index
    %196 = vector.load %arg13[%c0_186, %c0_187, %c0_188] : memref<9x128x128xbf16, #tpu.memory_space<vmem>>, vector<1x128x128xbf16>
    %197 = vector.shape_cast %196 : vector<1x128x128xbf16> to vector<128x128xbf16>
    %cst_189 = arith.constant dense<0.000000e+00> : vector<1x128xf32>
    %198 = tpu.matmul %195, %197, %cst_189 {dimension_numbers = #tpu.dot_dimension_numbers<[1], [0], [0], [1], [0, 0, 1, 1], [], []>} : vector<1x128xbf16>, vector<128x128xbf16>, vector<1x128xf32> -> vector<1x128xf32>
    %199 = arith.addf %193, %198 : vector<1x128xf32>
    %c0_190 = arith.constant 0 : index
    %c128_191 = arith.constant 128 : index
    %200 = vector.load %arg19[%c0_190, %c128_191] : memref<3x384xf32, #tpu.memory_space<vmem>>, vector<1x128xf32>
    %201 = arith.truncf %200 : vector<1x128xf32> to vector<1x128xbf16>
    %c1_192 = arith.constant 1 : index
    %c0_193 = arith.constant 0 : index
    %c0_194 = arith.constant 0 : index
    %202 = vector.load %arg13[%c1_192, %c0_193, %c0_194] : memref<9x128x128xbf16, #tpu.memory_space<vmem>>, vector<1x128x128xbf16>
    %203 = vector.shape_cast %202 : vector<1x128x128xbf16> to vector<128x128xbf16>
    %cst_195 = arith.constant dense<0.000000e+00> : vector<1x128xf32>
    %204 = tpu.matmul %201, %203, %cst_195 {dimension_numbers = #tpu.dot_dimension_numbers<[1], [0], [0], [1], [0, 0, 1, 1], [], []>} : vector<1x128xbf16>, vector<128x128xbf16>, vector<1x128xf32> -> vector<1x128xf32>
    %205 = arith.addf %199, %204 : vector<1x128xf32>
    %c0_196 = arith.constant 0 : index
    %c256_197 = arith.constant 256 : index
    %206 = vector.load %arg19[%c0_196, %c256_197] : memref<3x384xf32, #tpu.memory_space<vmem>>, vector<1x128xf32>
    %207 = arith.truncf %206 : vector<1x128xf32> to vector<1x128xbf16>
    %c2_198 = arith.constant 2 : index
    %c0_199 = arith.constant 0 : index
    %c0_200 = arith.constant 0 : index
    %208 = vector.load %arg13[%c2_198, %c0_199, %c0_200] : memref<9x128x128xbf16, #tpu.memory_space<vmem>>, vector<1x128x128xbf16>
    %209 = vector.shape_cast %208 : vector<1x128x128xbf16> to vector<128x128xbf16>
    %cst_201 = arith.constant dense<0.000000e+00> : vector<1x128xf32>
    %210 = tpu.matmul %207, %209, %cst_201 {dimension_numbers = #tpu.dot_dimension_numbers<[1], [0], [0], [1], [0, 0, 1, 1], [], []>} : vector<1x128xbf16>, vector<128x128xbf16>, vector<1x128xf32> -> vector<1x128xf32>
    %211 = arith.addf %205, %210 : vector<1x128xf32>
    %c1_202 = arith.constant 1 : index
    %c0_203 = arith.constant 0 : index
    %212 = vector.load %arg19[%c1_202, %c0_203] : memref<3x384xf32, #tpu.memory_space<vmem>>, vector<1x128xf32>
    %213 = arith.truncf %212 : vector<1x128xf32> to vector<1x128xbf16>
    %c3_204 = arith.constant 3 : index
    %c0_205 = arith.constant 0 : index
    %c0_206 = arith.constant 0 : index
    %214 = vector.load %arg13[%c3_204, %c0_205, %c0_206] : memref<9x128x128xbf16, #tpu.memory_space<vmem>>, vector<1x128x128xbf16>
    %215 = vector.shape_cast %214 : vector<1x128x128xbf16> to vector<128x128xbf16>
    %cst_207 = arith.constant dense<0.000000e+00> : vector<1x128xf32>
    %216 = tpu.matmul %213, %215, %cst_207 {dimension_numbers = #tpu.dot_dimension_numbers<[1], [0], [0], [1], [0, 0, 1, 1], [], []>} : vector<1x128xbf16>, vector<128x128xbf16>, vector<1x128xf32> -> vector<1x128xf32>
    %217 = arith.addf %211, %216 : vector<1x128xf32>
    %c1_208 = arith.constant 1 : index
    %c128_209 = arith.constant 128 : index
    %218 = vector.load %arg19[%c1_208, %c128_209] : memref<3x384xf32, #tpu.memory_space<vmem>>, vector<1x128xf32>
    %219 = arith.truncf %218 : vector<1x128xf32> to vector<1x128xbf16>
    %c4_210 = arith.constant 4 : index
    %c0_211 = arith.constant 0 : index
    %c0_212 = arith.constant 0 : index
    %220 = vector.load %arg13[%c4_210, %c0_211, %c0_212] : memref<9x128x128xbf16, #tpu.memory_space<vmem>>, vector<1x128x128xbf16>
    %221 = vector.shape_cast %220 : vector<1x128x128xbf16> to vector<128x128xbf16>
    %cst_213 = arith.constant dense<0.000000e+00> : vector<1x128xf32>
    %222 = tpu.matmul %219, %221, %cst_213 {dimension_numbers = #tpu.dot_dimension_numbers<[1], [0], [0], [1], [0, 0, 1, 1], [], []>} : vector<1x128xbf16>, vector<128x128xbf16>, vector<1x128xf32> -> vector<1x128xf32>
    %223 = arith.addf %217, %222 : vector<1x128xf32>
    %c1_214 = arith.constant 1 : index
    %c256_215 = arith.constant 256 : index
    %224 = vector.load %arg19[%c1_214, %c256_215] : memref<3x384xf32, #tpu.memory_space<vmem>>, vector<1x128xf32>
    %225 = arith.truncf %224 : vector<1x128xf32> to vector<1x128xbf16>
    %c5_216 = arith.constant 5 : index
    %c0_217 = arith.constant 0 : index
    %c0_218 = arith.constant 0 : index
    %226 = vector.load %arg13[%c5_216, %c0_217, %c0_218] : memref<9x128x128xbf16, #tpu.memory_space<vmem>>, vector<1x128x128xbf16>
    %227 = vector.shape_cast %226 : vector<1x128x128xbf16> to vector<128x128xbf16>
    %cst_219 = arith.constant dense<0.000000e+00> : vector<1x128xf32>
    %228 = tpu.matmul %225, %227, %cst_219 {dimension_numbers = #tpu.dot_dimension_numbers<[1], [0], [0], [1], [0, 0, 1, 1], [], []>} : vector<1x128xbf16>, vector<128x128xbf16>, vector<1x128xf32> -> vector<1x128xf32>
    %229 = arith.addf %223, %228 : vector<1x128xf32>
    %c2_220 = arith.constant 2 : index
    %c0_221 = arith.constant 0 : index
    %230 = vector.load %arg19[%c2_220, %c0_221] : memref<3x384xf32, #tpu.memory_space<vmem>>, vector<1x128xf32>
    %231 = arith.truncf %230 : vector<1x128xf32> to vector<1x128xbf16>
    %c6_222 = arith.constant 6 : index
    %c0_223 = arith.constant 0 : index
    %c0_224 = arith.constant 0 : index
    %232 = vector.load %arg13[%c6_222, %c0_223, %c0_224] : memref<9x128x128xbf16, #tpu.memory_space<vmem>>, vector<1x128x128xbf16>
    %233 = vector.shape_cast %232 : vector<1x128x128xbf16> to vector<128x128xbf16>
    %cst_225 = arith.constant dense<0.000000e+00> : vector<1x128xf32>
    %234 = tpu.matmul %231, %233, %cst_225 {dimension_numbers = #tpu.dot_dimension_numbers<[1], [0], [0], [1], [0, 0, 1, 1], [], []>} : vector<1x128xbf16>, vector<128x128xbf16>, vector<1x128xf32> -> vector<1x128xf32>
    %235 = arith.addf %229, %234 : vector<1x128xf32>
    %c2_226 = arith.constant 2 : index
    %c128_227 = arith.constant 128 : index
    %236 = vector.load %arg19[%c2_226, %c128_227] : memref<3x384xf32, #tpu.memory_space<vmem>>, vector<1x128xf32>
    %237 = arith.truncf %236 : vector<1x128xf32> to vector<1x128xbf16>
    %c7_228 = arith.constant 7 : index
    %c0_229 = arith.constant 0 : index
    %c0_230 = arith.constant 0 : index
    %238 = vector.load %arg13[%c7_228, %c0_229, %c0_230] : memref<9x128x128xbf16, #tpu.memory_space<vmem>>, vector<1x128x128xbf16>
    %239 = vector.shape_cast %238 : vector<1x128x128xbf16> to vector<128x128xbf16>
    %cst_231 = arith.constant dense<0.000000e+00> : vector<1x128xf32>
    %240 = tpu.matmul %237, %239, %cst_231 {dimension_numbers = #tpu.dot_dimension_numbers<[1], [0], [0], [1], [0, 0, 1, 1], [], []>} : vector<1x128xbf16>, vector<128x128xbf16>, vector<1x128xf32> -> vector<1x128xf32>
    %241 = arith.addf %235, %240 : vector<1x128xf32>
    %c2_232 = arith.constant 2 : index
    %c256_233 = arith.constant 256 : index
    %242 = vector.load %arg19[%c2_232, %c256_233] : memref<3x384xf32, #tpu.memory_space<vmem>>, vector<1x128xf32>
    %243 = arith.truncf %242 : vector<1x128xf32> to vector<1x128xbf16>
    %c8_234 = arith.constant 8 : index
    %c0_235 = arith.constant 0 : index
    %c0_236 = arith.constant 0 : index
    %244 = vector.load %arg13[%c8_234, %c0_235, %c0_236] : memref<9x128x128xbf16, #tpu.memory_space<vmem>>, vector<1x128x128xbf16>
    %245 = vector.shape_cast %244 : vector<1x128x128xbf16> to vector<128x128xbf16>
    %cst_237 = arith.constant dense<0.000000e+00> : vector<1x128xf32>
    %246 = tpu.matmul %243, %245, %cst_237 {dimension_numbers = #tpu.dot_dimension_numbers<[1], [0], [0], [1], [0, 0, 1, 1], [], []>} : vector<1x128xbf16>, vector<128x128xbf16>, vector<1x128xf32> -> vector<1x128xf32>
    %247 = arith.addf %241, %246 : vector<1x128xf32>
    %c0_238 = arith.constant 0 : index
    %c0_239 = arith.constant 0 : index
    %248 = vector.load %arg14[%c0_238, %c0_239] : memref<1x128xf32, #tpu.memory_space<vmem>>, vector<1x128xf32>
    %249 = arith.addf %247, %248 : vector<1x128xf32>
    %250 = arith.addf %249, %127 : vector<1x128xf32>
    %cst_240 = arith.constant 0.000000e+00 : f32
    %251 = vector.broadcast %cst_240 : f32 to vector<1x128xf32>
    %252 = arith.maximumf %250, %251 : vector<1x128xf32>
    %cst_241 = arith.constant dense<0.000000e+00> : vector<128xf32>
    %253 = vector.multi_reduction <add>, %252, %cst_241 [0] : vector<1x128xf32> to vector<128xf32>
    %254 = vector.shape_cast %253 : vector<128xf32> to vector<1x128xf32>
    %cst_242 = arith.constant 1.000000e+00 : f32
    %255 = vector.broadcast %cst_242 : f32 to vector<1x128xf32>
    %256 = arith.divf %254, %255 : vector<1x128xf32>
    %c0_243 = arith.constant 0 : index
    %c0_244 = arith.constant 0 : index
    %257 = vector.load %arg17[%c0_243, %c0_244] : memref<1x128xf32, #tpu.memory_space<vmem>>, vector<1x128xf32>
    tpu.vector_store %arg17[%c0_243, %c0_244], %256 {strides = array<i32>} : memref<1x128xf32, #tpu.memory_space<vmem>>, vector<1x128xf32>,
    %258 = arith.truncf %256 : vector<1x128xf32> to vector<1x128xbf16>
    %c0_245 = arith.constant 0 : index
    %c0_246 = arith.constant 0 : index
    %259 = vector.load %arg15[%c0_245, %c0_246] : memref<128x20xbf16, #tpu.memory_space<vmem>>, vector<128x20xbf16>
    %cst_247 = arith.constant dense<0.000000e+00> : vector<1x20xf32>
    %260 = tpu.matmul %258, %259, %cst_247 {dimension_numbers = #tpu.dot_dimension_numbers<[1], [0], [0], [1], [0, 0, 1, 1], [], []>} : vector<1x128xbf16>, vector<128x20xbf16>, vector<1x20xf32> -> vector<1x20xf32>
    %c0_248 = arith.constant 0 : index
    %c0_249 = arith.constant 0 : index
    %261 = vector.load %arg16[%c0_248, %c0_249] : memref<1x20xf32, #tpu.memory_space<vmem>>, vector<1x20xf32>
    %262 = arith.addf %260, %261 : vector<1x20xf32>
    %c0_250 = arith.constant 0 : index
    %c0_251 = arith.constant 0 : index
    %263 = vector.load %arg18[%c0_250, %c0_251] : memref<1x20xf32, #tpu.memory_space<vmem>>, vector<1x20xf32>
    tpu.vector_store %arg18[%c0_250, %c0_251], %262 {strides = array<i32>} : memref<1x20xf32, #tpu.memory_space<vmem>>, vector<1x20xf32>,
    return
  }
  func.func @transform_0(%arg0: i32) -> (i32, i32) {
    %c0_i32 = arith.constant 0 : i32
    %c0_i32_0 = arith.constant 0 : i32
    %c0_i32_1 = arith.constant 0 : i32
    return %c0_i32, %c0_i32_0 : i32, i32
  }
  func.func @transform_1(%arg0: i32) -> (i32, i32) {
    %c0_i32 = arith.constant 0 : i32
    %c0_i32_0 = arith.constant 0 : i32
    %c0_i32_1 = arith.constant 0 : i32
    return %c0_i32, %c0_i32_0 : i32, i32
  }
  func.func @transform_2(%arg0: i32) -> (i32, i32) {
    %c0_i32 = arith.constant 0 : i32
    %c0_i32_0 = arith.constant 0 : i32
    %c0_i32_1 = arith.constant 0 : i32
    return %c0_i32, %c0_i32_0 : i32, i32
  }
  func.func @transform_3(%arg0: i32) -> (i32, i32) {
    %c0_i32 = arith.constant 0 : i32
    %c0_i32_0 = arith.constant 0 : i32
    %c0_i32_1 = arith.constant 0 : i32
    return %c0_i32, %c0_i32_0 : i32, i32
  }
  func.func @transform_4(%arg0: i32) -> (i32, i32, i32) {
    %c0_i32 = arith.constant 0 : i32
    %c0_i32_0 = arith.constant 0 : i32
    %c0_i32_1 = arith.constant 0 : i32
    %c0_i32_2 = arith.constant 0 : i32
    return %c0_i32, %c0_i32_0, %c0_i32_1 : i32, i32, i32
  }
  func.func @transform_5(%arg0: i32) -> (i32, i32) {
    %c0_i32 = arith.constant 0 : i32
    %c0_i32_0 = arith.constant 0 : i32
    %c0_i32_1 = arith.constant 0 : i32
    return %c0_i32, %c0_i32_0 : i32, i32
  }
  func.func @transform_6(%arg0: i32) -> (i32, i32, i32) {
    %c0_i32 = arith.constant 0 : i32
    %c0_i32_0 = arith.constant 0 : i32
    %c0_i32_1 = arith.constant 0 : i32
    %c0_i32_2 = arith.constant 0 : i32
    return %c0_i32, %c0_i32_0, %c0_i32_1 : i32, i32, i32
  }
  func.func @transform_7(%arg0: i32) -> (i32, i32) {
    %c0_i32 = arith.constant 0 : i32
    %c0_i32_0 = arith.constant 0 : i32
    %c0_i32_1 = arith.constant 0 : i32
    return %c0_i32, %c0_i32_0 : i32, i32
  }
  func.func @transform_8(%arg0: i32) -> (i32, i32) {
    %c0_i32 = arith.constant 0 : i32
    %c0_i32_0 = arith.constant 0 : i32
    %c0_i32_1 = arith.constant 0 : i32
    return %c0_i32, %c0_i32_0 : i32, i32
  }
  func.func @transform_9(%arg0: i32) -> (i32, i32) {
    %c0_i32 = arith.constant 0 : i32
    %c0_i32_0 = arith.constant 0 : i32
    %c0_i32_1 = arith.constant 0 : i32
    return %c0_i32, %c0_i32_0 : i32, i32
  }
  func.func @transform_10(%arg0: i32) -> (i32, i32, i32) {
    %c0_i32 = arith.constant 0 : i32
    %c0_i32_0 = arith.constant 0 : i32
    %c0_i32_1 = arith.constant 0 : i32
    %c0_i32_2 = arith.constant 0 : i32
    return %c0_i32, %c0_i32_0, %c0_i32_1 : i32, i32, i32
  }
  func.func @transform_11(%arg0: i32) -> (i32, i32) {
    %c0_i32 = arith.constant 0 : i32
    %c0_i32_0 = arith.constant 0 : i32
    %c0_i32_1 = arith.constant 0 : i32
    return %c0_i32, %c0_i32_0 : i32, i32
  }
  func.func @transform_12(%arg0: i32) -> (i32, i32, i32) {
    %c0_i32 = arith.constant 0 : i32
    %c0_i32_0 = arith.constant 0 : i32
    %c0_i32_1 = arith.constant 0 : i32
    %c0_i32_2 = arith.constant 0 : i32
    return %c0_i32, %c0_i32_0, %c0_i32_1 : i32, i32, i32
  }
  func.func @transform_13(%arg0: i32) -> (i32, i32) {
    %c0_i32 = arith.constant 0 : i32
    %c0_i32_0 = arith.constant 0 : i32
    %c0_i32_1 = arith.constant 0 : i32
    return %c0_i32, %c0_i32_0 : i32, i32
  }
  func.func @transform_14(%arg0: i32) -> (i32, i32) {
    %c0_i32 = arith.constant 0 : i32
    %c0_i32_0 = arith.constant 0 : i32
    %c0_i32_1 = arith.constant 0 : i32
    return %c0_i32, %c0_i32_0 : i32, i32
  }
  func.func @transform_15(%arg0: i32) -> (i32, i32) {
    %c0_i32 = arith.constant 0 : i32
    %c0_i32_0 = arith.constant 0 : i32
    %c0_i32_1 = arith.constant 0 : i32
    return %c0_i32, %c0_i32_0 : i32, i32
  }
  func.func @transform_16(%arg0: i32) -> (i32, i32) {
    %c0_i32 = arith.constant 0 : i32
    %c0_i32_0 = arith.constant 0 : i32
    %c0_i32_1 = arith.constant 0 : i32
    return %c0_i32, %c0_i32_0 : i32, i32
  }
  func.func @transform_17(%arg0: i32) -> (i32, i32) {
    %c0_i32 = arith.constant 0 : i32
    %c0_i32_0 = arith.constant 0 : i32
    %c0_i32_1 = arith.constant 0 : i32
    return %c0_i32, %c0_i32_0 : i32, i32
  }
}

</mosaic_0001>

<bundles_post_ra>
// kernel: _lambda_.7
= control target key start
LH: loop header
LB: loop body
LE: loop exit
PB: predicated region body
PF: predicated region fallthrough
CT: control target
= control target key end

     0   :  { %19 = vsyncpa [#allocation4], 0  ;;  %s2953_s0 = inlined_call_operand.vmem [shape: f32[3,48], index: 0, kind: input, shape index: {}]   ;;  %s2954_s1 = inlined_call_operand.vmem [shape: f32[3,48], index: 1, kind: input, shape index: {}]   ;;  %s2955_s2 = inlined_call_operand.vmem [shape: f32[3,48], index: 2, kind: input, shape index: {}]   ;;  %s2956_s3 = inlined_call_operand.vmem [shape: f32[3,48], index: 3, kind: input, shape index: {}]   ;;  %s2957_s4 = inlined_call_operand.hbm [shape: bf16[9,32,64], index: 4, kind: input, shape index: {}]   ;;  %s2958_s5 = inlined_call_operand.vmem [shape: f32[1,64], index: 5, kind: input, shape index: {}]   ;;  %s2959_s6 = inlined_call_operand.hbm [shape: bf16[9,64,64], index: 6, kind: input, shape index: {}]   ;;  %s2960_s7 = inlined_call_operand.vmem [shape: f32[1,64], index: 7, kind: input, shape index: {}]   ;;  %s2961_s8 = inlined_call_operand.vmem [shape: bf16[32,64], index: 8, kind: input, shape index: {}]   ;;  %s2962_s9 = inlined_call_operand.vmem [shape: f32[1,64], index: 9, kind: input, shape index: {}]   ;;  %s2963_s10 = inlined_call_operand.hbm [shape: bf16[9,64,64], index: 10, kind: input, shape index: {}]   ;;  %s2964_s11 = inlined_call_operand.vmem [shape: f32[1,64], index: 11, kind: input, shape index: {}]   ;;  %s2965_s12 = inlined_call_operand.hbm [shape: bf16[9,64,64], index: 12, kind: input, shape index: {}]   ;;  %s2966_s13 = inlined_call_operand.vmem [shape: f32[1,64], index: 13, kind: input, shape index: {}]   ;;  %s2967_s14 = inlined_call_operand.vmem [shape: f32[2,64], index: 14, kind: output, shape index: {}]  }
   0x1   :  { %20 = vsyncpa [#allocation6], 0 }
   0x2   :  { %21 = vsyncpa [#allocation9], 0  ;;  %s49_s15 = sshll.u32 %s2959_s6, 4  ;;  %s2727_s16 = smov [#allocation5]   ;;  %s50_s15 = int_to_ptr.hbm [resolvable:$true] %s49_s15 }
   0x3   :  { %s51_s17 = sshll.u32 %s2727_s16, 4  ;;  %s34_s20 = sshll.u32 %s2957_s4, 4  ;;  %s52_s17 = int_to_ptr.vmem [resolvable:$true] %s51_s17  ;;  %s35_s20 = int_to_ptr.hbm [resolvable:$true] %s34_s20 }
   0x4   :  { %s2728_s21 = smov 64   ;;  %s2729_s22 = smov 4  }
   0x5   :  { %57 = dma.hbm_to_vmem [thread:$0]  %s50_s15, 4608, %s52_s17, [#allocation6], %s2728_s21, %s2728_s21, %s2729_s22  }
   0x6   :  { %s2730_s23 = smov [#allocation3]   ;;  %s68_s6 = sshll.u32 %s2963_s10, 4  ;;  %s69_s6 = int_to_ptr.hbm [resolvable:$true] %s68_s6 }
   0x7   :  { %s36_s24 = sshll.u32 %s2730_s23, 4  ;;  %s83_s4 = sshll.u32 %s2965_s12, 4  ;;  %s37_s24 = int_to_ptr.vmem [resolvable:$true] %s36_s24  ;;  %s84_s4 = int_to_ptr.hbm [resolvable:$true] %s83_s4 }
   0x8   :  { %42 = dma.hbm_to_vmem [thread:$0]  %s35_s20, 2304, %s37_s24, [#allocation4], %s2728_s21, %s2728_s21, %s2729_s22  }
   0x9   :  { %s2731_s29 = smov [#allocation7]   ;;  %s2732_s15 = smov [#allocation8]  }
   0xa   :  { %s70_s30 = sshll.u32 %s2731_s29, 4  ;;  %s85_s16 = sshll.u32 %s2732_s15, 4  ;;  %s71_s30 = int_to_ptr.vmem [resolvable:$true] %s70_s30  ;;  %s86_s16 = int_to_ptr.vmem [resolvable:$true] %s85_s16 }
   0xb   :  { %76 = dma.hbm_to_vmem [thread:$0]  %s69_s6, 4608, %s71_s30, [#allocation6], %s2728_s21, %s2728_s21, %s2729_s22  }
   0xc   :  { %91 = dma.hbm_to_vmem [thread:$0]  %s84_s4, 4608, %s86_s16, [#allocation9], %s2728_s21, %s2728_s21, %s2729_s22  }
   0xd   :  { %2721 = dma.done.wait [#allocation4], 2304  }
   0xe   :  { %2722 = vsyncadd [#allocation4], 4294964992 }
   0xf   :  { %2723 = dma.done.wait [#allocation6], 9216  }
  0x10   :  { %2724 = vsyncadd [#allocation6], 4294958080 }
  0x11   :  { %2725 = dma.done.wait [#allocation9], 4608  }
  0x12   :  { %2726 = vsyncadd [#allocation9], 4294962688  ;;  %v111_v0 = vld [vmem:[%s2953_s0] sm:$0x3]  ;;  %v2484_v6 = vld [vmem:[#allocation3 + $0x10] sm:$0xff]  ;;  %s2733_s22 = smov 112  }
  0x13   :  { %v327_v1 = vld [vmem:[%s2953_s0 + $0x1] sm:$0x3]  ;;  %v112_v2 = vpack.c.bf16 %v111_v0, %v111_v0  ;;  %v2483_v7 = vld [vmem:[#allocation3 + $0x8] sm:$0xff]  ;;  %v2482_v10 = vld [vmem:[#allocation3] sm:$0xff]  ;;  %vm136_vm0 = vcmask 261120   ;;  %v2734_v47 = vmov 0.0  }
  0x14   :  { %v328_v3 = vpack.c.bf16 %v327_v1, %v327_v1  ;;  %v2485_v4 = vld [vmem:[#allocation3 + $0x18] sm:$0xff]  ;;  %v2487_v11 = vld [vmem:[#allocation3 + $0x28] sm:$0xff]  ;;  %174 = vmatpush.bf16.msra.mxu1 %v2483_v7  ;;  %v2488_v12 = vld [vmem:[#allocation3 + $0x30] sm:$0xff]  ;;  %442 = vst [vmem:[#allocation2] sm:$0xf] %v2734_v47  ;;  %s2735_s27 = smov 32  }
  0x15   :  { %v218_v5 = vld [vmem:[%s2955_s2] sm:$0x3]  ;;  %187 = vrot.lane.b32.xlu0 %v112_v2, %s2733_s22  ;;  %146 = vmatpush.bf16.msra.mxu0 %v2485_v4  ;;  %v2491_v13 = vld [vmem:[#allocation3 + $0x48] sm:$0xff]  ;;  %v2486_v14 = vld [vmem:[#allocation3 + $0x20] sm:$0xff]  ;;  %vm447_vm1 = vcmask 779520   ;;  %vm495_vm2 = vcmask 523264  }
  0x16   :  { %v2489_v8 = vld [vmem:[#allocation3 + $0x38] sm:$0xff]  ;;  %405 = vrot.lane.b32.xlu1 %v328_v3, %s2733_s22  ;;  %210 = vmatpush.bf16.msra.mxu2 %v2487_v11  ;;  %v219_v15 = vpack.c.bf16 %v218_v5, %v218_v5  ;;  %v2490_v17 = vld [vmem:[#allocation3 + $0x40] sm:$0xff]  ;;  %v2495_v19 = vld [vmem:[#allocation3 + $0x68] sm:$0xff]  ;;  %vm1924_vm3 = vcmask 517120  }
  0x17   :  { %v117_v9 = vld [vmem:[%s2954_s1] sm:$0x3]  ;;  %246 = vmatpush.bf16.msra.mxu3 %v2489_v8  ;;  %v2494_v23 = vld [vmem:[#allocation3 + $0x60] sm:$0xff]  ;;  %v2499_v24 = vld [vmem:[#allocation3 + $0x88] sm:$0xff] }
  0x18   :  { %v118_v16 = vpack.c.bf16 %v117_v9, %v117_v9  ;;  %175 = vmatpush.bf16.msra.mxu1 %v2482_v10  ;;  %v254_v18 = vld [vmem:[%s2956_s3] sm:$0x3]  ;;  %v2496_v25 = vld [vmem:[#allocation3 + $0x70] sm:$0xff]  ;;  %v2498_v29 = vld [vmem:[#allocation3 + $0x80] sm:$0xff] }
  0x19   :  { %147 = vmatpush.bf16.msra.mxu0 %v2484_v6  ;;  %v255_v20 = vpack.c.bf16 %v254_v18, %v254_v18  ;;  %v2497_v21 = vld [vmem:[#allocation3 + $0x78] sm:$0xff]  ;;  %v2492_v26 = vld [vmem:[#allocation3 + $0x50] sm:$0xff]  ;;  %v2503_v45 = vld [vmem:[#allocation5 + $0x18] sm:$0xff] }
  0x1a   :  { %211 = vmatpush.bf16.msra.mxu2 %v2486_v14  ;;  %v2493_v22 = vld [vmem:[#allocation3 + $0x58] sm:$0xff]  ;;  %v2515_v46 = vld [vmem:[#allocation5 + $0x78] sm:$0xff]  ;;  %v2502_v48 = vld [vmem:[#allocation5 + $0x10] sm:$0xff] }
  0x1b   :  { %247 = vmatpush.bf16.msra.mxu3 %v2488_v12  ;;  %1950 = vmatmul.msk.bf16.vlgmr.msra.gmra.mxu1 %vm136_vm0, %v112_v2  ;;  %v363_v27 = vld [vmem:[%s2954_s1 + $0x1] sm:$0x3]  ;;  %v2514_v49 = vld [vmem:[#allocation5 + $0x70] sm:$0xff]  ;;  %v2620_v62 = vld [vmem:[%s2958_s5] ss:$0 sm:$0xff]  ;;  %s2736_s5 = smov 96  }
  0x1c   :  { %1941 = vmatmul.msk.bf16.vlgmr.msra.gmra.mxu0 %vm136_vm0, %v118_v16  ;;  %319 = vmatpush.bf16.msrb.mxu1 %v2493_v22  ;;  %v364_v28 = vpack.c.bf16 %v363_v27, %v363_v27  ;;  %v2513_v4 = vld [vmem:[#allocation5 + $0x68] sm:$0xff]  ;;  %v2500_v5 = vld [vmem:[#allocation5] sm:$0xff]  ;;  %v2507_v7 = vld [vmem:[#allocation5 + $0x38] sm:$0xff] }
  0x1d   :  { %282 = vmatpush.bf16.msrb.mxu0 %v2491_v13  ;;  %296 = vrot.lane.b32.xlu0 %v219_v15, %s2733_s22  ;;  %v2512_v6 = vld [vmem:[#allocation5 + $0x60] sm:$0xff]  ;;  %v2511_v8 = vld [vmem:[#allocation5 + $0x58] sm:$0xff]  ;;  %v2506_v9 = vld [vmem:[#allocation5 + $0x30] sm:$0xff] }
  0x1e   :  { %1968 = vmatmul.msk.bf16.vlgmr.msra.gmra.mxu3 %vm136_vm0, %v219_v15  ;;  %355 = vmatpush.bf16.msrb.mxu2 %v2495_v19  ;;  %v2510_v10 = vld [vmem:[#allocation5 + $0x50] sm:$0xff]  ;;  %v2505_v12 = vld [vmem:[#allocation5 + $0x28] sm:$0xff]  ;;  %v2504_v13 = vld [vmem:[#allocation5 + $0x20] sm:$0xff] }
  0x1f   :  { %391 = vmatpush.bf16.msrb.mxu3 %v2497_v21  ;;  %v2531_v21 = vld [vmem:[#allocation5 + $0xf8] sm:$0xff]  ;;  %v2508_v22 = vld [vmem:[#allocation5 + $0x40] sm:$0xff]  ;;  %v2529_v27 = vld [vmem:[#allocation5 + $0xe8] sm:$0xff] }
  0x20   :  { %320 = vmatpush.bf16.msrb.mxu1 %v2492_v26  ;;  %v2527_v26 = vld [vmem:[#allocation5 + $0xd8] sm:$0xff] }
  0x21   :  { %283 = vmatpush.bf16.msrb.mxu0 %v2490_v17 }
  0x22   :  { %356 = vmatpush.bf16.msrb.mxu2 %v2494_v23  ;;  %v2530_v23 = vld [vmem:[#allocation5 + $0xf0] sm:$0xff] }
  0x23   :  { %392 = vmatpush.bf16.msrb.mxu3 %v2496_v25  ;;  %v2519_v25 = vld [vmem:[#allocation5 + $0x98] sm:$0xff] }
  0x24   :  { %503 = vmatpush.bf16.msra.mxu1 %v2507_v7 }
  0x25   :  { %428 = vmatpush.bf16.msra.mxu0 %v2499_v24  ;;  %v2523_v24 = vld [vmem:[#allocation5 + $0xb8] sm:$0xff] }
  0x27   :  { %594 = vmatpush.bf16.msra.mxu3 %v2511_v8 }
  0x28   :  { %504 = vmatpush.bf16.msra.mxu1 %v2506_v9 }
  0x29   :  { %429 = vmatpush.bf16.msra.mxu0 %v2498_v29  ;;  %v2518_v29 = vld [vmem:[#allocation5 + $0x90] sm:$0xff] }
  0x2b   :  { %595 = vmatpush.bf16.msra.mxu3 %v2510_v10 }
  0x2c   :  { %1977 = vmatmul.msk.bf16.vlgmr.msrb.gmra.mxu0 %vm136_vm0, %v255_v20  ;;  %505 = vmatpush.bf16.msra.mxu1 %v2505_v12  ;;  %v2509_v20 = vld [vmem:[#allocation5 + $0x48] sm:$0xff] }
  0x2d   :  { %646 = vmatpush.bf16.msrb.mxu0 %v2515_v46 }
  0x2e   :  { %2004 = vmatmul.msk.bf16.vlgmr.msrb.gmra.mxu3 %vm136_vm0, %v364_v28  ;;  %v2522_v28 = vld [vmem:[#allocation5 + $0xb0] sm:$0xff] }
  0x2f   :  { %596 = vmatpush.bf16.msra.mxu3 %v2509_v20 }
  0x30   :  { %506 = vmatpush.bf16.msra.mxu1 %v2504_v13 }
  0x31   :  { %647 = vmatpush.bf16.msrb.mxu0 %v2514_v49 }
  0x33   :  { %597 = vmatpush.bf16.msra.mxu3 %v2508_v22 }
  0x35   :  { %648 = vmatpush.bf16.msrb.mxu0 %v2513_v4 }
  0x37   :  { %803 = vmatpush.bf16.msrb.mxu3 %v2527_v26 }
  0x39   :  { %649 = vmatpush.bf16.msrb.mxu0 %v2512_v6 }
  0x87   :  { %v188_v30 = vpop.permute.xlu0 %187 }
  0x88   :  { %v406_v31 = vpop.permute.xlu1 %405  ;;  %1959 = vmatmul.msk.bf16.vlgmr.msra.gmra.mxu2 %vm136_vm0, %v188_v30  ;;  %v2526_v30 = vld [vmem:[#allocation5 + $0xd0] sm:$0xff] }
  0x89   :  { %2013 = vmatmul.msk.bf16.vlgmr.msra.gmra.mxu0 %vm136_vm0, %v406_v31  ;;  %543 = vmatpush.bf16.msra.mxu2 %v2503_v45  ;;  %v2528_v31 = vld [vmem:[#allocation5 + $0xe0] sm:$0xff] }
  0x8a   :  { %856 = vmatpush.bf16.msra.mxu0 %v2531_v21  ;;  %804 = vmatpush.bf16.msrb.mxu3 %v2526_v30  ;;  %v2532_v45 = vld [vmem:[#allocation5 + $0x100] sm:$0xff] }
  0x8b   :  { %v2550_v30 = vld [vmem:[#allocation7 + $0x60] sm:$0xff] }
  0x8d   :  { %544 = vmatpush.bf16.msra.mxu2 %v2502_v48 }
  0x8e   :  { %857 = vmatpush.bf16.msra.mxu0 %v2530_v23 }
  0x8f   :  { %v297_v32 = vpop.permute.xlu0 %296 }
  0x90   :  { %1986 = vmatmul.msk.bf16.vlgmr.msrb.gmra.mxu1 %vm136_vm0, %v297_v32  ;;  %v2521_v32 = vld [vmem:[#allocation5 + $0xa8] sm:$0xff] }
  0x91   :  { %699 = vmatpush.bf16.msrb.mxu1 %v2519_v25 }
  0x92   :  { %858 = vmatpush.bf16.msra.mxu0 %v2529_v27  ;;  %v2539_v27 = vld [vmem:[#allocation7 + $0x8] sm:$0xff] }
  0x95   :  { %700 = vmatpush.bf16.msrb.mxu1 %v2518_v29  ;;  %v2538_v29 = vld [vmem:[#allocation7] sm:$0xff] }
  0x96   :  { %859 = vmatpush.bf16.msra.mxu0 %v2528_v31  ;;  %v2545_v31 = vld [vmem:[#allocation7 + $0x38] sm:$0xff] }
  0x98   :  { %1995 = vmatmul.msk.bf16.vlgmr.msrb.gmra.mxu2 %vm136_vm0, %v328_v3  ;;  %v177_v34 = vpop.f32.mrf.mxu1  ;;  %v2501_v3 = vld [vmem:[#allocation5 + $0x8] sm:$0xff] }
  0x99   :  { %v149_v33 = vpop.f32.mrf.mxu0  ;;  %545 = vmatpush.bf16.msra.mxu2 %v2501_v3  ;;  %v2552_v3 = vld [vmem:[#allocation7 + $0x70] sm:$0xff] }
  0x9a   :  { %v178_v35 = vadd.f32 %v177_v34, %v149_v33  ;;  %v2517_v33 = vld [vmem:[#allocation5 + $0x88] sm:$0xff] }
  0x9b   :  { %v2525_v34 = vld [vmem:[#allocation5 + $0xc8] sm:$0xff]  ;;  %701 = vmatpush.bf16.msrb.mxu1 %v2517_v33  ;;  %v2544_v33 = vld [vmem:[#allocation7 + $0x30] sm:$0xff] }
  0x9c   :  { %805 = vmatpush.bf16.msrb.mxu3 %v2525_v34  ;;  %v2568_v34 = vld [vmem:[#allocation7 + $0xf0] sm:$0xff] }
  0x9d   :  { %546 = vmatpush.bf16.msra.mxu2 %v2500_v5 }
  0xa0   :  { %v179_v38 = vpop.f32.mrf.mxu1 }
  0xa1   :  { %v249_v36 = vpop.f32.mrf.mxu3  ;;  %v151_v37 = vpop.f32.mrf.mxu0  ;;  %751 = vmatpush.bf16.msrb.mxu2 %v2523_v24  ;;  %v2537_v38 = vld [vmem:[%s2961_s8 + $0x8] sm:$0xff] }
  0xa2   :  { %v2524_v37 = vld [vmem:[#allocation5 + $0xc0] sm:$0xff] }
  0xa3   :  { %806 = vmatpush.bf16.msrb.mxu3 %v2524_v37 }
  0xa5   :  { %752 = vmatpush.bf16.msrb.mxu2 %v2522_v28  ;;  %v2551_v28 = vld [vmem:[#allocation7 + $0x68] sm:$0xff] }
  0xa9   :  { %v251_v39 = vpop.f32.mrf.mxu3  ;;  %v285_v40 = vpop.f32.mrf.mxu0  ;;  %753 = vmatpush.bf16.msrb.mxu2 %v2521_v32  ;;  %v2569_v32 = vld [vmem:[#allocation7 + $0xf8] sm:$0xff] }
  0xaa   :  { %v2535_v39 = vld [vmem:[#allocation5 + $0x118] sm:$0xff] }
  0xb1   :  { %v287_v41 = vpop.f32.mrf.mxu0  ;;  %v394_v42 = vpop.f32.mrf.mxu3 }
  0xb9   :  { %v396_v43 = vpop.f32.mrf.mxu3 }
  0xba   :  { %v2533_v43 = vld [vmem:[#allocation5 + $0x108] sm:$0xff] }
 0x106   :  { %v431_v44 = vpop.f32.mrf.mxu0 }
 0x10b   :  { %v213_v50 = vpop.f32.mrf.mxu2 }
 0x10c   :  { %v217_v53 = vadd.f32 %v213_v50, %v178_v35  ;;  %v2520_v35 = vld [vmem:[#allocation5 + $0xa0] sm:$0xff]  ;;  %v918_v50 = vld [vmem:[%s2956_s3] sm:$0x3] }
 0x10d   :  { %v322_v51 = vpop.f32.mrf.mxu1  ;;  %754 = vmatpush.bf16.msrb.mxu2 %v2520_v35  ;;  %v2543_v35 = vld [vmem:[#allocation7 + $0x28] sm:$0xff] }
 0x10e   :  { %v433_v52 = vpop.f32.mrf.mxu0  ;;  %v253_v54 = vadd.f32 %v249_v36, %v217_v53  ;;  %v2516_v36 = vld [vmem:[#allocation5 + $0x80] sm:$0xff] }
 0x10f   :  { %702 = vmatpush.bf16.msrb.mxu1 %v2516_v36  ;;  %v919_v52 = vpack.c.bf16 %v918_v50, %v918_v50  ;;  %v2542_v36 = vld [vmem:[#allocation7 + $0x20] sm:$0xff]  ;;  %v2548_v50 = vld [vmem:[#allocation7 + $0x50] sm:$0xff] }
 0x110   :  { %v289_v57 = vadd.f32 %v285_v40, %v253_v54  ;;  %v2536_v40 = vld [vmem:[%s2961_s8] sm:$0xff] }
 0x112   :  { %v326_v58 = vadd.f32 %v322_v51, %v289_v57 }
 0x113   :  { %v215_v55 = vpop.f32.mrf.mxu2 }
 0x115   :  { %v324_v56 = vpop.f32.mrf.mxu1 }
 0x11b   :  { %v358_v59 = vpop.f32.mrf.mxu2 }
 0x11c   :  { %v362_v60 = vadd.f32 %v358_v59, %v326_v58 }
 0x11e   :  { %v398_v61 = vadd.f32 %v394_v42, %v362_v60  ;;  %v2534_v42 = vld [vmem:[#allocation5 + $0x110] sm:$0xff] }
 0x120   :  { %v435_v63 = vadd.f32 %v431_v44, %v398_v61  ;;  %v2541_v61 = vld [vmem:[#allocation7 + $0x18] sm:$0xff] }
 0x122   :  { %v440_v0 = vadd.f32 %v2620_v62, %v435_v63  ;;  %v2553_v62 = vld [vmem:[#allocation7 + $0x78] sm:$0xff] }
 0x123   :  { %v360_v1 = vpop.f32.mrf.mxu2 }
 0x124   :  { %v441_v2 = vmax.f32 %v440_v0, 0.0 }
 0x126   :  { %444 = vrot.lane.b32.xlu1 %v441_v2, %s2735_s27  ;;  %v2540_v2 = vld [vmem:[#allocation7 + $0x10] sm:$0xff] }
 0x198   :  { %v445_v11 = vpop.permute.xlu1 %444 }
 0x199   :  { %448 = vst.msk [vmem:[#allocation2 + $0x1] sm:$0x3] %vm447_vm1, %v445_v11 }
 0x1a0   :  { %v604_v14 = vld [vmem:[#allocation2 + $0x1] sm:$0x3] }
 0x1a1   :  { %v449_v15 = vld [vmem:[#allocation2] sm:$0x3]  ;;  %v761_v16 = vld [vmem:[#allocation2 + $0x2] sm:$0x3]  ;;  %v605_v17 = vpack.c.bf16 %v604_v14, %v604_v14 }
 0x1a2   :  { %v450_v18 = vpack.c.bf16 %v449_v15, %v449_v15  ;;  %963 = vst [vmem:[#allocation2] sm:$0xf] %v2734_v47  ;;  %v762_v19 = vpack.c.bf16 %v761_v16, %v761_v16 }
 0x1a3   :  { %666 = vrot.lane.b32.xlu1 %v605_v17, %s2736_s5  ;;  %718 = vrot.lane.b32.xlu0 %v605_v17, %s2728_s21 }
 0x1a4   :  { %2081 = vmatmul.msk.bf16.vlgmr.msrb.gmra.mxu0 %vm495_vm2, %v605_v17  ;;  %469 = vrot.lane.b32.xlu2 %v450_v18, %s2736_s5 }
 0x1a5   :  { %2047 = vmatmul.msk.bf16.vlgmr.msra.gmra.mxu2 %vm495_vm2, %v450_v18  ;;  %1062 = vmatpush.bf16.msrb.mxu0 %v2541_v61 }
 0x1a6   :  { %949 = vmatpush.bf16.msra.mxu2 %v2537_v38 }
 0x1a9   :  { %1063 = vmatpush.bf16.msrb.mxu0 %v2540_v2 }
 0x1aa   :  { %950 = vmatpush.bf16.msra.mxu2 %v2536_v40 }
 0x1ab   :  { %875 = vrot.lane.b32.xlu0 %v762_v19, %s2728_s21 }
 0x1ac   :  { %561 = vrot.lane.b32.xlu2 %v450_v18, %s2728_s21  ;;  %v2621_v18 = vld [vmem:[%s2960_s7] ss:$0 sm:$0xff] }
 0x1ad   :  { %1064 = vmatpush.bf16.msrb.mxu0 %v2539_v27 }
 0x1b1   :  { %1065 = vmatpush.bf16.msrb.mxu0 %v2538_v29 }
 0x1b4   :  { %823 = vrot.lane.b32.xlu2 %v762_v19, %s2736_s5 }
 0x1fe   :  { %v470_v41 = vpop.permute.xlu2 %469 }
 0x1ff   :  { %2030 = vmatmul.msk.bf16.vlgmr.msra.gmra.mxu1 %vm495_vm2, %v470_v41 }
 0x200   :  { %908 = vmatpush.bf16.msra.mxu1 %v2535_v39 }
 0x204   :  { %909 = vmatpush.bf16.msra.mxu1 %v2534_v42 }
 0x206   :  { %v562_v44 = vpop.permute.xlu2 %561 }
 0x207   :  { %2064 = vmatmul.msk.bf16.vlgmr.msra.gmra.mxu3 %vm495_vm2, %v562_v44  ;;  %v2567_v44 = vld [vmem:[#allocation7 + $0xe8] sm:$0xff] }
 0x208   :  { %910 = vmatpush.bf16.msra.mxu1 %v2533_v43  ;;  %1022 = vmatpush.bf16.msra.mxu3 %v2545_v31 }
 0x20c   :  { %911 = vmatpush.bf16.msra.mxu1 %v2532_v45  ;;  %1023 = vmatpush.bf16.msra.mxu3 %v2544_v33  ;;  %v2557_v45 = vld [vmem:[#allocation7 + $0x98] sm:$0xff] }
 0x20e   :  { %v824_v46 = vpop.permute.xlu2 %823 }
 0x20f   :  { %2149 = vmatmul.msk.bf16.vlgmr.msra.gmra.mxu0 %vm495_vm2, %v824_v46  ;;  %v2549_v46 = vld [vmem:[#allocation7 + $0x58] sm:$0xff] }
 0x210   :  { %1024 = vmatpush.bf16.msra.mxu3 %v2543_v35 }
 0x214   :  { %1025 = vmatpush.bf16.msra.mxu3 %v2542_v36  ;;  %v2623_v36 = vld [vmem:[%s2964_s11] ss:$0 sm:$0xff] }
 0x215   :  { %v667_v48 = vpop.permute.xlu1 %666  ;;  %v719_v49 = vpop.permute.xlu0 %718 }
 0x216   :  { %2098 = vmatmul.msk.bf16.vlgmr.msrb.gmra.mxu1 %vm495_vm2, %v667_v48  ;;  %2115 = vmatmul.msk.bf16.vlgmr.msrb.gmra.mxu2 %vm495_vm2, %v719_v49  ;;  %v2556_v48 = vld [vmem:[#allocation7 + $0x90] sm:$0xff]  ;;  %v2561_v49 = vld [vmem:[#allocation7 + $0xb8] sm:$0xff] }
 0x217   :  { %2132 = vmatmul.msk.bf16.vlgmr.msrb.gmra.mxu3 %vm495_vm2, %v762_v19  ;;  %1165 = vmatpush.bf16.msrb.mxu2 %v2553_v62  ;;  %v2622_v19 = vld [vmem:[%s2962_s9] ss:$0 sm:$0xff] }
 0x218   :  { %1218 = vmatpush.bf16.msrb.mxu3 %v2557_v45  ;;  %1113 = vmatpush.bf16.msrb.mxu1 %v2549_v46  ;;  %v2563_v62 = vld [vmem:[#allocation7 + $0xc8] sm:$0xff]  ;;  %v2586_v45 = vld [vmem:[#allocation8 + $0x60] sm:$0xff] }
 0x219   :  { %1270 = vmatpush.bf16.msra.mxu0 %v2561_v49 }
 0x21b   :  { %1166 = vmatpush.bf16.msrb.mxu2 %v2552_v3  ;;  %v2570_v3 = vld [vmem:[#allocation7 + $0x100] sm:$0xff] }
 0x21c   :  { %1219 = vmatpush.bf16.msrb.mxu3 %v2556_v48  ;;  %1114 = vmatpush.bf16.msrb.mxu1 %v2548_v50 }
 0x21d   :  { %v876_v53 = vpop.permute.xlu0 %875 }
 0x21f   :  { %1167 = vmatpush.bf16.msrb.mxu2 %v2551_v28 }
 0x221   :  { %v651_v51 = vpop.f32.mrf.mxu0 }
 0x223   :  { %1168 = vmatpush.bf16.msrb.mxu2 %v2550_v30 }
 0x226   :  { %2166 = vmatmul.msk.bf16.vlgmr.msra.gmra.mxu1 %vm495_vm2, %v876_v53  ;;  %2175 = vmatmul.msk.bf16.vlgmr.msra.gmra.mxu2 %vm136_vm0, %v919_v52  ;;  %v2555_v52 = vld [vmem:[#allocation7 + $0x88] sm:$0xff] }
 0x227   :  { %1375 = vmatpush.bf16.msra.mxu2 %v2569_v32  ;;  %v2547_v53 = vld [vmem:[#allocation7 + $0x48] sm:$0xff]  ;;  %1220 = vmatpush.bf16.msrb.mxu3 %v2555_v52 }
 0x228   :  { %v548_v54 = vpop.f32.mrf.mxu2  ;;  %1115 = vmatpush.bf16.msrb.mxu1 %v2547_v53 }
 0x229   :  { %v653_v55 = vpop.f32.mrf.mxu0 }
 0x22a   :  { %v2546_v55 = vld [vmem:[#allocation7 + $0x40] sm:$0xff] }
 0x22b   :  { %1376 = vmatpush.bf16.msra.mxu2 %v2568_v34 }
 0x22c   :  { %1116 = vmatpush.bf16.msrb.mxu1 %v2546_v55  ;;  %v2585_v55 = vld [vmem:[#allocation8 + $0x58] sm:$0xff] }
 0x22f   :  { %1377 = vmatpush.bf16.msra.mxu2 %v2567_v44  ;;  %v2587_v44 = vld [vmem:[#allocation8 + $0x68] sm:$0xff] }
 0x230   :  { %v550_v56 = vpop.f32.mrf.mxu2 }
 0x231   :  { %v2559_v56 = vld [vmem:[#allocation7 + $0xa8] sm:$0xff] }
 0x27c   :  { %v508_v57 = vpop.f32.mrf.mxu1 }
 0x27d   :  { %v549_v63 = vadd.f32 %v548_v54, %v508_v57  ;;  %v2554_v54 = vld [vmem:[#allocation7 + $0x80] sm:$0xff]  ;;  %v2565_v57 = vld [vmem:[#allocation7 + $0xd8] sm:$0xff] }
 0x27e   :  { %1221 = vmatpush.bf16.msrb.mxu3 %v2554_v54  ;;  %1322 = vmatpush.bf16.msra.mxu1 %v2565_v57  ;;  %v2581_v54 = vld [vmem:[#allocation8 + $0x38] sm:$0xff]  ;;  %v2584_v57 = vld [vmem:[#allocation8 + $0x50] sm:$0xff] }
 0x284   :  { %v510_v58 = vpop.f32.mrf.mxu1 }
 0x285   :  { %v2558_v58 = vld [vmem:[#allocation7 + $0xa0] sm:$0xff] }
 0x28a   :  { %v599_v59 = vpop.f32.mrf.mxu3 }
 0x28b   :  { %v603_v4 = vadd.f32 %v599_v59, %v549_v63  ;;  %v2564_v59 = vld [vmem:[#allocation7 + $0xd0] sm:$0xff] }
 0x28c   :  { %v861_v60 = vpop.f32.mrf.mxu0  ;;  %1323 = vmatpush.bf16.msra.mxu1 %v2564_v59  ;;  %v2572_v63 = vld [vmem:[#allocation7 + $0x110] sm:$0xff]  ;;  %v2605_v59 = vld [vmem:[#allocation8 + $0xf8] sm:$0xff] }
 0x28d   :  { %v655_v6 = vadd.f32 %v651_v51, %v603_v4  ;;  %v2560_v51 = vld [vmem:[#allocation7 + $0xb0] sm:$0xff] }
 0x28e   :  { %1271 = vmatpush.bf16.msra.mxu0 %v2560_v51 }
 0x290   :  { %1324 = vmatpush.bf16.msra.mxu1 %v2563_v62  ;;  %v2579_v62 = vld [vmem:[#allocation8 + $0x28] sm:$0xff] }
 0x292   :  { %v601_v0 = vpop.f32.mrf.mxu3  ;;  %1272 = vmatpush.bf16.msra.mxu0 %v2559_v56  ;;  %v2580_v56 = vld [vmem:[#allocation8 + $0x30] sm:$0xff] }
 0x293   :  { %v704_v1 = vpop.f32.mrf.mxu1  ;;  %v2562_v0 = vld [vmem:[#allocation7 + $0xc0] sm:$0xff] }
 0x294   :  { %v863_v5 = vpop.f32.mrf.mxu0  ;;  %v708_v8 = vadd.f32 %v704_v1, %v655_v6  ;;  %v2571_v1 = vld [vmem:[#allocation7 + $0x108] sm:$0xff]  ;;  %1325 = vmatpush.bf16.msra.mxu1 %v2562_v0  ;;  %v2578_v0 = vld [vmem:[#allocation8 + $0x20] sm:$0xff] }
 0x296   :  { %1273 = vmatpush.bf16.msra.mxu0 %v2558_v58  ;;  %v2597_v58 = vld [vmem:[#allocation8 + $0xb8] sm:$0xff] }
 0x299   :  { %v756_v7 = vpop.f32.mrf.mxu2 }
 0x29a   :  { %v808_v9 = vpop.f32.mrf.mxu3  ;;  %v760_v11 = vadd.f32 %v756_v7, %v708_v8 }
 0x29b   :  { %v706_v10 = vpop.f32.mrf.mxu1 }
 0x29c   :  { %v812_v12 = vadd.f32 %v808_v9, %v760_v11 }
 0x29e   :  { %v865_v16 = vadd.f32 %v861_v60, %v812_v12  ;;  %v2573_v60 = vld [vmem:[#allocation7 + $0x118] sm:$0xff] }
 0x2a1   :  { %v758_v13 = vpop.f32.mrf.mxu2 }
 0x2a2   :  { %v810_v14 = vpop.f32.mrf.mxu3 }
 0x2a3   :  { %v913_v15 = vpop.f32.mrf.mxu1 }
 0x2a4   :  { %v917_v17 = vadd.f32 %v913_v15, %v865_v16  ;;  %v2577_v15 = vld [vmem:[#allocation8 + $0x18] sm:$0xff] }
 0x2a5   :  { %v2589_v16 = vld [vmem:[#allocation8 + $0x78] sm:$0xff] }
 0x2a6   :  { %v960_v21 = vadd.f32 %v2621_v18, %v917_v17  ;;  %v2576_v18 = vld [vmem:[#allocation8 + $0x10] sm:$0xff] }
 0x2a9   :  { %v952_v20 = vpop.f32.mrf.mxu2 }
 0x2aa   :  { %v953_v22 = vadd.f32 %v2622_v19, %v952_v20  ;;  %v2588_v19 = vld [vmem:[#allocation8 + $0x70] sm:$0xff] }
 0x2ab   :  { %v915_v23 = vpop.f32.mrf.mxu1 }
 0x2ac   :  { %v2897_v24 = vadd.f32 %v960_v21, %v953_v22 }
 0x2ae   :  { %v962_v25 = vmax.f32 %v2897_v24, 0.0 }
 0x2b0   :  { %965 = vrot.lane.b32.xlu1 %v962_v25, %s2735_s27 }
 0x2b1   :  { %v954_v26 = vpop.f32.mrf.mxu2 }
 0x322   :  { %v966_v37 = vpop.permute.xlu1 %965 }
 0x323   :  { %968 = vst.msk [vmem:[#allocation2 + $0x1] sm:$0x3] %vm447_vm1, %v966_v37 }
 0x32a   :  { %v1123_v38 = vld [vmem:[#allocation2 + $0x1] sm:$0x3] }
 0x32b   :  { %v969_v39 = vld [vmem:[#allocation2] sm:$0x3]  ;;  %v1280_v40 = vld [vmem:[#allocation2 + $0x2] sm:$0x3]  ;;  %v1124_v41 = vpack.c.bf16 %v1123_v38, %v1123_v38 }
 0x32c   :  { %v970_v42 = vpack.c.bf16 %v969_v39, %v969_v39  ;;  %1443 = vst [vmem:[#allocation2] sm:$0xf] %v2734_v47  ;;  %v1281_v43 = vpack.c.bf16 %v1280_v40, %v1280_v40  ;;  %v2566_v47 = vld [vmem:[#allocation7 + $0xe0] sm:$0xff] }
 0x32d   :  { %1185 = vrot.lane.b32.xlu0 %v1124_v41, %s2736_s5  ;;  %2243 = vmatmul.msk.bf16.vlgmr.msrb.gmra.mxu2 %vm495_vm2, %v1124_v41 }
 0x32e   :  { %1080 = vrot.lane.b32.xlu1 %v970_v42, %s2728_s21  ;;  %989 = vrot.lane.b32.xlu2 %v970_v42, %s2736_s5 }
 0x32f   :  { %2209 = vmatmul.msk.bf16.vlgmr.msrb.gmra.mxu0 %vm495_vm2, %v970_v42  ;;  %1378 = vmatpush.bf16.msra.mxu2 %v2566_v47  ;;  %v2574_v47 = vld [vmem:[#allocation8] sm:$0xff] }
 0x330   :  { %1502 = vmatpush.bf16.msrb.mxu0 %v2581_v54 }
 0x333   :  { %1593 = vmatpush.bf16.msrb.mxu2 %v2585_v55 }
 0x334   :  { %1503 = vmatpush.bf16.msrb.mxu0 %v2580_v56 }
 0x335   :  { %1237 = vrot.lane.b32.xlu0 %v1124_v41, %s2728_s21 }
 0x336   :  { %1394 = vrot.lane.b32.xlu1 %v1281_v43, %s2728_s21  ;;  %1342 = vrot.lane.b32.xlu2 %v1281_v43, %s2736_s5 }
 0x337   :  { %1594 = vmatpush.bf16.msrb.mxu2 %v2584_v57 }
 0x338   :  { %1504 = vmatpush.bf16.msrb.mxu0 %v2579_v62 }
 0x33c   :  { %1505 = vmatpush.bf16.msrb.mxu0 %v2578_v0 }
 0x388   :  { %v990_v61 = vpop.permute.xlu2 %989 }
 0x389   :  { %2192 = vmatmul.msk.bf16.vlgmr.msra.gmra.mxu3 %vm495_vm2, %v990_v61  ;;  %v2604_v61 = vld [vmem:[#allocation8 + $0xf0] sm:$0xff] }
 0x38a   :  { %1427 = vmatpush.bf16.msra.mxu3 %v2573_v60  ;;  %v2596_v60 = vld [vmem:[#allocation8 + $0xb0] sm:$0xff] }
 0x38e   :  { %1428 = vmatpush.bf16.msra.mxu3 %v2572_v63  ;;  %v2583_v63 = vld [vmem:[#allocation8 + $0x48] sm:$0xff] }
 0x38f   :  { %1595 = vmatpush.bf16.msrb.mxu2 %v2583_v63 }
 0x390   :  { %v1343_v2 = vpop.permute.xlu2 %1342 }
 0x391   :  { %2311 = vmatmul.msk.bf16.vlgmr.msra.gmra.mxu2 %vm495_vm2, %v1343_v2  ;;  %v2593_v2 = vld [vmem:[#allocation8 + $0x98] sm:$0xff] }
 0x392   :  { %1429 = vmatpush.bf16.msra.mxu3 %v2571_v1  ;;  %v2582_v1 = vld [vmem:[#allocation8 + $0x40] sm:$0xff] }
 0x393   :  { %1596 = vmatpush.bf16.msrb.mxu2 %v2582_v1 }
 0x396   :  { %1430 = vmatpush.bf16.msra.mxu3 %v2570_v3  ;;  %v2595_v3 = vld [vmem:[#allocation8 + $0xa8] sm:$0xff] }
 0x39f   :  { %v1186_v4 = vpop.permute.xlu0 %1185 }
 0x3a0   :  { %v1081_v5 = vpop.permute.xlu1 %1080  ;;  %2260 = vmatmul.msk.bf16.vlgmr.msrb.gmra.mxu3 %vm495_vm2, %v1186_v4  ;;  %v2601_v4 = vld [vmem:[#allocation8 + $0xd8] sm:$0xff] }
 0x3a1   :  { %2226 = vmatmul.msk.bf16.vlgmr.msrb.gmra.mxu1 %vm495_vm2, %v1081_v5  ;;  %1645 = vmatpush.bf16.msrb.mxu3 %v2589_v16  ;;  %v2603_v5 = vld [vmem:[#allocation8 + $0xe8] sm:$0xff] }
 0x3a2   :  { %1542 = vmatpush.bf16.msrb.mxu1 %v2577_v15  ;;  %1802 = vmatpush.bf16.msra.mxu2 %v2601_v4 }
 0x3a5   :  { %1646 = vmatpush.bf16.msrb.mxu3 %v2588_v19 }
 0x3a6   :  { %1543 = vmatpush.bf16.msrb.mxu1 %v2576_v18  ;;  %v2607_v18 = vld [vmem:[#allocation8 + $0x108] sm:$0xff] }
 0x3a7   :  { %v1238_v6 = vpop.permute.xlu0 %1237 }
 0x3a8   :  { %2277 = vmatmul.msk.bf16.vlgmr.msra.gmra.mxu0 %vm495_vm2, %v1238_v6  ;;  %v1395_v8 = vpop.permute.xlu1 %1394  ;;  %v2592_v6 = vld [vmem:[#allocation8 + $0x90] sm:$0xff] }
 0x3a9   :  { %1647 = vmatpush.bf16.msrb.mxu3 %v2587_v44  ;;  %1698 = vmatpush.bf16.msra.mxu0 %v2593_v2 }
 0x3ac   :  { %v1067_v7 = vpop.f32.mrf.mxu0 }
 0x3ad   :  { %1648 = vmatpush.bf16.msrb.mxu3 %v2586_v45  ;;  %1699 = vmatpush.bf16.msra.mxu0 %v2592_v6 }
 0x3b0   :  { %v1170_v9 = vpop.f32.mrf.mxu2  ;;  %2328 = vmatmul.msk.bf16.vlgmr.msra.gmra.mxu3 %vm495_vm2, %v1395_v8  ;;  %v2600_v8 = vld [vmem:[#allocation8 + $0xd0] sm:$0xff] }
 0x3b1   :  { %2294 = vmatmul.msk.bf16.vlgmr.msra.gmra.mxu1 %vm495_vm2, %v1281_v43  ;;  %v2575_v43 = vld [vmem:[#allocation8 + $0x8] sm:$0xff]  ;;  %1855 = vmatpush.bf16.msra.mxu3 %v2605_v59 }
 0x3b2   :  { %1544 = vmatpush.bf16.msrb.mxu1 %v2575_v43  ;;  %1803 = vmatpush.bf16.msra.mxu2 %v2600_v8 }
 0x3b4   :  { %v1069_v10 = vpop.f32.mrf.mxu0 }
 0x3b5   :  { %1856 = vmatpush.bf16.msra.mxu3 %v2604_v61  ;;  %v2591_v10 = vld [vmem:[#allocation8 + $0x88] sm:$0xff] }
 0x3b6   :  { %1545 = vmatpush.bf16.msrb.mxu1 %v2574_v47  ;;  %1700 = vmatpush.bf16.msra.mxu0 %v2591_v10 }
 0x3b8   :  { %v1172_v11 = vpop.f32.mrf.mxu2 }
 0x3b9   :  { %1857 = vmatpush.bf16.msra.mxu3 %v2603_v5  ;;  %v2599_v11 = vld [vmem:[#allocation8 + $0xc8] sm:$0xff] }
 0x3ba   :  { %1750 = vmatpush.bf16.msra.mxu1 %v2597_v58  ;;  %1804 = vmatpush.bf16.msra.mxu2 %v2599_v11 }
 0x3be   :  { %1751 = vmatpush.bf16.msra.mxu1 %v2596_v60 }
 0x3c2   :  { %1752 = vmatpush.bf16.msra.mxu1 %v2595_v3 }
 0x40c   :  { %v1027_v12 = vpop.f32.mrf.mxu3 }
 0x40d   :  { %v1068_v21 = vadd.f32 %v1067_v7, %v1027_v12  ;;  %v2594_v7 = vld [vmem:[#allocation8 + $0xa0] sm:$0xff] }
 0x40e   :  { %1753 = vmatpush.bf16.msra.mxu1 %v2594_v7  ;;  %v2590_v12 = vld [vmem:[#allocation8 + $0x80] sm:$0xff] }
 0x40f   :  { %1701 = vmatpush.bf16.msra.mxu0 %v2590_v12 }
 0x414   :  { %v1029_v13 = vpop.f32.mrf.mxu3  ;;  %v1380_v14 = vpop.f32.mrf.mxu2 }
 0x415   :  { %v2598_v13 = vld [vmem:[#allocation8 + $0xc0] sm:$0xff] }
 0x416   :  { %1805 = vmatpush.bf16.msra.mxu2 %v2598_v13 }
 0x41c   :  { %v1382_v17 = vpop.f32.mrf.mxu2 }
 0x41d   :  { %v2608_v17 = vld [vmem:[#allocation8 + $0x110] sm:$0xff] }
 0x41e   :  { %v1118_v20 = vpop.f32.mrf.mxu1 }
 0x41f   :  { %v1122_v22 = vadd.f32 %v1118_v20, %v1068_v21  ;;  %v2606_v21 = vld [vmem:[#allocation8 + $0x100] sm:$0xff] }
 0x421   :  { %v1174_v28 = vadd.f32 %v1170_v9, %v1122_v22  ;;  %v2602_v9 = vld [vmem:[#allocation8 + $0xe0] sm:$0xff] }
 0x422   :  { %1858 = vmatpush.bf16.msra.mxu3 %v2602_v9 }
 0x423   :  { %v1223_v23 = vpop.f32.mrf.mxu3 }
 0x424   :  { %v1227_v29 = vadd.f32 %v1223_v23, %v1174_v28 }
 0x425   :  { %v1275_v26 = vpop.f32.mrf.mxu0 }
 0x426   :  { %v1120_v27 = vpop.f32.mrf.mxu1  ;;  %v1279_v31 = vadd.f32 %v1275_v26, %v1227_v29 }
 0x42b   :  { %v1225_v30 = vpop.f32.mrf.mxu3 }
 0x42d   :  { %v1277_v32 = vpop.f32.mrf.mxu0 }
 0x42e   :  { %v1327_v33 = vpop.f32.mrf.mxu1 }
 0x42f   :  { %v1331_v34 = vadd.f32 %v1327_v33, %v1279_v31 }
 0x431   :  { %v1384_v35 = vadd.f32 %v1380_v14, %v1331_v34  ;;  %v2609_v14 = vld [vmem:[#allocation8 + $0x118] sm:$0xff] }
 0x433   :  { %v1432_v37 = vpop.f32.mrf.mxu3 }
 0x434   :  { %v1436_v38 = vadd.f32 %v1432_v37, %v1384_v35 }
 0x436   :  { %v1441_v39 = vadd.f32 %v2623_v36, %v1436_v38  ;;  %v1329_v40 = vpop.f32.mrf.mxu1 }
 0x438   :  { %v1442_v41 = vmax.f32 %v1441_v39, 0.0 }
 0x43a   :  { %1445 = vrot.lane.b32.xlu2 %v1442_v41, %s2735_s27 }
 0x43b   :  { %v1434_v42 = vpop.f32.mrf.mxu3 }
 0x494   :  { %v1446_v46 = vpop.permute.xlu2 %1445 }
 0x495   :  { %1448 = vst.msk [vmem:[#allocation2 + $0x1] sm:$0x3] %vm447_vm1, %v1446_v46 }
 0x49c   :  { %v1603_v48 = vld [vmem:[#allocation2 + $0x1] sm:$0x3] }
 0x49d   :  { %v1449_v49 = vld [vmem:[#allocation2] sm:$0x3]  ;;  %v1604_v50 = vpack.c.bf16 %v1603_v48, %v1603_v48  ;;  %v1760_v52 = vld [vmem:[#allocation2 + $0x2] sm:$0x3] }
 0x49e   :  { %v1450_v51 = vpack.c.bf16 %v1449_v49, %v1449_v49  ;;  %v2930_v53 = vpack.c.bf16 %v1760_v52, %v1760_v52  ;;  %v2624_v49 = vld [vmem:[%s2966_s13] ss:$0 sm:$0xff] }
 0x49f   :  { %1665 = vrot.lane.b32.xlu2 %v1604_v50, %s2736_s5  ;;  %2396 = vmatmul.msk.bf16.vlgmr.msrb.gmra.mxu3 %vm495_vm2, %v1604_v50 }
 0x4a0   :  { %1560 = vrot.lane.b32.xlu1 %v1450_v51, %s2728_s21  ;;  %1469 = vrot.lane.b32.xlu0 %v1450_v51, %s2736_s5 }
 0x4a1   :  { %2362 = vmatmul.msk.bf16.vlgmr.msrb.gmra.mxu1 %vm495_vm2, %v1450_v51 }
 0x4a7   :  { %1874 = vrot.lane.b32.xlu2 %v2930_v53, %s2728_s21 }
 0x4a8   :  { %1717 = vrot.lane.b32.xlu1 %v1604_v50, %s2728_s21  ;;  %1822 = vrot.lane.b32.xlu0 %v2930_v53, %s2736_s5 }
 0x4f9   :  { %v1666_v23 = vpop.permute.xlu2 %1665 }
 0x501   :  { %v1875_v29 = vpop.permute.xlu2 %1874 }
 0x512   :  { %v1561_v15 = vpop.permute.xlu1 %1560  ;;  %v1470_v16 = vpop.permute.xlu0 %1469 }
 0x513   :  { %2345 = vmatmul.msk.bf16.vlgmr.msrb.gmra.mxu0 %vm495_vm2, %v1470_v16  ;;  %2379 = vmatmul.msk.bf16.vlgmr.msrb.gmra.mxu2 %vm495_vm2, %v1561_v15 }
 0x514   :  { %1907 = vmatpush.bf16.msrb.mxu0 %v2609_v14 }
 0x518   :  { %1908 = vmatpush.bf16.msrb.mxu0 %v2608_v17 }
 0x51a   :  { %v1718_v19 = vpop.permute.xlu1 %1717  ;;  %v1823_v20 = vpop.permute.xlu0 %1822 }
 0x51b   :  { %2430 = vmatmul.msk.bf16.vlgmr.msra.gmra.mxu1 %vm495_vm2, %v1718_v19  ;;  %2464 = vmatmul.msk.bf16.vlgmr.msra.gmra.mxu3 %vm495_vm2, %v1823_v20 }
 0x51c   :  { %1909 = vmatpush.bf16.msrb.mxu0 %v2607_v18 }
 0x51e   :  { %v1547_v22 = vpop.f32.mrf.mxu1 }
 0x520   :  { %1910 = vmatpush.bf16.msrb.mxu0 %v2606_v21 }
 0x522   :  { %v1650_v26 = vpop.f32.mrf.mxu3 }
 0x523   :  { %2413 = vmatmul.msk.bf16.vlgmr.msra.gmra.mxu0 %vm495_vm2, %v1666_v23  ;;  %2447 = vmatmul.msk.bf16.vlgmr.msra.gmra.mxu2 %vm495_vm2, %v2930_v53 }
 0x526   :  { %v1549_v27 = vpop.f32.mrf.mxu1 }
 0x52a   :  { %v1652_v28 = vpop.f32.mrf.mxu3 }
 0x533   :  { %2481 = vmatmul.msk.bf16.vlgmr.msrb.gmra.mxu0 %vm495_vm2, %v1875_v29 }
 0x590   :  { %v1507_v30 = vpop.f32.mrf.mxu0 }
 0x591   :  { %v1548_v34 = vadd.f32 %v1547_v22, %v1507_v30 }
 0x596   :  { %v1598_v31 = vpop.f32.mrf.mxu2 }
 0x597   :  { %v1602_v37 = vadd.f32 %v1598_v31, %v1548_v34 }
 0x598   :  { %v1509_v32 = vpop.f32.mrf.mxu0  ;;  %v1755_v33 = vpop.f32.mrf.mxu1 }
 0x599   :  { %v1654_v40 = vadd.f32 %v1650_v26, %v1602_v37 }
 0x59e   :  { %v1600_v35 = vpop.f32.mrf.mxu2  ;;  %v1860_v36 = vpop.f32.mrf.mxu3 }
 0x5a0   :  { %v1703_v38 = vpop.f32.mrf.mxu0  ;;  %v1757_v39 = vpop.f32.mrf.mxu1 }
 0x5a1   :  { %v1707_v41 = vadd.f32 %v1703_v38, %v1654_v40 }
 0x5a3   :  { %v1759_v47 = vadd.f32 %v1755_v33, %v1707_v41 }
 0x5a6   :  { %v1807_v42 = vpop.f32.mrf.mxu2  ;;  %v1862_v43 = vpop.f32.mrf.mxu3 }
 0x5a7   :  { %v1811_v45 = vadd.f32 %v1807_v42, %v1759_v47 }
 0x5a8   :  { %v1705_v44 = vpop.f32.mrf.mxu0 }
 0x5a9   :  { %v1864_v48 = vadd.f32 %v1860_v36, %v1811_v45 }
 0x5ae   :  { %v1809_v46 = vpop.f32.mrf.mxu2 }
 0x5b0   :  { %v1912_v50 = vpop.f32.mrf.mxu0 }
 0x5b1   :  { %v1916_v51 = vadd.f32 %v1912_v50, %v1864_v48 }
 0x5b3   :  { %v1921_v52 = vadd.f32 %v2624_v49, %v1916_v51 }
 0x5b5   :  { %v1922_v53 = vadd.f32 %v1921_v52, %v962_v25 }
 0x5b7   :  { %v1923_v54 = vmax.f32 %v1922_v53, 0.0 }
 0x5b8   :  { %v1914_v55 = vpop.f32.mrf.mxu0 }
 0x5b9   :  { %1925 = vst.msk [vmem:[%s2967_s14] sm:$0x3] %vm1924_vm3, %v1923_v54 }
 0x5ba   :  { %1930 = vsyncpa [#allocation4], 1 }
 0x5bb   :  { %1931 = vsyncpa [#allocation6], 1 }
 0x5bc   :  { %1932 = vsyncpa [#allocation9], 1 }

// kernel: _lambda_.5
= control target key start
LH: loop header
LB: loop body
LE: loop exit
PB: predicated region body
PF: predicated region fallthrough
CT: control target
= control target key end

     0   :  { %s3279_s25 = smov 122   ;;  %s3280_s26 = smov 116   ;;  %vm59_vm0 = vcmask 392192   ;;  %s3962_s0 = inlined_call_operand.vmem [shape: f32[11,66], index: 0, kind: input, shape index: {}]   ;;  %s3963_s1 = inlined_call_operand.vmem [shape: f32[11,66], index: 1, kind: input, shape index: {}]   ;;  %s3964_s3 = inlined_call_operand.vmem [shape: f32[11,66], index: 3, kind: input, shape index: {}]   ;;  %s3965_s4 = inlined_call_operand.vmem [shape: bf16[49,48,128], index: 4, kind: input, shape index: {}]   ;;  %s3966_s2 = inlined_call_operand.vmem [shape: f32[11,66], index: 2, kind: input, shape index: {}]   ;;  %s3967_s5 = inlined_call_operand.vmem [shape: f32[1,128], index: 5, kind: input, shape index: {}]   ;;  %s3968_s6 = inlined_call_operand.vmem [shape: f32[8,128], index: 6, kind: output, shape index: {}]  }
   0x1   :  { %v24_v0 = vld [vmem:[%s3962_s0] sm:$0xff]  ;;  %s3281_s29 = smov 110   ;;  %v3133_v6 = vld [vmem:[%s3965_s4 + $0x28] sm:$0xff]  ;;  %v3131_v10 = vld [vmem:[%s3965_s4 + $0x18] sm:$0xff] }
   0x2   :  { %v32_v1 = vld [vmem:[%s3963_s1] sm:$0xff]  ;;  %v25_v2 = vpack.c.bf16 %v24_v0, %v24_v0  ;;  %68 = vmatpush.bf16.msra.mxu0 %v3133_v6  ;;  %v3130_v11 = vld [vmem:[%s3965_s4 + $0x10] sm:$0xff]  ;;  %v3129_v14 = vld [vmem:[%s3965_s4 + $0x8] sm:$0xff] }
   0x3   :  { %v33_v3 = vpack.c.bf16 %v32_v1, %v32_v1  ;;  %v376_v4 = vld [vmem:[%s3964_s3] sm:$0xff]  ;;  %102 = vmatpush.bf16.msra.mxu1 %v3130_v11  ;;  %v3142_v15 = vld [vmem:[%s3965_s4 + $0x70] sm:$0xff]  ;;  %v3135_v16 = vld [vmem:[%s3965_s4 + $0x38] sm:$0xff] }
   0x4   :  { %118 = vrot.lane.b32.xlu0 %v25_v2, %s3279_s25  ;;  %207 = vrot.lane.b32.xlu1 %v25_v2, %s3280_s26  ;;  %v3329_v5 = vpack.c.bf16 %v376_v4, %v376_v4  ;;  %v332_v7 = vld [vmem:[%s3966_s2] sm:$0xff]  ;;  %v3139_v17 = vld [vmem:[%s3965_s4 + $0x58] sm:$0xff] }
   0x5   :  { %251 = vrot.lane.b32.xlu2 %v33_v3, %s3280_s26  ;;  %v3132_v8 = vld [vmem:[%s3965_s4 + $0x20] sm:$0xff]  ;;  %v3344_v9 = vpack.c.bf16 %v332_v7, %v332_v7  ;;  %191 = vmatpush.bf16.msra.mxu3 %v3139_v17  ;;  %v3141_v19 = vld [vmem:[%s3965_s4 + $0x68] sm:$0xff]  ;;  %v3134_v21 = vld [vmem:[%s3965_s4 + $0x30] sm:$0xff] }
   0x6   :  { %69 = vmatpush.bf16.msra.mxu0 %v3132_v8  ;;  %v642_v12 = vld [vmem:[%s3962_s0 + $0x1] sm:$0xff]  ;;  %v3138_v28 = vld [vmem:[%s3965_s4 + $0x50] sm:$0xff]  ;;  %v3147_v37 = vld [vmem:[%s3965_s4 + $0x98] sm:$0xff] }
   0x7   :  { %v3136_v13 = vld [vmem:[%s3965_s4 + $0x40] sm:$0xff]  ;;  %v3376_v18 = vpack.c.bf16 %v642_v12, %v642_v12  ;;  %103 = vmatpush.bf16.msra.mxu1 %v3129_v14  ;;  %v3137_v31 = vld [vmem:[%s3965_s4 + $0x48] sm:$0xff]  ;;  %v3151_v38 = vld [vmem:[%s3965_s4 + $0xb8] sm:$0xff] }
   0x8   :  { %146 = vmatpush.bf16.msra.mxu2 %v3136_v13  ;;  %v3128_v20 = vld [vmem:[%s3965_s4] sm:$0xff]  ;;  %v3145_v35 = vld [vmem:[%s3965_s4 + $0x88] sm:$0xff]  ;;  %v3154_v40 = vld [vmem:[%s3965_s4 + $0xd0] sm:$0xff] }
   0x9   :  { %v686_v22 = vld [vmem:[%s3963_s1 + $0x1] sm:$0xff]  ;;  %192 = vmatpush.bf16.msra.mxu3 %v3138_v28  ;;  %v3146_v41 = vld [vmem:[%s3965_s4 + $0x90] sm:$0xff]  ;;  %v3143_v43 = vld [vmem:[%s3965_s4 + $0x78] sm:$0xff] }
   0xa   :  { %70 = vmatpush.bf16.msra.mxu0 %v3131_v10  ;;  %v3397_v23 = vpack.c.bf16 %v686_v22, %v686_v22  ;;  %v996_v24 = vld [vmem:[%s3964_s3 + $0x1] sm:$0xff]  ;;  %v3150_v42 = vld [vmem:[%s3965_s4 + $0xb0] sm:$0xff]  ;;  %v3155_v53 = vld [vmem:[%s3965_s4 + $0xd8] sm:$0xff] }
   0xb   :  { %104 = vmatpush.bf16.msra.mxu1 %v3128_v20  ;;  %v952_v25 = vld [vmem:[%s3966_s2 + $0x1] sm:$0xff]  ;;  %v3412_v26 = vpack.c.bf16 %v996_v24, %v996_v24  ;;  %v3166_v56 = vld [vmem:[%s3965_s4 + $0x130] sm:$0xff]  ;;  %v3159_v59 = vld [vmem:[%s3965_s4 + $0xf8] sm:$0xff] }
   0xc   :  { %163 = vrot.lane.b32.xlu0 %v33_v3, %s3279_s25  ;;  %295 = vrot.lane.b32.xlu1 %v25_v2, %s3281_s29  ;;  %v3414_v27 = vpack.c.bf16 %v952_v25, %v952_v25  ;;  %v3140_v29 = vld [vmem:[%s3965_s4 + $0x60] sm:$0xff]  ;;  %v3153_v44 = vld [vmem:[%s3965_s4 + $0xc8] sm:$0xff] }
   0xd   :  { %473 = vrot.lane.b32.xlu2 %v3329_v5, %s3279_s25  ;;  %2221 = vmatmul.msk.bf16.vlgmr.msra.gmra.mxu0 %vm59_vm0, %v33_v3  ;;  %v1262_v30 = vld [vmem:[%s3962_s0 + $0x2] sm:$0xff]  ;;  %v3163_v62 = vld [vmem:[%s3965_s4 + $0x118] sm:$0xff]  ;;  %v3158_v63 = vld [vmem:[%s3965_s4 + $0xf0] sm:$0xff] }
   0xe   :  { %235 = vmatpush.bf16.msrb.mxu0 %v3142_v15  ;;  %147 = vmatpush.bf16.msra.mxu2 %v3135_v16  ;;  %v3438_v32 = vpack.c.bf16 %v1262_v30, %v1262_v30  ;;  %v3148_v33 = vld [vmem:[%s3965_s4 + $0xa0] sm:$0xff]  ;;  %v3149_v46 = vld [vmem:[%s3965_s4 + $0xa8] sm:$0xff]  ;;  %v3162_v4 = vld [vmem:[%s3965_s4 + $0x110] sm:$0xff] }
   0xf   :  { %2234 = vmatmul.msk.bf16.vlgmr.msra.gmra.mxu1 %vm59_vm0, %v25_v2  ;;  %v1306_v34 = vld [vmem:[%s3963_s1 + $0x2] sm:$0xff]  ;;  %193 = vmatpush.bf16.msra.mxu3 %v3137_v31  ;;  %v3167_v6 = vld [vmem:[%s3965_s4 + $0x138] sm:$0xff]  ;;  %v3178_v10 = vld [vmem:[%s3965_s4 + $0x190] sm:$0xff] }
  0x10   :  { %v3449_v36 = vpack.c.bf16 %v1306_v34, %v1306_v34  ;;  %279 = vmatpush.bf16.msrb.mxu1 %v3145_v35  ;;  %v3144_v39 = vld [vmem:[%s3965_s4 + $0x80] sm:$0xff]  ;;  %v3157_v48 = vld [vmem:[%s3965_s4 + $0xe8] sm:$0xff]  ;;  %v3171_v15 = vld [vmem:[%s3965_s4 + $0x158] sm:$0xff] }
  0x11   :  { %v3152_v47 = vld [vmem:[%s3965_s4 + $0xc0] sm:$0xff]  ;;  %v3165_v60 = vld [vmem:[%s3965_s4 + $0x128] sm:$0xff]  ;;  %v3175_v17 = vld [vmem:[%s3965_s4 + $0x178] sm:$0xff] }
  0x12   :  { %236 = vmatpush.bf16.msrb.mxu0 %v3141_v19  ;;  %148 = vmatpush.bf16.msra.mxu2 %v3134_v21  ;;  %v3156_v49 = vld [vmem:[%s3965_s4 + $0xe0] sm:$0xff]  ;;  %v3169_v61 = vld [vmem:[%s3965_s4 + $0x148] sm:$0xff]  ;;  %v3170_v20 = vld [vmem:[%s3965_s4 + $0x150] sm:$0xff] }
  0x13   :  { %367 = vmatpush.bf16.msrb.mxu3 %v3151_v38  ;;  %v1616_v50 = vld [vmem:[%s3964_s3 + $0x2] sm:$0xff]  ;;  %v3174_v24 = vld [vmem:[%s3965_s4 + $0x170] sm:$0xff] }
  0x14   :  { %428 = vrot.lane.b32.xlu1 %v3344_v9, %s3279_s25  ;;  %517 = vrot.lane.b32.xlu0 %v3344_v9, %s3280_s26  ;;  %v3501_v51 = vpack.c.bf16 %v1616_v50, %v1616_v50  ;;  %v1572_v52 = vld [vmem:[%s3966_s2 + $0x2] sm:$0xff]  ;;  %v3190_v34 = vld [vmem:[%s3965_s4 + $0x1f0] sm:$0xff] }
  0x15   :  { %561 = vrot.lane.b32.xlu2 %v3329_v5, %s3280_s26  ;;  %280 = vmatpush.bf16.msrb.mxu1 %v3144_v39  ;;  %v3511_v54 = vpack.c.bf16 %v1572_v52, %v1572_v52  ;;  %v3160_v55 = vld [vmem:[%s3965_s4 + $0x100] sm:$0xff]  ;;  %v3161_v7 = vld [vmem:[%s3965_s4 + $0x108] sm:$0xff]  ;;  %v3187_v39 = vld [vmem:[%s3965_s4 + $0x1d8] sm:$0xff] }
  0x16   :  { %237 = vmatpush.bf16.msrb.mxu0 %v3140_v29  ;;  %323 = vmatpush.bf16.msrb.mxu2 %v3148_v33  ;;  %v3164_v0 = vld [vmem:[%s3965_s4 + $0x120] sm:$0xff]  ;;  %v3181_v14 = vld [vmem:[%s3965_s4 + $0x1a8] sm:$0xff]  ;;  %v3195_v52 = vld [vmem:[%s3965_s4 + $0x218] sm:$0xff] }
  0x17   :  { %368 = vmatpush.bf16.msrb.mxu3 %v3150_v42  ;;  %v3168_v3 = vld [vmem:[%s3965_s4 + $0x140] sm:$0xff]  ;;  %v3173_v30 = vld [vmem:[%s3965_s4 + $0x168] sm:$0xff] }
  0x18   :  { %v3172_v8 = vld [vmem:[%s3965_s4 + $0x160] sm:$0xff]  ;;  %v3193_v35 = vld [vmem:[%s3965_s4 + $0x208] sm:$0xff] }
  0x19   :  { %281 = vmatpush.bf16.msrb.mxu1 %v3143_v43  ;;  %v1882_v12 = vld [vmem:[%s3962_s0 + $0x3] sm:$0xff] }
  0x1a   :  { %324 = vmatpush.bf16.msrb.mxu2 %v3147_v37  ;;  %411 = vmatpush.bf16.msra.mxu0 %v3154_v40  ;;  %v3573_v13 = vpack.c.bf16 %v1882_v12, %v1882_v12  ;;  %v3176_v21 = vld [vmem:[%s3965_s4 + $0x180] sm:$0xff]  ;;  %v3183_v37 = vld [vmem:[%s3965_s4 + $0x1b8] sm:$0xff]  ;;  %v3189_v38 = vld [vmem:[%s3965_s4 + $0x1e8] sm:$0xff] }
  0x1b   :  { %369 = vmatpush.bf16.msrb.mxu3 %v3149_v46  ;;  %v3180_v22 = vld [vmem:[%s3965_s4 + $0x1a0] sm:$0xff]  ;;  %v3185_v46 = vld [vmem:[%s3965_s4 + $0x1c8] sm:$0xff] }
  0x1c   :  { %605 = vrot.lane.b32.xlu0 %v3344_v9, %s3281_s29  ;;  %738 = vrot.lane.b32.xlu1 %v3376_v18, %s3279_s25  ;;  %v1926_v25 = vld [vmem:[%s3963_s1 + $0x3] sm:$0xff] }
  0x1d   :  { %827 = vrot.lane.b32.xlu2 %v3376_v18, %s3280_s26  ;;  %456 = vmatpush.bf16.msra.mxu1 %v3157_v48  ;;  %v3608_v28 = vpack.c.bf16 %v1926_v25, %v1926_v25  ;;  %v3184_v33 = vld [vmem:[%s3965_s4 + $0x1c0] sm:$0xff]  ;;  %v3205_v50 = vld [vmem:[%s3965_s4 + $0x268] sm:$0xff] }
  0x1e   :  { %325 = vmatpush.bf16.msrb.mxu2 %v3146_v41  ;;  %412 = vmatpush.bf16.msra.mxu0 %v3153_v44  ;;  %v3182_v41 = vld [vmem:[%s3965_s4 + $0x1b0] sm:$0xff]  ;;  %v3188_v42 = vld [vmem:[%s3965_s4 + $0x1e0] sm:$0xff]  ;;  %v3209_v12 = vld [vmem:[%s3965_s4 + $0x288] sm:$0xff] }
  0x1f   :  { %v3192_v43 = vld [vmem:[%s3965_s4 + $0x200] sm:$0xff]  ;;  %v3186_v44 = vld [vmem:[%s3965_s4 + $0x1d0] sm:$0xff] }
  0x20   :  { %v3196_v48 = vld [vmem:[%s3965_s4 + $0x220] sm:$0xff] }
  0x21   :  { %457 = vmatpush.bf16.msra.mxu1 %v3156_v49  ;;  %v3202_v49 = vld [vmem:[%s3965_s4 + $0x250] sm:$0xff] }
  0x22   :  { %413 = vmatpush.bf16.msra.mxu0 %v3152_v47 }
  0x24   :  { %783 = vrot.lane.b32.xlu1 %v3397_v23, %s3279_s25  ;;  %871 = vrot.lane.b32.xlu0 %v3397_v23, %s3280_s26 }
  0x25   :  { %915 = vrot.lane.b32.xlu2 %v3376_v18, %s3281_s29  ;;  %458 = vmatpush.bf16.msra.mxu1 %v3155_v53  ;;  %v3201_v53 = vld [vmem:[%s3965_s4 + $0x248] sm:$0xff] }
  0x2c   :  { %1093 = vrot.lane.b32.xlu1 %v3412_v26, %s3279_s25  ;;  %1048 = vrot.lane.b32.xlu0 %v3414_v27, %s3279_s25 }
  0x2d   :  { %1181 = vrot.lane.b32.xlu2 %v3412_v26, %s3280_s26 }
  0x34   :  { %1137 = vrot.lane.b32.xlu1 %v3414_v27, %s3280_s26  ;;  %1225 = vrot.lane.b32.xlu0 %v3414_v27, %s3281_s29 }
  0x35   :  { %1358 = vrot.lane.b32.xlu2 %v3438_v32, %s3279_s25 }
  0x3c   :  { %1447 = vrot.lane.b32.xlu1 %v3438_v32, %s3280_s26  ;;  %1403 = vrot.lane.b32.xlu0 %v3449_v36, %s3279_s25 }
  0x3d   :  { %1535 = vrot.lane.b32.xlu2 %v3438_v32, %s3281_s29 }
  0x44   :  { %1491 = vrot.lane.b32.xlu0 %v3449_v36, %s3280_s26  ;;  %1713 = vrot.lane.b32.xlu1 %v3501_v51, %s3279_s25 }
  0x45   :  { %1757 = vrot.lane.b32.xlu2 %v3511_v54, %s3280_s26 }
  0x4c   :  { %1668 = vrot.lane.b32.xlu0 %v3511_v54, %s3279_s25  ;;  %1801 = vrot.lane.b32.xlu1 %v3501_v51, %s3280_s26 }
  0x4d   :  { %1845 = vrot.lane.b32.xlu2 %v3511_v54, %s3281_s29 }
  0x54   :  { %1978 = vrot.lane.b32.xlu0 %v3573_v13, %s3279_s25  ;;  %2067 = vrot.lane.b32.xlu1 %v3573_v13, %s3280_s26 }
  0x55   :  { %2111 = vrot.lane.b32.xlu2 %v3608_v28, %s3280_s26 }
  0x5c   :  { %2023 = vrot.lane.b32.xlu0 %v3608_v28, %s3279_s25  ;;  %2155 = vrot.lane.b32.xlu1 %v3573_v13, %s3281_s29 }
  0x5f   :  { %v252_v45 = vpop.permute.xlu2 %251 }
  0x60   :  { %2310 = vmatmul.msk.bf16.vlgmr.msrb.gmra.mxu1 %vm59_vm0, %v252_v45  ;;  %v3191_v45 = vld [vmem:[%s3965_s4 + $0x1f8] sm:$0xff] }
  0x61   :  { %633 = vmatpush.bf16.msrb.mxu1 %v3169_v61 }
  0x65   :  { %634 = vmatpush.bf16.msrb.mxu1 %v3168_v3 }
  0x67   :  { %v474_v16 = vpop.permute.xlu2 %473 }
  0x69   :  { %635 = vmatpush.bf16.msrb.mxu1 %v3167_v6  ;;  %v3206_v6 = vld [vmem:[%s3965_s4 + $0x270] sm:$0xff] }
  0x6f   :  { %v562_v29 = vpop.permute.xlu2 %561 }
  0x76   :  { %v119_v57 = vpop.permute.xlu0 %118  ;;  %v208_v58 = vpop.permute.xlu1 %207 }
  0x77   :  { %2253 = vmatmul.msk.bf16.vlgmr.msra.gmra.mxu2 %vm59_vm0, %v119_v57  ;;  %2291 = vmatmul.msk.bf16.vlgmr.msrb.gmra.mxu0 %vm59_vm0, %v208_v58  ;;  %v3200_v57 = vld [vmem:[%s3965_s4 + $0x240] sm:$0xff] }
  0x78   :  { %501 = vmatpush.bf16.msra.mxu2 %v3160_v55  ;;  %589 = vmatpush.bf16.msrb.mxu0 %v3166_v56  ;;  %v3199_v55 = vld [vmem:[%s3965_s4 + $0x238] sm:$0xff]  ;;  %v3194_v56 = vld [vmem:[%s3965_s4 + $0x210] sm:$0xff]  ;;  %v3204_v58 = vld [vmem:[%s3965_s4 + $0x260] sm:$0xff] }
  0x7c   :  { %502 = vmatpush.bf16.msra.mxu2 %v3159_v59  ;;  %590 = vmatpush.bf16.msrb.mxu0 %v3165_v60  ;;  %v3198_v59 = vld [vmem:[%s3965_s4 + $0x230] sm:$0xff]  ;;  %v3203_v60 = vld [vmem:[%s3965_s4 + $0x258] sm:$0xff] }
  0x7e   :  { %v164_v1 = vpop.permute.xlu0 %163  ;;  %v296_v2 = vpop.permute.xlu1 %295 }
  0x7f   :  { %2272 = vmatmul.msk.bf16.vlgmr.msra.gmra.mxu3 %vm59_vm0, %v164_v1  ;;  %v3207_v1 = vld [vmem:[%s3965_s4 + $0x278] sm:$0xff] }
  0x80   :  { %545 = vmatpush.bf16.msra.mxu3 %v3163_v62  ;;  %503 = vmatpush.bf16.msra.mxu2 %v3158_v63  ;;  %v3208_v62 = vld [vmem:[%s3965_s4 + $0x280] sm:$0xff]  ;;  %v3214_v63 = vld [vmem:[%s3965_s4 + $0x2b0] sm:$0xff] }
  0x81   :  { %591 = vmatpush.bf16.msrb.mxu0 %v3164_v0  ;;  %v3217_v0 = vld [vmem:[%s3965_s4 + $0x2c8] sm:$0xff] }
  0x84   :  { %546 = vmatpush.bf16.msra.mxu3 %v3162_v4 }
  0x86   :  { %v429_v11 = vpop.permute.xlu1 %428  ;;  %v518_v19 = vpop.permute.xlu0 %517 }
  0x87   :  { %2329 = vmatmul.msk.bf16.vlgmr.msrb.gmra.mxu2 %vm59_vm0, %v296_v2  ;;  %2367 = vmatmul.msk.bf16.vlgmr.msra.gmra.mxu0 %vm59_vm0, %v3329_v5  ;;  %v3177_v5 = vld [vmem:[%s3965_s4 + $0x188] sm:$0xff] }
  0x88   :  { %2386 = vmatmul.msk.bf16.vlgmr.msra.gmra.mxu1 %vm59_vm0, %v429_v11  ;;  %547 = vmatpush.bf16.msra.mxu3 %v3161_v7  ;;  %v3213_v2 = vld [vmem:[%s3965_s4 + $0x2a8] sm:$0xff]  ;;  %v3212_v7 = vld [vmem:[%s3965_s4 + $0x2a0] sm:$0xff]  ;;  %v3215_v11 = vld [vmem:[%s3965_s4 + $0x2b8] sm:$0xff] }
  0x89   :  { %677 = vmatpush.bf16.msrb.mxu2 %v3172_v8  ;;  %766 = vmatpush.bf16.msra.mxu0 %v3178_v10  ;;  %v3216_v8 = vld [vmem:[%s3965_s4 + $0x2c0] sm:$0xff]  ;;  %v3210_v10 = vld [vmem:[%s3965_s4 + $0x290] sm:$0xff] }
  0x8a   :  { %811 = vmatpush.bf16.msra.mxu1 %v3181_v14 }
  0x8d   :  { %678 = vmatpush.bf16.msrb.mxu2 %v3171_v15  ;;  %767 = vmatpush.bf16.msra.mxu0 %v3177_v5  ;;  %v3220_v15 = vld [vmem:[%s3965_s4 + $0x2e0] sm:$0xff]  ;;  %v3226_v5 = vld [vmem:[%s3965_s4 + $0x310] sm:$0xff] }
  0x8e   :  { %812 = vmatpush.bf16.msra.mxu1 %v3180_v22  ;;  %v606_v31 = vpop.permute.xlu0 %605  ;;  %v739_v40 = vpop.permute.xlu1 %738  ;;  %v3218_v22 = vld [vmem:[%s3965_s4 + $0x2d0] sm:$0xff] }
  0x8f   :  { %2348 = vmatmul.msk.bf16.vlgmr.msrb.gmra.mxu3 %vm59_vm0, %v3344_v9  ;;  %v3179_v9 = vld [vmem:[%s3965_s4 + $0x198] sm:$0xff] }
  0x90   :  { %721 = vmatpush.bf16.msrb.mxu3 %v3175_v17  ;;  %v3229_v17 = vld [vmem:[%s3965_s4 + $0x328] sm:$0xff] }
  0x91   :  { %679 = vmatpush.bf16.msrb.mxu2 %v3170_v20  ;;  %768 = vmatpush.bf16.msra.mxu0 %v3176_v21  ;;  %v3223_v21 = vld [vmem:[%s3965_s4 + $0x2f8] sm:$0xff] }
  0x92   :  { %813 = vmatpush.bf16.msra.mxu1 %v3179_v9  ;;  %v3228_v9 = vld [vmem:[%s3965_s4 + $0x320] sm:$0xff] }
  0x94   :  { %722 = vmatpush.bf16.msrb.mxu3 %v3174_v24  ;;  %v3224_v24 = vld [vmem:[%s3965_s4 + $0x300] sm:$0xff] }
  0x96   :  { %v784_v47 = vpop.permute.xlu1 %783  ;;  %v872_v3 = vpop.permute.xlu0 %871 }
  0x97   :  { %2405 = vmatmul.msk.bf16.vlgmr.msra.gmra.mxu2 %vm59_vm0, %v474_v16  ;;  %2443 = vmatmul.msk.bf16.vlgmr.msrb.gmra.mxu0 %vm59_vm0, %v562_v29  ;;  %v72_v16 = vpop.f32.mrf.mxu0  ;;  %v106_v29 = vpop.f32.mrf.mxu1 }
  0x98   :  { %2462 = vmatmul.msk.bf16.vlgmr.msrb.gmra.mxu1 %vm59_vm0, %v606_v31  ;;  %723 = vmatpush.bf16.msrb.mxu3 %v3173_v30  ;;  %v3222_v30 = vld [vmem:[%s3965_s4 + $0x2f0] sm:$0xff]  ;;  %v3780_v31 = vadd.f32 %v106_v29, %v72_v16  ;;  %v3263_v29 = vld [vmem:[%s3965_s4 + $0x438] sm:$0xff] }
  0x99   :  { %855 = vmatpush.bf16.msra.mxu2 %v3184_v33  ;;  %943 = vmatpush.bf16.msrb.mxu0 %v3190_v34  ;;  %v3227_v33 = vld [vmem:[%s3965_s4 + $0x318] sm:$0xff] }
  0x9a   :  { %987 = vmatpush.bf16.msrb.mxu1 %v3193_v35  ;;  %v3221_v35 = vld [vmem:[%s3965_s4 + $0x2e8] sm:$0xff] }
  0x9d   :  { %856 = vmatpush.bf16.msra.mxu2 %v3183_v37  ;;  %944 = vmatpush.bf16.msrb.mxu0 %v3189_v38  ;;  %v3232_v38 = vld [vmem:[%s3965_s4 + $0x340] sm:$0xff] }
  0x9e   :  { %988 = vmatpush.bf16.msrb.mxu1 %v3192_v43  ;;  %v1094_v4 = vpop.permute.xlu1 %1093  ;;  %v1049_v20 = vpop.permute.xlu0 %1048  ;;  %v3241_v43 = vld [vmem:[%s3965_s4 + $0x388] sm:$0xff] }
  0x9f   :  { %2424 = vmatmul.msk.bf16.vlgmr.msra.gmra.mxu3 %vm59_vm0, %v518_v19  ;;  %v3219_v19 = vld [vmem:[%s3965_s4 + $0x2d8] sm:$0xff]  ;;  %v74_v25 = vpop.f32.mrf.mxu0 }
  0xa0   :  { %899 = vmatpush.bf16.msra.mxu3 %v3187_v39  ;;  %v3238_v39 = vld [vmem:[%s3965_s4 + $0x370] sm:$0xff] }
  0xa1   :  { %857 = vmatpush.bf16.msra.mxu2 %v3182_v41  ;;  %945 = vmatpush.bf16.msrb.mxu0 %v3188_v42  ;;  %v3231_v41 = vld [vmem:[%s3965_s4 + $0x338] sm:$0xff]  ;;  %v3237_v42 = vld [vmem:[%s3965_s4 + $0x368] sm:$0xff] }
  0xa2   :  { %989 = vmatpush.bf16.msrb.mxu1 %v3191_v45  ;;  %v3236_v45 = vld [vmem:[%s3965_s4 + $0x360] sm:$0xff] }
  0xa4   :  { %900 = vmatpush.bf16.msra.mxu3 %v3186_v44  ;;  %v3230_v44 = vld [vmem:[%s3965_s4 + $0x330] sm:$0xff] }
  0xa6   :  { %v1138_v14 = vpop.permute.xlu1 %1137  ;;  %v1226_v37 = vpop.permute.xlu0 %1225 }
  0xa7   :  { %2481 = vmatmul.msk.bf16.vlgmr.msrb.gmra.mxu2 %vm59_vm0, %v3376_v18  ;;  %2519 = vmatmul.msk.bf16.vlgmr.msra.gmra.mxu0 %vm59_vm0, %v739_v40  ;;  %v828_v18 = vpop.permute.xlu2 %827  ;;  %v108_v40 = vpop.f32.mrf.mxu1 }
  0xa8   :  { %2538 = vmatmul.msk.bf16.vlgmr.msra.gmra.mxu1 %vm59_vm0, %v784_v47  ;;  %901 = vmatpush.bf16.msra.mxu3 %v3185_v46  ;;  %v3234_v46 = vld [vmem:[%s3965_s4 + $0x350] sm:$0xff]  ;;  %v3240_v47 = vld [vmem:[%s3965_s4 + $0x380] sm:$0xff] }
  0xa9   :  { %1031 = vmatpush.bf16.msrb.mxu2 %v3196_v48  ;;  %1121 = vmatpush.bf16.msra.mxu0 %v3202_v49 }
  0xaa   :  { %1165 = vmatpush.bf16.msra.mxu1 %v3205_v50  ;;  %v3233_v50 = vld [vmem:[%s3965_s4 + $0x348] sm:$0xff] }
  0xad   :  { %1032 = vmatpush.bf16.msrb.mxu2 %v3195_v52  ;;  %1122 = vmatpush.bf16.msra.mxu0 %v3201_v53  ;;  %v3239_v52 = vld [vmem:[%s3965_s4 + $0x378] sm:$0xff] }
  0xae   :  { %1166 = vmatpush.bf16.msra.mxu1 %v3204_v58  ;;  %v1448_v49 = vpop.permute.xlu1 %1447  ;;  %v3249_v58 = vld [vmem:[%s3965_s4 + $0x3c8] sm:$0xff] }
  0xaf   :  { %2500 = vmatmul.msk.bf16.vlgmr.msrb.gmra.mxu3 %vm59_vm0, %v3397_v23  ;;  %v916_v61 = vpop.permute.xlu2 %915  ;;  %v3197_v23 = vld [vmem:[%s3965_s4 + $0x228] sm:$0xff] }
  0xb0   :  { %1076 = vmatpush.bf16.msrb.mxu3 %v3199_v55  ;;  %v3250_v55 = vld [vmem:[%s3965_s4 + $0x3d0] sm:$0xff] }
  0xb1   :  { %1033 = vmatpush.bf16.msrb.mxu2 %v3194_v56  ;;  %1123 = vmatpush.bf16.msra.mxu0 %v3200_v57  ;;  %v3243_v57 = vld [vmem:[%s3965_s4 + $0x398] sm:$0xff] }
  0xb2   :  { %1167 = vmatpush.bf16.msra.mxu1 %v3203_v60  ;;  %v3247_v60 = vld [vmem:[%s3965_s4 + $0x3b8] sm:$0xff] }
  0xb4   :  { %1077 = vmatpush.bf16.msrb.mxu3 %v3198_v59  ;;  %v3253_v59 = vld [vmem:[%s3965_s4 + $0x3e8] sm:$0xff] }
  0xb7   :  { %2557 = vmatmul.msk.bf16.vlgmr.msra.gmra.mxu2 %vm59_vm0, %v828_v18  ;;  %2595 = vmatmul.msk.bf16.vlgmr.msrb.gmra.mxu0 %vm59_vm0, %v916_v61  ;;  %v1182_v34 = vpop.permute.xlu2 %1181  ;;  %v3244_v18 = vld [vmem:[%s3965_s4 + $0x3a0] sm:$0xff]  ;;  %v3242_v61 = vld [vmem:[%s3965_s4 + $0x390] sm:$0xff] }
  0xb8   :  { %2614 = vmatmul.msk.bf16.vlgmr.msrb.gmra.mxu1 %vm59_vm0, %v3414_v27  ;;  %1078 = vmatpush.bf16.msrb.mxu3 %v3197_v23  ;;  %v3211_v27 = vld [vmem:[%s3965_s4 + $0x298] sm:$0xff]  ;;  %v3248_v23 = vld [vmem:[%s3965_s4 + $0x3c0] sm:$0xff] }
  0xb9   :  { %1209 = vmatpush.bf16.msra.mxu2 %v3208_v62  ;;  %1297 = vmatpush.bf16.msrb.mxu0 %v3214_v63  ;;  %v3246_v63 = vld [vmem:[%s3965_s4 + $0x3b0] sm:$0xff] }
  0xba   :  { %1341 = vmatpush.bf16.msrb.mxu1 %v3217_v0  ;;  %v3252_v0 = vld [vmem:[%s3965_s4 + $0x3e0] sm:$0xff] }
  0xbd   :  { %1210 = vmatpush.bf16.msra.mxu2 %v3207_v1  ;;  %1298 = vmatpush.bf16.msrb.mxu0 %v3213_v2 }
  0xbe   :  { %1342 = vmatpush.bf16.msrb.mxu1 %v3216_v8  ;;  %v3255_v8 = vld [vmem:[%s3965_s4 + $0x3f8] sm:$0xff] }
  0xbf   :  { %2576 = vmatmul.msk.bf16.vlgmr.msra.gmra.mxu3 %vm59_vm0, %v872_v3  ;;  %v1359_v48 = vpop.permute.xlu2 %1358  ;;  %v3245_v3 = vld [vmem:[%s3965_s4 + $0x3a8] sm:$0xff] }
  0xc0   :  { %1253 = vmatpush.bf16.msra.mxu3 %v3211_v27  ;;  %v3251_v27 = vld [vmem:[%s3965_s4 + $0x3d8] sm:$0xff] }
  0xc1   :  { %1211 = vmatpush.bf16.msra.mxu2 %v3206_v6  ;;  %1299 = vmatpush.bf16.msrb.mxu0 %v3212_v7  ;;  %v3256_v6 = vld [vmem:[%s3965_s4 + $0x400] sm:$0xff]  ;;  %v3262_v7 = vld [vmem:[%s3965_s4 + $0x430] sm:$0xff] }
  0xc2   :  { %1343 = vmatpush.bf16.msrb.mxu1 %v3215_v11 }
  0xc4   :  { %1254 = vmatpush.bf16.msra.mxu3 %v3210_v10  ;;  %v3261_v10 = vld [vmem:[%s3965_s4 + $0x428] sm:$0xff] }
  0xc7   :  { %2633 = vmatmul.msk.bf16.vlgmr.msrb.gmra.mxu2 %vm59_vm0, %v3412_v26  ;;  %2671 = vmatmul.msk.bf16.vlgmr.msra.gmra.mxu0 %vm59_vm0, %v1094_v4  ;;  %v3225_v26 = vld [vmem:[%s3965_s4 + $0x308] sm:$0xff]  ;;  %v1536_v1 = vpop.permute.xlu2 %1535 }
  0xc8   :  { %2690 = vmatmul.msk.bf16.vlgmr.msra.gmra.mxu1 %vm59_vm0, %v1138_v14  ;;  %1255 = vmatpush.bf16.msra.mxu3 %v3209_v12  ;;  %v1714_v12 = vpop.permute.xlu1 %1713 }
  0xc9   :  { %1386 = vmatpush.bf16.msrb.mxu2 %v3220_v15  ;;  %1475 = vmatpush.bf16.msra.mxu0 %v3226_v5  ;;  %v3259_v5 = vld [vmem:[%s3965_s4 + $0x418] sm:$0xff] }
  0xca   :  { %1519 = vmatpush.bf16.msra.mxu1 %v3229_v17  ;;  %v3254_v17 = vld [vmem:[%s3965_s4 + $0x3f0] sm:$0xff] }
  0xcd   :  { %1387 = vmatpush.bf16.msrb.mxu2 %v3219_v19  ;;  %1476 = vmatpush.bf16.msra.mxu0 %v3225_v26  ;;  %v3260_v19 = vld [vmem:[%s3965_s4 + $0x420] sm:$0xff]  ;;  %v3258_v26 = vld [vmem:[%s3965_s4 + $0x410] sm:$0xff] }
  0xce   :  { %1520 = vmatpush.bf16.msra.mxu1 %v3228_v9 }
  0xcf   :  { %2652 = vmatmul.msk.bf16.vlgmr.msrb.gmra.mxu3 %vm59_vm0, %v1049_v20  ;;  %v1758_v16 = vpop.permute.xlu2 %1757  ;;  %v3264_v20 = vld [vmem:[%s3965_s4 + $0x440] sm:$0xff] }
  0xd0   :  { %1431 = vmatpush.bf16.msrb.mxu3 %v3223_v21  ;;  %v1802_v9 = vpop.permute.xlu1 %1801 }
  0xd1   :  { %1388 = vmatpush.bf16.msrb.mxu2 %v3218_v22  ;;  %1477 = vmatpush.bf16.msra.mxu0 %v3224_v24 }
  0xd2   :  { %1521 = vmatpush.bf16.msra.mxu1 %v3227_v33 }
  0xd4   :  { %1432 = vmatpush.bf16.msrb.mxu3 %v3222_v30 }
  0xd7   :  { %2709 = vmatmul.msk.bf16.vlgmr.msra.gmra.mxu2 %vm59_vm0, %v1182_v34  ;;  %2747 = vmatmul.msk.bf16.vlgmr.msrb.gmra.mxu0 %vm59_vm0, %v3438_v32  ;;  %v3235_v32 = vld [vmem:[%s3965_s4 + $0x358] sm:$0xff]  ;;  %v1846_v33 = vpop.permute.xlu2 %1845  ;;  %v3268_v34 = vld [vmem:[%s3965_s4 + $0x460] sm:$0xff] }
  0xd8   :  { %2766 = vmatmul.msk.bf16.vlgmr.msrb.gmra.mxu1 %vm59_vm0, %v3449_v36  ;;  %1433 = vmatpush.bf16.msrb.mxu3 %v3221_v35  ;;  %v1404_v36 = vpop.permute.xlu0 %1403  ;;  %v3274_v35 = vld [vmem:[%s3965_s4 + $0x490] sm:$0xff] }
  0xd9   :  { %1563 = vmatpush.bf16.msra.mxu2 %v3232_v38  ;;  %1651 = vmatpush.bf16.msrb.mxu0 %v3238_v39  ;;  %v3267_v38 = vld [vmem:[%s3965_s4 + $0x458] sm:$0xff]  ;;  %v3273_v39 = vld [vmem:[%s3965_s4 + $0x488] sm:$0xff] }
  0xda   :  { %1696 = vmatpush.bf16.msrb.mxu1 %v3241_v43 }
  0xdd   :  { %1564 = vmatpush.bf16.msra.mxu2 %v3231_v41  ;;  %1652 = vmatpush.bf16.msrb.mxu0 %v3237_v42  ;;  %v3836_v56 = vpop.f32.mrf.mxu1 }
  0xde   :  { %1697 = vmatpush.bf16.msrb.mxu1 %v3240_v47  ;;  %v3270_v47 = vld [vmem:[%s3965_s4 + $0x470] sm:$0xff] }
  0xdf   :  { %2728 = vmatmul.msk.bf16.vlgmr.msra.gmra.mxu3 %vm59_vm0, %v1226_v37 }
  0xe0   :  { %1607 = vmatpush.bf16.msra.mxu3 %v3235_v32  ;;  %v1492_v53 = vpop.permute.xlu0 %1491  ;;  %v3271_v32 = vld [vmem:[%s3965_s4 + $0x478] sm:$0xff] }
  0xe1   :  { %1565 = vmatpush.bf16.msra.mxu2 %v3230_v44  ;;  %1653 = vmatpush.bf16.msrb.mxu0 %v3236_v45  ;;  %v3266_v45 = vld [vmem:[%s3965_s4 + $0x450] sm:$0xff] }
  0xe2   :  { %1698 = vmatpush.bf16.msrb.mxu1 %v3239_v52 }
  0xe4   :  { %1608 = vmatpush.bf16.msra.mxu3 %v3234_v46  ;;  %v3272_v46 = vld [vmem:[%s3965_s4 + $0x480] sm:$0xff] }
  0xe5   :  { %v285_v62 = vpop.f32.mrf.mxu1 }
  0xe7   :  { %2785 = vmatmul.msk.bf16.vlgmr.msrb.gmra.mxu2 %vm59_vm0, %v1359_v48  ;;  %2823 = vmatmul.msk.bf16.vlgmr.msra.gmra.mxu0 %vm59_vm0, %v1448_v49 }
  0xe8   :  { %2842 = vmatmul.msk.bf16.vlgmr.msra.gmra.mxu1 %vm59_vm0, %v1492_v53  ;;  %1609 = vmatpush.bf16.msra.mxu3 %v3233_v50  ;;  %v1669_v4 = vpop.permute.xlu0 %1668  ;;  %v3269_v53 = vld [vmem:[%s3965_s4 + $0x468] sm:$0xff] }
  0xe9   :  { %1741 = vmatpush.bf16.msrb.mxu2 %v3244_v18  ;;  %1829 = vmatpush.bf16.msra.mxu0 %v3250_v55 }
  0xea   :  { %1873 = vmatpush.bf16.msra.mxu1 %v3253_v59 }
  0xed   :  { %1742 = vmatpush.bf16.msrb.mxu2 %v3243_v57  ;;  %1830 = vmatpush.bf16.msra.mxu0 %v3249_v58  ;;  %v2068_v58 = vpop.permute.xlu1 %2067 }
  0xee   :  { %1874 = vmatpush.bf16.msra.mxu1 %v3252_v0 }
  0xef   :  { %2804 = vmatmul.msk.bf16.vlgmr.msrb.gmra.mxu3 %vm59_vm0, %v1404_v36 }
  0xf0   :  { %1785 = vmatpush.bf16.msrb.mxu3 %v3247_v60  ;;  %v1979_v36 = vpop.permute.xlu0 %1978 }
  0xf1   :  { %1743 = vmatpush.bf16.msrb.mxu2 %v3242_v61  ;;  %1831 = vmatpush.bf16.msra.mxu0 %v3248_v23 }
  0xf2   :  { %1875 = vmatpush.bf16.msra.mxu1 %v3251_v27 }
  0xf4   :  { %v239_v2 = vpop.f32.mrf.mxu0  ;;  %1786 = vmatpush.bf16.msrb.mxu3 %v3246_v63 }
  0xf7   :  { %2861 = vmatmul.msk.bf16.vlgmr.msra.gmra.mxu2 %vm59_vm0, %v1536_v1  ;;  %2899 = vmatmul.msk.bf16.vlgmr.msrb.gmra.mxu0 %vm59_vm0, %v3501_v51  ;;  %v3265_v51 = vld [vmem:[%s3965_s4 + $0x448] sm:$0xff] }
  0xf8   :  { %2918 = vmatmul.msk.bf16.vlgmr.msrb.gmra.mxu1 %vm59_vm0, %v1669_v4  ;;  %1787 = vmatpush.bf16.msrb.mxu3 %v3245_v3  ;;  %v2156_v3 = vpop.permute.xlu1 %2155 }
  0xf9   :  { %1917 = vmatpush.bf16.msra.mxu2 %v3256_v6  ;;  %2006 = vmatpush.bf16.msrb.mxu0 %v3262_v7 }
  0xfa   :  { %v150_v11 = vpop.f32.mrf.mxu2  ;;  %2051 = vmatpush.bf16.msrb.mxu1 %v3265_v51 }
  0xfb   :  { %v154_v14 = vadd.f32 %v150_v11, %v3780_v31 }
  0xfc   :  { %v241_v15 = vpop.f32.mrf.mxu0 }
  0xfd   :  { %1918 = vmatpush.bf16.msra.mxu2 %v3255_v8  ;;  %2007 = vmatpush.bf16.msrb.mxu0 %v3261_v10  ;;  %v2112_v10 = vpop.permute.xlu2 %2111 }
  0xfe   :  { %2052 = vmatpush.bf16.msrb.mxu1 %v3264_v20 }
  0xff   :  { %2880 = vmatmul.msk.bf16.vlgmr.msra.gmra.mxu3 %vm59_vm0, %v3511_v54  ;;  %v3257_v54 = vld [vmem:[%s3965_s4 + $0x408] sm:$0xff] }
 0x100   :  { %1961 = vmatpush.bf16.msra.mxu3 %v3259_v5 }
 0x101   :  { %1919 = vmatpush.bf16.msra.mxu2 %v3254_v17  ;;  %2008 = vmatpush.bf16.msrb.mxu0 %v3260_v19 }
 0x102   :  { %v152_v21 = vpop.f32.mrf.mxu2  ;;  %v195_v22 = vpop.f32.mrf.mxu3  ;;  %2053 = vmatpush.bf16.msrb.mxu1 %v3263_v29 }
 0x103   :  { %v199_v24 = vadd.f32 %v195_v22, %v154_v14 }
 0x104   :  { %v415_v25 = vpop.f32.mrf.mxu0  ;;  %1962 = vmatpush.bf16.msra.mxu3 %v3258_v26 }
 0x105   :  { %v243_v30 = vadd.f32 %v239_v2, %v199_v24  ;;  %v460_v31 = vpop.f32.mrf.mxu1 }
 0x107   :  { %v287_v37 = vadd.f32 %v3836_v56, %v243_v30  ;;  %2937 = vmatmul.msk.bf16.vlgmr.msrb.gmra.mxu2 %vm59_vm0, %v1714_v12  ;;  %2975 = vmatmul.msk.bf16.vlgmr.msra.gmra.mxu0 %vm59_vm0, %v1802_v9  ;;  %v2024_v56 = vpop.permute.xlu0 %2023 }
 0x108   :  { %2994 = vmatmul.msk.bf16.vlgmr.msra.gmra.mxu1 %vm59_vm0, %v1846_v33  ;;  %1963 = vmatpush.bf16.msra.mxu3 %v3257_v54 }
 0x109   :  { %2095 = vmatpush.bf16.msrb.mxu2 %v3268_v34  ;;  %2183 = vmatpush.bf16.msra.mxu0 %v3274_v35 }
 0x10a   :  { %v197_v40 = vpop.f32.mrf.mxu3  ;;  %v327_v41 = vpop.f32.mrf.mxu2 }
 0x10b   :  { %v331_v42 = vadd.f32 %v327_v41, %v287_v37 }
 0x10c   :  { %v417_v43 = vpop.f32.mrf.mxu0 }
 0x10d   :  { %v462_v44 = vpop.f32.mrf.mxu1  ;;  %2096 = vmatpush.bf16.msrb.mxu2 %v3267_v38  ;;  %2184 = vmatpush.bf16.msra.mxu0 %v3273_v39 }
 0x10f   :  { %2956 = vmatmul.msk.bf16.vlgmr.msrb.gmra.mxu3 %vm59_vm0, %v1758_v16 }
 0x110   :  { %2139 = vmatpush.bf16.msrb.mxu3 %v3271_v32 }
 0x111   :  { %2097 = vmatpush.bf16.msrb.mxu2 %v3266_v45  ;;  %2185 = vmatpush.bf16.msra.mxu0 %v3272_v46 }
 0x112   :  { %v329_v48 = vpop.f32.mrf.mxu2  ;;  %v371_v49 = vpop.f32.mrf.mxu3 }
 0x113   :  { %v375_v50 = vadd.f32 %v371_v49, %v331_v42 }
 0x114   :  { %v593_v52 = vpop.f32.mrf.mxu0  ;;  %2140 = vmatpush.bf16.msrb.mxu3 %v3270_v47 }
 0x115   :  { %v419_v18 = vadd.f32 %v415_v25, %v375_v50  ;;  %v637_v55 = vpop.f32.mrf.mxu1 }
 0x117   :  { %v464_v57 = vadd.f32 %v460_v31, %v419_v18  ;;  %3013 = vmatmul.msk.bf16.vlgmr.msra.gmra.mxu2 %vm59_vm0, %v3573_v13  ;;  %3051 = vmatmul.msk.bf16.vlgmr.msrb.gmra.mxu0 %vm59_vm0, %v1979_v36 }
 0x118   :  { %3070 = vmatmul.msk.bf16.vlgmr.msrb.gmra.mxu1 %vm59_vm0, %v2024_v56  ;;  %2141 = vmatpush.bf16.msrb.mxu3 %v3269_v53 }
 0x11a   :  { %v373_v59 = vpop.f32.mrf.mxu3  ;;  %v505_v60 = vpop.f32.mrf.mxu2 }
 0x11b   :  { %v509_v61 = vadd.f32 %v505_v60, %v464_v57 }
 0x11c   :  { %v595_v23 = vpop.f32.mrf.mxu0 }
 0x11d   :  { %v639_v62 = vpop.f32.mrf.mxu1 }
 0x11f   :  { %3032 = vmatmul.msk.bf16.vlgmr.msra.gmra.mxu3 %vm59_vm0, %v3608_v28 }
 0x122   :  { %v507_v63 = vpop.f32.mrf.mxu2  ;;  %v549_v0 = vpop.f32.mrf.mxu3 }
 0x123   :  { %v553_v1 = vadd.f32 %v549_v0, %v509_v61 }
 0x124   :  { %v770_v2 = vpop.f32.mrf.mxu0 }
 0x125   :  { %v597_v13 = vadd.f32 %v593_v52, %v553_v1  ;;  %v815_v27 = vpop.f32.mrf.mxu1 }
 0x127   :  { %v641_v4 = vadd.f32 %v637_v55, %v597_v13  ;;  %3089 = vmatmul.msk.bf16.vlgmr.msrb.gmra.mxu2 %vm59_vm0, %v2068_v58  ;;  %3127 = vmatmul.msk.bf16.vlgmr.msra.gmra.mxu0 %vm59_vm0, %v2156_v3 }
 0x12a   :  { %v551_v6 = vpop.f32.mrf.mxu3  ;;  %v681_v7 = vpop.f32.mrf.mxu2 }
 0x12b   :  { %v685_v8 = vadd.f32 %v681_v7, %v641_v4 }
 0x12c   :  { %v772_v11 = vpop.f32.mrf.mxu0 }
 0x12d   :  { %v817_v12 = vpop.f32.mrf.mxu1 }
 0x12f   :  { %3108 = vmatmul.msk.bf16.vlgmr.msrb.gmra.mxu3 %vm59_vm0, %v2112_v10 }
 0x132   :  { %v683_v28 = vpop.f32.mrf.mxu2  ;;  %v725_v14 = vpop.f32.mrf.mxu3 }
 0x133   :  { %v729_v51 = vadd.f32 %v725_v14, %v685_v8 }
 0x134   :  { %v947_v15 = vpop.f32.mrf.mxu0 }
 0x135   :  { %v774_v5 = vadd.f32 %v770_v2, %v729_v51  ;;  %v991_v16 = vpop.f32.mrf.mxu1 }
 0x137   :  { %v819_v17 = vadd.f32 %v815_v27, %v774_v5 }
 0x13a   :  { %v727_v19 = vpop.f32.mrf.mxu3  ;;  %v859_v26 = vpop.f32.mrf.mxu2 }
 0x13b   :  { %v863_v22 = vadd.f32 %v859_v26, %v819_v17 }
 0x13c   :  { %v949_v20 = vpop.f32.mrf.mxu0 }
 0x13d   :  { %v993_v21 = vpop.f32.mrf.mxu1 }
 0x142   :  { %v861_v24 = vpop.f32.mrf.mxu2  ;;  %v903_v25 = vpop.f32.mrf.mxu3 }
 0x143   :  { %v907_v9 = vadd.f32 %v903_v25, %v863_v22 }
 0x144   :  { %v1125_v54 = vpop.f32.mrf.mxu0 }
 0x145   :  { %v951_v29 = vadd.f32 %v947_v15, %v907_v9  ;;  %v1169_v30 = vpop.f32.mrf.mxu1 }
 0x147   :  { %v995_v31 = vadd.f32 %v991_v16, %v951_v29 }
 0x14a   :  { %v905_v33 = vpop.f32.mrf.mxu3  ;;  %v1035_v34 = vpop.f32.mrf.mxu2 }
 0x14b   :  { %v1039_v38 = vadd.f32 %v1035_v34, %v995_v31 }
 0x14c   :  { %v1127_v35 = vpop.f32.mrf.mxu0 }
 0x14d   :  { %v1171_v37 = vpop.f32.mrf.mxu1 }
 0x152   :  { %v1037_v39 = vpop.f32.mrf.mxu2  ;;  %v1080_v40 = vpop.f32.mrf.mxu3 }
 0x153   :  { %v1084_v41 = vadd.f32 %v1080_v40, %v1039_v38 }
 0x154   :  { %v1301_v42 = vpop.f32.mrf.mxu0 }
 0x155   :  { %v1129_v43 = vadd.f32 %v1125_v54, %v1084_v41  ;;  %v1345_v32 = vpop.f32.mrf.mxu1 }
 0x157   :  { %v1173_v36 = vadd.f32 %v1169_v30, %v1129_v43 }
 0x15a   :  { %v1082_v44 = vpop.f32.mrf.mxu3  ;;  %v1213_v45 = vpop.f32.mrf.mxu2 }
 0x15b   :  { %v1217_v60 = vadd.f32 %v1213_v45, %v1173_v36 }
 0x15c   :  { %v1303_v46 = vpop.f32.mrf.mxu0 }
 0x15d   :  { %v1347_v47 = vpop.f32.mrf.mxu1  ;;  %v3278_v46 = vld [vmem:[%s3967_s5] ss:$0 sm:$0xff] }
 0x162   :  { %v1215_v48 = vpop.f32.mrf.mxu2  ;;  %v1257_v49 = vpop.f32.mrf.mxu3 }
 0x163   :  { %v1261_v23 = vadd.f32 %v1257_v49, %v1217_v60 }
 0x164   :  { %v1479_v50 = vpop.f32.mrf.mxu0 }
 0x165   :  { %v1523_v52 = vpop.f32.mrf.mxu1  ;;  %v1305_v0 = vadd.f32 %v1301_v42, %v1261_v23 }
 0x167   :  { %v1349_v3 = vadd.f32 %v1345_v32, %v1305_v0 }
 0x16a   :  { %v1259_v53 = vpop.f32.mrf.mxu3  ;;  %v1390_v18 = vpop.f32.mrf.mxu2 }
 0x16b   :  { %v1394_v13 = vadd.f32 %v1390_v18, %v1349_v3 }
 0x16c   :  { %v1481_v55 = vpop.f32.mrf.mxu0 }
 0x16d   :  { %v1525_v56 = vpop.f32.mrf.mxu1 }
 0x172   :  { %v1392_v57 = vpop.f32.mrf.mxu2  ;;  %v1435_v58 = vpop.f32.mrf.mxu3 }
 0x173   :  { %v1439_v6 = vadd.f32 %v1435_v58, %v1394_v13 }
 0x174   :  { %v1655_v59 = vpop.f32.mrf.mxu0 }
 0x175   :  { %v1700_v61 = vpop.f32.mrf.mxu1  ;;  %v1483_v10 = vadd.f32 %v1479_v50, %v1439_v6 }
 0x177   :  { %v1527_v28 = vadd.f32 %v1523_v52, %v1483_v10 }
 0x17a   :  { %v1437_v62 = vpop.f32.mrf.mxu3  ;;  %v1567_v63 = vpop.f32.mrf.mxu2 }
 0x17b   :  { %v1571_v51 = vadd.f32 %v1567_v63, %v1527_v28 }
 0x17c   :  { %v1657_v1 = vpop.f32.mrf.mxu0 }
 0x17d   :  { %v1702_v2 = vpop.f32.mrf.mxu1 }
 0x182   :  { %v1569_v27 = vpop.f32.mrf.mxu2  ;;  %v1611_v4 = vpop.f32.mrf.mxu3 }
 0x183   :  { %v1615_v5 = vadd.f32 %v1611_v4, %v1571_v51 }
 0x184   :  { %v1833_v7 = vpop.f32.mrf.mxu0 }
 0x185   :  { %v1877_v8 = vpop.f32.mrf.mxu1  ;;  %v1659_v19 = vadd.f32 %v1655_v59, %v1615_v5 }
 0x187   :  { %v1704_v21 = vadd.f32 %v1700_v61, %v1659_v19 }
 0x18a   :  { %v1613_v11 = vpop.f32.mrf.mxu3  ;;  %v1745_v12 = vpop.f32.mrf.mxu2 }
 0x18b   :  { %v1749_v22 = vadd.f32 %v1745_v12, %v1704_v21 }
 0x18c   :  { %v1835_v14 = vpop.f32.mrf.mxu0 }
 0x18d   :  { %v1879_v15 = vpop.f32.mrf.mxu1 }
 0x192   :  { %v1747_v16 = vpop.f32.mrf.mxu2  ;;  %v1789_v17 = vpop.f32.mrf.mxu3 }
 0x193   :  { %v1793_v9 = vadd.f32 %v1789_v17, %v1749_v22 }
 0x194   :  { %v2010_v26 = vpop.f32.mrf.mxu0 }
 0x195   :  { %v2055_v20 = vpop.f32.mrf.mxu1  ;;  %v1837_v30 = vadd.f32 %v1833_v7, %v1793_v9 }
 0x197   :  { %v1881_v34 = vadd.f32 %v1877_v8, %v1837_v30 }
 0x19a   :  { %v1791_v24 = vpop.f32.mrf.mxu3  ;;  %v1921_v25 = vpop.f32.mrf.mxu2 }
 0x19b   :  { %v1925_v37 = vadd.f32 %v1921_v25, %v1881_v34 }
 0x19c   :  { %v2012_v54 = vpop.f32.mrf.mxu0 }
 0x19d   :  { %v2057_v29 = vpop.f32.mrf.mxu1 }
 0x1a2   :  { %v1923_v31 = vpop.f32.mrf.mxu2  ;;  %v1965_v33 = vpop.f32.mrf.mxu3 }
 0x1a3   :  { %v1969_v38 = vadd.f32 %v1965_v33, %v1925_v37 }
 0x1a4   :  { %v2187_v35 = vpop.f32.mrf.mxu0 }
 0x1a5   :  { %v2014_v41 = vadd.f32 %v2010_v26, %v1969_v38 }
 0x1a7   :  { %v2059_v43 = vadd.f32 %v2055_v20, %v2014_v41 }
 0x1aa   :  { %v1967_v39 = vpop.f32.mrf.mxu3  ;;  %v2099_v40 = vpop.f32.mrf.mxu2 }
 0x1ab   :  { %v2103_v32 = vadd.f32 %v2099_v40, %v2059_v43 }
 0x1ac   :  { %v2189_v42 = vpop.f32.mrf.mxu0 }
 0x1b2   :  { %v2101_v36 = vpop.f32.mrf.mxu2  ;;  %v2143_v44 = vpop.f32.mrf.mxu3 }
 0x1b3   :  { %v2147_v45 = vadd.f32 %v2143_v44, %v2103_v32 }
 0x1b5   :  { %v2191_v47 = vadd.f32 %v2187_v35, %v2147_v45 }
 0x1b7   :  { %v2196_v48 = vadd.f32 %v3278_v46, %v2191_v47 }
 0x1b9   :  { %v2197_v49 = vmax.f32 %v2196_v48, 0.0 }
 0x1ba   :  { %v2145_v50 = vpop.f32.mrf.mxu3 }
 0x1bb   :  { %2198 = vst [vmem:[%s3968_s6] sm:$0xff] %v2197_v49 }

// kernel: _lambda_.6
= control target key start
LH: loop header
LB: loop body
LE: loop exit
PB: predicated region body
PF: predicated region fallthrough
CT: control target
= control target key end

     0   :  { %17 = vsyncpa [#allocation4], 0  ;;  %s3001_s24 = smov [#allocation3]   ;;  %s3002_s26 = smov 64   ;;  %s3533_s0 = inlined_call_operand.vmem [shape: f32[5,80], index: 0, kind: input, shape index: {}]   ;;  %s3534_s1 = inlined_call_operand.vmem [shape: f32[5,80], index: 1, kind: input, shape index: {}]   ;;  %s3535_s2 = inlined_call_operand.vmem [shape: f32[5,80], index: 2, kind: input, shape index: {}]   ;;  %s3536_s3 = inlined_call_operand.vmem [shape: f32[5,80], index: 3, kind: input, shape index: {}]   ;;  %s3537_s4 = inlined_call_operand.vmem [shape: bf16[9,64,64], index: 4, kind: input, shape index: {}]   ;;  %s3538_s5 = inlined_call_operand.vmem [shape: f32[1,64], index: 5, kind: input, shape index: {}]   ;;  %s3539_s6 = inlined_call_operand.vmem [shape: bf16[9,64,64], index: 6, kind: input, shape index: {}]   ;;  %s3540_s7 = inlined_call_operand.vmem [shape: f32[1,64], index: 7, kind: input, shape index: {}]   ;;  %s3541_s8 = inlined_call_operand.vmem [shape: bf16[9,64,64], index: 8, kind: input, shape index: {}]   ;;  %s3542_s9 = inlined_call_operand.vmem [shape: f32[1,64], index: 9, kind: input, shape index: {}]   ;;  %s3543_s10 = inlined_call_operand.hbm [shape: bf16[9,64,64], index: 10, kind: input, shape index: {}]   ;;  %s3544_s11 = inlined_call_operand.vmem [shape: f32[1,64], index: 11, kind: input, shape index: {}]   ;;  %s3545_s12 = inlined_call_operand.vmem [shape: f32[4,64], index: 12, kind: output, shape index: {}]  }
   0x1   :  { %s42_s23 = sshll.u32 %s3543_s10, 4  ;;  %s44_s25 = sshll.u32 %s3001_s24, 4  ;;  %s43_s23 = int_to_ptr.hbm [resolvable:$true] %s42_s23  ;;  %s45_s25 = int_to_ptr.vmem [resolvable:$true] %s44_s25 }
   0x2   :  { %s3003_s27 = smov 4  }
   0x3   :  { %50 = dma.hbm_to_vmem [thread:$0]  %s43_s23, 4608, %s45_s25, [#allocation4], %s3002_s26, %s3002_s26, %s3003_s27  }
   0x4   :  { %2999 = dma.done.wait [#allocation4], 4608  }
   0x5   :  { %3000 = vsyncadd [#allocation4], 4294962688  ;;  %v58_v0 = vld [vmem:[%s3533_s0] sm:$0xf]  ;;  %s3004_s30 = smov 112   ;;  %v2823_v3 = vld [vmem:[%s3537_s4 + $0x18] sm:$0xff] }
   0x6   :  { %62 = vrot.lane.b32.xlu0 %v58_v0, %s3004_s30  ;;  %v75_v1 = vld [vmem:[%s3533_s0 + $0x1] sm:$0xf]  ;;  %v2835_v4 = vld [vmem:[%s3537_s4 + $0x78] sm:$0xff]  ;;  %vm84_vm0 = vcmask 783360   ;;  %v3005_v5 = vmov 0.0   ;;  %186 = vmatpush.bf16.msra.mxu1 %v2823_v3  ;;  %v2822_v6 = vld [vmem:[%s3537_s4 + $0x10] sm:$0xff] }
   0x7   :  { %80 = vrot.lane.b32.xlu1 %v75_v1, %s3004_s30  ;;  %v66_v2 = vld [vmem:[%s3535_s2] sm:$0xf]  ;;  %85 = vst.msk [vmem:[#allocation2] sm:$0x3f] %vm84_vm0, %v3005_v5  ;;  %289 = vmatpush.bf16.msra.mxu3 %v2835_v4  ;;  %v2834_v7 = vld [vmem:[%s3537_s4 + $0x70] sm:$0xff]  ;;  %s3006_s28 = smov 16  }
   0x8   :  { %v59_v8 = vld [vmem:[%s3534_s1] sm:$0xf]  ;;  %v2821_v22 = vld [vmem:[%s3537_s4 + $0x8] sm:$0xff]  ;;  %v2827_v26 = vld [vmem:[%s3537_s4 + $0x38] sm:$0xff]  ;;  %vm90_vm1 = vcmask 650368   ;;  %vm138_vm2 = vcmask 523264  }
   0x9   :  { %v60_v9 = vmax.f32 %v58_v0, %v59_v8  ;;  %v68_v13 = vld [vmem:[%s3536_s3] sm:$0xf]  ;;  %v2833_v23 = vld [vmem:[%s3537_s4 + $0x68] sm:$0xff]  ;;  %v2831_v27 = vld [vmem:[%s3537_s4 + $0x58] sm:$0xff]  ;;  %146 = vmatpush.bf16.msra.mxu0 %v2827_v26  ;;  %s3007_s27 = smov 96   ;;  %vm2009_vm3 = vcmask 519168  }
   0xa   :  { %187 = vmatpush.bf16.msra.mxu1 %v2822_v6  ;;  %v77_v17 = vld [vmem:[%s3534_s1 + $0x1] sm:$0xf]  ;;  %v2826_v28 = vld [vmem:[%s3537_s4 + $0x30] sm:$0xff]  ;;  %237 = vmatpush.bf16.msra.mxu2 %v2831_v27  ;;  %v2825_v31 = vld [vmem:[%s3537_s4 + $0x28] sm:$0xff] }
   0xb   :  { %290 = vmatpush.bf16.msra.mxu3 %v2834_v7  ;;  %v2820_v24 = vld [vmem:[%s3537_s4] sm:$0xff]  ;;  %v2830_v29 = vld [vmem:[%s3537_s4 + $0x50] sm:$0xff]  ;;  %v2829_v39 = vld [vmem:[%s3537_s4 + $0x48] sm:$0xff] }
   0xc   :  { %v2832_v25 = vld [vmem:[%s3537_s4 + $0x60] sm:$0xff]  ;;  %v2843_v40 = vld [vmem:[%s3537_s4 + $0xb8] sm:$0xff]  ;;  %v2842_v42 = vld [vmem:[%s3537_s4 + $0xb0] sm:$0xff] }
   0xd   :  { %147 = vmatpush.bf16.msra.mxu0 %v2826_v28  ;;  %v2824_v32 = vld [vmem:[%s3537_s4 + $0x20] sm:$0xff]  ;;  %v2839_v43 = vld [vmem:[%s3537_s4 + $0x98] sm:$0xff]  ;;  %v2841_v44 = vld [vmem:[%s3537_s4 + $0xa8] sm:$0xff] }
   0xe   :  { %71 = vrot.lane.b32.xlu0 %v66_v2, %s3004_s30  ;;  %188 = vmatpush.bf16.msra.mxu1 %v2821_v22  ;;  %v2828_v41 = vld [vmem:[%s3537_s4 + $0x40] sm:$0xff]  ;;  %v2847_v45 = vld [vmem:[%s3537_s4 + $0xd8] sm:$0xff]  ;;  %v2838_v47 = vld [vmem:[%s3537_s4 + $0x90] sm:$0xff] }
   0xf   :  { %291 = vmatpush.bf16.msra.mxu3 %v2833_v23  ;;  %238 = vmatpush.bf16.msra.mxu2 %v2830_v29  ;;  %v2851_v46 = vld [vmem:[%s3537_s4 + $0xf8] sm:$0xff]  ;;  %v2840_v48 = vld [vmem:[%s3537_s4 + $0xa0] sm:$0xff]  ;;  %v2846_v49 = vld [vmem:[%s3537_s4 + $0xd0] sm:$0xff] }
  0x10   :  { %v2850_v50 = vld [vmem:[%s3537_s4 + $0xf0] sm:$0xff]  ;;  %v2837_v51 = vld [vmem:[%s3537_s4 + $0x88] sm:$0xff]  ;;  %v2836_v54 = vld [vmem:[%s3537_s4 + $0x80] sm:$0xff] }
  0x11   :  { %148 = vmatpush.bf16.msra.mxu0 %v2825_v31  ;;  %v2845_v52 = vld [vmem:[%s3537_s4 + $0xc8] sm:$0xff]  ;;  %v2844_v55 = vld [vmem:[%s3537_s4 + $0xc0] sm:$0xff]  ;;  %v2855_v57 = vld [vmem:[%s3537_s4 + $0x118] sm:$0xff] }
  0x12   :  { %189 = vmatpush.bf16.msra.mxu1 %v2820_v24  ;;  %v2849_v53 = vld [vmem:[%s3537_s4 + $0xe8] sm:$0xff]  ;;  %v2848_v56 = vld [vmem:[%s3537_s4 + $0xe0] sm:$0xff]  ;;  %v2854_v59 = vld [vmem:[%s3537_s4 + $0x110] sm:$0xff] }
  0x13   :  { %292 = vmatpush.bf16.msra.mxu3 %v2832_v25  ;;  %239 = vmatpush.bf16.msra.mxu2 %v2829_v39  ;;  %v2853_v60 = vld [vmem:[%s3537_s4 + $0x108] sm:$0xff]  ;;  %v2852_v62 = vld [vmem:[%s3537_s4 + $0x100] sm:$0xff] }
  0x14   :  { %v2869_v39 = vld [vmem:[%s3539_s6 + $0x68] sm:$0xff] }
  0x15   :  { %149 = vmatpush.bf16.msra.mxu0 %v2824_v32  ;;  %v2971_v32 = vld [vmem:[%s3538_s5] ss:$0 sm:$0xff] }
  0x16   :  { %394 = vmatpush.bf16.msrb.mxu1 %v2843_v40  ;;  %v2856_v40 = vld [vmem:[%s3539_s6] sm:$0xff] }
  0x17   :  { %240 = vmatpush.bf16.msra.mxu2 %v2828_v41  ;;  %499 = vmatpush.bf16.msrb.mxu3 %v2851_v46  ;;  %v2868_v41 = vld [vmem:[%s3539_s6 + $0x60] sm:$0xff]  ;;  %v2861_v46 = vld [vmem:[%s3539_s6 + $0x28] sm:$0xff] }
  0x19   :  { %342 = vmatpush.bf16.msrb.mxu0 %v2839_v43  ;;  %v2879_v43 = vld [vmem:[%s3539_s6 + $0xb8] sm:$0xff] }
  0x1a   :  { %395 = vmatpush.bf16.msrb.mxu1 %v2842_v42  ;;  %v2863_v42 = vld [vmem:[%s3539_s6 + $0x38] sm:$0xff] }
  0x1b   :  { %446 = vmatpush.bf16.msrb.mxu2 %v2847_v45  ;;  %500 = vmatpush.bf16.msrb.mxu3 %v2850_v50  ;;  %v2878_v45 = vld [vmem:[%s3539_s6 + $0xb0] sm:$0xff] }
  0x1d   :  { %343 = vmatpush.bf16.msrb.mxu0 %v2838_v47  ;;  %v2860_v47 = vld [vmem:[%s3539_s6 + $0x20] sm:$0xff] }
  0x1e   :  { %396 = vmatpush.bf16.msrb.mxu1 %v2841_v44  ;;  %v2862_v44 = vld [vmem:[%s3539_s6 + $0x30] sm:$0xff] }
  0x1f   :  { %447 = vmatpush.bf16.msrb.mxu2 %v2846_v49  ;;  %501 = vmatpush.bf16.msrb.mxu3 %v2849_v53 }
  0x21   :  { %344 = vmatpush.bf16.msrb.mxu0 %v2837_v51 }
  0x22   :  { %397 = vmatpush.bf16.msrb.mxu1 %v2840_v48 }
  0x23   :  { %448 = vmatpush.bf16.msrb.mxu2 %v2845_v52  ;;  %502 = vmatpush.bf16.msrb.mxu3 %v2848_v56  ;;  %v2876_v56 = vld [vmem:[%s3539_s6 + $0xa0] sm:$0xff] }
  0x25   :  { %345 = vmatpush.bf16.msrb.mxu0 %v2836_v54 }
  0x27   :  { %449 = vmatpush.bf16.msrb.mxu2 %v2844_v55  ;;  %v2877_v55 = vld [vmem:[%s3539_s6 + $0xa8] sm:$0xff] }
  0x78   :  { %v63_v10 = vpop.permute.xlu0 %62 }
  0x79   :  { %v65_v11 = vmax.f32 %v60_v9, %v63_v10  ;;  %v81_v19 = vpop.permute.xlu1 %80 }
  0x7b   :  { %v67_v12 = vmax.f32 %v65_v11, %v66_v2  ;;  %v2859_v11 = vld [vmem:[%s3539_s6 + $0x18] sm:$0xff] }
  0x7d   :  { %v69_v14 = vmax.f32 %v67_v12, %v68_v13  ;;  %v2871_v12 = vld [vmem:[%s3539_s6 + $0x78] sm:$0xff] }
  0x80   :  { %v72_v15 = vpop.permute.xlu0 %71 }
  0x81   :  { %v74_v16 = vmax.f32 %v69_v14, %v72_v15  ;;  %v2858_v14 = vld [vmem:[%s3539_s6 + $0x10] sm:$0xff] }
  0x82   :  { %v2870_v15 = vld [vmem:[%s3539_s6 + $0x70] sm:$0xff] }
  0x83   :  { %v76_v18 = vmax.f32 %v74_v16, %v75_v1 }
  0x85   :  { %v78_v20 = vmax.f32 %v76_v18, %v77_v17 }
  0x87   :  { %v3111_v21 = vmax.f32 %v78_v20, %v81_v19 }
  0x89   :  { %87 = vrot.lane.b32.xlu1 %v3111_v21, %s3006_s28 }
  0xfb   :  { %v88_v30 = vpop.permute.xlu1 %87 }
  0xfc   :  { %91 = vst.msk [vmem:[#allocation2 + $0x1] sm:$0xf] %vm90_vm1, %v88_v30 }
 0x103   :  { %v404_v33 = vld [vmem:[#allocation2 + $0x2] sm:$0xf] }
 0x104   :  { %v247_v34 = vld [vmem:[#allocation2 + $0x1] sm:$0xf]  ;;  %v3146_v36 = vpack.c.bf16 %v404_v33, %v404_v33 }
 0x105   :  { %v92_v35 = vld [vmem:[#allocation2] sm:$0xf]  ;;  %v248_v37 = vpack.c.bf16 %v247_v34, %v247_v34 }
 0x106   :  { %v93_v38 = vpack.c.bf16 %v92_v35, %v92_v35  ;;  %567 = vst.msk [vmem:[#allocation2] sm:$0x3f] %vm84_vm0, %v3005_v5  ;;  %466 = vrot.lane.b32.xlu1 %v3146_v36, %s3004_s30 }
 0x107   :  { %309 = vrot.lane.b32.xlu0 %v248_v37, %s3004_s30  ;;  %2107 = vmatmul.msk.bf16.vlgmr.msra.gmra.mxu3 %vm138_vm2, %v248_v37 }
 0x108   :  { %112 = vrot.lane.b32.xlu2 %v93_v38, %s3004_s30  ;;  %2057 = vmatmul.msk.bf16.vlgmr.msra.gmra.mxu1 %vm138_vm2, %v93_v38 }
 0x109   :  { %626 = vmatpush.bf16.msra.mxu1 %v2863_v42 }
 0x10d   :  { %627 = vmatpush.bf16.msra.mxu1 %v2862_v44 }
 0x10f   :  { %518 = vrot.lane.b32.xlu0 %v3146_v36, %s3007_s27 }
 0x110   :  { %204 = vrot.lane.b32.xlu2 %v93_v38, %s3007_s27  ;;  %v2857_v38 = vld [vmem:[%s3539_s6 + $0x8] sm:$0xff] }
 0x111   :  { %628 = vmatpush.bf16.msra.mxu1 %v2861_v46 }
 0x115   :  { %629 = vmatpush.bf16.msra.mxu1 %v2860_v47 }
 0x118   :  { %361 = vrot.lane.b32.xlu2 %v248_v37, %s3007_s27 }
 0x162   :  { %v113_v58 = vpop.permute.xlu2 %112 }
 0x163   :  { %2040 = vmatmul.msk.bf16.vlgmr.msra.gmra.mxu0 %vm138_vm2, %v113_v58  ;;  %v2875_v58 = vld [vmem:[%s3539_s6 + $0x98] sm:$0xff] }
 0x164   :  { %551 = vmatpush.bf16.msra.mxu0 %v2855_v57  ;;  %v2867_v57 = vld [vmem:[%s3539_s6 + $0x58] sm:$0xff] }
 0x165   :  { %717 = vmatpush.bf16.msra.mxu3 %v2867_v57  ;;  %v2904_v57 = vld [vmem:[%s3541_s8 + $0x60] sm:$0xff] }
 0x168   :  { %552 = vmatpush.bf16.msra.mxu0 %v2854_v59  ;;  %v2866_v59 = vld [vmem:[%s3539_s6 + $0x50] sm:$0xff] }
 0x169   :  { %718 = vmatpush.bf16.msra.mxu3 %v2866_v59  ;;  %v2923_v59 = vld [vmem:[%s3541_s8 + $0xf8] sm:$0xff] }
 0x16a   :  { %v205_v61 = vpop.permute.xlu2 %204 }
 0x16b   :  { %2082 = vmatmul.msk.bf16.vlgmr.msra.gmra.mxu2 %vm138_vm2, %v205_v61  ;;  %v2874_v61 = vld [vmem:[%s3539_s6 + $0x90] sm:$0xff] }
 0x16c   :  { %553 = vmatpush.bf16.msra.mxu0 %v2853_v60  ;;  %666 = vmatpush.bf16.msra.mxu2 %v2859_v11  ;;  %v2887_v60 = vld [vmem:[%s3539_s6 + $0xf8] sm:$0xff]  ;;  %v2890_v11 = vld [vmem:[%s3539_s6 + $0x110] sm:$0xff] }
 0x170   :  { %554 = vmatpush.bf16.msra.mxu0 %v2852_v62  ;;  %667 = vmatpush.bf16.msra.mxu2 %v2858_v14  ;;  %v2886_v62 = vld [vmem:[%s3539_s6 + $0xf0] sm:$0xff] }
 0x172   :  { %v362_v63 = vpop.permute.xlu2 %361 }
 0x173   :  { %2157 = vmatmul.msk.bf16.vlgmr.msrb.gmra.mxu1 %vm138_vm2, %v362_v63  ;;  %v2865_v63 = vld [vmem:[%s3539_s6 + $0x48] sm:$0xff] }
 0x174   :  { %668 = vmatpush.bf16.msra.mxu2 %v2857_v38  ;;  %822 = vmatpush.bf16.msrb.mxu1 %v2875_v58  ;;  %v2903_v58 = vld [vmem:[%s3541_s8 + $0x58] sm:$0xff] }
 0x175   :  { %719 = vmatpush.bf16.msra.mxu3 %v2865_v63  ;;  %v2900_v63 = vld [vmem:[%s3541_s8 + $0x40] sm:$0xff] }
 0x178   :  { %v467_v0 = vpop.permute.xlu1 %466  ;;  %669 = vmatpush.bf16.msra.mxu2 %v2856_v40  ;;  %823 = vmatpush.bf16.msrb.mxu1 %v2874_v61  ;;  %v2922_v61 = vld [vmem:[%s3541_s8 + $0xf0] sm:$0xff] }
 0x179   :  { %v310_v1 = vpop.permute.xlu0 %309  ;;  %2207 = vmatmul.msk.bf16.vlgmr.msrb.gmra.mxu3 %vm138_vm2, %v467_v0  ;;  %v2873_v0 = vld [vmem:[%s3539_s6 + $0x88] sm:$0xff] }
 0x17a   :  { %2132 = vmatmul.msk.bf16.vlgmr.msrb.gmra.mxu0 %vm138_vm2, %v310_v1  ;;  %v2864_v1 = vld [vmem:[%s3539_s6 + $0x40] sm:$0xff] }
 0x17b   :  { %2182 = vmatmul.msk.bf16.vlgmr.msrb.gmra.mxu2 %vm138_vm2, %v3146_v36  ;;  %769 = vmatpush.bf16.msrb.mxu0 %v2871_v12  ;;  %v2880_v12 = vld [vmem:[%s3539_s6 + $0xc0] sm:$0xff] }
 0x17c   :  { %874 = vmatpush.bf16.msrb.mxu2 %v2879_v43  ;;  %824 = vmatpush.bf16.msrb.mxu1 %v2873_v0 }
 0x17d   :  { %720 = vmatpush.bf16.msra.mxu3 %v2864_v1 }
 0x17f   :  { %770 = vmatpush.bf16.msrb.mxu0 %v2870_v15  ;;  %v2888_v15 = vld [vmem:[%s3539_s6 + $0x100] sm:$0xff] }
 0x180   :  { %875 = vmatpush.bf16.msrb.mxu2 %v2878_v45 }
 0x181   :  { %v519_v3 = vpop.permute.xlu0 %518 }
 0x183   :  { %771 = vmatpush.bf16.msrb.mxu0 %v2869_v39 }
 0x184   :  { %876 = vmatpush.bf16.msrb.mxu2 %v2877_v55  ;;  %v2893_v55 = vld [vmem:[%s3541_s8 + $0x8] sm:$0xff] }
 0x185   :  { %v191_v2 = vpop.f32.mrf.mxu1 }
 0x187   :  { %772 = vmatpush.bf16.msrb.mxu0 %v2868_v41 }
 0x188   :  { %877 = vmatpush.bf16.msrb.mxu2 %v2876_v56  ;;  %v2905_v56 = vld [vmem:[%s3541_s8 + $0x68] sm:$0xff] }
 0x18a   :  { %2232 = vmatmul.msk.bf16.vlgmr.msra.gmra.mxu0 %vm138_vm2, %v519_v3  ;;  %v294_v4 = vpop.f32.mrf.mxu3  ;;  %v2883_v3 = vld [vmem:[%s3539_s6 + $0xd8] sm:$0xff] }
 0x18b   :  { %979 = vmatpush.bf16.msra.mxu0 %v2887_v60  ;;  %926 = vmatpush.bf16.msrb.mxu3 %v2883_v3  ;;  %v2902_v60 = vld [vmem:[%s3541_s8 + $0x50] sm:$0xff] }
 0x18d   :  { %v193_v6 = vpop.f32.mrf.mxu1 }
 0x18e   :  { %v2882_v6 = vld [vmem:[%s3539_s6 + $0xd0] sm:$0xff] }
 0x18f   :  { %980 = vmatpush.bf16.msra.mxu0 %v2886_v62  ;;  %927 = vmatpush.bf16.msrb.mxu3 %v2882_v6  ;;  %v2901_v62 = vld [vmem:[%s3541_s8 + $0x48] sm:$0xff] }
 0x192   :  { %v296_v7 = vpop.f32.mrf.mxu3 }
 0x193   :  { %v2884_v7 = vld [vmem:[%s3539_s6 + $0xe0] sm:$0xff] }
 0x1e0   :  { %v151_v8 = vpop.f32.mrf.mxu0 }
 0x1e1   :  { %v192_v16 = vadd.f32 %v191_v2, %v151_v8  ;;  %v2872_v2 = vld [vmem:[%s3539_s6 + $0x80] sm:$0xff]  ;;  %v2891_v8 = vld [vmem:[%s3539_s6 + $0x118] sm:$0xff] }
 0x1e2   :  { %825 = vmatpush.bf16.msrb.mxu1 %v2872_v2 }
 0x1e8   :  { %v153_v9 = vpop.f32.mrf.mxu0 }
 0x1ee   :  { %v242_v10 = vpop.f32.mrf.mxu2 }
 0x1ef   :  { %v246_v17 = vadd.f32 %v242_v10, %v192_v16  ;;  %v2881_v10 = vld [vmem:[%s3539_s6 + $0xc8] sm:$0xff] }
 0x1f0   :  { %v399_v13 = vpop.f32.mrf.mxu1  ;;  %928 = vmatpush.bf16.msrb.mxu3 %v2881_v10  ;;  %v2920_v10 = vld [vmem:[%s3541_s8 + $0xe0] sm:$0xff] }
 0x1f1   :  { %v298_v22 = vadd.f32 %v294_v4, %v246_v17  ;;  %v2885_v4 = vld [vmem:[%s3539_s6 + $0xe8] sm:$0xff] }
 0x1f2   :  { %981 = vmatpush.bf16.msra.mxu0 %v2885_v4 }
 0x1f4   :  { %929 = vmatpush.bf16.msrb.mxu3 %v2880_v12  ;;  %v2917_v12 = vld [vmem:[%s3541_s8 + $0xc8] sm:$0xff] }
 0x1f6   :  { %v244_v18 = vpop.f32.mrf.mxu2  ;;  %982 = vmatpush.bf16.msra.mxu0 %v2884_v7 }
 0x1f7   :  { %v347_v19 = vpop.f32.mrf.mxu0 }
 0x1f8   :  { %v401_v20 = vpop.f32.mrf.mxu1  ;;  %v351_v23 = vadd.f32 %v347_v19, %v298_v22 }
 0x1fa   :  { %v403_v27 = vadd.f32 %v399_v13, %v351_v23  ;;  %v2889_v13 = vld [vmem:[%s3539_s6 + $0x108] sm:$0xff] }
 0x1fc   :  { %v504_v24 = vpop.f32.mrf.mxu3 }
 0x1fe   :  { %v451_v25 = vpop.f32.mrf.mxu2 }
 0x1ff   :  { %v349_v26 = vpop.f32.mrf.mxu0  ;;  %v455_v28 = vadd.f32 %v451_v25, %v403_v27 }
 0x201   :  { %v508_v30 = vadd.f32 %v504_v24, %v455_v28 }
 0x204   :  { %v506_v29 = vpop.f32.mrf.mxu3 }
 0x206   :  { %v453_v31 = vpop.f32.mrf.mxu2 }
 0x207   :  { %v556_v33 = vpop.f32.mrf.mxu0  ;;  %v2907_v31 = vld [vmem:[%s3541_s8 + $0x78] sm:$0xff] }
 0x208   :  { %v560_v34 = vadd.f32 %v556_v33, %v508_v30  ;;  %v2895_v30 = vld [vmem:[%s3541_s8 + $0x18] sm:$0xff]  ;;  %v2906_v33 = vld [vmem:[%s3541_s8 + $0x70] sm:$0xff] }
 0x20a   :  { %v565_v35 = vadd.f32 %v2971_v32, %v560_v34  ;;  %v2894_v32 = vld [vmem:[%s3541_s8 + $0x10] sm:$0xff] }
 0x20c   :  { %v566_v36 = vmax.f32 %v565_v35, 0.0 }
 0x20e   :  { %569 = vrot.lane.b32.xlu1 %v566_v36, %s3006_s28 }
 0x20f   :  { %v558_v37 = vpop.f32.mrf.mxu0 }
 0x280   :  { %v570_v48 = vpop.permute.xlu1 %569 }
 0x281   :  { %572 = vst.msk [vmem:[#allocation2 + $0x1] sm:$0xf] %vm90_vm1, %v570_v48 }
 0x288   :  { %v727_v49 = vld [vmem:[#allocation2 + $0x1] sm:$0xf] }
 0x289   :  { %v573_v50 = vld [vmem:[#allocation2] sm:$0xf]  ;;  %v728_v52 = vpack.c.bf16 %v727_v49, %v727_v49 }
 0x28a   :  { %v884_v51 = vld [vmem:[#allocation2 + $0x2] sm:$0xf]  ;;  %v574_v53 = vpack.c.bf16 %v573_v50, %v573_v50  ;;  %v2972_v49 = vld [vmem:[%s3540_s7] ss:$0 sm:$0xff] }
 0x28b   :  { %1048 = vst.msk [vmem:[#allocation2] sm:$0x3f] %vm84_vm0, %v3005_v5  ;;  %789 = vrot.lane.b32.xlu1 %v728_v52, %s3004_s30  ;;  %2324 = vmatmul.msk.bf16.vlgmr.msrb.gmra.mxu0 %vm138_vm2, %v728_v52  ;;  %v885_v54 = vpack.c.bf16 %v884_v51, %v884_v51 }
 0x28c   :  { %684 = vrot.lane.b32.xlu0 %v574_v53, %s3007_s27  ;;  %593 = vrot.lane.b32.xlu2 %v574_v53, %s3004_s30 }
 0x28d   :  { %2274 = vmatmul.msk.bf16.vlgmr.msra.gmra.mxu2 %vm138_vm2, %v574_v53  ;;  %1198 = vmatpush.bf16.msrb.mxu0 %v2903_v58 }
 0x291   :  { %1199 = vmatpush.bf16.msrb.mxu0 %v2902_v60 }
 0x293   :  { %998 = vrot.lane.b32.xlu1 %v885_v54, %s3007_s27 }
 0x294   :  { %946 = vrot.lane.b32.xlu0 %v885_v54, %s3004_s30  ;;  %841 = vrot.lane.b32.xlu2 %v728_v52, %s3007_s27 }
 0x295   :  { %1200 = vmatpush.bf16.msrb.mxu0 %v2901_v62 }
 0x299   :  { %1201 = vmatpush.bf16.msrb.mxu0 %v2900_v63 }
 0x2e6   :  { %v594_v9 = vpop.permute.xlu2 %593 }
 0x2e7   :  { %2257 = vmatmul.msk.bf16.vlgmr.msra.gmra.mxu1 %vm138_vm2, %v594_v9  ;;  %v2918_v9 = vld [vmem:[%s3541_s8 + $0xd0] sm:$0xff] }
 0x2e8   :  { %1031 = vmatpush.bf16.msra.mxu1 %v2891_v8  ;;  %v2921_v8 = vld [vmem:[%s3541_s8 + $0xe8] sm:$0xff] }
 0x2ec   :  { %1032 = vmatpush.bf16.msra.mxu1 %v2890_v11  ;;  %v2899_v11 = vld [vmem:[%s3541_s8 + $0x38] sm:$0xff] }
 0x2ed   :  { %1107 = vmatpush.bf16.msra.mxu2 %v2899_v11  ;;  %v2950_v11 = vld [vmem:[#allocation3 + $0xb0] sm:$0xff] }
 0x2ee   :  { %v842_v14 = vpop.permute.xlu2 %841 }
 0x2ef   :  { %2374 = vmatmul.msk.bf16.vlgmr.msrb.gmra.mxu2 %vm138_vm2, %v842_v14  ;;  %v2916_v14 = vld [vmem:[%s3541_s8 + $0xc0] sm:$0xff] }
 0x2f0   :  { %1033 = vmatpush.bf16.msra.mxu1 %v2889_v13  ;;  %v2898_v13 = vld [vmem:[%s3541_s8 + $0x30] sm:$0xff] }
 0x2f1   :  { %1108 = vmatpush.bf16.msra.mxu2 %v2898_v13 }
 0x2f4   :  { %1034 = vmatpush.bf16.msra.mxu1 %v2888_v15  ;;  %v2897_v15 = vld [vmem:[%s3541_s8 + $0x28] sm:$0xff] }
 0x2f5   :  { %1109 = vmatpush.bf16.msra.mxu2 %v2897_v15 }
 0x2fd   :  { %v790_v16 = vpop.permute.xlu1 %789 }
 0x2fe   :  { %v685_v17 = vpop.permute.xlu0 %684  ;;  %2349 = vmatmul.msk.bf16.vlgmr.msrb.gmra.mxu1 %vm138_vm2, %v790_v16  ;;  %v2915_v16 = vld [vmem:[%s3541_s8 + $0xb8] sm:$0xff] }
 0x2ff   :  { %2299 = vmatmul.msk.bf16.vlgmr.msra.gmra.mxu3 %vm138_vm2, %v685_v17  ;;  %1250 = vmatpush.bf16.msrb.mxu1 %v2907_v31  ;;  %v2896_v17 = vld [vmem:[%s3541_s8 + $0x20] sm:$0xff]  ;;  %v2925_v31 = vld [vmem:[%s3541_s8 + $0x108] sm:$0xff] }
 0x300   :  { %1147 = vmatpush.bf16.msra.mxu3 %v2895_v30  ;;  %1110 = vmatpush.bf16.msra.mxu2 %v2896_v17  ;;  %v2926_v30 = vld [vmem:[%s3541_s8 + $0x110] sm:$0xff] }
 0x303   :  { %1251 = vmatpush.bf16.msrb.mxu1 %v2906_v33 }
 0x304   :  { %1148 = vmatpush.bf16.msra.mxu3 %v2894_v32 }
 0x305   :  { %v999_v20 = vpop.permute.xlu1 %998 }
 0x306   :  { %v947_v18 = vpop.permute.xlu0 %946 }
 0x307   :  { %2424 = vmatmul.msk.bf16.vlgmr.msra.gmra.mxu0 %vm138_vm2, %v947_v18  ;;  %1252 = vmatpush.bf16.msrb.mxu1 %v2905_v56  ;;  %v2914_v18 = vld [vmem:[%s3541_s8 + $0xb0] sm:$0xff] }
 0x308   :  { %v774_v19 = vpop.f32.mrf.mxu0  ;;  %1149 = vmatpush.bf16.msra.mxu3 %v2893_v55  ;;  %v2942_v55 = vld [vmem:[#allocation3 + $0x70] sm:$0xff] }
 0x30b   :  { %1253 = vmatpush.bf16.msrb.mxu1 %v2904_v57 }
 0x30e   :  { %2449 = vmatmul.msk.bf16.vlgmr.msra.gmra.mxu1 %vm138_vm2, %v999_v20  ;;  %v2913_v20 = vld [vmem:[%s3541_s8 + $0xa8] sm:$0xff] }
 0x30f   :  { %2399 = vmatmul.msk.bf16.vlgmr.msrb.gmra.mxu3 %vm138_vm2, %v885_v54  ;;  %1460 = vmatpush.bf16.msra.mxu1 %v2923_v59 }
 0x310   :  { %v671_v22 = vpop.f32.mrf.mxu2  ;;  %v776_v23 = vpop.f32.mrf.mxu0 }
 0x311   :  { %v2912_v23 = vld [vmem:[%s3541_s8 + $0xa0] sm:$0xff] }
 0x313   :  { %1461 = vmatpush.bf16.msra.mxu1 %v2922_v61 }
 0x317   :  { %1462 = vmatpush.bf16.msra.mxu1 %v2921_v8  ;;  %v2928_v8 = vld [vmem:[#allocation3] sm:$0xff] }
 0x318   :  { %v673_v24 = vpop.f32.mrf.mxu2 }
 0x31b   :  { %1463 = vmatpush.bf16.msra.mxu1 %v2920_v10  ;;  %v2951_v10 = vld [vmem:[#allocation3 + $0xb8] sm:$0xff] }
 0x364   :  { %v631_v25 = vpop.f32.mrf.mxu1 }
 0x365   :  { %v672_v35 = vadd.f32 %v671_v22, %v631_v25  ;;  %v2910_v22 = vld [vmem:[%s3541_s8 + $0x90] sm:$0xff]  ;;  %v2909_v25 = vld [vmem:[%s3541_s8 + $0x88] sm:$0xff] }
 0x36c   :  { %v633_v26 = vpop.f32.mrf.mxu1 }
 0x36d   :  { %v2908_v26 = vld [vmem:[%s3541_s8 + $0x80] sm:$0xff] }
 0x372   :  { %v879_v27 = vpop.f32.mrf.mxu2 }
 0x37a   :  { %v881_v28 = vpop.f32.mrf.mxu2 }
 0x37b   :  { %v827_v29 = vpop.f32.mrf.mxu1  ;;  %v2927_v28 = vld [vmem:[%s3541_s8 + $0x118] sm:$0xff] }
 0x382   :  { %v722_v34 = vpop.f32.mrf.mxu3 }
 0x383   :  { %v829_v36 = vpop.f32.mrf.mxu1  ;;  %v726_v38 = vadd.f32 %v722_v34, %v672_v35  ;;  %v2924_v34 = vld [vmem:[%s3541_s8 + $0x100] sm:$0xff] }
 0x384   :  { %v984_v37 = vpop.f32.mrf.mxu0 }
 0x385   :  { %v778_v39 = vadd.f32 %v774_v19, %v726_v38  ;;  %v2911_v19 = vld [vmem:[%s3541_s8 + $0x98] sm:$0xff] }
 0x386   :  { %1303 = vmatpush.bf16.msrb.mxu2 %v2911_v19  ;;  %v2949_v19 = vld [vmem:[#allocation3 + $0xa8] sm:$0xff] }
 0x387   :  { %v831_v43 = vadd.f32 %v827_v29, %v778_v39 }
 0x389   :  { %v883_v44 = vadd.f32 %v879_v27, %v831_v43 }
 0x38a   :  { %v724_v40 = vpop.f32.mrf.mxu3  ;;  %1304 = vmatpush.bf16.msrb.mxu2 %v2910_v22  ;;  %v2935_v22 = vld [vmem:[#allocation3 + $0x38] sm:$0xff] }
 0x38b   :  { %v1036_v41 = vpop.f32.mrf.mxu1 }
 0x38c   :  { %v986_v42 = vpop.f32.mrf.mxu0 }
 0x38e   :  { %1305 = vmatpush.bf16.msrb.mxu2 %v2909_v25  ;;  %v2959_v25 = vld [vmem:[#allocation3 + $0xf8] sm:$0xff] }
 0x392   :  { %v931_v45 = vpop.f32.mrf.mxu3  ;;  %1306 = vmatpush.bf16.msrb.mxu2 %v2908_v26  ;;  %v2938_v26 = vld [vmem:[#allocation3 + $0x50] sm:$0xff] }
 0x393   :  { %v935_v46 = vadd.f32 %v931_v45, %v883_v44  ;;  %v1038_v47 = vpop.f32.mrf.mxu1 }
 0x395   :  { %v988_v48 = vadd.f32 %v984_v37, %v935_v46 }
 0x397   :  { %v1040_v50 = vadd.f32 %v1036_v41, %v988_v48 }
 0x399   :  { %v1045_v51 = vadd.f32 %v2972_v49, %v1040_v50  ;;  %v2931_v49 = vld [vmem:[#allocation3 + $0x18] sm:$0xff] }
 0x39a   :  { %v933_v52 = vpop.f32.mrf.mxu3  ;;  %v2943_v50 = vld [vmem:[#allocation3 + $0x78] sm:$0xff] }
 0x39b   :  { %v3380_v53 = vadd.f32 %v1045_v51, %v3111_v21  ;;  %v2892_v21 = vld [vmem:[%s3541_s8] sm:$0xff]  ;;  %v2930_v52 = vld [vmem:[#allocation3 + $0x10] sm:$0xff] }
 0x39c   :  { %1150 = vmatpush.bf16.msra.mxu3 %v2892_v21 }
 0x39d   :  { %v1047_v54 = vmax.f32 %v3380_v53, 0.0 }
 0x39f   :  { %1050 = vrot.lane.b32.xlu2 %v1047_v54, %s3006_s28 }
 0x3a0   :  { %1355 = vmatpush.bf16.msrb.mxu3 %v2915_v16 }
 0x3a4   :  { %1356 = vmatpush.bf16.msrb.mxu3 %v2914_v18 }
 0x3a8   :  { %1357 = vmatpush.bf16.msrb.mxu3 %v2913_v20  ;;  %v2948_v20 = vld [vmem:[#allocation3 + $0xa0] sm:$0xff] }
 0x3ac   :  { %1358 = vmatpush.bf16.msrb.mxu3 %v2912_v23  ;;  %v2939_v23 = vld [vmem:[#allocation3 + $0x58] sm:$0xff] }
 0x3f9   :  { %v1051_v0 = vpop.permute.xlu2 %1050 }
 0x3fa   :  { %1053 = vst.msk [vmem:[#allocation2 + $0x1] sm:$0xf] %vm90_vm1, %v1051_v0  ;;  %v2973_v0 = vld [vmem:[%s3542_s9] ss:$0 sm:$0xff] }
 0x401   :  { %v1208_v1 = vld [vmem:[#allocation2 + $0x1] sm:$0xf] }
 0x402   :  { %v1054_v2 = vld [vmem:[#allocation2] sm:$0xf]  ;;  %v1209_v4 = vpack.c.bf16 %v1208_v1, %v1208_v1 }
 0x403   :  { %v1365_v3 = vld [vmem:[#allocation2 + $0x2] sm:$0xf]  ;;  %v1055_v6 = vpack.c.bf16 %v1054_v2, %v1054_v2 }
 0x404   :  { %1528 = vst.msk [vmem:[#allocation2] sm:$0x3f] %vm84_vm0, %v3005_v5  ;;  %1270 = vrot.lane.b32.xlu1 %v1209_v4, %s3004_s30  ;;  %2541 = vmatmul.msk.bf16.vlgmr.msrb.gmra.mxu1 %vm138_vm2, %v1209_v4  ;;  %v1366_v7 = vpack.c.bf16 %v1365_v3, %v1365_v3  ;;  %v2919_v5 = vld [vmem:[%s3541_s8 + $0xd8] sm:$0xff] }
 0x405   :  { %1165 = vrot.lane.b32.xlu2 %v1055_v6, %s3007_s27  ;;  %1074 = vrot.lane.b32.xlu0 %v1055_v6, %s3004_s30 }
 0x406   :  { %2491 = vmatmul.msk.bf16.vlgmr.msra.gmra.mxu3 %vm138_vm2, %v1055_v6  ;;  %1407 = vmatpush.bf16.msra.mxu0 %v2919_v5  ;;  %v2941_v5 = vld [vmem:[#allocation3 + $0x68] sm:$0xff] }
 0x407   :  { %1587 = vmatpush.bf16.msra.mxu3 %v2935_v22  ;;  %1678 = vmatpush.bf16.msrb.mxu1 %v2939_v23 }
 0x40a   :  { %1408 = vmatpush.bf16.msra.mxu0 %v2918_v9  ;;  %v2940_v9 = vld [vmem:[#allocation3 + $0x60] sm:$0xff] }
 0x40b   :  { %1679 = vmatpush.bf16.msrb.mxu1 %v2938_v26 }
 0x40c   :  { %1479 = vrot.lane.b32.xlu1 %v1366_v7, %s3007_s27 }
 0x40d   :  { %1427 = vrot.lane.b32.xlu2 %v1366_v7, %s3004_s30  ;;  %1322 = vrot.lane.b32.xlu0 %v1209_v4, %s3007_s27 }
 0x40e   :  { %1409 = vmatpush.bf16.msra.mxu0 %v2917_v12 }
 0x412   :  { %1410 = vmatpush.bf16.msra.mxu0 %v2916_v14 }
 0x45f   :  { %v1166_v24 = vpop.permute.xlu2 %1165 }
 0x460   :  { %2516 = vmatmul.msk.bf16.vlgmr.msrb.gmra.mxu0 %vm138_vm2, %v1166_v24  ;;  %v2934_v24 = vld [vmem:[#allocation3 + $0x30] sm:$0xff] }
 0x461   :  { %1627 = vmatpush.bf16.msrb.mxu0 %v2931_v49  ;;  %1588 = vmatpush.bf16.msra.mxu3 %v2934_v24 }
 0x465   :  { %1628 = vmatpush.bf16.msrb.mxu0 %v2930_v52 }
 0x467   :  { %v1428_v27 = vpop.permute.xlu2 %1427 }
 0x468   :  { %2641 = vmatmul.msk.bf16.vlgmr.msra.gmra.mxu1 %vm138_vm2, %v1428_v27  ;;  %v2958_v27 = vld [vmem:[#allocation3 + $0xf0] sm:$0xff] }
 0x470   :  { %2616 = vmatmul.msk.bf16.vlgmr.msra.gmra.mxu0 %vm138_vm2, %v1366_v7  ;;  %v2929_v7 = vld [vmem:[#allocation3 + $0x8] sm:$0xff] }
 0x471   :  { %1629 = vmatpush.bf16.msrb.mxu0 %v2929_v7 }
 0x475   :  { %1630 = vmatpush.bf16.msrb.mxu0 %v2928_v8 }
 0x476   :  { %v1271_v35 = vpop.permute.xlu1 %1270 }
 0x477   :  { %v1075_v29 = vpop.permute.xlu0 %1074 }
 0x478   :  { %2474 = vmatmul.msk.bf16.vlgmr.msra.gmra.mxu2 %vm138_vm2, %v1075_v29  ;;  %v2937_v29 = vld [vmem:[#allocation3 + $0x48] sm:$0xff] }
 0x479   :  { %1512 = vmatpush.bf16.msra.mxu2 %v2927_v28  ;;  %1835 = vmatpush.bf16.msra.mxu0 %v2951_v10  ;;  %v2933_v28 = vld [vmem:[#allocation3 + $0x28] sm:$0xff] }
 0x47a   :  { %1589 = vmatpush.bf16.msra.mxu3 %v2933_v28  ;;  %1680 = vmatpush.bf16.msrb.mxu1 %v2937_v29 }
 0x47d   :  { %1513 = vmatpush.bf16.msra.mxu2 %v2926_v30  ;;  %1836 = vmatpush.bf16.msra.mxu0 %v2950_v11  ;;  %v2932_v30 = vld [vmem:[#allocation3 + $0x20] sm:$0xff] }
 0x47e   :  { %v1480_v39 = vpop.permute.xlu1 %1479  ;;  %1590 = vmatpush.bf16.msra.mxu3 %v2932_v30 }
 0x47f   :  { %v1323_v32 = vpop.permute.xlu0 %1322 }
 0x480   :  { %2591 = vmatmul.msk.bf16.vlgmr.msrb.gmra.mxu3 %vm138_vm2, %v1323_v32  ;;  %v2947_v32 = vld [vmem:[#allocation3 + $0x98] sm:$0xff] }
 0x481   :  { %v1255_v33 = vpop.f32.mrf.mxu1  ;;  %1514 = vmatpush.bf16.msra.mxu2 %v2925_v31  ;;  %1837 = vmatpush.bf16.msra.mxu0 %v2949_v19  ;;  %v2936_v31 = vld [vmem:[#allocation3 + $0x40] sm:$0xff] }
 0x482   :  { %1681 = vmatpush.bf16.msrb.mxu1 %v2936_v31  ;;  %1783 = vmatpush.bf16.msrb.mxu3 %v2947_v32 }
 0x485   :  { %1515 = vmatpush.bf16.msra.mxu2 %v2924_v34  ;;  %1838 = vmatpush.bf16.msra.mxu0 %v2948_v20  ;;  %v2957_v34 = vld [vmem:[#allocation3 + $0xe8] sm:$0xff] }
 0x488   :  { %2566 = vmatmul.msk.bf16.vlgmr.msrb.gmra.mxu2 %vm138_vm2, %v1271_v35  ;;  %v2946_v35 = vld [vmem:[#allocation3 + $0x90] sm:$0xff] }
 0x489   :  { %v1152_v36 = vpop.f32.mrf.mxu3  ;;  %v1257_v37 = vpop.f32.mrf.mxu1  ;;  %1730 = vmatpush.bf16.msrb.mxu2 %v2943_v50  ;;  %1784 = vmatpush.bf16.msrb.mxu3 %v2946_v35  ;;  %v2960_v50 = vld [vmem:[#allocation3 + $0x100] sm:$0xff] }
 0x48a   :  { %v2956_v37 = vld [vmem:[#allocation3 + $0xe0] sm:$0xff] }
 0x48d   :  { %1731 = vmatpush.bf16.msrb.mxu2 %v2942_v55 }
 0x491   :  { %v1154_v38 = vpop.f32.mrf.mxu3  ;;  %1732 = vmatpush.bf16.msrb.mxu2 %v2941_v5 }
 0x495   :  { %1733 = vmatpush.bf16.msrb.mxu2 %v2940_v9 }
 0x498   :  { %2666 = vmatmul.msk.bf16.vlgmr.msra.gmra.mxu2 %vm138_vm2, %v1480_v39  ;;  %v2945_v39 = vld [vmem:[#allocation3 + $0x88] sm:$0xff] }
 0x499   :  { %1940 = vmatpush.bf16.msra.mxu2 %v2959_v25  ;;  %1785 = vmatpush.bf16.msrb.mxu3 %v2945_v39 }
 0x49d   :  { %1941 = vmatpush.bf16.msra.mxu2 %v2958_v27 }
 0x4a1   :  { %1942 = vmatpush.bf16.msra.mxu2 %v2957_v34 }
 0x4a5   :  { %1943 = vmatpush.bf16.msra.mxu2 %v2956_v37 }
 0x4dd   :  { %v1203_v40 = vpop.f32.mrf.mxu0 }
 0x4e5   :  { %v1205_v41 = vpop.f32.mrf.mxu0  ;;  %v1465_v42 = vpop.f32.mrf.mxu1 }
 0x4e6   :  { %v2944_v41 = vld [vmem:[#allocation3 + $0x80] sm:$0xff] }
 0x4e7   :  { %1786 = vmatpush.bf16.msrb.mxu3 %v2944_v41 }
 0x4ed   :  { %v1412_v43 = vpop.f32.mrf.mxu0  ;;  %v1467_v44 = vpop.f32.mrf.mxu1 }
 0x4ee   :  { %v2963_v44 = vld [vmem:[#allocation3 + $0x118] sm:$0xff] }
 0x4f5   :  { %v1414_v45 = vpop.f32.mrf.mxu0 }
 0x4fb   :  { %v1112_v46 = vpop.f32.mrf.mxu2 }
 0x4fc   :  { %v1153_v51 = vadd.f32 %v1152_v36, %v1112_v46  ;;  %v2954_v36 = vld [vmem:[#allocation3 + $0xd0] sm:$0xff] }
 0x4fe   :  { %v1207_v56 = vadd.f32 %v1203_v40, %v1153_v51  ;;  %v2953_v40 = vld [vmem:[#allocation3 + $0xc8] sm:$0xff] }
 0x500   :  { %v1259_v58 = vadd.f32 %v1255_v33, %v1207_v56  ;;  %v2955_v33 = vld [vmem:[#allocation3 + $0xd8] sm:$0xff] }
 0x501   :  { %1887 = vmatpush.bf16.msra.mxu1 %v2955_v33 }
 0x503   :  { %v1114_v47 = vpop.f32.mrf.mxu2  ;;  %v1360_v48 = vpop.f32.mrf.mxu3 }
 0x504   :  { %v2962_v47 = vld [vmem:[#allocation3 + $0x110] sm:$0xff] }
 0x505   :  { %1888 = vmatpush.bf16.msra.mxu1 %v2954_v36 }
 0x509   :  { %1889 = vmatpush.bf16.msra.mxu1 %v2953_v40 }
 0x50b   :  { %v1308_v21 = vpop.f32.mrf.mxu2  ;;  %v1362_v57 = vpop.f32.mrf.mxu3 }
 0x50c   :  { %v1312_v59 = vadd.f32 %v1308_v21, %v1259_v58 }
 0x50e   :  { %v1364_v60 = vadd.f32 %v1360_v48, %v1312_v59  ;;  %v2961_v48 = vld [vmem:[#allocation3 + $0x108] sm:$0xff] }
 0x510   :  { %v1416_v62 = vadd.f32 %v1412_v43, %v1364_v60 }
 0x512   :  { %v1469_v63 = vadd.f32 %v1465_v42, %v1416_v62  ;;  %v2952_v42 = vld [vmem:[#allocation3 + $0xc0] sm:$0xff] }
 0x513   :  { %v1310_v61 = vpop.f32.mrf.mxu2  ;;  %1890 = vmatpush.bf16.msra.mxu1 %v2952_v42 }
 0x51b   :  { %v1517_v1 = vpop.f32.mrf.mxu2 }
 0x51c   :  { %v1521_v2 = vadd.f32 %v1517_v1, %v1469_v63 }
 0x51e   :  { %v1526_v3 = vadd.f32 %v2973_v0, %v1521_v2 }
 0x520   :  { %v1527_v4 = vmax.f32 %v1526_v3, 0.0 }
 0x522   :  { %1530 = vrot.lane.b32.xlu0 %v1527_v4, %s3006_s28 }
 0x523   :  { %v1519_v6 = vpop.f32.mrf.mxu2 }
 0x594   :  { %v1531_v12 = vpop.permute.xlu0 %1530 }
 0x595   :  { %1533 = vst.msk [vmem:[#allocation2 + $0x1] sm:$0xf] %vm90_vm1, %v1531_v12  ;;  %v2974_v12 = vld [vmem:[%s3544_s11] ss:$0 sm:$0xff] }
 0x59c   :  { %v1688_v13 = vld [vmem:[#allocation2 + $0x1] sm:$0xf] }
 0x59d   :  { %v1534_v14 = vld [vmem:[#allocation2] sm:$0xf]  ;;  %v1689_v15 = vpack.c.bf16 %v1688_v13, %v1688_v13 }
 0x59e   :  { %v1535_v16 = vpack.c.bf16 %v1534_v14, %v1534_v14  ;;  %v1845_v17 = vld [vmem:[#allocation2 + $0x2] sm:$0xf] }
 0x59f   :  { %1750 = vrot.lane.b32.xlu2 %v1689_v15, %s3004_s30  ;;  %2734 = vmatmul.msk.bf16.vlgmr.msrb.gmra.mxu2 %vm138_vm2, %v1689_v15  ;;  %v3510_v18 = vpack.c.bf16 %v1845_v17, %v1845_v17 }
 0x5a0   :  { %1645 = vrot.lane.b32.xlu0 %v1535_v16, %s3007_s27  ;;  %1554 = vrot.lane.b32.xlu1 %v1535_v16, %s3004_s30 }
 0x5a1   :  { %2700 = vmatmul.msk.bf16.vlgmr.msrb.gmra.mxu0 %vm138_vm2, %v1535_v16 }
 0x5a7   :  { %1802 = vrot.lane.b32.xlu2 %v1689_v15, %s3007_s27 }
 0x5a8   :  { %1959 = vrot.lane.b32.xlu0 %v3510_v18, %s3007_s27  ;;  %1907 = vrot.lane.b32.xlu1 %v3510_v18, %s3004_s30 }
 0x5f9   :  { %v1751_v38 = vpop.permute.xlu2 %1750 }
 0x601   :  { %v1803_v43 = vpop.permute.xlu2 %1802 }
 0x602   :  { %2768 = vmatmul.msk.bf16.vlgmr.msra.gmra.mxu0 %vm138_vm2, %v1803_v43 }
 0x612   :  { %v1646_v45 = vpop.permute.xlu0 %1645  ;;  %v1555_v46 = vpop.permute.xlu1 %1554 }
 0x613   :  { %2683 = vmatmul.msk.bf16.vlgmr.msra.gmra.mxu3 %vm138_vm2, %v1555_v46  ;;  %2717 = vmatmul.msk.bf16.vlgmr.msrb.gmra.mxu1 %vm138_vm2, %v1646_v45 }
 0x614   :  { %1992 = vmatpush.bf16.msra.mxu3 %v2963_v44 }
 0x618   :  { %1993 = vmatpush.bf16.msra.mxu3 %v2962_v47 }
 0x61a   :  { %v1908_v49 = vpop.permute.xlu1 %1907  ;;  %v1960_v21 = vpop.permute.xlu0 %1959 }
 0x61b   :  { %2802 = vmatmul.msk.bf16.vlgmr.msra.gmra.mxu2 %vm138_vm2, %v1908_v49 }
 0x61c   :  { %1994 = vmatpush.bf16.msra.mxu3 %v2961_v48 }
 0x61e   :  { %v1632_v51 = vpop.f32.mrf.mxu0 }
 0x620   :  { %1995 = vmatpush.bf16.msra.mxu3 %v2960_v50 }
 0x622   :  { %v1735_v52 = vpop.f32.mrf.mxu2 }
 0x623   :  { %2751 = vmatmul.msk.bf16.vlgmr.msrb.gmra.mxu3 %vm138_vm2, %v1751_v38  ;;  %2785 = vmatmul.msk.bf16.vlgmr.msra.gmra.mxu1 %vm138_vm2, %v3510_v18 }
 0x626   :  { %v1634_v55 = vpop.f32.mrf.mxu0 }
 0x62a   :  { %v1737_v56 = vpop.f32.mrf.mxu2 }
 0x633   :  { %2819 = vmatmul.msk.bf16.vlgmr.msra.gmra.mxu3 %vm138_vm2, %v1960_v21 }
 0x67f   :  { %v1840_v57 = vpop.f32.mrf.mxu0 }
 0x687   :  { %v1842_v58 = vpop.f32.mrf.mxu0 }
 0x690   :  { %v1683_v59 = vpop.f32.mrf.mxu1 }
 0x696   :  { %v1592_v60 = vpop.f32.mrf.mxu3 }
 0x697   :  { %v1633_v0 = vadd.f32 %v1632_v51, %v1592_v60 }
 0x698   :  { %v1685_v61 = vpop.f32.mrf.mxu1 }
 0x699   :  { %v1687_v2 = vadd.f32 %v1683_v59, %v1633_v0 }
 0x69b   :  { %v1739_v6 = vadd.f32 %v1735_v52, %v1687_v2 }
 0x69e   :  { %v1594_v62 = vpop.f32.mrf.mxu3  ;;  %v1945_v63 = vpop.f32.mrf.mxu2 }
 0x6a0   :  { %v1892_v1 = vpop.f32.mrf.mxu1 }
 0x6a6   :  { %v1788_v3 = vpop.f32.mrf.mxu3  ;;  %v1947_v4 = vpop.f32.mrf.mxu2 }
 0x6a7   :  { %v1792_v5 = vadd.f32 %v1788_v3, %v1739_v6 }
 0x6a8   :  { %v1894_v7 = vpop.f32.mrf.mxu1 }
 0x6a9   :  { %v1844_v8 = vadd.f32 %v1840_v57, %v1792_v5 }
 0x6ab   :  { %v1896_v10 = vadd.f32 %v1892_v1, %v1844_v8 }
 0x6ad   :  { %v1949_v11 = vadd.f32 %v1945_v63, %v1896_v10 }
 0x6ae   :  { %v1790_v9 = vpop.f32.mrf.mxu3 }
 0x6b6   :  { %v1997_v13 = vpop.f32.mrf.mxu3 }
 0x6b7   :  { %v2001_v14 = vadd.f32 %v1997_v13, %v1949_v11 }
 0x6b9   :  { %v2006_v15 = vadd.f32 %v2974_v12, %v2001_v14 }
 0x6bb   :  { %v2007_v16 = vadd.f32 %v2006_v15, %v1047_v54 }
 0x6bd   :  { %v2008_v17 = vmax.f32 %v2007_v16, 0.0 }
 0x6be   :  { %v1999_v18 = vpop.f32.mrf.mxu3 }
 0x6bf   :  { %2010 = vst.msk [vmem:[%s3545_s12] sm:$0xf] %vm2009_vm3, %v2008_v17 }
 0x6c0   :  { %2015 = vsyncpa [#allocation4], 1 }

// kernel: _lambda_.8
= control target key start
LH: loop header
LB: loop body
LE: loop exit
PB: predicated region body
PF: predicated region fallthrough
CT: control target
= control target key end

     0   :  { %19 = vsyncpa [#allocation4], 0  ;;  %s2936_s0 = inlined_call_operand.vmem [shape: f32[2,64], index: 0, kind: input, shape index: {}]   ;;  %s2937_s1 = inlined_call_operand.vmem [shape: f32[2,64], index: 1, kind: input, shape index: {}]   ;;  %s2938_s2 = inlined_call_operand.vmem [shape: f32[2,64], index: 2, kind: input, shape index: {}]   ;;  %s2939_s3 = inlined_call_operand.vmem [shape: f32[2,64], index: 3, kind: input, shape index: {}]   ;;  %s2940_s4 = inlined_call_operand.hbm [shape: bf16[9,32,64], index: 4, kind: input, shape index: {}]   ;;  %s2941_s5 = inlined_call_operand.vmem [shape: f32[1,64], index: 5, kind: input, shape index: {}]   ;;  %s2942_s6 = inlined_call_operand.hbm [shape: bf16[9,64,64], index: 6, kind: input, shape index: {}]   ;;  %s2943_s7 = inlined_call_operand.vmem [shape: f32[1,64], index: 7, kind: input, shape index: {}]   ;;  %s2944_s8 = inlined_call_operand.vmem [shape: bf16[32,64], index: 8, kind: input, shape index: {}]   ;;  %s2945_s9 = inlined_call_operand.vmem [shape: f32[1,64], index: 9, kind: input, shape index: {}]   ;;  %s2946_s10 = inlined_call_operand.hbm [shape: bf16[9,64,64], index: 10, kind: input, shape index: {}]   ;;  %s2947_s11 = inlined_call_operand.vmem [shape: f32[1,64], index: 11, kind: input, shape index: {}]   ;;  %s2948_s12 = inlined_call_operand.hbm [shape: bf16[9,64,64], index: 12, kind: input, shape index: {}]   ;;  %s2949_s13 = inlined_call_operand.vmem [shape: f32[1,64], index: 13, kind: input, shape index: {}]   ;;  %s2950_s14 = inlined_call_operand.vmem [shape: f32[1,64], index: 14, kind: output, shape index: {}]  }
   0x1   :  { %20 = vsyncpa [#allocation6], 0 }
   0x2   :  { %21 = vsyncpa [#allocation9], 0  ;;  %s49_s15 = sshll.u32 %s2942_s6, 4  ;;  %s2708_s16 = smov [#allocation5]   ;;  %s50_s15 = int_to_ptr.hbm [resolvable:$true] %s49_s15 }
   0x3   :  { %s51_s17 = sshll.u32 %s2708_s16, 4  ;;  %s34_s20 = sshll.u32 %s2940_s4, 4  ;;  %s52_s17 = int_to_ptr.vmem [resolvable:$true] %s51_s17  ;;  %s35_s20 = int_to_ptr.hbm [resolvable:$true] %s34_s20 }
   0x4   :  { %s2709_s21 = smov 64   ;;  %s2710_s22 = smov 4  }
   0x5   :  { %57 = dma.hbm_to_vmem [thread:$0]  %s50_s15, 4608, %s52_s17, [#allocation6], %s2709_s21, %s2709_s21, %s2710_s22  }
   0x6   :  { %s2711_s23 = smov [#allocation3]   ;;  %s68_s6 = sshll.u32 %s2946_s10, 4  ;;  %s69_s6 = int_to_ptr.hbm [resolvable:$true] %s68_s6 }
   0x7   :  { %s36_s24 = sshll.u32 %s2711_s23, 4  ;;  %s83_s4 = sshll.u32 %s2948_s12, 4  ;;  %s37_s24 = int_to_ptr.vmem [resolvable:$true] %s36_s24  ;;  %s84_s4 = int_to_ptr.hbm [resolvable:$true] %s83_s4 }
   0x8   :  { %42 = dma.hbm_to_vmem [thread:$0]  %s35_s20, 2304, %s37_s24, [#allocation4], %s2709_s21, %s2709_s21, %s2710_s22  }
   0x9   :  { %s2712_s29 = smov [#allocation7]   ;;  %s2713_s15 = smov [#allocation8]  }
   0xa   :  { %s70_s30 = sshll.u32 %s2712_s29, 4  ;;  %s85_s16 = sshll.u32 %s2713_s15, 4  ;;  %s71_s30 = int_to_ptr.vmem [resolvable:$true] %s70_s30  ;;  %s86_s16 = int_to_ptr.vmem [resolvable:$true] %s85_s16 }
   0xb   :  { %76 = dma.hbm_to_vmem [thread:$0]  %s69_s6, 4608, %s71_s30, [#allocation6], %s2709_s21, %s2709_s21, %s2710_s22  }
   0xc   :  { %91 = dma.hbm_to_vmem [thread:$0]  %s84_s4, 4608, %s86_s16, [#allocation9], %s2709_s21, %s2709_s21, %s2710_s22  }
   0xd   :  { %2702 = dma.done.wait [#allocation4], 2304  }
   0xe   :  { %2703 = vsyncadd [#allocation4], 4294964992 }
   0xf   :  { %2704 = dma.done.wait [#allocation6], 9216  }
  0x10   :  { %2705 = vsyncadd [#allocation6], 4294958080 }
  0x11   :  { %2706 = dma.done.wait [#allocation9], 4608  }
  0x12   :  { %2707 = vsyncadd [#allocation9], 4294962688  ;;  %v111_v0 = vld [vmem:[%s2936_s0] sm:$0x1]  ;;  %v327_v1 = vld [vmem:[%s2936_s0 + $0x1] sm:$0x1] }
  0x13   :  { %v112_v2 = vpack.c.bf16 %v111_v0, %v111_v0  ;;  %v328_v3 = vpack.c.bf16 %v327_v1, %v327_v1  ;;  %v2473_v4 = vld [vmem:[#allocation3 + $0x18] sm:$0xff]  ;;  %v2471_v5 = vld [vmem:[#allocation3 + $0x8] sm:$0xff]  ;;  %s2714_s19 = smov 96   ;;  %v2472_v9 = vld [vmem:[#allocation3 + $0x10] sm:$0xff]  ;;  %vm136_vm0 = vcmask 261120   ;;  %vm439_vm1 = vcmask 1042432  }
  0x14   :  { %v2477_v6 = vld [vmem:[#allocation3 + $0x38] sm:$0xff]  ;;  %v2475_v8 = vld [vmem:[#allocation3 + $0x28] sm:$0xff]  ;;  %146 = vmatpush.bf16.msra.mxu0 %v2473_v4  ;;  %174 = vmatpush.bf16.msra.mxu1 %v2471_v5  ;;  %v2470_v11 = vld [vmem:[#allocation3] sm:$0xff]  ;;  %vm440_vm2 = vcmask 522244   ;;  %v2715_v49 = vmov 0.0   ;;  %vm495_vm4 = vcmask 523264  }
  0x15   :  { %187 = vrot.lane.b32.xlu0 %v112_v2, %s2714_s19  ;;  %v218_v7 = vld [vmem:[%s2938_s2] sm:$0x1]  ;;  %405 = vrot.lane.b32.xlu1 %v328_v3, %s2714_s19  ;;  %v2476_v12 = vld [vmem:[#allocation3 + $0x30] sm:$0xff]  ;;  %v2479_v13 = vld [vmem:[#allocation3 + $0x48] sm:$0xff]  ;;  %vm447_vm5 = vcmask 1040896   ;;  %vm1912_vm6 = vcmask 516096  }
  0x16   :  { %v117_v10 = vld [vmem:[%s2937_s1] sm:$0x1]  ;;  %246 = vmatpush.bf16.msra.mxu3 %v2477_v6  ;;  %210 = vmatpush.bf16.msra.mxu2 %v2475_v8  ;;  %v2474_v14 = vld [vmem:[#allocation3 + $0x20] sm:$0xff]  ;;  %v219_v15 = vpack.c.bf16 %v218_v7, %v218_v7  ;;  %v2483_v19 = vld [vmem:[#allocation3 + $0x68] sm:$0xff] }
  0x17   :  { %v118_v16 = vpack.c.bf16 %v117_v10, %v117_v10  ;;  %v2478_v17 = vld [vmem:[#allocation3 + $0x40] sm:$0xff]  ;;  %v254_v18 = vld [vmem:[%s2939_s3] sm:$0x1]  ;;  %v2487_v24 = vld [vmem:[#allocation3 + $0x88] sm:$0xff] }
  0x18   :  { %147 = vmatpush.bf16.msra.mxu0 %v2472_v9  ;;  %175 = vmatpush.bf16.msra.mxu1 %v2470_v11  ;;  %v255_v20 = vpack.c.bf16 %v254_v18, %v254_v18  ;;  %v2485_v21 = vld [vmem:[#allocation3 + $0x78] sm:$0xff]  ;;  %v2482_v23 = vld [vmem:[#allocation3 + $0x60] sm:$0xff]  ;;  %v2484_v25 = vld [vmem:[#allocation3 + $0x70] sm:$0xff] }
  0x19   :  { %v2481_v22 = vld [vmem:[#allocation3 + $0x58] sm:$0xff]  ;;  %v2480_v26 = vld [vmem:[#allocation3 + $0x50] sm:$0xff]  ;;  %v2486_v29 = vld [vmem:[#allocation3 + $0x80] sm:$0xff] }
  0x1a   :  { %247 = vmatpush.bf16.msra.mxu3 %v2476_v12  ;;  %211 = vmatpush.bf16.msra.mxu2 %v2474_v14  ;;  %v363_v27 = vld [vmem:[%s2937_s1 + $0x1] sm:$0x1]  ;;  %v2491_v45 = vld [vmem:[#allocation5 + $0x18] sm:$0xff]  ;;  %vm2838_vm3 = vmor %vm440_vm2, %vm439_vm1 }
  0x1b   :  { %1929 = vmatmul.msk.bf16.vlgmr.msra.gmra.mxu0 %vm136_vm0, %v118_v16  ;;  %1938 = vmatmul.msk.bf16.vlgmr.msra.gmra.mxu1 %vm136_vm0, %v112_v2  ;;  %v364_v28 = vpack.c.bf16 %v363_v27, %v363_v27  ;;  %v2499_v46 = vld [vmem:[#allocation5 + $0x58] sm:$0xff]  ;;  %442 = vst.msk [vmem:[#allocation2] sm:$0x77] %vm2838_vm3, %v2715_v49  ;;  %v2490_v50 = vld [vmem:[#allocation5 + $0x10] sm:$0xff]  ;;  %v2489_v56 = vld [vmem:[#allocation5 + $0x8] sm:$0xff] }
  0x1c   :  { %282 = vmatpush.bf16.msrb.mxu0 %v2479_v13  ;;  %319 = vmatpush.bf16.msrb.mxu1 %v2481_v22  ;;  %v2495_v48 = vld [vmem:[#allocation5 + $0x38] sm:$0xff]  ;;  %v2498_v51 = vld [vmem:[#allocation5 + $0x50] sm:$0xff]  ;;  %v2497_v57 = vld [vmem:[#allocation5 + $0x48] sm:$0xff] }
  0x1d   :  { %296 = vrot.lane.b32.xlu0 %v219_v15, %s2714_s19  ;;  %1956 = vmatmul.msk.bf16.vlgmr.msra.gmra.mxu3 %vm136_vm0, %v219_v15  ;;  %v2494_v52 = vld [vmem:[#allocation5 + $0x30] sm:$0xff]  ;;  %v2503_v53 = vld [vmem:[#allocation5 + $0x78] sm:$0xff]  ;;  %v2493_v60 = vld [vmem:[#allocation5 + $0x28] sm:$0xff] }
  0x1e   :  { %355 = vmatpush.bf16.msrb.mxu2 %v2483_v19  ;;  %391 = vmatpush.bf16.msrb.mxu3 %v2485_v21  ;;  %v2502_v55 = vld [vmem:[#allocation5 + $0x70] sm:$0xff]  ;;  %v2488_v2 = vld [vmem:[#allocation5] sm:$0xff]  ;;  %v436_v12 = vld [vmem:[%s2941_s5] sm:$0x1] }
  0x1f   :  { %v2492_v19 = vld [vmem:[#allocation5 + $0x20] sm:$0xff]  ;;  %v2514_v27 = vld [vmem:[#allocation5 + $0xd0] sm:$0xff] }
  0x20   :  { %283 = vmatpush.bf16.msrb.mxu0 %v2478_v17  ;;  %320 = vmatpush.bf16.msrb.mxu1 %v2480_v26  ;;  %v2500_v22 = vld [vmem:[#allocation5 + $0x60] sm:$0xff]  ;;  %v2510_v26 = vld [vmem:[#allocation5 + $0xb0] sm:$0xff] }
  0x22   :  { %356 = vmatpush.bf16.msrb.mxu2 %v2482_v23  ;;  %392 = vmatpush.bf16.msrb.mxu3 %v2484_v25  ;;  %v449_v62 = vld [vmem:[#allocation2] sm:$0x1]  ;;  %v761_v63 = vld [vmem:[#allocation2 + $0x2] sm:$0x1]  ;;  %v552_v17 = vld [vmem:[#allocation2 + $0x4] sm:$0x1] }
  0x23   :  { %v450_v0 = vpack.c.bf16 %v449_v62, %v449_v62  ;;  %v2845_v1 = vpack.c.bf16 %v761_v63, %v761_v63  ;;  %v553_v18 = vpack.c.bf16 %v552_v17, %v552_v17  ;;  %v2511_v23 = vld [vmem:[#allocation5 + $0xb8] sm:$0xff] }
  0x24   :  { %428 = vmatpush.bf16.msra.mxu0 %v2487_v24  ;;  %503 = vmatpush.bf16.msra.mxu1 %v2495_v48  ;;  %v2515_v24 = vld [vmem:[#allocation5 + $0xd8] sm:$0xff]  ;;  %v918_v48 = vld [vmem:[%s2939_s3] sm:$0x1] }
  0x25   :  { %469 = vrot.lane.b32.xlu2 %v450_v0, %s2709_s21  ;;  %823 = vrot.lane.b32.xlu0 %v2845_v1, %s2709_s21  ;;  %v2507_v25 = vld [vmem:[#allocation5 + $0x98] sm:$0xff] }
  0x26   :  { %594 = vmatpush.bf16.msra.mxu3 %v2499_v46  ;;  %v2516_v46 = vld [vmem:[#allocation5 + $0xe0] sm:$0xff]  ;;  %v2529_v17 = vld [vmem:[#allocation7 + $0x18] sm:$0xff] }
  0x28   :  { %429 = vmatpush.bf16.msra.mxu0 %v2486_v29  ;;  %504 = vmatpush.bf16.msra.mxu1 %v2494_v52  ;;  %v2519_v29 = vld [vmem:[#allocation5 + $0xf8] sm:$0xff]  ;;  %v866_v52 = vld [vmem:[#allocation2 + $0x6] sm:$0x1] }
  0x2a   :  { %595 = vmatpush.bf16.msra.mxu3 %v2498_v51  ;;  %v919_v51 = vpack.c.bf16 %v918_v48, %v918_v48 }
  0x2b   :  { %1965 = vmatmul.msk.bf16.vlgmr.msrb.gmra.mxu0 %vm136_vm0, %v255_v20  ;;  %v2501_v20 = vld [vmem:[#allocation5 + $0x68] sm:$0xff] }
  0x2c   :  { %646 = vmatpush.bf16.msrb.mxu0 %v2503_v53  ;;  %505 = vmatpush.bf16.msra.mxu1 %v2493_v60 }
  0x2d   :  { %1992 = vmatmul.msk.bf16.vlgmr.msrb.gmra.mxu3 %vm136_vm0, %v364_v28  ;;  %v2506_v28 = vld [vmem:[#allocation5 + $0x90] sm:$0xff] }
  0x2e   :  { %596 = vmatpush.bf16.msra.mxu3 %v2497_v57 }
  0x30   :  { %647 = vmatpush.bf16.msrb.mxu0 %v2502_v55  ;;  %506 = vmatpush.bf16.msra.mxu1 %v2492_v19  ;;  %v2520_v55 = vld [vmem:[#allocation5 + $0x100] sm:$0xff]  ;;  %v2537_v19 = vld [vmem:[#allocation7 + $0x58] sm:$0xff] }
  0x34   :  { %648 = vmatpush.bf16.msrb.mxu0 %v2501_v20  ;;  %v2540_v20 = vld [vmem:[#allocation7 + $0x70] sm:$0xff] }
  0x38   :  { %649 = vmatpush.bf16.msrb.mxu0 %v2500_v22 }
  0x7f   :  { %v470_v21 = vpop.permute.xlu2 %469 }
  0x87   :  { %v188_v30 = vpop.permute.xlu0 %187  ;;  %v406_v31 = vpop.permute.xlu1 %405 }
  0x88   :  { %1947 = vmatmul.msk.bf16.vlgmr.msra.gmra.mxu2 %vm136_vm0, %v188_v30  ;;  %2001 = vmatmul.msk.bf16.vlgmr.msra.gmra.mxu0 %vm136_vm0, %v406_v31  ;;  %v2518_v30 = vld [vmem:[#allocation5 + $0xf0] sm:$0xff]  ;;  %v2509_v31 = vld [vmem:[#allocation5 + $0xa8] sm:$0xff] }
  0x89   :  { %543 = vmatpush.bf16.msra.mxu2 %v2491_v45  ;;  %856 = vmatpush.bf16.msra.mxu0 %v2519_v29  ;;  %v2524_v45 = vld [vmem:[%s2944_s8] sm:$0xff] }
  0x8d   :  { %544 = vmatpush.bf16.msra.mxu2 %v2490_v50  ;;  %857 = vmatpush.bf16.msra.mxu0 %v2518_v30  ;;  %v2522_v50 = vld [vmem:[#allocation5 + $0x110] sm:$0xff]  ;;  %v953_v30 = vld [vmem:[%s2943_s7] sm:$0x1] }
  0x8f   :  { %v297_v32 = vpop.permute.xlu0 %296 }
  0x90   :  { %1974 = vmatmul.msk.bf16.vlgmr.msrb.gmra.mxu1 %vm136_vm0, %v297_v32  ;;  %v2513_v32 = vld [vmem:[#allocation5 + $0xc8] sm:$0xff] }
  0x91   :  { %545 = vmatpush.bf16.msra.mxu2 %v2489_v56  ;;  %699 = vmatpush.bf16.msrb.mxu1 %v2507_v25 }
  0x95   :  { %546 = vmatpush.bf16.msra.mxu2 %v2488_v2  ;;  %700 = vmatpush.bf16.msrb.mxu1 %v2506_v28 }
  0x97   :  { %v824_v53 = vpop.permute.xlu0 %823 }
  0x98   :  { %1983 = vmatmul.msk.bf16.vlgmr.msrb.gmra.mxu2 %vm136_vm0, %v328_v3  ;;  %v149_v33 = vpop.f32.mrf.mxu0  ;;  %v177_v34 = vpop.f32.mrf.mxu1  ;;  %v2496_v3 = vld [vmem:[#allocation5 + $0x40] sm:$0xff] }
  0x99   :  { %v178_v35 = vadd.f32 %v177_v34, %v149_v33  ;;  %597 = vmatpush.bf16.msra.mxu3 %v2496_v3  ;;  %751 = vmatpush.bf16.msrb.mxu2 %v2511_v23  ;;  %v2505_v33 = vld [vmem:[#allocation5 + $0x88] sm:$0xff] }
  0x9a   :  { %v2517_v34 = vld [vmem:[#allocation5 + $0xe8] sm:$0xff]  ;;  %701 = vmatpush.bf16.msrb.mxu1 %v2505_v33 }
  0x9b   :  { %858 = vmatpush.bf16.msra.mxu0 %v2517_v34 }
  0x9c   :  { %2052 = vmatmul.msk.bf16.vlgmr.msra.gmra.mxu3 %vm495_vm4, %v553_v18  ;;  %v2532_v18 = vld [vmem:[#allocation7 + $0x30] sm:$0xff] }
  0x9d   :  { %803 = vmatpush.bf16.msrb.mxu3 %v2515_v24  ;;  %752 = vmatpush.bf16.msrb.mxu2 %v2510_v26 }
  0x9f   :  { %859 = vmatpush.bf16.msra.mxu0 %v2516_v46  ;;  %v2534_v46 = vld [vmem:[#allocation7 + $0x40] sm:$0xff] }
  0xa0   :  { %v249_v36 = vpop.f32.mrf.mxu3  ;;  %v151_v37 = vpop.f32.mrf.mxu0  ;;  %2018 = vmatmul.msk.bf16.vlgmr.msra.gmra.mxu1 %vm495_vm4, %v470_v21  ;;  %v2531_v21 = vld [vmem:[#allocation7 + $0x28] sm:$0xff] }
  0xa1   :  { %v179_v38 = vpop.f32.mrf.mxu1  ;;  %804 = vmatpush.bf16.msrb.mxu3 %v2514_v27  ;;  %753 = vmatpush.bf16.msrb.mxu2 %v2509_v31  ;;  %v2512_v37 = vld [vmem:[#allocation5 + $0xc0] sm:$0xff]  ;;  %v924_v27 = vld [vmem:[%s2945_s9] sm:$0x1] }
  0xa2   :  { %v2504_v38 = vld [vmem:[#allocation5 + $0x80] sm:$0xff] }
  0xa3   :  { %702 = vmatpush.bf16.msrb.mxu1 %v2504_v38  ;;  %v2530_v38 = vld [vmem:[#allocation7 + $0x20] sm:$0xff] }
  0xa5   :  { %805 = vmatpush.bf16.msrb.mxu3 %v2513_v32 }
  0xa8   :  { %v251_v39 = vpop.f32.mrf.mxu3  ;;  %v285_v40 = vpop.f32.mrf.mxu0  ;;  %2035 = vmatmul.msk.bf16.vlgmr.msra.gmra.mxu2 %vm495_vm4, %v450_v0 }
  0xa9   :  { %v2525_v39 = vld [vmem:[%s2944_s8 + $0x8] sm:$0xff]  ;;  %806 = vmatpush.bf16.msrb.mxu3 %v2512_v37 }
  0xaa   :  { %v2528_v37 = vld [vmem:[#allocation7 + $0x10] sm:$0xff] }
  0xac   :  { %2120 = vmatmul.msk.bf16.vlgmr.msrb.gmra.mxu3 %vm495_vm4, %v2845_v1  ;;  %v867_v1 = vpack.c.bf16 %v866_v52, %v866_v52 }
  0xb0   :  { %v287_v41 = vpop.f32.mrf.mxu0  ;;  %v394_v42 = vpop.f32.mrf.mxu3 }
  0xb8   :  { %v396_v43 = vpop.f32.mrf.mxu3 }
 0x105   :  { %v431_v44 = vpop.f32.mrf.mxu0 }
 0x10b   :  { %v213_v54 = vpop.f32.mrf.mxu2 }
 0x10c   :  { %v217_v61 = vadd.f32 %v213_v54, %v178_v35  ;;  %v2508_v35 = vld [vmem:[#allocation5 + $0xa0] sm:$0xff]  ;;  %v2521_v54 = vld [vmem:[#allocation5 + $0x108] sm:$0xff] }
 0x10d   :  { %v322_v58 = vpop.f32.mrf.mxu1  ;;  %v433_v59 = vpop.f32.mrf.mxu0  ;;  %754 = vmatpush.bf16.msrb.mxu2 %v2508_v35 }
 0x10e   :  { %v253_v4 = vadd.f32 %v249_v36, %v217_v61  ;;  %v709_v36 = vld [vmem:[#allocation2 + $0x5] sm:$0x1] }
 0x110   :  { %v289_v7 = vadd.f32 %v285_v40, %v253_v4  ;;  %v710_v40 = vpack.c.bf16 %v709_v36, %v709_v36 }
 0x111   :  { %946 = vmatpush.bf16.msra.mxu2 %v2525_v39  ;;  %v2536_v39 = vld [vmem:[#allocation7 + $0x50] sm:$0xff] }
 0x112   :  { %v326_v8 = vadd.f32 %v322_v58, %v289_v7  ;;  %2103 = vmatmul.msk.bf16.vlgmr.msrb.gmra.mxu2 %vm495_vm4, %v710_v40  ;;  %v2539_v40 = vld [vmem:[#allocation7 + $0x68] sm:$0xff] }
 0x113   :  { %v215_v5 = vpop.f32.mrf.mxu2 }
 0x115   :  { %v324_v6 = vpop.f32.mrf.mxu1  ;;  %947 = vmatpush.bf16.msra.mxu2 %v2524_v45  ;;  %v2526_v45 = vld [vmem:[#allocation7] sm:$0xff] }
 0x11b   :  { %v358_v9 = vpop.f32.mrf.mxu2 }
 0x11c   :  { %v362_v10 = vadd.f32 %v358_v9, %v326_v8 }
 0x11d   :  { %v508_v56 = vpop.f32.mrf.mxu1 }
 0x11e   :  { %v398_v11 = vadd.f32 %v394_v42, %v362_v10 }
 0x11f   :  { %v599_v60 = vpop.f32.mrf.mxu3 }
 0x120   :  { %v435_v13 = vadd.f32 %v431_v44, %v398_v11  ;;  %v2523_v44 = vld [vmem:[#allocation5 + $0x118] sm:$0xff] }
 0x121   :  { %908 = vmatpush.bf16.msra.mxu1 %v2523_v44  ;;  %v2538_v44 = vld [vmem:[#allocation7 + $0x60] sm:$0xff] }
 0x122   :  { %v437_v14 = vadd.f32 %v436_v12, %v435_v13  ;;  %2163 = vmatmul.msk.bf16.vlgmr.msra.gmra.mxu2 %vm136_vm0, %v919_v51  ;;  %v2545_v51 = vld [vmem:[#allocation7 + $0x98] sm:$0xff] }
 0x123   :  { %v360_v15 = vpop.f32.mrf.mxu2 }
 0x124   :  { %v438_v16 = vmax.f32 %v437_v14, 0.0  ;;  %v2533_v14 = vld [vmem:[#allocation7 + $0x38] sm:$0xff] }
 0x125   :  { %909 = vmatpush.bf16.msra.mxu1 %v2522_v50  ;;  %v510_v62 = vpop.f32.mrf.mxu1  ;;  %1016 = vmatpush.bf16.msra.mxu3 %v2533_v14  ;;  %v2558_v14 = vld [vmem:[#allocation7 + $0x100] sm:$0xff] }
 0x126   :  { %444 = vrot.lane.b32.xlu1 %v438_v16, %s2709_s21  ;;  %v2541_v16 = vld [vmem:[#allocation7 + $0x78] sm:$0xff]  ;;  %v2555_v62 = vld [vmem:[#allocation7 + $0xe8] sm:$0xff] }
 0x127   :  { %v601_v0 = vpop.f32.mrf.mxu3  ;;  %1159 = vmatpush.bf16.msrb.mxu2 %v2541_v16 }
 0x129   :  { %910 = vmatpush.bf16.msra.mxu1 %v2521_v54  ;;  %1017 = vmatpush.bf16.msra.mxu3 %v2532_v18  ;;  %v2557_v54 = vld [vmem:[#allocation7 + $0xf8] sm:$0xff] }
 0x12b   :  { %v548_v57 = vpop.f32.mrf.mxu2  ;;  %1160 = vmatpush.bf16.msrb.mxu2 %v2540_v20 }
 0x12c   :  { %v549_v59 = vadd.f32 %v548_v57, %v508_v56  ;;  %v2549_v56 = vld [vmem:[#allocation7 + $0xb8] sm:$0xff] }
 0x12d   :  { %911 = vmatpush.bf16.msra.mxu1 %v2520_v55  ;;  %1018 = vmatpush.bf16.msra.mxu3 %v2531_v21  ;;  %v2544_v55 = vld [vmem:[#allocation7 + $0x90] sm:$0xff]  ;;  %v2553_v57 = vld [vmem:[#allocation7 + $0xd8] sm:$0xff] }
 0x12e   :  { %v603_v61 = vadd.f32 %v599_v60, %v549_v59  ;;  %v2548_v59 = vld [vmem:[#allocation7 + $0xb0] sm:$0xff] }
 0x12f   :  { %v808_v7 = vpop.f32.mrf.mxu3  ;;  %1161 = vmatpush.bf16.msrb.mxu2 %v2539_v40  ;;  %v2552_v60 = vld [vmem:[#allocation7 + $0xd0] sm:$0xff]  ;;  %v2565_v40 = vld [vmem:[#allocation8 + $0x18] sm:$0xff] }
 0x131   :  { %1019 = vmatpush.bf16.msra.mxu3 %v2530_v38  ;;  %v2577_v38 = vld [vmem:[#allocation8 + $0x78] sm:$0xff] }
 0x133   :  { %v550_v63 = vpop.f32.mrf.mxu2  ;;  %1162 = vmatpush.bf16.msrb.mxu2 %v2538_v44 }
 0x134   :  { %v2542_v63 = vld [vmem:[#allocation7 + $0x80] sm:$0xff] }
 0x135   :  { %1212 = vmatpush.bf16.msrb.mxu3 %v2545_v51 }
 0x137   :  { %v810_v10 = vpop.f32.mrf.mxu3  ;;  %1369 = vmatpush.bf16.msra.mxu2 %v2557_v54 }
 0x138   :  { %v2550_v10 = vld [vmem:[#allocation7 + $0xc0] sm:$0xff] }
 0x139   :  { %1213 = vmatpush.bf16.msrb.mxu3 %v2544_v55 }
 0x195   :  { %v756_v2 = vpop.f32.mrf.mxu2 }
 0x198   :  { %v445_v41 = vpop.permute.xlu1 %444 }
 0x199   :  { %448 = vst.msk [vmem:[#allocation2 + $0x1] sm:$0x1] %vm447_vm5, %v445_v41  ;;  %v2527_v41 = vld [vmem:[#allocation7 + $0x8] sm:$0xff] }
 0x19d   :  { %v758_v3 = vpop.f32.mrf.mxu2 }
 0x19e   :  { %v2561_v3 = vld [vmem:[#allocation7 + $0x118] sm:$0xff] }
 0x1a0   :  { %v604_v42 = vld [vmem:[#allocation2 + $0x1] sm:$0x1] }
 0x1a1   :  { %v605_v43 = vpack.c.bf16 %v604_v42, %v604_v42  ;;  %957 = vst.msk [vmem:[#allocation2] sm:$0x77] %vm2838_vm3, %v2715_v49 }
 0x1a3   :  { %666 = vrot.lane.b32.xlu2 %v605_v43, %s2709_s21  ;;  %2069 = vmatmul.msk.bf16.vlgmr.msrb.gmra.mxu0 %vm495_vm4, %v605_v43  ;;  %v2535_v43 = vld [vmem:[#allocation7 + $0x48] sm:$0xff] }
 0x1a4   :  { %1056 = vmatpush.bf16.msrb.mxu0 %v2529_v17 }
 0x1a5   :  { %v949_v9 = vpop.f32.mrf.mxu2 }
 0x1a6   :  { %v950_v31 = vadd.f32 %v949_v9, %v924_v27 }
 0x1a8   :  { %v963_v13 = vld [vmem:[#allocation2] sm:$0x1]  ;;  %1057 = vmatpush.bf16.msrb.mxu0 %v2528_v37  ;;  %v1065_v48 = vld [vmem:[#allocation2 + $0x4] sm:$0x1]  ;;  %v1274_v50 = vld [vmem:[#allocation2 + $0x2] sm:$0x1] }
 0x1a9   :  { %v964_v15 = vpack.c.bf16 %v963_v13, %v963_v13  ;;  %v1066_v52 = vpack.c.bf16 %v1065_v48, %v1065_v48  ;;  %v1222_v9 = vld [vmem:[#allocation2 + $0x5] sm:$0x1]  ;;  %v1379_v18 = vld [vmem:[#allocation2 + $0x6] sm:$0x1]  ;;  %v2573_v37 = vld [vmem:[#allocation8 + $0x58] sm:$0xff] }
 0x1aa   :  { %v2559_v13 = vld [vmem:[#allocation7 + $0x108] sm:$0xff] }
 0x1ab   :  { %983 = vrot.lane.b32.xlu2 %v964_v15, %s2709_s21 }
 0x1ac   :  { %1058 = vmatpush.bf16.msrb.mxu0 %v2527_v41  ;;  %v2572_v41 = vld [vmem:[#allocation8 + $0x50] sm:$0xff] }
 0x1ad   :  { %v951_v12 = vpop.f32.mrf.mxu2 }
 0x1ae   :  { %v1223_v12 = vpack.c.bf16 %v1222_v9, %v1222_v9 }
 0x1b0   :  { %1059 = vmatpush.bf16.msrb.mxu0 %v2526_v45 }
 0x1b3   :  { %2137 = vmatmul.msk.bf16.vlgmr.msra.gmra.mxu0 %vm495_vm4, %v824_v53  ;;  %v1275_v53 = vpack.c.bf16 %v1274_v50, %v1274_v50 }
 0x1b4   :  { %1264 = vmatpush.bf16.msra.mxu0 %v2549_v56 }
 0x1b8   :  { %1265 = vmatpush.bf16.msra.mxu0 %v2548_v59  ;;  %v2571_v59 = vld [vmem:[#allocation8 + $0x48] sm:$0xff] }
 0x1c3   :  { %2197 = vmatmul.msk.bf16.vlgmr.msrb.gmra.mxu0 %vm495_vm4, %v964_v15 }
 0x1fd   :  { %v667_v58 = vpop.permute.xlu2 %666 }
 0x1fe   :  { %2086 = vmatmul.msk.bf16.vlgmr.msrb.gmra.mxu1 %vm495_vm4, %v667_v58  ;;  %v2556_v58 = vld [vmem:[#allocation7 + $0xf0] sm:$0xff] }
 0x1ff   :  { %1107 = vmatpush.bf16.msrb.mxu1 %v2537_v19  ;;  %1370 = vmatpush.bf16.msra.mxu2 %v2556_v58  ;;  %v2564_v58 = vld [vmem:[#allocation8 + $0x10] sm:$0xff] }
 0x203   :  { %1108 = vmatpush.bf16.msrb.mxu1 %v2536_v39  ;;  %1371 = vmatpush.bf16.msra.mxu2 %v2555_v62  ;;  %v2569_v39 = vld [vmem:[#allocation8 + $0x38] sm:$0xff]  ;;  %v2563_v62 = vld [vmem:[#allocation8 + $0x8] sm:$0xff] }
 0x205   :  { %v984_v42 = vpop.permute.xlu2 %983 }
 0x206   :  { %2180 = vmatmul.msk.bf16.vlgmr.msra.gmra.mxu3 %vm495_vm4, %v984_v42  ;;  %v2576_v42 = vld [vmem:[#allocation8 + $0x70] sm:$0xff] }
 0x207   :  { %1109 = vmatpush.bf16.msrb.mxu1 %v2535_v43 }
 0x20b   :  { %1110 = vmatpush.bf16.msrb.mxu1 %v2534_v46 }
 0x20e   :  { %2154 = vmatmul.msk.bf16.vlgmr.msra.gmra.mxu1 %vm495_vm4, %v867_v1 }
 0x20f   :  { %1316 = vmatpush.bf16.msra.mxu1 %v2553_v57  ;;  %v2568_v57 = vld [vmem:[#allocation8 + $0x30] sm:$0xff] }
 0x213   :  { %1317 = vmatpush.bf16.msra.mxu1 %v2552_v60  ;;  %v2575_v60 = vld [vmem:[#allocation8 + $0x68] sm:$0xff] }
 0x21e   :  { %2214 = vmatmul.msk.bf16.vlgmr.msrb.gmra.mxu1 %vm495_vm4, %v1066_v52  ;;  %v1431_v52 = vld [vmem:[%s2947_s11] sm:$0x1] }
 0x220   :  { %v651_v4 = vpop.f32.mrf.mxu0 }
 0x221   :  { %v655_v5 = vadd.f32 %v651_v4, %v603_v61  ;;  %v2543_v61 = vld [vmem:[#allocation7 + $0x88] sm:$0xff] }
 0x222   :  { %1214 = vmatpush.bf16.msrb.mxu3 %v2543_v61  ;;  %v2547_v4 = vld [vmem:[#allocation7 + $0xa8] sm:$0xff] }
 0x223   :  { %1266 = vmatpush.bf16.msra.mxu0 %v2547_v4  ;;  %v2567_v61 = vld [vmem:[#allocation8 + $0x28] sm:$0xff]  ;;  %v2562_v4 = vld [vmem:[#allocation8] sm:$0xff] }
 0x226   :  { %1215 = vmatpush.bf16.msrb.mxu3 %v2542_v63  ;;  %v2570_v63 = vld [vmem:[#allocation8 + $0x40] sm:$0xff] }
 0x228   :  { %v653_v6 = vpop.f32.mrf.mxu0 }
 0x229   :  { %v2554_v6 = vld [vmem:[#allocation7 + $0xe0] sm:$0xff] }
 0x22a   :  { %1421 = vmatpush.bf16.msra.mxu3 %v2561_v3  ;;  %1372 = vmatpush.bf16.msra.mxu2 %v2554_v6  ;;  %v2566_v3 = vld [vmem:[#allocation8 + $0x20] sm:$0xff]  ;;  %v2589_v6 = vld [vmem:[#allocation8 + $0xd8] sm:$0xff] }
 0x230   :  { %v861_v8 = vpop.f32.mrf.mxu0 }
 0x238   :  { %v863_v11 = vpop.f32.mrf.mxu0 }
 0x240   :  { %v1061_v16 = vpop.f32.mrf.mxu0 }
 0x27b   :  { %v704_v22 = vpop.f32.mrf.mxu1 }
 0x27c   :  { %v708_v23 = vadd.f32 %v704_v22, %v655_v5  ;;  %v2551_v5 = vld [vmem:[#allocation7 + $0xc8] sm:$0xff]  ;;  %v1063_v22 = vpop.f32.mrf.mxu0 }
 0x27d   :  { %1318 = vmatpush.bf16.msra.mxu1 %v2551_v5  ;;  %v2590_v22 = vld [vmem:[#allocation8 + $0xe0] sm:$0xff] }
 0x27e   :  { %v760_v24 = vadd.f32 %v756_v2, %v708_v23 }
 0x280   :  { %v812_v26 = vadd.f32 %v808_v7, %v760_v24  ;;  %v2560_v7 = vld [vmem:[#allocation7 + $0x110] sm:$0xff] }
 0x281   :  { %1422 = vmatpush.bf16.msra.mxu3 %v2560_v7  ;;  %1319 = vmatpush.bf16.msra.mxu1 %v2550_v10  ;;  %v2581_v7 = vld [vmem:[#allocation8 + $0x98] sm:$0xff] }
 0x282   :  { %v865_v28 = vadd.f32 %v861_v8, %v812_v26  ;;  %v2546_v8 = vld [vmem:[#allocation7 + $0xa0] sm:$0xff]  ;;  %v2593_v10 = vld [vmem:[#allocation8 + $0xf8] sm:$0xff] }
 0x283   :  { %v706_v25 = vpop.f32.mrf.mxu1  ;;  %1267 = vmatpush.bf16.msra.mxu0 %v2546_v8 }
 0x284   :  { %2282 = vmatmul.msk.bf16.vlgmr.msra.gmra.mxu1 %vm495_vm4, %v1275_v53  ;;  %v1380_v25 = vpack.c.bf16 %v1379_v18, %v1379_v18  ;;  %v2591_v18 = vld [vmem:[#allocation8 + $0xe8] sm:$0xff] }
 0x285   :  { %1423 = vmatpush.bf16.msra.mxu3 %v2559_v13  ;;  %1533 = vmatpush.bf16.msrb.mxu1 %v2565_v40  ;;  %v2580_v13 = vld [vmem:[#allocation8 + $0x90] sm:$0xff] }
 0x286   :  { %2265 = vmatmul.msk.bf16.vlgmr.msra.gmra.mxu0 %vm495_vm4, %v1223_v12  ;;  %v2588_v12 = vld [vmem:[#allocation8 + $0xd0] sm:$0xff] }
 0x287   :  { %1493 = vmatpush.bf16.msrb.mxu0 %v2569_v39 }
 0x289   :  { %v1021_v15 = vpop.f32.mrf.mxu3  ;;  %1424 = vmatpush.bf16.msra.mxu3 %v2558_v14  ;;  %1534 = vmatpush.bf16.msrb.mxu1 %v2564_v58  ;;  %v2592_v14 = vld [vmem:[#allocation8 + $0xf0] sm:$0xff] }
 0x28a   :  { %v1062_v17 = vadd.f32 %v1061_v16, %v1021_v15  ;;  %v2584_v15 = vld [vmem:[#allocation8 + $0xb0] sm:$0xff]  ;;  %v2587_v16 = vld [vmem:[#allocation8 + $0xc8] sm:$0xff] }
 0x28b   :  { %v913_v29 = vpop.f32.mrf.mxu1  ;;  %1494 = vmatpush.bf16.msrb.mxu0 %v2568_v57 }
 0x28c   :  { %v917_v32 = vadd.f32 %v913_v29, %v865_v28 }
 0x28d   :  { %1535 = vmatpush.bf16.msrb.mxu1 %v2563_v62 }
 0x28e   :  { %v954_v33 = vadd.f32 %v953_v30, %v917_v32 }
 0x28f   :  { %1495 = vmatpush.bf16.msrb.mxu0 %v2567_v61 }
 0x290   :  { %v2886_v34 = vadd.f32 %v954_v33, %v950_v31 }
 0x291   :  { %v1023_v21 = vpop.f32.mrf.mxu3  ;;  %1536 = vmatpush.bf16.msrb.mxu1 %v2562_v4 }
 0x292   :  { %v956_v35 = vmax.f32 %v2886_v34, 0.0  ;;  %v2578_v21 = vld [vmem:[#allocation8 + $0x80] sm:$0xff] }
 0x293   :  { %v915_v36 = vpop.f32.mrf.mxu1  ;;  %1496 = vmatpush.bf16.msrb.mxu0 %v2566_v3 }
 0x294   :  { %959 = vrot.lane.b32.xlu1 %v956_v35, %s2709_s21 }
 0x297   :  { %1689 = vmatpush.bf16.msra.mxu0 %v2581_v7 }
 0x29b   :  { %v1112_v19 = vpop.f32.mrf.mxu1  ;;  %1690 = vmatpush.bf16.msra.mxu0 %v2580_v13 }
 0x29c   :  { %1336 = vrot.lane.b32.xlu1 %v1275_v53, %s2709_s21  ;;  %v1116_v20 = vadd.f32 %v1112_v19, %v1062_v17  ;;  %v2579_v17 = vld [vmem:[#allocation8 + $0x88] sm:$0xff] }
 0x29d   :  { %v2583_v19 = vld [vmem:[#allocation8 + $0xa8] sm:$0xff] }
 0x29f   :  { %1691 = vmatpush.bf16.msra.mxu0 %v2579_v17 }
 0x2a3   :  { %v1114_v23 = vpop.f32.mrf.mxu1  ;;  %1692 = vmatpush.bf16.msra.mxu0 %v2578_v21 }
 0x2a4   :  { %v2582_v23 = vld [vmem:[#allocation8 + $0xa0] sm:$0xff] }
 0x301   :  { %v1321_v30 = vpop.f32.mrf.mxu1 }
 0x303   :  { %v1269_v29 = vpop.f32.mrf.mxu0 }
 0x306   :  { %v960_v0 = vpop.permute.xlu1 %959 }
 0x307   :  { %962 = vst.msk [vmem:[#allocation2 + $0x1] sm:$0x1] %vm447_vm5, %v960_v0  ;;  %v2574_v0 = vld [vmem:[#allocation8 + $0x60] sm:$0xff] }
 0x30b   :  { %v1271_v47 = vpop.f32.mrf.mxu0 }
 0x30e   :  { %v1117_v1 = vld [vmem:[#allocation2 + $0x1] sm:$0x1]  ;;  %v1337_v11 = vpop.permute.xlu1 %1336 }
 0x30f   :  { %v1118_v2 = vpack.c.bf16 %v1117_v1, %v1117_v1  ;;  %1434 = vst.msk [vmem:[#allocation2] sm:$0x77] %vm2838_vm3, %v2715_v49  ;;  %v1323_v49 = vpop.f32.mrf.mxu1 }
 0x311   :  { %1179 = vrot.lane.b32.xlu0 %v1118_v2, %s2709_s21  ;;  %2231 = vmatmul.msk.bf16.vlgmr.msrb.gmra.mxu2 %vm495_vm4, %v1118_v2 }
 0x312   :  { %1584 = vmatpush.bf16.msrb.mxu2 %v2573_v37 }
 0x316   :  { %v1440_v32 = vld [vmem:[#allocation2] sm:$0x1]  ;;  %1585 = vmatpush.bf16.msrb.mxu2 %v2572_v41  ;;  %v1542_v1 = vld [vmem:[#allocation2 + $0x4] sm:$0x1]  ;;  %v1751_v5 = vld [vmem:[#allocation2 + $0x2] sm:$0x1] }
 0x317   :  { %v2907_v33 = vpack.c.bf16 %v1440_v32, %v1440_v32  ;;  %v1543_v2 = vpack.c.bf16 %v1542_v1, %v1542_v1  ;;  %v1752_v9 = vpack.c.bf16 %v1751_v5, %v1751_v5  ;;  %v2595_v32 = vld [vmem:[#allocation8 + $0x108] sm:$0xff] }
 0x319   :  { %1460 = vrot.lane.b32.xlu0 %v2907_v33, %s2709_s21  ;;  %2350 = vmatmul.msk.bf16.vlgmr.msrb.gmra.mxu1 %vm495_vm4, %v2907_v33  ;;  %v2594_v33 = vld [vmem:[#allocation8 + $0x100] sm:$0xff] }
 0x31a   :  { %1586 = vmatpush.bf16.msrb.mxu2 %v2571_v59 }
 0x31e   :  { %1587 = vmatpush.bf16.msrb.mxu2 %v2570_v63  ;;  %v1908_v63 = vld [vmem:[%s2949_s13] sm:$0x1] }
 0x321   :  { %2299 = vmatmul.msk.bf16.vlgmr.msra.gmra.mxu2 %vm495_vm4, %v1337_v11  ;;  %v2585_v11 = vld [vmem:[#allocation8 + $0xb8] sm:$0xff] }
 0x322   :  { %1793 = vmatpush.bf16.msra.mxu2 %v2589_v6  ;;  %1741 = vmatpush.bf16.msra.mxu1 %v2585_v11 }
 0x326   :  { %1794 = vmatpush.bf16.msra.mxu2 %v2588_v12  ;;  %1742 = vmatpush.bf16.msra.mxu1 %v2584_v15 }
 0x32a   :  { %1795 = vmatpush.bf16.msra.mxu2 %v2587_v16  ;;  %1743 = vmatpush.bf16.msra.mxu1 %v2583_v19 }
 0x32e   :  { %1744 = vmatpush.bf16.msra.mxu1 %v2582_v23 }
 0x331   :  { %2367 = vmatmul.msk.bf16.vlgmr.msrb.gmra.mxu2 %vm495_vm4, %v1543_v2 }
 0x383   :  { %v1180_v24 = vpop.permute.xlu0 %1179 }
 0x384   :  { %2248 = vmatmul.msk.bf16.vlgmr.msrb.gmra.mxu3 %vm495_vm4, %v1180_v24 }
 0x385   :  { %1636 = vmatpush.bf16.msrb.mxu3 %v2577_v38 }
 0x389   :  { %1637 = vmatpush.bf16.msrb.mxu3 %v2576_v42 }
 0x38b   :  { %v1461_v8 = vpop.permute.xlu0 %1460 }
 0x38c   :  { %2333 = vmatmul.msk.bf16.vlgmr.msrb.gmra.mxu0 %vm495_vm4, %v1461_v8 }
 0x38d   :  { %1638 = vmatpush.bf16.msrb.mxu3 %v2575_v60 }
 0x391   :  { %1639 = vmatpush.bf16.msrb.mxu3 %v2574_v0 }
 0x394   :  { %v1164_v26 = vpop.f32.mrf.mxu2  ;;  %2316 = vmatmul.msk.bf16.vlgmr.msra.gmra.mxu3 %vm495_vm4, %v1380_v25 }
 0x395   :  { %v1168_v27 = vadd.f32 %v1164_v26, %v1116_v20  ;;  %1846 = vmatpush.bf16.msra.mxu3 %v2593_v10  ;;  %v2586_v20 = vld [vmem:[#allocation8 + $0xc0] sm:$0xff] }
 0x396   :  { %1796 = vmatpush.bf16.msra.mxu2 %v2586_v20  ;;  %v1538_v49 = vpop.f32.mrf.mxu1 }
 0x399   :  { %1847 = vmatpush.bf16.msra.mxu3 %v2592_v14  ;;  %2435 = vmatmul.msk.bf16.vlgmr.msra.gmra.mxu2 %vm495_vm4, %v1752_v9 }
 0x39c   :  { %v1166_v28 = vpop.f32.mrf.mxu2 }
 0x39d   :  { %1848 = vmatpush.bf16.msra.mxu3 %v2591_v18  ;;  %v2597_v28 = vld [vmem:[#allocation8 + $0x118] sm:$0xff] }
 0x39e   :  { %1898 = vmatpush.bf16.msrb.mxu0 %v2597_v28  ;;  %v1540_v40 = vpop.f32.mrf.mxu1 }
 0x3a1   :  { %1849 = vmatpush.bf16.msra.mxu3 %v2590_v22 }
 0x3a4   :  { %v1374_v31 = vpop.f32.mrf.mxu2 }
 0x3ac   :  { %v1376_v36 = vpop.f32.mrf.mxu2 }
 0x3b4   :  { %v1589_v37 = vpop.f32.mrf.mxu2 }
 0x3bc   :  { %v1591_v41 = vpop.f32.mrf.mxu2 }
 0x407   :  { %v1217_v43 = vpop.f32.mrf.mxu3 }
 0x408   :  { %v1221_v44 = vadd.f32 %v1217_v43, %v1168_v27  ;;  %v1856_v43 = vld [vmem:[#allocation2 + $0x6] sm:$0x1] }
 0x409   :  { %v1498_v47 = vpop.f32.mrf.mxu0 }
 0x40a   :  { %v1273_v45 = vadd.f32 %v1269_v29, %v1221_v44  ;;  %v1699_v29 = vld [vmem:[#allocation2 + $0x5] sm:$0x1]  ;;  %v1539_v36 = vadd.f32 %v1538_v49, %v1498_v47  ;;  %v1857_v44 = vpack.c.bf16 %v1856_v43, %v1856_v43 }
 0x40c   :  { %v1325_v48 = vadd.f32 %v1321_v30, %v1273_v45  ;;  %v1700_v30 = vpack.c.bf16 %v1699_v29, %v1699_v29  ;;  %v1593_v38 = vadd.f32 %v1589_v37, %v1539_v36 }
 0x40e   :  { %v1378_v50 = vadd.f32 %v1374_v31, %v1325_v48  ;;  %v2596_v31 = vld [vmem:[#allocation8 + $0x110] sm:$0xff]  ;;  %2418 = vmatmul.msk.bf16.vlgmr.msra.gmra.mxu1 %vm495_vm4, %v1700_v30 }
 0x40f   :  { %v1219_v46 = vpop.f32.mrf.mxu3  ;;  %1899 = vmatpush.bf16.msrb.mxu0 %v2596_v31 }
 0x411   :  { %v1500_v39 = vpop.f32.mrf.mxu0 }
 0x413   :  { %1900 = vmatpush.bf16.msrb.mxu0 %v2595_v32 }
 0x417   :  { %v1426_v51 = vpop.f32.mrf.mxu3  ;;  %1901 = vmatpush.bf16.msrb.mxu0 %v2594_v33 }
 0x418   :  { %v1430_v53 = vadd.f32 %v1426_v51, %v1378_v50 }
 0x41a   :  { %v1432_v54 = vadd.f32 %v1431_v52, %v1430_v53 }
 0x41c   :  { %v1433_v55 = vmax.f32 %v1432_v54, 0.0  ;;  %v1798_v51 = vpop.f32.mrf.mxu2 }
 0x41e   :  { %1436 = vrot.lane.b32.xlu2 %v1433_v55, %s2709_s21 }
 0x41f   :  { %v1428_v56 = vpop.f32.mrf.mxu3 }
 0x424   :  { %v1800_v54 = vpop.f32.mrf.mxu2 }
 0x426   :  { %1813 = vrot.lane.b32.xlu2 %v1752_v9, %s2709_s21 }
 0x478   :  { %v1437_v24 = vpop.permute.xlu2 %1436 }
 0x479   :  { %1439 = vst.msk [vmem:[#allocation2 + $0x1] sm:$0x1] %vm447_vm5, %v1437_v24 }
 0x480   :  { %v1594_v25 = vld [vmem:[#allocation2 + $0x1] sm:$0x1]  ;;  %v1814_v27 = vpop.permute.xlu2 %1813 }
 0x481   :  { %v1595_v26 = vpack.c.bf16 %v1594_v25, %v1594_v25 }
 0x483   :  { %1656 = vrot.lane.b32.xlu1 %v1595_v26, %s2709_s21  ;;  %2384 = vmatmul.msk.bf16.vlgmr.msrb.gmra.mxu3 %vm495_vm4, %v1595_v26 }
 0x48b   :  { %v1746_v50 = vpop.f32.mrf.mxu1 }
 0x493   :  { %2452 = vmatmul.msk.bf16.vlgmr.msra.gmra.mxu3 %vm495_vm4, %v1814_v27  ;;  %v1748_v53 = vpop.f32.mrf.mxu1 }
 0x4f5   :  { %v1657_v42 = vpop.permute.xlu1 %1656 }
 0x4f6   :  { %2401 = vmatmul.msk.bf16.vlgmr.msra.gmra.mxu0 %vm495_vm4, %v1657_v42 }
 0x506   :  { %v1641_v45 = vpop.f32.mrf.mxu3  ;;  %2469 = vmatmul.msk.bf16.vlgmr.msrb.gmra.mxu0 %vm495_vm4, %v1857_v44 }
 0x507   :  { %v1645_v46 = vadd.f32 %v1641_v45, %v1593_v38 }
 0x50e   :  { %v1643_v48 = vpop.f32.mrf.mxu3 }
 0x516   :  { %v1851_v52 = vpop.f32.mrf.mxu3 }
 0x51e   :  { %v1853_v55 = vpop.f32.mrf.mxu3 }
 0x573   :  { %v1694_v56 = vpop.f32.mrf.mxu0 }
 0x574   :  { %v1698_v57 = vadd.f32 %v1694_v56, %v1645_v46 }
 0x576   :  { %v1750_v58 = vadd.f32 %v1746_v50, %v1698_v57 }
 0x578   :  { %v1802_v60 = vadd.f32 %v1798_v51, %v1750_v58 }
 0x57a   :  { %v1855_v61 = vadd.f32 %v1851_v52, %v1802_v60 }
 0x57b   :  { %v1696_v59 = vpop.f32.mrf.mxu0 }
 0x583   :  { %v1903_v62 = vpop.f32.mrf.mxu0 }
 0x584   :  { %v1907_v0 = vadd.f32 %v1903_v62, %v1855_v61 }
 0x586   :  { %v1909_v1 = vadd.f32 %v1908_v63, %v1907_v0 }
 0x588   :  { %v1910_v2 = vadd.f32 %v1909_v1, %v956_v35 }
 0x58a   :  { %v1911_v3 = vmax.f32 %v1910_v2, 0.0 }
 0x58b   :  { %v1905_v4 = vpop.f32.mrf.mxu0 }
 0x58c   :  { %1913 = vst.msk [vmem:[%s2950_s14] sm:$0x1] %vm1912_vm6, %v1911_v3 }
 0x58d   :  { %1918 = vsyncpa [#allocation4], 1 }
 0x58e   :  { %1919 = vsyncpa [#allocation6], 1 }
 0x58f   :  { %1920 = vsyncpa [#allocation9], 1 }

// kernel: _lambda_.9
= control target key start
LH: loop header
LB: loop body
LE: loop exit
PB: predicated region body
PF: predicated region fallthrough
CT: control target
= control target key end

     0   :  { %s5544_s0 = inlined_call_operand.vmem [shape: f32[2,128], index: 0, kind: input, shape index: {}]   ;;  %s5545_s1 = inlined_call_operand.vmem [shape: f32[2,128], index: 1, kind: input, shape index: {}]   ;;  %s5546_s2 = inlined_call_operand.vmem [shape: f32[2,128], index: 2, kind: input, shape index: {}]   ;;  %s5547_s3 = inlined_call_operand.vmem [shape: f32[2,128], index: 3, kind: input, shape index: {}]   ;;  %s5548_s4 = inlined_call_operand.hbm [shape: bf16[9,64,128], index: 4, kind: input, shape index: {}]   ;;  %s5549_s5 = inlined_call_operand.vmem [shape: f32[1,128], index: 5, kind: input, shape index: {}]   ;;  %s5550_s6 = inlined_call_operand.vmem [shape: bf16[9,128,128], index: 6, kind: input, shape index: {}]   ;;  %s5551_s7 = inlined_call_operand.vmem [shape: f32[1,128], index: 7, kind: input, shape index: {}]   ;;  %s5552_s8 = inlined_call_operand.vmem [shape: bf16[64,128], index: 8, kind: input, shape index: {}]   ;;  %s5553_s9 = inlined_call_operand.vmem [shape: f32[1,128], index: 9, kind: input, shape index: {}]   ;;  %s5554_s10 = inlined_call_operand.vmem [shape: bf16[9,128,128], index: 10, kind: input, shape index: {}]   ;;  %s5555_s11 = inlined_call_operand.vmem [shape: f32[1,128], index: 11, kind: input, shape index: {}]   ;;  %s5556_s12 = inlined_call_operand.vmem [shape: bf16[9,128,128], index: 12, kind: input, shape index: {}]   ;;  %s5557_s13 = inlined_call_operand.vmem [shape: f32[1,128], index: 13, kind: input, shape index: {}]   ;;  %s5558_s14 = inlined_call_operand.vmem [shape: bf16[128,20], index: 14, kind: input, shape index: {}]   ;;  %s5559_s15 = inlined_call_operand.vmem [shape: f32[1,20], index: 15, kind: input, shape index: {}]   ;;  %s5560_s16 = inlined_call_operand.vmem [shape: f32[1,128], index: 16, kind: output, shape index: {0}]   ;;  %s5561_s17 = inlined_call_operand.vmem [shape: f32[1,20], index: 17, kind: output, shape index: {1}]  }
   0x1   :  { %5564 = sst [smem:[#allocation6_spill]] %s5544_s0 }
   0x2   :  { %5565 = sst [smem:[#allocation7_spill]] %s5545_s1 }
   0x3   :  { %23 = vsyncpa [#allocation4], 0  ;;  %s36_s26 = sshll.u32 %s5548_s4, 4  ;;  %s4629_s27 = smov [#allocation3]   ;;  %s37_s26 = int_to_ptr.hbm [resolvable:$true] %s36_s26 }
   0x4   :  { %s38_s28 = sshll.u32 %s4629_s27, 4  ;;  %s4630_s29 = smov 64   ;;  %s39_s28 = int_to_ptr.vmem [resolvable:$true] %s38_s28 }
   0x5   :  { %s4631_s0 = smov 4  }
   0x6   :  { %44 = dma.hbm_to_vmem [thread:$0]  %s37_s26, 4608, %s39_s28, [#allocation4], %s4630_s29, %s4630_s29, %s4631_s0  }
   0x7   :  { %4627 = dma.done.wait [#allocation4], 4608  }
   0x8   :  { %4628 = vsyncadd [#allocation4], 4294962688  ;;  %s5566_s19 = sld [smem:[#allocation6_spill]]  ;;  %v4342_v4 = vld [vmem:[#allocation3 + $0x38] sm:$0xff]  ;;  %v227_v8 = vld [vmem:[%s5546_s2] sm:$0x1] }
   0x9   :  { %v4338_v5 = vld [vmem:[#allocation3 + $0x18] sm:$0xff]  ;;  %125 = vmatpush.bf16.msra.mxu0 %v4342_v4  ;;  %v4341_v9 = vld [vmem:[#allocation3 + $0x30] sm:$0xff]  ;;  %v228_v13 = vpack.c.bf16 %v227_v8, %v227_v8  ;;  %v4340_v14 = vld [vmem:[#allocation3 + $0x28] sm:$0xff]  ;;  %s5567_s23 = sld [smem:[#allocation7_spill]]  ;;  %vm117_vm0 = vcmask 523264   ;;  %vm2874_vm1 = vcmask 155648  }
   0xa   :  { %v4350_v6 = vld [vmem:[#allocation3 + $0x78] sm:$0xff]  ;;  %165 = vmatpush.bf16.msra.mxu1 %v4338_v5  ;;  %v4337_v10 = vld [vmem:[#allocation3 + $0x10] sm:$0xff]  ;;  %v4336_v15 = vld [vmem:[#allocation3 + $0x8] sm:$0xff] }
   0xb   :  { %v4346_v7 = vld [vmem:[#allocation3 + $0x58] sm:$0xff]  ;;  %269 = vmatpush.bf16.msra.mxu3 %v4350_v6  ;;  %v4349_v11 = vld [vmem:[#allocation3 + $0x70] sm:$0xff]  ;;  %v4348_v16 = vld [vmem:[#allocation3 + $0x68] sm:$0xff] }
   0xc   :  { %217 = vmatpush.bf16.msra.mxu2 %v4346_v7  ;;  %v4345_v12 = vld [vmem:[#allocation3 + $0x50] sm:$0xff]  ;;  %v4344_v17 = vld [vmem:[#allocation3 + $0x48] sm:$0xff]  ;;  %v4339_v18 = vld [vmem:[#allocation3 + $0x20] sm:$0xff] }
   0xd   :  { %126 = vmatpush.bf16.msra.mxu0 %v4341_v9  ;;  %v4335_v20 = vld [vmem:[#allocation3] sm:$0xff]  ;;  %v4354_v21 = vld [vmem:[#allocation3 + $0x98] sm:$0xff]  ;;  %v4353_v27 = vld [vmem:[#allocation3 + $0x90] sm:$0xff] }
   0xe   :  { %v72_v0 = vld [vmem:[%s5566_s19] sm:$0x1]  ;;  %v384_v1 = vld [vmem:[%s5566_s19 + $0x1] sm:$0x1]  ;;  %166 = vmatpush.bf16.msra.mxu1 %v4337_v10  ;;  %v4347_v22 = vld [vmem:[#allocation3 + $0x60] sm:$0xff] }
   0xf   :  { %v73_v2 = vpack.c.bf16 %v72_v0, %v72_v0  ;;  %v4734_v3 = vpack.c.bf16 %v384_v1, %v384_v1  ;;  %270 = vmatpush.bf16.msra.mxu3 %v4349_v11  ;;  %v82_v19 = vld [vmem:[%s5567_s23] sm:$0x1]  ;;  %v4366_v23 = vld [vmem:[#allocation3 + $0xf8] sm:$0xff]  ;;  %v4343_v24 = vld [vmem:[#allocation3 + $0x40] sm:$0xff] }
  0x10   :  { %218 = vmatpush.bf16.msra.mxu2 %v4345_v12  ;;  %v83_v25 = vpack.c.bf16 %v82_v19, %v82_v19  ;;  %v4358_v26 = vld [vmem:[#allocation3 + $0xb8] sm:$0xff]  ;;  %v4365_v28 = vld [vmem:[#allocation3 + $0xf0] sm:$0xff]  ;;  %v4352_v29 = vld [vmem:[#allocation3 + $0x88] sm:$0xff] }
  0x11   :  { %184 = vrot.lane.b32.xlu0 %v73_v2, %s4630_s29  ;;  %498 = vrot.lane.b32.xlu1 %v4734_v3, %s4630_s29  ;;  %v4351_v30 = vld [vmem:[#allocation3 + $0x80] sm:$0xff]  ;;  %v4362_v31 = vld [vmem:[#allocation3 + $0xd8] sm:$0xff]  ;;  %v4357_v32 = vld [vmem:[#allocation3 + $0xb0] sm:$0xff] }
  0x12   :  { %127 = vmatpush.bf16.msra.mxu0 %v4340_v14  ;;  %167 = vmatpush.bf16.msra.mxu1 %v4336_v15  ;;  %v279_v33 = vld [vmem:[%s5547_s3] sm:$0x1]  ;;  %v4364_v35 = vld [vmem:[#allocation3 + $0xe8] sm:$0xff]  ;;  %v4370_v36 = vld [vmem:[#allocation3 + $0x118] sm:$0xff] }
  0x13   :  { %271 = vmatpush.bf16.msra.mxu3 %v4348_v16  ;;  %v280_v34 = vpack.c.bf16 %v279_v33, %v279_v33  ;;  %v4361_v37 = vld [vmem:[#allocation3 + $0xd0] sm:$0xff]  ;;  %v4356_v38 = vld [vmem:[#allocation3 + $0xa8] sm:$0xff]  ;;  %v4363_v39 = vld [vmem:[#allocation3 + $0xe0] sm:$0xff] }
  0x14   :  { %219 = vmatpush.bf16.msra.mxu2 %v4344_v17  ;;  %v4369_v40 = vld [vmem:[#allocation3 + $0x110] sm:$0xff]  ;;  %v4360_v42 = vld [vmem:[#allocation3 + $0xc8] sm:$0xff]  ;;  %v4355_v43 = vld [vmem:[#allocation3 + $0xa0] sm:$0xff] }
  0x15   :  { %v436_v41 = vld [vmem:[%s5567_s23 + $0x1] sm:$0x1]  ;;  %v4368_v45 = vld [vmem:[#allocation3 + $0x108] sm:$0xff]  ;;  %v4359_v46 = vld [vmem:[#allocation3 + $0xc0] sm:$0xff] }
  0x16   :  { %128 = vmatpush.bf16.msra.mxu0 %v4339_v18  ;;  %168 = vmatpush.bf16.msra.mxu1 %v4335_v20  ;;  %v437_v44 = vpack.c.bf16 %v436_v41, %v436_v41  ;;  %v4367_v47 = vld [vmem:[#allocation3 + $0x100] sm:$0xff]  ;;  %v4386_v48 = vld [vmem:[%s5550_s6 + $0x78] sm:$0xff]  ;;  %v4383_v53 = vld [vmem:[%s5550_s6 + $0x60] sm:$0xff] }
  0x17   :  { %272 = vmatpush.bf16.msra.mxu3 %v4347_v22  ;;  %v4385_v49 = vld [vmem:[%s5550_s6 + $0x70] sm:$0xff]  ;;  %v4394_v50 = vld [vmem:[%s5550_s6 + $0xb8] sm:$0xff]  ;;  %v4384_v52 = vld [vmem:[%s5550_s6 + $0x68] sm:$0xff] }
  0x18   :  { %220 = vmatpush.bf16.msra.mxu2 %v4343_v24  ;;  %v4393_v51 = vld [vmem:[%s5550_s6 + $0xb0] sm:$0xff]  ;;  %v4392_v54 = vld [vmem:[%s5550_s6 + $0xa8] sm:$0xff]  ;;  %v4402_v55 = vld [vmem:[%s5550_s6 + $0xf8] sm:$0xff] }
  0x19   :  { %341 = vrot.lane.b32.xlu0 %v228_v13, %s4630_s29  ;;  %2901 = vmatmul.msk.bf16.vlgmr.msra.gmra.mxu0 %vm117_vm0, %v83_v25  ;;  %v4378_v56 = vld [vmem:[%s5550_s6 + $0x38] sm:$0xff]  ;;  %v4391_v57 = vld [vmem:[%s5550_s6 + $0xa0] sm:$0xff]  ;;  %v4401_v59 = vld [vmem:[%s5550_s6 + $0xf0] sm:$0xff] }
  0x1a   :  { %321 = vmatpush.bf16.msrb.mxu0 %v4354_v21  ;;  %2918 = vmatmul.msk.bf16.vlgmr.msra.gmra.mxu1 %vm117_vm0, %v73_v2  ;;  %v4382_v58 = vld [vmem:[%s5550_s6 + $0x58] sm:$0xff]  ;;  %v4377_v62 = vld [vmem:[%s5550_s6 + $0x30] sm:$0xff]  ;;  %v4400_v1 = vld [vmem:[%s5550_s6 + $0xe8] sm:$0xff] }
  0x1b   :  { %478 = vmatpush.bf16.msrb.mxu3 %v4366_v23  ;;  %374 = vmatpush.bf16.msrb.mxu1 %v4358_v26  ;;  %v4381_v63 = vld [vmem:[%s5550_s6 + $0x50] sm:$0xff]  ;;  %v4390_v0 = vld [vmem:[%s5550_s6 + $0x98] sm:$0xff]  ;;  %v4376_v2 = vld [vmem:[%s5550_s6 + $0x28] sm:$0xff] }
  0x1c   :  { %2952 = vmatmul.msk.bf16.vlgmr.msra.gmra.mxu3 %vm117_vm0, %v228_v13  ;;  %426 = vmatpush.bf16.msrb.mxu2 %v4362_v31  ;;  %v4389_v4 = vld [vmem:[%s5550_s6 + $0x90] sm:$0xff]  ;;  %v4380_v5 = vld [vmem:[%s5550_s6 + $0x48] sm:$0xff]  ;;  %v4399_v6 = vld [vmem:[%s5550_s6 + $0xe0] sm:$0xff] }
  0x1d   :  { %v4375_v8 = vld [vmem:[%s5550_s6 + $0x20] sm:$0xff]  ;;  %v4410_v10 = vld [vmem:[%s5550_s6 + $0x138] sm:$0xff]  ;;  %v4373_v12 = vld [vmem:[%s5550_s6 + $0x10] sm:$0xff] }
  0x1e   :  { %322 = vmatpush.bf16.msrb.mxu0 %v4353_v27  ;;  %v4379_v9 = vld [vmem:[%s5550_s6 + $0x40] sm:$0xff]  ;;  %v4374_v11 = vld [vmem:[%s5550_s6 + $0x18] sm:$0xff]  ;;  %v4372_v13 = vld [vmem:[%s5550_s6 + $0x8] sm:$0xff] }
  0x1f   :  { %479 = vmatpush.bf16.msrb.mxu3 %v4365_v28  ;;  %375 = vmatpush.bf16.msrb.mxu1 %v4357_v32  ;;  %v4371_v14 = vld [vmem:[%s5550_s6] sm:$0xff]  ;;  %v4409_v22 = vld [vmem:[%s5550_s6 + $0x130] sm:$0xff]  ;;  %v4388_v24 = vld [vmem:[%s5550_s6 + $0x88] sm:$0xff]  ;;  %v4632_v28 = vmov 0.0  }
  0x20   :  { %427 = vmatpush.bf16.msrb.mxu2 %v4361_v37  ;;  %v4417_v23 = vld [vmem:[%s5550_s6 + $0x170] sm:$0xff]  ;;  %v4398_v25 = vld [vmem:[%s5550_s6 + $0xd8] sm:$0xff]  ;;  %v4408_v27 = vld [vmem:[%s5550_s6 + $0x128] sm:$0xff]  ;;  %544 = vst [vmem:[#allocation2] sm:$0x77] %v4632_v28 }
  0x21   :  { %545 = vst [vmem:[#allocation2 + $0x8] sm:$0x7] %v4632_v28  ;;  %v4397_v31 = vld [vmem:[%s5550_s6 + $0xd0] sm:$0xff]  ;;  %v4426_v32 = vld [vmem:[%s5550_s6 + $0x1b8] sm:$0xff]  ;;  %v4407_v33 = vld [vmem:[%s5550_s6 + $0x120] sm:$0xff] }
  0x22   :  { %323 = vmatpush.bf16.msrb.mxu0 %v4352_v29  ;;  %v4416_v29 = vld [vmem:[%s5550_s6 + $0x168] sm:$0xff]  ;;  %v4425_v37 = vld [vmem:[%s5550_s6 + $0x1b0] sm:$0xff]  ;;  %v4414_v41 = vld [vmem:[%s5550_s6 + $0x158] sm:$0xff] }
  0x23   :  { %480 = vmatpush.bf16.msrb.mxu3 %v4364_v35  ;;  %376 = vmatpush.bf16.msrb.mxu1 %v4356_v38  ;;  %v4415_v35 = vld [vmem:[%s5550_s6 + $0x160] sm:$0xff] }
  0x24   :  { %428 = vmatpush.bf16.msrb.mxu2 %v4360_v42  ;;  %v4395_v42 = vld [vmem:[%s5550_s6 + $0xc0] sm:$0xff] }
  0x26   :  { %324 = vmatpush.bf16.msrb.mxu0 %v4351_v30  ;;  %v4387_v30 = vld [vmem:[%s5550_s6 + $0x80] sm:$0xff] }
  0x27   :  { %481 = vmatpush.bf16.msrb.mxu3 %v4363_v39  ;;  %377 = vmatpush.bf16.msrb.mxu1 %v4355_v43  ;;  %v547_v38 = vld [vmem:[#allocation2] sm:$0x1]  ;;  %v4424_v43 = vld [vmem:[%s5550_s6 + $0x1a8] sm:$0xff] }
  0x28   :  { %429 = vmatpush.bf16.msrb.mxu2 %v4359_v46  ;;  %v548_v39 = vpack.c.bf16 %v547_v38, %v547_v38 }
  0x29   :  { %2969 = vmatmul.msk.bf16.vlgmr.msrb.gmra.mxu0 %vm117_vm0, %v280_v34 }
  0x2a   :  { %531 = vmatpush.bf16.msra.mxu0 %v4370_v36  ;;  %v4396_v36 = vld [vmem:[%s5550_s6 + $0xc8] sm:$0xff] }
  0x2b   :  { %632 = vmatpush.bf16.msra.mxu1 %v4386_v48  ;;  %773 = vmatpush.bf16.msra.mxu3 %v4394_v50  ;;  %v4405_v48 = vld [vmem:[%s5550_s6 + $0x110] sm:$0xff]  ;;  %v4423_v50 = vld [vmem:[%s5550_s6 + $0x1a0] sm:$0xff] }
  0x2c   :  { %3020 = vmatmul.msk.bf16.vlgmr.msrb.gmra.mxu3 %vm117_vm0, %v437_v44  ;;  %v4434_v44 = vld [vmem:[%s5550_s6 + $0x1f8] sm:$0xff] }
  0x2e   :  { %532 = vmatpush.bf16.msra.mxu0 %v4369_v40  ;;  %v4406_v40 = vld [vmem:[%s5550_s6 + $0x118] sm:$0xff] }
  0x2f   :  { %633 = vmatpush.bf16.msra.mxu1 %v4385_v49  ;;  %774 = vmatpush.bf16.msra.mxu3 %v4393_v51  ;;  %v4413_v49 = vld [vmem:[%s5550_s6 + $0x150] sm:$0xff] }
  0x30   :  { %v4433_v51 = vld [vmem:[%s5550_s6 + $0x1f0] sm:$0xff] }
  0x32   :  { %533 = vmatpush.bf16.msra.mxu0 %v4368_v45  ;;  %v565_v45 = vld [vmem:[#allocation2 + $0x4] sm:$0x1] }
  0x33   :  { %634 = vmatpush.bf16.msra.mxu1 %v4384_v52  ;;  %775 = vmatpush.bf16.msra.mxu3 %v4392_v54  ;;  %v706_v52 = vld [vmem:[#allocation2 + $0x8] sm:$0x1] }
  0x34   :  { %v4404_v54 = vld [vmem:[%s5550_s6 + $0x108] sm:$0xff] }
  0x36   :  { %534 = vmatpush.bf16.msra.mxu0 %v4367_v47  ;;  %v566_v47 = vpack.c.bf16 %v565_v45, %v565_v45 }
  0x37   :  { %635 = vmatpush.bf16.msra.mxu1 %v4383_v53  ;;  %776 = vmatpush.bf16.msra.mxu3 %v4391_v57  ;;  %v707_v53 = vpack.c.bf16 %v706_v52, %v706_v52  ;;  %v4422_v57 = vld [vmem:[%s5550_s6 + $0x198] sm:$0xff] }
  0x3a   :  { %854 = vmatpush.bf16.msrb.mxu0 %v4402_v55  ;;  %v4412_v55 = vld [vmem:[%s5550_s6 + $0x148] sm:$0xff] }
  0x3b   :  { %636 = vmatpush.bf16.msra.mxu1 %v4382_v58  ;;  %777 = vmatpush.bf16.msra.mxu3 %v4390_v0  ;;  %v4432_v58 = vld [vmem:[%s5550_s6 + $0x1e8] sm:$0xff]  ;;  %v787_v0 = vld [vmem:[#allocation2 + $0x1] sm:$0x1] }
  0x3e   :  { %855 = vmatpush.bf16.msrb.mxu0 %v4401_v59  ;;  %v4403_v59 = vld [vmem:[%s5550_s6 + $0x100] sm:$0xff] }
  0x3f   :  { %637 = vmatpush.bf16.msra.mxu1 %v4381_v63  ;;  %778 = vmatpush.bf16.msra.mxu3 %v4389_v4  ;;  %v4431_v63 = vld [vmem:[%s5550_s6 + $0x1e0] sm:$0xff] }
  0x42   :  { %856 = vmatpush.bf16.msrb.mxu0 %v4400_v1  ;;  %v788_v1 = vpack.c.bf16 %v787_v0, %v787_v0  ;;  %v4452_v0 = vld [vmem:[%s5554_s10 + $0x28] sm:$0xff] }
  0x43   :  { %638 = vmatpush.bf16.msra.mxu1 %v4380_v5  ;;  %779 = vmatpush.bf16.msra.mxu3 %v4388_v24  ;;  %v4441_v5 = vld [vmem:[%s5550_s6 + $0x230] sm:$0xff]  ;;  %v4438_v24 = vld [vmem:[%s5550_s6 + $0x218] sm:$0xff] }
  0x46   :  { %857 = vmatpush.bf16.msrb.mxu0 %v4399_v6  ;;  %v4446_v6 = vld [vmem:[%s5552_s8 + $0x18] sm:$0xff] }
  0x47   :  { %639 = vmatpush.bf16.msra.mxu1 %v4379_v9  ;;  %780 = vmatpush.bf16.msra.mxu3 %v4387_v30  ;;  %v4430_v9 = vld [vmem:[%s5550_s6 + $0x1d8] sm:$0xff]  ;;  %v1111_v30 = vld [vmem:[#allocation2 + $0x6] sm:$0x1] }
  0x4a   :  { %858 = vmatpush.bf16.msrb.mxu0 %v4398_v25  ;;  %781 = vmatmul.bf16.vlgmr.msra.gmra.mxu3 %v707_v53  ;;  %v4443_v25 = vld [vmem:[%s5552_s8] sm:$0xff] }
  0x4b   :  { %1097 = vmatpush.bf16.msrb.mxu3 %v4426_v32  ;;  %v4437_v32 = vld [vmem:[%s5550_s6 + $0x210] sm:$0xff] }
  0x4e   :  { %859 = vmatpush.bf16.msrb.mxu0 %v4397_v31 }
  0x4f   :  { %1098 = vmatpush.bf16.msrb.mxu3 %v4425_v37 }
  0x52   :  { %860 = vmatpush.bf16.msrb.mxu0 %v4396_v36 }
  0x53   :  { %1099 = vmatpush.bf16.msrb.mxu3 %v4424_v43 }
  0x56   :  { %861 = vmatpush.bf16.msrb.mxu0 %v4395_v42 }
  0x57   :  { %1100 = vmatpush.bf16.msrb.mxu3 %v4423_v50  ;;  %v4459_v50 = vld [vmem:[%s5554_s10 + $0x60] sm:$0xff] }
  0x5b   :  { %1101 = vmatpush.bf16.msrb.mxu3 %v4422_v57  ;;  %v4457_v57 = vld [vmem:[%s5554_s10 + $0x50] sm:$0xff] }
  0x83   :  { %v185_v60 = vpop.permute.xlu0 %184  ;;  %v499_v61 = vpop.permute.xlu1 %498 }
  0x84   :  { %2935 = vmatmul.msk.bf16.vlgmr.msra.gmra.mxu2 %vm117_vm0, %v185_v60  ;;  %3037 = vmatmul.msk.bf16.vlgmr.msra.gmra.mxu0 %vm117_vm0, %v499_v61  ;;  %v4411_v60 = vld [vmem:[%s5550_s6 + $0x140] sm:$0xff]  ;;  %v4442_v61 = vld [vmem:[%s5550_s6 + $0x238] sm:$0xff] }
  0x85   :  { %693 = vmatpush.bf16.msra.mxu2 %v4378_v56  ;;  %1178 = vmatpush.bf16.msra.mxu0 %v4434_v44  ;;  %v4462_v44 = vld [vmem:[%s5554_s10 + $0x78] sm:$0xff] }
  0x89   :  { %694 = vmatpush.bf16.msra.mxu2 %v4377_v62  ;;  %1179 = vmatpush.bf16.msra.mxu0 %v4433_v51  ;;  %v4421_v62 = vld [vmem:[%s5550_s6 + $0x190] sm:$0xff] }
  0x8a   :  { %1102 = vmatpush.bf16.msrb.mxu3 %v4421_v62  ;;  %v4478_v62 = vld [vmem:[%s5554_s10 + $0xf8] sm:$0xff] }
  0x8b   :  { %v342_v7 = vpop.permute.xlu0 %341 }
  0x8c   :  { %2986 = vmatmul.msk.bf16.vlgmr.msrb.gmra.mxu1 %vm117_vm0, %v342_v7 }
  0x8d   :  { %695 = vmatpush.bf16.msra.mxu2 %v4376_v2  ;;  %935 = vmatpush.bf16.msrb.mxu1 %v4410_v10  ;;  %v949_v2 = vld [vmem:[#allocation2 + $0x9] sm:$0x1] }
  0x8e   :  { %1180 = vmatpush.bf16.msra.mxu0 %v4432_v58  ;;  %v950_v4 = vpack.c.bf16 %v949_v2, %v949_v2  ;;  %v4440_v10 = vld [vmem:[%s5550_s6 + $0x228] sm:$0xff]  ;;  %v4469_v58 = vld [vmem:[%s5554_s10 + $0xb0] sm:$0xff] }
  0x8f   :  { %v4477_v2 = vld [vmem:[%s5554_s10 + $0xf0] sm:$0xff] }
  0x91   :  { %696 = vmatpush.bf16.msra.mxu2 %v4375_v8  ;;  %936 = vmatpush.bf16.msrb.mxu1 %v4409_v22  ;;  %v4420_v8 = vld [vmem:[%s5550_s6 + $0x188] sm:$0xff] }
  0x92   :  { %1181 = vmatpush.bf16.msra.mxu0 %v4431_v63  ;;  %1103 = vmatpush.bf16.msrb.mxu3 %v4420_v8  ;;  %v4455_v63 = vld [vmem:[%s5554_s10 + $0x40] sm:$0xff]  ;;  %v4485_v8 = vld [vmem:[%s5554_s10 + $0x130] sm:$0xff] }
  0x94   :  { %3003 = vmatmul.msk.bf16.vlgmr.msrb.gmra.mxu2 %vm117_vm0, %v4734_v3  ;;  %v4418_v3 = vld [vmem:[%s5550_s6 + $0x178] sm:$0xff]  ;;  %862 = vmatmul.bf16.vlgmr.msrb.gmra.mxu0 %v788_v1  ;;  %v4467_v1 = vld [vmem:[%s5554_s10 + $0xa0] sm:$0xff] }
  0x95   :  { %697 = vmatpush.bf16.msra.mxu2 %v4374_v11  ;;  %937 = vmatpush.bf16.msrb.mxu1 %v4408_v27  ;;  %v4445_v11 = vld [vmem:[%s5552_s8 + $0x10] sm:$0xff]  ;;  %v4427_v27 = vld [vmem:[%s5550_s6 + $0x1c0] sm:$0xff] }
  0x96   :  { %v130_v15 = vpop.f32.mrf.mxu0  ;;  %1182 = vmatpush.bf16.msra.mxu0 %v4430_v9  ;;  %v4450_v9 = vld [vmem:[%s5554_s10 + $0x18] sm:$0xff] }
  0x97   :  { %v170_v16 = vpop.f32.mrf.mxu1 }
  0x98   :  { %v4846_v17 = vadd.f32 %v170_v16, %v130_v15  ;;  %v4439_v15 = vld [vmem:[%s5550_s6 + $0x220] sm:$0xff]  ;;  %v4444_v16 = vld [vmem:[%s5552_s8 + $0x8] sm:$0xff] }
  0x99   :  { %698 = vmatpush.bf16.msra.mxu2 %v4373_v12  ;;  %938 = vmatpush.bf16.msrb.mxu1 %v4407_v33  ;;  %v4419_v12 = vld [vmem:[%s5550_s6 + $0x180] sm:$0xff]  ;;  %v1112_v33 = vpack.c.bf16 %v1111_v30, %v1111_v30  ;;  %v4448_v30 = vld [vmem:[%s5554_s10 + $0x8] sm:$0xff] }
  0x9a   :  { %1104 = vmatpush.bf16.msrb.mxu3 %v4419_v12  ;;  %v4484_v12 = vld [vmem:[%s5554_s10 + $0x128] sm:$0xff] }
  0x9c   :  { %640 = vmatmul.bf16.vlgmr.msra.gmra.mxu1 %v566_v47  ;;  %v4461_v47 = vld [vmem:[%s5554_s10 + $0x70] sm:$0xff] }
  0x9d   :  { %699 = vmatpush.bf16.msra.mxu2 %v4372_v13  ;;  %939 = vmatpush.bf16.msrb.mxu1 %v4406_v40  ;;  %v4429_v13 = vld [vmem:[%s5550_s6 + $0x1d0] sm:$0xff] }
  0x9e   :  { %v132_v19 = vpop.f32.mrf.mxu0  ;;  %1183 = vmatpush.bf16.msra.mxu0 %v4429_v13  ;;  %1416 = vmatpush.bf16.msra.mxu3 %v4462_v44 }
  0x9f   :  { %v4848_v18 = vpop.f32.mrf.mxu3  ;;  %v172_v20 = vpop.f32.mrf.mxu1 }
  0xa0   :  { %v4428_v20 = vld [vmem:[%s5550_s6 + $0x1c8] sm:$0xff] }
  0xa1   :  { %700 = vmatpush.bf16.msra.mxu2 %v4371_v14  ;;  %940 = vmatpush.bf16.msrb.mxu1 %v4405_v48  ;;  %v1030_v14 = vld [vmem:[#allocation2 + $0x2] sm:$0x1] }
  0xa2   :  { %v1031_v19 = vpack.c.bf16 %v1030_v14, %v1030_v14  ;;  %1184 = vmatpush.bf16.msra.mxu0 %v4428_v20  ;;  %1417 = vmatpush.bf16.msra.mxu3 %v4461_v47  ;;  %v4493_v47 = vld [vmem:[%s5554_s10 + $0x170] sm:$0xff] }
  0xa4   :  { %701 = vmatmul.bf16.vlgmr.msra.gmra.mxu2 %v548_v39  ;;  %1105 = vmatmul.bf16.vlgmr.msrb.gmra.mxu3 %v1031_v19  ;;  %v4435_v39 = vld [vmem:[%s5550_s6 + $0x200] sm:$0xff] }
  0xa5   :  { %1016 = vmatpush.bf16.msrb.mxu2 %v4418_v3  ;;  %941 = vmatpush.bf16.msrb.mxu1 %v4404_v54  ;;  %v4458_v54 = vld [vmem:[%s5554_s10 + $0x58] sm:$0xff] }
  0xa6   :  { %v4862_v26 = vpop.f32.mrf.mxu0  ;;  %1185 = vmatpush.bf16.msra.mxu0 %v4427_v27  ;;  %v4483_v27 = vld [vmem:[%s5554_s10 + $0x120] sm:$0xff] }
  0xa7   :  { %v276_v21 = vpop.f32.mrf.mxu3 }
  0xa9   :  { %1017 = vmatpush.bf16.msrb.mxu2 %v4417_v23  ;;  %942 = vmatpush.bf16.msrb.mxu1 %v4403_v59  ;;  %v4456_v59 = vld [vmem:[%s5554_s10 + $0x48] sm:$0xff] }
  0xaa   :  { %1186 = vmatmul.bf16.vlgmr.msra.gmra.mxu0 %v1112_v33 }
  0xad   :  { %1018 = vmatpush.bf16.msrb.mxu2 %v4416_v29  ;;  %1259 = vmatpush.bf16.msra.mxu1 %v4442_v61  ;;  %v4468_v61 = vld [vmem:[%s5554_s10 + $0xa8] sm:$0xff] }
  0xae   :  { %v328_v34 = vpop.f32.mrf.mxu0 }
  0xaf   :  { %v4908_v46 = vpop.f32.mrf.mxu3  ;;  %v1192_v34 = vld [vmem:[#allocation2 + $0xa] sm:$0x1] }
  0xb0   :  { %1329 = vst [vmem:[#allocation2 + $0x8] sm:$0x7] %v4632_v28  ;;  %v1193_v53 = vpack.c.bf16 %v1192_v34, %v1192_v34  ;;  %v4482_v34 = vld [vmem:[%s5554_s10 + $0x118] sm:$0xff] }
  0xb1   :  { %1019 = vmatpush.bf16.msrb.mxu2 %v4415_v35  ;;  %1260 = vmatpush.bf16.msra.mxu1 %v4441_v5  ;;  %v4451_v5 = vld [vmem:[%s5554_s10 + $0x20] sm:$0xff] }
  0xb5   :  { %1020 = vmatpush.bf16.msrb.mxu2 %v4414_v41  ;;  %1261 = vmatpush.bf16.msra.mxu1 %v4440_v10  ;;  %v4465_v10 = vld [vmem:[%s5554_s10 + $0x90] sm:$0xff] }
  0xb7   :  { %v485_v56 = vpop.f32.mrf.mxu3 }
  0xb8   :  { %v4454_v56 = vld [vmem:[%s5554_s10 + $0x38] sm:$0xff] }
  0xb9   :  { %1021 = vmatpush.bf16.msrb.mxu2 %v4413_v49  ;;  %1262 = vmatpush.bf16.msra.mxu1 %v4439_v15 }
  0xba   :  { %1477 = vmatpush.bf16.msrb.mxu0 %v4454_v56 }
  0xbd   :  { %1022 = vmatpush.bf16.msrb.mxu2 %v4412_v55  ;;  %1263 = vmatpush.bf16.msra.mxu1 %v4438_v24  ;;  %v4470_v55 = vld [vmem:[%s5554_s10 + $0xb8] sm:$0xff]  ;;  %v4464_v24 = vld [vmem:[%s5554_s10 + $0x88] sm:$0xff] }
  0xc1   :  { %1023 = vmatpush.bf16.msrb.mxu2 %v4411_v60  ;;  %1264 = vmatpush.bf16.msra.mxu1 %v4437_v32  ;;  %v4453_v60 = vld [vmem:[%s5554_s10 + $0x30] sm:$0xff] }
  0xc2   :  { %1478 = vmatpush.bf16.msrb.mxu0 %v4453_v60  ;;  %v4473_v32 = vld [vmem:[%s5554_s10 + $0xd0] sm:$0xff] }
  0xc3   :  { %v4517_v60 = vld [vmem:[%s5554_s10 + $0x230] sm:$0xff] }
  0xc4   :  { %1024 = vmatmul.bf16.vlgmr.msrb.gmra.mxu2 %v950_v4  ;;  %v4486_v4 = vld [vmem:[%s5554_s10 + $0x138] sm:$0xff] }
  0xc5   :  { %1315 = vmatpush.bf16.msra.mxu2 %v4446_v6  ;;  %v4466_v6 = vld [vmem:[%s5554_s10 + $0x98] sm:$0xff] }
  0xc6   :  { %1479 = vmatpush.bf16.msrb.mxu0 %v4452_v0  ;;  %v4490_v0 = vld [vmem:[%s5554_s10 + $0x158] sm:$0xff] }
  0xc9   :  { %1316 = vmatpush.bf16.msra.mxu2 %v4445_v11  ;;  %v4475_v11 = vld [vmem:[%s5554_s10 + $0xe0] sm:$0xff] }
  0xca   :  { %1480 = vmatpush.bf16.msrb.mxu0 %v4451_v5 }
  0xcd   :  { %1317 = vmatpush.bf16.msra.mxu2 %v4444_v16 }
  0xce   :  { %1481 = vmatpush.bf16.msrb.mxu0 %v4450_v9  ;;  %v4496_v9 = vld [vmem:[%s5554_s10 + $0x188] sm:$0xff] }
  0xd1   :  { %1318 = vmatpush.bf16.msra.mxu2 %v4443_v25  ;;  %v4474_v25 = vld [vmem:[%s5554_s10 + $0xd8] sm:$0xff] }
  0xd5   :  { %1557 = vmatpush.bf16.msrb.mxu2 %v4470_v55  ;;  %v1490_v55 = vld [vmem:[#allocation2 + $0x8] sm:$0x1] }
  0xd6   :  { %v1491_v56 = vpack.c.bf16 %v1490_v55, %v1490_v55  ;;  %v4530_v55 = vld [vmem:[%s5556_s12 + $0x58] sm:$0xff] }
  0xd9   :  { %1558 = vmatpush.bf16.msrb.mxu2 %v4469_v58  ;;  %v4498_v58 = vld [vmem:[%s5554_s10 + $0x198] sm:$0xff] }
  0xdd   :  { %1559 = vmatpush.bf16.msrb.mxu2 %v4468_v61 }
  0xe1   :  { %1560 = vmatpush.bf16.msrb.mxu2 %v4467_v1  ;;  %v4497_v1 = vld [vmem:[%s5554_s10 + $0x190] sm:$0xff] }
  0xe5   :  { %1561 = vmatpush.bf16.msrb.mxu2 %v4466_v6 }
  0xe9   :  { %1562 = vmatpush.bf16.msrb.mxu2 %v4465_v10  ;;  %v4506_v10 = vld [vmem:[%s5554_s10 + $0x1d8] sm:$0xff] }
  0xed   :  { %1563 = vmatpush.bf16.msrb.mxu2 %v4464_v24  ;;  %v1733_v24 = vld [vmem:[#allocation2 + $0x9] sm:$0x1] }
 0x101   :  { %v536_v7 = vpop.f32.mrf.mxu0 }
 0x107   :  { %v222_v3 = vpop.f32.mrf.mxu2 }
 0x108   :  { %v226_v23 = vadd.f32 %v222_v3, %v4846_v17  ;;  %v1273_v17 = vld [vmem:[%s5547_s3] sm:$0x1]  ;;  %v5095_v3 = vpop.f32.mrf.mxu3 }
 0x109   :  { %v379_v21 = vpop.f32.mrf.mxu1  ;;  %v538_v22 = vpop.f32.mrf.mxu0  ;;  %v1274_v29 = vpack.c.bf16 %v1273_v17, %v1273_v17 }
 0x10a   :  { %v278_v31 = vadd.f32 %v4848_v18, %v226_v23  ;;  %v4436_v18 = vld [vmem:[%s5550_s6 + $0x208] sm:$0xff]  ;;  %v4449_v23 = vld [vmem:[%s5554_s10 + $0x10] sm:$0xff] }
 0x10b   :  { %3470 = vmatmul.msk.bf16.vlgmr.msra.gmra.mxu2 %vm117_vm0, %v1274_v29  ;;  %1265 = vmatpush.bf16.msra.mxu1 %v4436_v18 }
 0x10c   :  { %v330_v37 = vadd.f32 %v4862_v26, %v278_v31  ;;  %v541_v26 = vld [vmem:[%s5549_s5] sm:$0x1]  ;;  %1482 = vmatpush.bf16.msrb.mxu0 %v4449_v23 }
 0x10d   :  { %v4463_v31 = vld [vmem:[%s5554_s10 + $0x80] sm:$0xff] }
 0x10e   :  { %v383_v38 = vadd.f32 %v379_v21, %v330_v37  ;;  %1564 = vmatpush.bf16.msrb.mxu2 %v4463_v31  ;;  %v4447_v37 = vld [vmem:[%s5554_s10] sm:$0xff] }
 0x10f   :  { %v224_v35 = vpop.f32.mrf.mxu2  ;;  %1266 = vmatpush.bf16.msra.mxu1 %v4435_v39  ;;  %v4481_v39 = vld [vmem:[%s5554_s10 + $0x110] sm:$0xff]  ;;  %v4487_v23 = vld [vmem:[%s5554_s10 + $0x140] sm:$0xff] }
 0x110   :  { %v784_v20 = vpop.f32.mrf.mxu3  ;;  %v4502_v35 = vld [vmem:[%s5554_s10 + $0x1b8] sm:$0xff]  ;;  %1483 = vmatpush.bf16.msrb.mxu0 %v4448_v30 }
 0x111   :  { %v381_v36 = vpop.f32.mrf.mxu1  ;;  %v5097_v19 = vpop.f32.mrf.mxu0 }
 0x112   :  { %1881 = vmatpush.bf16.msra.mxu2 %v4502_v35  ;;  %v4512_v35 = vld [vmem:[%s5554_s10 + $0x208] sm:$0xff] }
 0x114   :  { %1484 = vmatpush.bf16.msrb.mxu0 %v4447_v37 }
 0x117   :  { %v431_v40 = vpop.f32.mrf.mxu2 }
 0x118   :  { %v435_v41 = vadd.f32 %v431_v40, %v383_v38  ;;  %v4472_v38 = vld [vmem:[%s5554_s10 + $0xc8] sm:$0xff]  ;;  %v4494_v40 = vld [vmem:[%s5554_s10 + $0x178] sm:$0xff] }
 0x119   :  { %v5091_v13 = vpop.f32.mrf.mxu1  ;;  %v865_v22 = vpop.f32.mrf.mxu0  ;;  %1800 = vmatpush.bf16.msra.mxu0 %v4494_v40 }
 0x11a   :  { %v487_v42 = vadd.f32 %v4908_v46, %v435_v41  ;;  %v4460_v46 = vld [vmem:[%s5554_s10 + $0x68] sm:$0xff]  ;;  %v4501_v41 = vld [vmem:[%s5554_s10 + $0x1b0] sm:$0xff] }
 0x11b   :  { %1418 = vmatpush.bf16.msra.mxu3 %v4460_v46  ;;  %1882 = vmatpush.bf16.msra.mxu2 %v4501_v41  ;;  %v4479_v46 = vld [vmem:[%s5554_s10 + $0x100] sm:$0xff] }
 0x11c   :  { %v540_v43 = vadd.f32 %v536_v7, %v487_v42  ;;  %v4476_v7 = vld [vmem:[%s5554_s10 + $0xe8] sm:$0xff]  ;;  %1565 = vmatmul.bf16.vlgmr.msrb.gmra.mxu2 %v1491_v56  ;;  %v1324_v41 = vld [vmem:[%s5551_s7] sm:$0x1] }
 0x11d   :  { %1801 = vmatpush.bf16.msra.mxu0 %v4493_v47  ;;  %v4533_v47 = vld [vmem:[%s5556_s12 + $0x70] sm:$0xff]  ;;  %v4524_v56 = vld [vmem:[%s5556_s12 + $0x28] sm:$0xff] }
 0x11e   :  { %v542_v45 = vadd.f32 %v541_v26, %v540_v43  ;;  %v4471_v26 = vld [vmem:[%s5554_s10 + $0xc0] sm:$0xff]  ;;  %v4480_v43 = vld [vmem:[%s5554_s10 + $0x108] sm:$0xff] }
 0x11f   :  { %v433_v48 = vpop.f32.mrf.mxu2  ;;  %1419 = vmatpush.bf16.msra.mxu3 %v4459_v50  ;;  %v4492_v50 = vld [vmem:[%s5554_s10 + $0x168] sm:$0xff] }
 0x120   :  { %v543_v49 = vmax.f32 %v542_v45, 0.0  ;;  %v4500_v48 = vld [vmem:[%s5554_s10 + $0x1a8] sm:$0xff] }
 0x121   :  { %v643_v15 = vpop.f32.mrf.mxu1  ;;  %1883 = vmatpush.bf16.msra.mxu2 %v4500_v48  ;;  %1802 = vmatpush.bf16.msra.mxu0 %v4492_v50  ;;  %v4531_v50 = vld [vmem:[%s5556_s12 + $0x60] sm:$0xff] }
 0x122   :  { %546 = vst [vmem:[#allocation2 + $0x5] sm:$0x1] %v543_v49  ;;  %v4510_v49 = vld [vmem:[%s5554_s10 + $0x1f8] sm:$0xff]  ;;  %v4495_v15 = vld [vmem:[%s5554_s10 + $0x180] sm:$0xff] }
 0x123   :  { %1420 = vmatpush.bf16.msra.mxu3 %v4458_v54  ;;  %v4518_v54 = vld [vmem:[%s5554_s10 + $0x238] sm:$0xff] }
 0x127   :  { %1421 = vmatpush.bf16.msra.mxu3 %v4457_v57  ;;  %v5093_v14 = vpop.f32.mrf.mxu2  ;;  %v5113_v29 = vpop.f32.mrf.mxu3  ;;  %v4491_v57 = vld [vmem:[%s5554_s10 + $0x160] sm:$0xff] }
 0x128   :  { %v5124_v33 = vpop.f32.mrf.mxu0  ;;  %1803 = vmatpush.bf16.msra.mxu0 %v4491_v57  ;;  %v4542_v57 = vld [vmem:[%s5556_s12 + $0xb8] sm:$0xff] }
 0x129   :  { %v868_v51 = vld [vmem:[#allocation2 + $0x5] sm:$0x1] }
 0x12a   :  { %v869_v52 = vpack.c.bf16 %v868_v51, %v868_v51  ;;  %1328 = vst [vmem:[#allocation2] sm:$0x77] %v4632_v28  ;;  %v4499_v51 = vld [vmem:[%s5554_s10 + $0x1a0] sm:$0xff] }
 0x12b   :  { %1422 = vmatpush.bf16.msra.mxu3 %v4456_v59  ;;  %1884 = vmatpush.bf16.msra.mxu2 %v4499_v51  ;;  %v4508_v59 = vld [vmem:[%s5554_s10 + $0x1e8] sm:$0xff] }
 0x12c   :  { %943 = vmatmul.bf16.vlgmr.msrb.gmra.mxu1 %v869_v52  ;;  %v4509_v52 = vld [vmem:[%s5554_s10 + $0x1f0] sm:$0xff]  ;;  %1804 = vmatpush.bf16.msra.mxu0 %v4490_v0  ;;  %v4540_v0 = vld [vmem:[%s5556_s12 + $0xa8] sm:$0xff] }
 0x12d   :  { %1638 = vmatpush.bf16.msrb.mxu1 %v4478_v62 }
 0x12f   :  { %1423 = vmatpush.bf16.msra.mxu3 %v4455_v63  ;;  %v704_v16 = vpop.f32.mrf.mxu2  ;;  %v1108_v44 = vpop.f32.mrf.mxu3  ;;  %v703_v63 = vadd.f32 %v5093_v14, %v5091_v13  ;;  %1885 = vmatpush.bf16.msra.mxu2 %v4498_v58  ;;  %v4488_v14 = vld [vmem:[%s5554_s10 + $0x148] sm:$0xff]  ;;  %v4529_v58 = vld [vmem:[%s5556_s12 + $0x50] sm:$0xff] }
 0x130   :  { %v1189_v45 = vpop.f32.mrf.mxu0  ;;  %v4505_v16 = vld [vmem:[%s5554_s10 + $0x1d0] sm:$0xff]  ;;  %v4534_v44 = vld [vmem:[%s5556_s12 + $0x78] sm:$0xff] }
 0x131   :  { %1639 = vmatpush.bf16.msrb.mxu1 %v4477_v2  ;;  %v1349_v36 = vld [vmem:[#allocation2 + $0x4] sm:$0x1]  ;;  %v1331_v61 = vld [vmem:[#allocation2] sm:$0x1]  ;;  %v1571_v5 = vld [vmem:[#allocation2 + $0x1] sm:$0x1] }
 0x132   :  { %v1350_v18 = vpack.c.bf16 %v1349_v36, %v1349_v36  ;;  %v1332_v62 = vpack.c.bf16 %v1331_v61, %v1331_v61  ;;  %v4507_v2 = vld [vmem:[%s5554_s10 + $0x1e0] sm:$0xff]  ;;  %v1572_v6 = vpack.c.bf16 %v1571_v5, %v1571_v5  ;;  %v4526_v45 = vld [vmem:[%s5556_s12 + $0x38] sm:$0xff]  ;;  %v4548_v61 = vld [vmem:[%s5556_s12 + $0xe8] sm:$0xff] }
 0x133   :  { %1719 = vmatpush.bf16.msrb.mxu3 %v4486_v4  ;;  %v4516_v4 = vld [vmem:[%s5554_s10 + $0x228] sm:$0xff]  ;;  %1886 = vmatpush.bf16.msra.mxu2 %v4497_v1  ;;  %v1814_v20 = vld [vmem:[#allocation2 + $0x2] sm:$0x1]  ;;  %v1895_v36 = vld [vmem:[#allocation2 + $0x6] sm:$0x1] }
 0x134   :  { %1424 = vmatmul.bf16.vlgmr.msra.gmra.mxu3 %v1350_v18  ;;  %1485 = vmatmul.bf16.vlgmr.msrb.gmra.mxu0 %v1332_v62  ;;  %v1815_v22 = vpack.c.bf16 %v1814_v20, %v1814_v20  ;;  %v1283_v18 = vld [vmem:[%s5553_s9] sm:$0x1]  ;;  %v4528_v62 = vld [vmem:[%s5556_s12 + $0x48] sm:$0xff] }
 0x135   :  { %1640 = vmatpush.bf16.msrb.mxu1 %v4476_v7  ;;  %v786_v7 = vadd.f32 %v5095_v3, %v703_v63  ;;  %v4522_v63 = vld [vmem:[%s5556_s12 + $0x18] sm:$0xff]  ;;  %v4547_v1 = vld [vmem:[%s5556_s12 + $0xe0] sm:$0xff] }
 0x136   :  { %v4539_v5 = vld [vmem:[%s5556_s12 + $0xa0] sm:$0xff] }
 0x137   :  { %1720 = vmatpush.bf16.msrb.mxu3 %v4485_v8  ;;  %v4489_v8 = vld [vmem:[%s5554_s10 + $0x150] sm:$0xff]  ;;  %v867_v13 = vadd.f32 %v5097_v19, %v786_v7  ;;  %1887 = vmatpush.bf16.msra.mxu2 %v4496_v9  ;;  %v4514_v19 = vld [vmem:[%s5554_s10 + $0x218] sm:$0xff] }
 0x138   :  { %1805 = vmatpush.bf16.msra.mxu0 %v4489_v8  ;;  %v4558_v7 = vld [vmem:[%s5556_s12 + $0x138] sm:$0xff]  ;;  %v4520_v8 = vld [vmem:[%s5556_s12 + $0x8] sm:$0xff] }
 0x139   :  { %1641 = vmatpush.bf16.msrb.mxu1 %v4475_v11  ;;  %v4515_v11 = vld [vmem:[%s5554_s10 + $0x220] sm:$0xff]  ;;  %v4538_v9 = vld [vmem:[%s5556_s12 + $0x98] sm:$0xff] }
 0x13b   :  { %1721 = vmatpush.bf16.msrb.mxu3 %v4484_v12  ;;  %1888 = vmatpush.bf16.msra.mxu2 %v4495_v15  ;;  %v4556_v15 = vld [vmem:[%s5556_s12 + $0x128] sm:$0xff] }
 0x13c   :  { %1267 = vmatmul.bf16.vlgmr.msra.gmra.mxu1 %v1193_v53  ;;  %1806 = vmatpush.bf16.msra.mxu0 %v4488_v14  ;;  %v4544_v14 = vld [vmem:[%s5556_s12 + $0xc8] sm:$0xff] }
 0x13d   :  { %1642 = vmatpush.bf16.msrb.mxu1 %v4474_v25  ;;  %v4504_v25 = vld [vmem:[%s5554_s10 + $0x1c8] sm:$0xff] }
 0x13e   :  { %1889 = vmatmul.bf16.vlgmr.msra.gmra.mxu2 %v1815_v22 }
 0x13f   :  { %1722 = vmatpush.bf16.msrb.mxu3 %v4483_v27  ;;  %v4513_v27 = vld [vmem:[%s5554_s10 + $0x210] sm:$0xff]  ;;  %2209 = vmatpush.bf16.msrb.mxu2 %v4526_v45  ;;  %v4580_v45 = vld [vmem:[%s5556_s12 + $0x1e8] sm:$0xff] }
 0x140   :  { %1807 = vmatpush.bf16.msra.mxu0 %v4487_v23 }
 0x141   :  { %1643 = vmatpush.bf16.msrb.mxu1 %v4473_v32  ;;  %v1734_v32 = vpack.c.bf16 %v1733_v24, %v1733_v24 }
 0x143   :  { %1723 = vmatpush.bf16.msrb.mxu3 %v4482_v34  ;;  %v4503_v34 = vld [vmem:[%s5554_s10 + $0x1c0] sm:$0xff] }
 0x144   :  { %1808 = vmatmul.bf16.vlgmr.msra.gmra.mxu0 %v1734_v32  ;;  %v4565_v32 = vld [vmem:[%s5556_s12 + $0x170] sm:$0xff] }
 0x145   :  { %1644 = vmatpush.bf16.msrb.mxu1 %v4472_v38  ;;  %v4511_v38 = vld [vmem:[%s5554_s10 + $0x200] sm:$0xff]  ;;  %2148 = vmatpush.bf16.msrb.mxu0 %v4534_v44  ;;  %v4573_v44 = vld [vmem:[%s5556_s12 + $0x1b0] sm:$0xff] }
 0x147   :  { %v5099_v21 = vpop.f32.mrf.mxu2  ;;  %1724 = vmatpush.bf16.msrb.mxu3 %v4481_v39 }
 0x149   :  { %1645 = vmatpush.bf16.msrb.mxu1 %v4471_v26  ;;  %2149 = vmatpush.bf16.msrb.mxu0 %v4533_v47 }
 0x14b   :  { %1725 = vmatpush.bf16.msrb.mxu3 %v4480_v43 }
 0x14c   :  { %1646 = vmatmul.bf16.vlgmr.msrb.gmra.mxu1 %v1572_v6  ;;  %v4546_v6 = vld [vmem:[%s5556_s12 + $0xd8] sm:$0xff] }
 0x14d   :  { %1962 = vmatpush.bf16.msra.mxu1 %v4510_v49 }
 0x14f   :  { %v1027_v17 = vpop.f32.mrf.mxu2  ;;  %1726 = vmatpush.bf16.msrb.mxu3 %v4479_v46  ;;  %v4532_v46 = vld [vmem:[%s5556_s12 + $0x68] sm:$0xff] }
 0x150   :  { %v1976_v17 = vld [vmem:[#allocation2 + $0xa] sm:$0x1]  ;;  %2150 = vmatpush.bf16.msrb.mxu0 %v4532_v46  ;;  %v4562_v46 = vld [vmem:[%s5556_s12 + $0x158] sm:$0xff] }
 0x151   :  { %1963 = vmatpush.bf16.msra.mxu1 %v4509_v52  ;;  %2061 = vst [vmem:[#allocation2 + $0x8] sm:$0x7] %v4632_v28  ;;  %v4550_v52 = vld [vmem:[%s5556_s12 + $0xf8] sm:$0xff] }
 0x153   :  { %2043 = vmatpush.bf16.msra.mxu3 %v4518_v54  ;;  %v1977_v54 = vpack.c.bf16 %v1976_v17, %v1976_v17  ;;  %v4536_v17 = vld [vmem:[%s5556_s12 + $0x88] sm:$0xff] }
 0x154   :  { %2151 = vmatpush.bf16.msrb.mxu0 %v4531_v50 }
 0x155   :  { %1964 = vmatpush.bf16.msra.mxu1 %v4508_v59  ;;  %v4523_v59 = vld [vmem:[%s5556_s12 + $0x20] sm:$0xff] }
 0x157   :  { %2044 = vmatpush.bf16.msra.mxu3 %v4517_v60  ;;  %v4541_v60 = vld [vmem:[%s5556_s12 + $0xb0] sm:$0xff] }
 0x158   :  { %2152 = vmatpush.bf16.msrb.mxu0 %v4530_v55 }
 0x159   :  { %1965 = vmatpush.bf16.msra.mxu1 %v4507_v2  ;;  %v4527_v2 = vld [vmem:[%s5556_s12 + $0x40] sm:$0xff] }
 0x15b   :  { %2045 = vmatpush.bf16.msra.mxu3 %v4516_v4  ;;  %v4521_v4 = vld [vmem:[%s5556_s12 + $0x10] sm:$0xff] }
 0x15c   :  { %2153 = vmatpush.bf16.msrb.mxu0 %v4529_v58  ;;  %v4571_v58 = vld [vmem:[%s5556_s12 + $0x1a0] sm:$0xff] }
 0x15d   :  { %1966 = vmatpush.bf16.msra.mxu1 %v4506_v10  ;;  %v4545_v10 = vld [vmem:[%s5556_s12 + $0xd0] sm:$0xff] }
 0x15f   :  { %2046 = vmatpush.bf16.msra.mxu3 %v4515_v11  ;;  %v4557_v11 = vld [vmem:[%s5556_s12 + $0x130] sm:$0xff] }
 0x160   :  { %2154 = vmatpush.bf16.msrb.mxu0 %v4528_v62 }
 0x161   :  { %1967 = vmatpush.bf16.msra.mxu1 %v4505_v16  ;;  %v4566_v16 = vld [vmem:[%s5556_s12 + $0x178] sm:$0xff] }
 0x163   :  { %2047 = vmatpush.bf16.msra.mxu3 %v4514_v19 }
 0x164   :  { %2155 = vmatpush.bf16.msrb.mxu0 %v4527_v2  ;;  %v4589_v2 = vld [vmem:[%s5556_s12 + $0x230] sm:$0xff] }
 0x165   :  { %1968 = vmatpush.bf16.msra.mxu1 %v4504_v25 }
 0x167   :  { %2048 = vmatpush.bf16.msra.mxu3 %v4513_v27 }
 0x168   :  { %2451 = vmatpush.bf16.msra.mxu0 %v4558_v7 }
 0x169   :  { %1969 = vmatpush.bf16.msra.mxu1 %v4503_v34  ;;  %v4582_v34 = vld [vmem:[%s5556_s12 + $0x1f8] sm:$0xff] }
 0x16b   :  { %2049 = vmatpush.bf16.msra.mxu3 %v4512_v35 }
 0x16c   :  { %2452 = vmatpush.bf16.msra.mxu0 %v4557_v11  ;;  %v4568_v11 = vld [vmem:[%s5556_s12 + $0x188] sm:$0xff] }
 0x16d   :  { %2289 = vmatpush.bf16.msrb.mxu1 %v4542_v57 }
 0x16f   :  { %2050 = vmatpush.bf16.msra.mxu3 %v4511_v38  ;;  %v4581_v38 = vld [vmem:[%s5556_s12 + $0x1f0] sm:$0xff] }
 0x170   :  { %2453 = vmatpush.bf16.msra.mxu0 %v4556_v15 }
 0x171   :  { %2290 = vmatpush.bf16.msrb.mxu1 %v4541_v60  ;;  %v4590_v60 = vld [vmem:[%s5556_s12 + $0x238] sm:$0xff] }
 0x175   :  { %2291 = vmatpush.bf16.msrb.mxu1 %v4540_v0  ;;  %v4570_v0 = vld [vmem:[%s5556_s12 + $0x198] sm:$0xff] }
 0x179   :  { %2292 = vmatpush.bf16.msrb.mxu1 %v4539_v5  ;;  %v4569_v5 = vld [vmem:[%s5556_s12 + $0x190] sm:$0xff] }
 0x17d   :  { %2293 = vmatpush.bf16.msrb.mxu1 %v4538_v9  ;;  %v2465_v9 = vld [vmem:[#allocation2 + $0x9] sm:$0x1] }
 0x18e   :  { %v5147_v42 = vpop.f32.mrf.mxu2 }
 0x196   :  { %v1322_v53 = vpop.f32.mrf.mxu2 }
 0x19f   :  { %v5369_v22 = vpop.f32.mrf.mxu2 }
 0x1a7   :  { %v1568_v25 = vpop.f32.mrf.mxu2 }
 0x1a9   :  { %v944_v12 = vpop.f32.mrf.mxu1 }
 0x1aa   :  { %v948_v3 = vadd.f32 %v944_v12, %v867_v13  ;;  %v4519_v12 = vld [vmem:[%s5556_s12] sm:$0xff]  ;;  %v4537_v13 = vld [vmem:[%s5556_s12 + $0x90] sm:$0xff] }
 0x1ab   :  { %2294 = vmatpush.bf16.msrb.mxu1 %v4537_v13  ;;  %v4587_v13 = vld [vmem:[%s5556_s12 + $0x220] sm:$0xff] }
 0x1ac   :  { %v1029_v30 = vadd.f32 %v5099_v21, %v948_v3  ;;  %v1896_v21 = vpack.c.bf16 %v1895_v36, %v1895_v36  ;;  %v4535_v36 = vld [vmem:[%s5556_s12 + $0x80] sm:$0xff] }
 0x1ae   :  { %v1110_v37 = vadd.f32 %v5113_v29, %v1029_v30  ;;  %v1321_v29 = vadd.f32 %v5147_v42, %v1283_v18  ;;  %1970 = vmatmul.bf16.vlgmr.msra.gmra.mxu1 %v1896_v21  ;;  %v4525_v42 = vld [vmem:[%s5556_s12 + $0x30] sm:$0xff]  ;;  %v4543_v30 = vld [vmem:[%s5556_s12 + $0xc0] sm:$0xff]  ;;  %v4564_v21 = vld [vmem:[%s5556_s12 + $0x168] sm:$0xff] }
 0x1af   :  { %2210 = vmatpush.bf16.msrb.mxu2 %v4525_v42  ;;  %2295 = vmatpush.bf16.msrb.mxu1 %v4536_v17  ;;  %v4574_v18 = vld [vmem:[%s5556_s12 + $0x1b8] sm:$0xff]  ;;  %v4585_v17 = vld [vmem:[%s5556_s12 + $0x210] sm:$0xff] }
 0x1b0   :  { %v1191_v39 = vadd.f32 %v5124_v33, %v1110_v37  ;;  %v4554_v37 = vld [vmem:[%s5556_s12 + $0x118] sm:$0xff] }
 0x1b1   :  { %v946_v31 = vpop.f32.mrf.mxu1  ;;  %v5367_v20 = vpop.f32.mrf.mxu0 }
 0x1b2   :  { %v4555_v31 = vld [vmem:[%s5556_s12 + $0x120] sm:$0xff] }
 0x1b3   :  { %2211 = vmatpush.bf16.msrb.mxu2 %v4524_v56  ;;  %2454 = vmatpush.bf16.msra.mxu0 %v4555_v31  ;;  %v4551_v56 = vld [vmem:[%s5556_s12 + $0x100] sm:$0xff] }
 0x1b4   :  { %2296 = vmatpush.bf16.msrb.mxu1 %v4535_v36 }
 0x1b7   :  { %2212 = vmatpush.bf16.msrb.mxu2 %v4523_v59  ;;  %v5365_v3 = vpop.f32.mrf.mxu3  ;;  %2455 = vmatpush.bf16.msra.mxu0 %v4554_v37  ;;  %v4578_v59 = vld [vmem:[%s5556_s12 + $0x1d8] sm:$0xff] }
 0x1b8   :  { %2613 = vmatpush.bf16.msra.mxu1 %v4574_v18  ;;  %v1487_v7 = vadd.f32 %v5367_v20, %v5365_v3  ;;  %v4586_v20 = vld [vmem:[%s5556_s12 + $0x218] sm:$0xff] }
 0x1b9   :  { %v1268_v40 = vpop.f32.mrf.mxu1  ;;  %v1488_v24 = vpop.f32.mrf.mxu0 }
 0x1ba   :  { %v1272_v26 = vadd.f32 %v1268_v40, %v1191_v39 }
 0x1bb   :  { %2213 = vmatpush.bf16.msrb.mxu2 %v4522_v63  ;;  %v4560_v63 = vld [vmem:[%s5556_s12 + $0x148] sm:$0xff] }
 0x1bc   :  { %v1325_v43 = vadd.f32 %v1324_v41, %v1272_v26  ;;  %2614 = vmatpush.bf16.msra.mxu1 %v4573_v44 }
 0x1be   :  { %v5266_v33 = vadd.f32 %v1325_v43, %v1321_v29  ;;  %v4553_v29 = vld [vmem:[%s5556_s12 + $0x110] sm:$0xff]  ;;  %v4563_v43 = vld [vmem:[%s5556_s12 + $0x160] sm:$0xff] }
 0x1bf   :  { %2214 = vmatpush.bf16.msrb.mxu2 %v4521_v4  ;;  %v1427_v19 = vpop.f32.mrf.mxu3  ;;  %2456 = vmatpush.bf16.msra.mxu0 %v4553_v29  ;;  %v4559_v4 = vld [vmem:[%s5556_s12 + $0x140] sm:$0xff]  ;;  %v2708_v29 = vld [vmem:[#allocation2 + $0xa] sm:$0x1] }
 0x1c0   :  { %v1327_v48 = vmax.f32 %v5266_v33, 0.0  ;;  %v4567_v19 = vld [vmem:[%s5556_s12 + $0x180] sm:$0xff] }
 0x1c1   :  { %v1270_v49 = vpop.f32.mrf.mxu1  ;;  %v5388_v35 = vpop.f32.mrf.mxu0 }
 0x1c2   :  { %1330 = vst [vmem:[#allocation2 + $0x5] sm:$0x1] %v1327_v48  ;;  %v5405_v39 = vpop.f32.mrf.mxu2  ;;  %v4552_v49 = vld [vmem:[%s5556_s12 + $0x108] sm:$0xff] }
 0x1c3   :  { %2215 = vmatpush.bf16.msrb.mxu2 %v4520_v8  ;;  %2457 = vmatpush.bf16.msra.mxu0 %v4552_v49  ;;  %v4588_v8 = vld [vmem:[%s5556_s12 + $0x228] sm:$0xff] }
 0x1c7   :  { %2216 = vmatpush.bf16.msrb.mxu2 %v4519_v12  ;;  %2458 = vmatpush.bf16.msra.mxu0 %v4551_v56  ;;  %v4575_v12 = vld [vmem:[%s5556_s12 + $0x1c0] sm:$0xff] }
 0x1c8   :  { %v4595_v56 = vld [vmem:[%s5558_s14 + $0x20] sm:$0xff] }
 0x1c9   :  { %v1652_v51 = vld [vmem:[#allocation2 + $0x5] sm:$0x1]  ;;  %v5371_v23 = vpop.f32.mrf.mxu1 }
 0x1ca   :  { %v1653_v53 = vpack.c.bf16 %v1652_v51, %v1652_v51  ;;  %2060 = vst [vmem:[#allocation2] sm:$0x77] %v4632_v28  ;;  %v4549_v28 = vld [vmem:[%s5556_s12 + $0xf0] sm:$0xff]  ;;  %v1811_v51 = vpop.f32.mrf.mxu0  ;;  %v1892_v55 = vpop.f32.mrf.mxu2 }
 0x1cb   :  { %2532 = vmatpush.bf16.msra.mxu2 %v4566_v16 }
 0x1cc   :  { %1727 = vmatmul.bf16.vlgmr.msrb.gmra.mxu3 %v1653_v53  ;;  %v4579_v53 = vld [vmem:[%s5556_s12 + $0x1e0] sm:$0xff] }
 0x1cd   :  { %2370 = vmatpush.bf16.msrb.mxu3 %v4550_v52  ;;  %v4572_v52 = vld [vmem:[%s5556_s12 + $0x1a8] sm:$0xff] }
 0x1ce   :  { %2615 = vmatpush.bf16.msra.mxu1 %v4572_v52  ;;  %v4597_v52 = vld [vmem:[%s5558_s14 + $0x30] sm:$0xff] }
 0x1cf   :  { %2533 = vmatpush.bf16.msra.mxu2 %v4565_v32  ;;  %v4584_v32 = vld [vmem:[%s5556_s12 + $0x208] sm:$0xff] }
 0x1d1   :  { %2371 = vmatpush.bf16.msrb.mxu3 %v4549_v28  ;;  %v1649_v27 = vpop.f32.mrf.mxu1  ;;  %v2081_v40 = vld [vmem:[#allocation2 + $0x4] sm:$0x1]  ;;  %v2063_v47 = vld [vmem:[#allocation2] sm:$0x1]  ;;  %v2303_v50 = vld [vmem:[#allocation2 + $0x1] sm:$0x1] }
 0x1d2   :  { %v2082_v41 = vpack.c.bf16 %v2081_v40, %v2081_v40  ;;  %v2064_v42 = vpack.c.bf16 %v2063_v47, %v2063_v47  ;;  %v4561_v28 = vld [vmem:[%s5556_s12 + $0x150] sm:$0xff]  ;;  %2616 = vmatpush.bf16.msra.mxu1 %v4571_v58  ;;  %v2627_v15 = vld [vmem:[#allocation2 + $0x6] sm:$0x1]  ;;  %v2546_v25 = vld [vmem:[#allocation2 + $0x2] sm:$0x1] }
 0x1d3   :  { %2534 = vmatpush.bf16.msra.mxu2 %v4564_v21  ;;  %v2628_v16 = vpack.c.bf16 %v2627_v15, %v2627_v15 }
 0x1d4   :  { %2156 = vmatmul.bf16.vlgmr.msrb.gmra.mxu0 %v2082_v41  ;;  %2217 = vmatmul.bf16.vlgmr.msrb.gmra.mxu2 %v2064_v42 }
 0x1d5   :  { %2372 = vmatpush.bf16.msrb.mxu3 %v4548_v61  ;;  %v2222_v61 = vld [vmem:[#allocation2 + $0x8] sm:$0x1]  ;;  %2775 = vmatpush.bf16.msrb.mxu0 %v4590_v60  ;;  %v4593_v60 = vld [vmem:[%s5558_s14 + $0x10] sm:$0xff] }
 0x1d6   :  { %v2223_v62 = vpack.c.bf16 %v2222_v61, %v2222_v61  ;;  %2617 = vmatpush.bf16.msra.mxu1 %v4570_v0 }
 0x1d7   :  { %2535 = vmatpush.bf16.msra.mxu2 %v4563_v43  ;;  %v2709_v43 = vpack.c.bf16 %v2708_v29, %v2708_v29 }
 0x1d8   :  { %2297 = vmatmul.bf16.vlgmr.msrb.gmra.mxu1 %v2223_v62  ;;  %v4592_v62 = vld [vmem:[%s5558_s14 + $0x8] sm:$0xff] }
 0x1d9   :  { %2373 = vmatpush.bf16.msrb.mxu3 %v4547_v1  ;;  %v4577_v1 = vld [vmem:[%s5556_s12 + $0x1d0] sm:$0xff]  ;;  %2776 = vmatpush.bf16.msrb.mxu0 %v4589_v2 }
 0x1da   :  { %2618 = vmatpush.bf16.msra.mxu1 %v4569_v5 }
 0x1db   :  { %2536 = vmatpush.bf16.msra.mxu2 %v4562_v46 }
 0x1dc   :  { %2051 = vmatmul.bf16.vlgmr.msra.gmra.mxu3 %v1977_v54  ;;  %v2304_v54 = vpack.c.bf16 %v2303_v50, %v2303_v50 }
 0x1dd   :  { %2374 = vmatpush.bf16.msrb.mxu3 %v4546_v6  ;;  %v4576_v6 = vld [vmem:[%s5556_s12 + $0x1c8] sm:$0xff]  ;;  %2777 = vmatpush.bf16.msrb.mxu0 %v4588_v8 }
 0x1de   :  { %2619 = vmatpush.bf16.msra.mxu1 %v4568_v11  ;;  %v2789_v11 = vld [vmem:[%s5557_s13] sm:$0x1] }
 0x1df   :  { %2537 = vmatpush.bf16.msra.mxu2 %v4561_v28  ;;  %v4594_v28 = vld [vmem:[%s5558_s14 + $0x18] sm:$0xff] }
 0x1e1   :  { %2375 = vmatpush.bf16.msrb.mxu3 %v4545_v10  ;;  %v2466_v10 = vpack.c.bf16 %v2465_v9, %v2465_v9  ;;  %2778 = vmatpush.bf16.msrb.mxu0 %v4587_v13 }
 0x1e2   :  { %2620 = vmatpush.bf16.msra.mxu1 %v4567_v19  ;;  %v2812_v19 = vld [vmem:[%s5559_s15] sm:$0x1] }
 0x1e3   :  { %2538 = vmatpush.bf16.msra.mxu2 %v4560_v63  ;;  %v4591_v63 = vld [vmem:[%s5558_s14] sm:$0xff] }
 0x1e5   :  { %2376 = vmatpush.bf16.msrb.mxu3 %v4544_v14  ;;  %v1570_v14 = vadd.f32 %v5369_v22, %v1487_v7  ;;  %v2547_v22 = vpack.c.bf16 %v2546_v25, %v2546_v25  ;;  %2779 = vmatpush.bf16.msrb.mxu0 %v4586_v20 }
 0x1e7   :  { %2539 = vmatpush.bf16.msra.mxu2 %v4559_v4  ;;  %v1651_v24 = vadd.f32 %v5371_v23, %v1570_v14 }
 0x1e8   :  { %2621 = vmatmul.bf16.vlgmr.msra.gmra.mxu1 %v2547_v22 }
 0x1e9   :  { %2377 = vmatpush.bf16.msrb.mxu3 %v4543_v30  ;;  %2780 = vmatpush.bf16.msrb.mxu0 %v4585_v17 }
 0x1ea   :  { %2540 = vmatmul.bf16.vlgmr.msra.gmra.mxu2 %v2466_v10 }
 0x1ec   :  { %2378 = vmatmul.bf16.vlgmr.msrb.gmra.mxu3 %v2304_v54  ;;  %v4596_v54 = vld [vmem:[%s5558_s14 + $0x28] sm:$0xff] }
 0x1ed   :  { %2694 = vmatpush.bf16.msra.mxu3 %v4582_v34  ;;  %2781 = vmatpush.bf16.msrb.mxu0 %v4584_v32  ;;  %v4583_v34 = vld [vmem:[%s5556_s12 + $0x200] sm:$0xff] }
 0x1f1   :  { %2695 = vmatpush.bf16.msra.mxu3 %v4581_v38  ;;  %2782 = vmatpush.bf16.msrb.mxu0 %v4583_v34 }
 0x1f5   :  { %2696 = vmatpush.bf16.msra.mxu3 %v4580_v45 }
 0x1f9   :  { %2697 = vmatpush.bf16.msra.mxu3 %v4579_v53 }
 0x1fd   :  { %2698 = vmatpush.bf16.msra.mxu3 %v4578_v59 }
 0x201   :  { %2699 = vmatpush.bf16.msra.mxu3 %v4577_v1 }
 0x205   :  { %2700 = vmatpush.bf16.msra.mxu3 %v4576_v6 }
 0x209   :  { %2701 = vmatpush.bf16.msra.mxu3 %v4575_v12 }
 0x20c   :  { %2702 = vmatmul.bf16.vlgmr.msra.gmra.mxu3 %v2628_v16 }
 0x22b   :  { %v5410_v26 = vpop.f32.mrf.mxu1 }
 0x233   :  { %v1973_v57 = vpop.f32.mrf.mxu1 }
 0x24f   :  { %v1728_v3 = vpop.f32.mrf.mxu3 }
 0x250   :  { %v1732_v27 = vadd.f32 %v1728_v3, %v1651_v24 }
 0x251   :  { %v2157_v44 = vpop.f32.mrf.mxu0 }
 0x252   :  { %v1813_v30 = vadd.f32 %v5388_v35, %v1732_v27  ;;  %v2057_v35 = vld [vmem:[%s5555_s11] sm:$0x1] }
 0x254   :  { %v1894_v23 = vadd.f32 %v5405_v39, %v1813_v30 }
 0x255   :  { %v2298_v49 = vpop.f32.mrf.mxu1 }
 0x256   :  { %v1975_v36 = vadd.f32 %v5410_v26, %v1894_v23  ;;  %v4598_v26 = vld [vmem:[%s5558_s14 + $0x38] sm:$0xff] }
 0x257   :  { %v1730_v31 = vpop.f32.mrf.mxu3  ;;  %2861 = vmatpush.bf16.msrb.mxu2 %v4598_v26  ;;  %v2218_v47 = vpop.f32.mrf.mxu2 }
 0x258   :  { %v2219_v0 = vadd.f32 %v2218_v47, %v2157_v44 }
 0x259   :  { %v2159_v45 = vpop.f32.mrf.mxu0 }
 0x25a   :  { %v2302_v1 = vadd.f32 %v2298_v49, %v2219_v0 }
 0x25b   :  { %2862 = vmatpush.bf16.msrb.mxu2 %v4597_v52 }
 0x25d   :  { %v2300_v51 = vpop.f32.mrf.mxu1 }
 0x25f   :  { %v2052_v37 = vpop.f32.mrf.mxu3  ;;  %v2220_v46 = vpop.f32.mrf.mxu2  ;;  %2863 = vmatpush.bf16.msrb.mxu2 %v4596_v54 }
 0x260   :  { %v2056_v21 = vadd.f32 %v2052_v37, %v1975_v36 }
 0x262   :  { %v2058_v18 = vadd.f32 %v2057_v35, %v2056_v21 }
 0x263   :  { %2864 = vmatpush.bf16.msrb.mxu2 %v4595_v56 }
 0x264   :  { %v2059_v38 = vmax.f32 %v2058_v18, 0.0 }
 0x265   :  { %v2622_v55 = vpop.f32.mrf.mxu1 }
 0x266   :  { %2062 = vst [vmem:[#allocation2 + $0x5] sm:$0x1] %v2059_v38 }
 0x267   :  { %v2054_v40 = vpop.f32.mrf.mxu3  ;;  %2865 = vmatpush.bf16.msrb.mxu2 %v4594_v28 }
 0x26b   :  { %2866 = vmatpush.bf16.msrb.mxu2 %v4593_v60 }
 0x26d   :  { %v2384_v41 = vld [vmem:[#allocation2 + $0x5] sm:$0x1]  ;;  %v2541_v53 = vpop.f32.mrf.mxu2  ;;  %v2624_v59 = vpop.f32.mrf.mxu1 }
 0x26e   :  { %v2385_v39 = vpack.c.bf16 %v2384_v41, %v2384_v41 }
 0x26f   :  { %v2379_v42 = vpop.f32.mrf.mxu3  ;;  %2867 = vmatpush.bf16.msrb.mxu2 %v4592_v62 }
 0x270   :  { %2459 = vmatmul.bf16.vlgmr.msra.gmra.mxu0 %v2385_v39  ;;  %v2383_v4 = vadd.f32 %v2379_v42, %v2302_v1 }
 0x273   :  { %2868 = vmatpush.bf16.msrb.mxu2 %v4591_v63 }
 0x275   :  { %v2543_v58 = vpop.f32.mrf.mxu2 }
 0x277   :  { %v2381_v50 = vpop.f32.mrf.mxu3 }
 0x280   :  { %2783 = vmatmul.bf16.vlgmr.msrb.gmra.mxu0 %v2709_v43 }
 0x28f   :  { %v2703_v57 = vpop.f32.mrf.mxu3 }
 0x297   :  { %v2705_v61 = vpop.f32.mrf.mxu3 }
 0x2ed   :  { %v2460_v2 = vpop.f32.mrf.mxu0 }
 0x2ee   :  { %v2464_v5 = vadd.f32 %v2460_v2, %v2383_v4 }
 0x2f0   :  { %v2545_v6 = vadd.f32 %v2541_v53, %v2464_v5 }
 0x2f2   :  { %v2626_v8 = vadd.f32 %v2622_v55, %v2545_v6 }
 0x2f4   :  { %v2707_v9 = vadd.f32 %v2703_v57, %v2626_v8 }
 0x2f5   :  { %v2462_v7 = vpop.f32.mrf.mxu0 }
 0x2fd   :  { %v2784_v10 = vpop.f32.mrf.mxu0 }
 0x2fe   :  { %v2788_v12 = vadd.f32 %v2784_v10, %v2707_v9 }
 0x300   :  { %v2790_v13 = vadd.f32 %v2789_v11, %v2788_v12 }
 0x302   :  { %v2791_v14 = vadd.f32 %v2790_v13, %v1327_v48 }
 0x304   :  { %v2792_v15 = vmax.f32 %v2791_v14, 0.0 }
 0x305   :  { %v2786_v16 = vpop.f32.mrf.mxu0 }
 0x306   :  { %2794 = vst [vmem:[%s5560_s16] sm:$0x1] %v2792_v15  ;;  %v2795_v3 = vpack.c.bf16 %v2792_v15, %v2792_v15 }
 0x308   :  { %2869 = vmatmul.bf16.vlgmr.msrb.gmra.mxu2 %v2795_v3 }
 0x38b   :  { %v2870_v20 = vpop.f32.mrf.mxu2 }
 0x38c   :  { %v2871_v24 = vadd.f32 %v2870_v20, %v2812_v19 }
 0x38e   :  { %2875 = vst.msk [vmem:[%s5561_s17] sm:$0x1] %vm2874_vm1, %v2871_v24 }
 0x393   :  { %v2872_v33 = vpop.f32.mrf.mxu2 }
 0x394   :  { %2884 = vsyncpa [#allocation4], 1 }

</bundles_post_ra>
